<compile_context>
chip_gen: v7x
topology: tpu7x:2x2x1
jax: 0.10.0
libtpu: 0.0.40
codegen_flags: <defaults>
</compile_context>

<pallas_src>
import functools

import jax
import jax.numpy as jnp
import numpy as np
from jax.experimental import pallas as pl
from jax.experimental.pallas import tpu as pltpu


def _ln_norm(x, eps=1e-5):
    """LayerNorm normalization only; the affine (gamma/beta) is folded into
    the downstream fused weights at pack time (PyTorch default eps=1e-5)."""
    mu = jnp.mean(x, axis=-1, keepdims=True)
    var = jnp.mean((x - mu) ** 2, axis=-1, keepdims=True)
    return (x - mu) * jax.lax.rsqrt(var + eps)


def slot_attention_kernel(
    x_ref, slots_ref,
    b_ref,
    w_kv_ref, w_q_ref, w_gru_ref, w1_ref, w2_ref,
    out_ref,
    *, iters, eps, matmul_dtype):
    f32 = jnp.float32
    Bt, N, D = x_ref.shape
    S = slots_ref.shape[1]
    H = w1_ref.shape[1]
    R = Bt * S  # folded slot rows

    def mm(a, w):
        # MXU matmul; operands in matmul_dtype, f32 accumulation.
        return jnp.dot(a.astype(matmul_dtype), w, preferred_element_type=f32)

    # Bias slab rows (static row-prefix slices, lane offset 0).
    b_kv = b_ref[0:1, :2 * D]
    # In-loop biases: broadcast ONCE to full row height before the unrolled
    # loop (broadcast_in_dim is not CSE'd by JAX).
    b_q = jnp.broadcast_to(b_ref[1:2, :D], (R, D))
    b_gru = jnp.broadcast_to(b_ref[2:3, :4 * D], (R, 4 * D))
    b_1 = jnp.broadcast_to(b_ref[3:4, :H], (R, H))
    b_2 = jnp.broadcast_to(b_ref[4:5, :D], (R, D))

    # Weight slabs (already cast to matmul_dtype in the wrapper).
    w_kv = w_kv_ref[...]
    w_q = w_q_ref[...]
    w_gru = w_gru_ref[...]
    w1 = w1_ref[...]
    w2 = w2_ref[...]

    # Fold the Bt batch elements into tall 2-D operands for the projections.
    x = x_ref[...].reshape(Bt * N, D).astype(f32)          # (Bt*N, D)
    slots = slots_ref[...].reshape(R, D).astype(f32)       # (R, D)

    # norm_input (affine folded) + fused k|v projection, computed once.
    x_n = _ln_norm(x)
    kv = mm(x_n, w_kv) + b_kv                               # (Bt*N, 2D) f32
    # Pre-transpose k once (loop-invariant) so the dots einsum is a plain
    # MXU matmul with no per-iteration relayout; store k/v in matmul_dtype.
    kT3 = jnp.transpose(kv[:, :D].reshape(Bt, N, D),
                        (0, 2, 1)).astype(matmul_dtype)     # (Bt, D, N)
    v3 = kv[:, D:].reshape(Bt, N, D).astype(matmul_dtype)   # (Bt, N, D)

    for _ in range(iters):  # static trip count -> fully unrolled
        slots_prev = slots

        # q = to_q(norm_slots(slots)); norm_slots affine + attention scale are
        # folded into w_q / b_q at pack time.
        q = mm(_ln_norm(slots), w_q) + b_q                   # (R, D)
        q3 = q.reshape(Bt, S, D)

        # dots = einsum('bid,bjd->bij', q, k) * scale  (scale already in q)
        dots = jnp.einsum("bid,bdj->bij", q3.astype(matmul_dtype), kT3,
                          preferred_element_type=f32)        # (Bt, S, N)

        # softmax over the SLOT axis (dim=1), then +eps, then renormalize over
        # the token axis.  Divisions replaced by exact reciprocal + multiply.
        dots = dots - jnp.max(dots, axis=1, keepdims=True)
        e = jnp.exp(dots)
        attn = e * pl.reciprocal(jnp.sum(e, axis=1, keepdims=True)) + eps
        attn = attn * pl.reciprocal(jnp.sum(attn, axis=-1, keepdims=True))

        # updates = einsum('bjd,bij->bid', v, attn) = attn @ v (per batch)
        updates = jnp.einsum("bij,bjd->bid", attn.astype(matmul_dtype), v3,
                             preferred_element_type=f32)     # (Bt, S, D)
        updates = updates.reshape(R, D)

        # nn.GRUCell(updates, slots_prev) — single fused (R,2D)@(2D,4D) push:
        #   g[:, 0:D]   = updates@Wir + slots_prev@Whr (+ bir+bhr)  -> r_sum
        #   g[:, D:2D]  = updates@Wiz + slots_prev@Whz (+ biz+bhz)  -> z_sum
        #   g[:, 2D:3D] = updates@Win (+ bin)                        -> ih_n
        #   g[:, 3D:4D] = slots_prev@Whn (+ bhn)                     -> hh_n
        us = jnp.concatenate([updates, slots_prev], axis=1)  # (R, 2D)
        g = mm(us, w_gru) + b_gru                            # (R, 4D)
        r = jax.nn.sigmoid(g[:, :D])
        z = jax.nn.sigmoid(g[:, D:2 * D])
        n_gate = jnp.tanh(g[:, 2 * D:3 * D] + r * g[:, 3 * D:4 * D])
        slots = (1.0 - z) * n_gate + z * slots_prev

        # residual MLP: slots += fc2(relu(fc1(norm_pre_ff(slots))))
        h1 = jnp.maximum(mm(_ln_norm(slots), w1) + b_1, 0.0)
        slots = slots + mm(h1, w2) + b_2

    out_ref[...] = slots.reshape(Bt, S, D).astype(out_ref.dtype)


def _pack_params(params, D, H, scale, matmul_dtype):
    """Fold LN affines / attention scale into the weights and pack 28 raw
    parameter tensors into 6 slabs (5 weights + one bias slab)."""
    p = params

    def fold_ln(g, b, w, bias):
        # (LN(x)*g + b) @ w + bias == LN(x) @ (diag(g)@w) + (b@w + bias)
        return w * g.reshape(-1, 1), b @ w + bias

    # norm_input folded into the fused k|v projection.
    w_kv = jnp.concatenate([p["wk"], p["wv"]], axis=1)                  # (D, 2D)
    b_kv = jnp.concatenate([p["bk"], p["bv"]], axis=1)
    w_kv, b_kv = fold_ln(p["g_in"], p["b_in"], w_kv, b_kv)

    # norm_slots folded into to_q; attention scale folded into q as well.
    w_q, b_q = fold_ln(p["g_sl"], p["b_sl"], p["wq"], p["bq"])
    w_q, b_q = w_q * scale, b_q * scale

    # Fused GRU weight: [updates | slots_prev] @ (2D, 4D)
    zero = jnp.zeros((D, D), p["wir"].dtype)
    w_gru = jnp.concatenate([
        jnp.concatenate([p["wir"], p["whr"]], axis=0),
        jnp.concatenate([p["wiz"], p["whz"]], axis=0),
        jnp.concatenate([p["win"], zero], axis=0),
        jnp.concatenate([zero, p["whn"]], axis=0),
    ], axis=1)                                                          # (2D, 4D)
    b_gru = jnp.concatenate([p["bir"] + p["bhr"], p["biz"] + p["bhz"],
                             p["bin"], p["bhn"]], axis=1)               # (1, 4D)

    # norm_pre_ff folded into fc1; fc2 unchanged.
    w1, b1 = fold_ln(p["g_ff"], p["b_ff"], p["w1"], p["b1"])
    w2, b2 = p["w2"], p["b2"]

    bw = max(2 * D, 4 * D, H)

    def row(v):
        v = v.reshape(1, -1)
        return jnp.pad(v, ((0, 0), (0, bw - v.shape[1])))

    b_slab = jnp.concatenate([row(b_kv), row(b_q), row(b_gru), row(b1),
                              row(b2)], axis=0).astype(jnp.float32)     # (5, BW)
    weights = tuple(w.astype(matmul_dtype) for w in (w_kv, w_q, w_gru, w1, w2))
    return (b_slab,) + weights


def _two_tensorcores():
    """Best-effort detection of dual-TensorCore chips (v7x / megacore)."""
    try:
        kind = jax.devices()[0].device_kind.lower()
    except Exception:
        return False
    return any(t in kind for t in ("v7", "7x", "v5p", "v4", "v3"))


def slot_attention(x, slots_init, params, *, iters=3, eps=1e-8,
                   block_b=None, matmul_dtype=jnp.float32):
    B, N, D = x.shape
    S = slots_init.shape[1]
    H = params["w1"].shape[1]
    scale = float(D) ** -0.5

    # Grid sizing: this kernel is latency / MXU-push-count bound, not VMEM or
    # HBM bound.  Single-TC chips (v5e/v6e): grid=1 (whole batch per step,
    # no per-step overhead, tallest matmuls).  Dual-TC chips (v7x etc.): an
    # even "parallel" grid so both cores get work.  VMEM only becomes a
    # concern on v7x (64 MiB) if N/D/block_b scale far beyond this config.
    if block_b is None:
        if _two_tensorcores() and B % 2 == 0:
            block_b = B // 2
        else:
            block_b = B
    assert B % block_b == 0, "block_b must divide the batch size"

    packed = _pack_params(params, D, H, scale, matmul_dtype)

    def full_spec(a):
        nd = a.ndim
        return pl.BlockSpec(a.shape, lambda b, _nd=nd: (0,) * _nd)

    in_specs = [
        pl.BlockSpec((block_b, N, D), lambda b: (b, 0, 0)),
        pl.BlockSpec((block_b, S, D), lambda b: (b, 0, 0)),
    ] + [full_spec(a) for a in packed]

    kernel = functools.partial(slot_attention_kernel, iters=iters, eps=eps,
                               matmul_dtype=matmul_dtype)
    return pl.pallas_call(
        kernel,
        out_shape=jax.ShapeDtypeStruct((B, S, D), x.dtype),
        grid=(B // block_b,),
        in_specs=in_specs,
        out_specs=pl.BlockSpec((block_b, S, D), lambda b: (b, 0, 0)),
        compiler_params=pltpu.CompilerParams(
            dimension_semantics=("parallel",)),  # batch blocks independent
    )(x, slots_init, *packed)


def _ln_ref(x, g, b, eps=1e-5):
    mu = jnp.mean(x, axis=-1, keepdims=True)
    var = jnp.mean((x - mu) ** 2, axis=-1, keepdims=True)
    return (x - mu) * jax.lax.rsqrt(var + eps) * g + b


def slot_attention_ref(x, slots_init, params, *, iters=3, eps=1e-8):
    """Pure-JAX reference mirroring the PyTorch forward (for validation)."""
    B, N, D = x.shape
    scale = D ** -0.5
    p = params
    slots = slots_init
    x_n = _ln_ref(x, p["g_in"], p["b_in"])
    k = x_n @ p["wk"] + p["bk"]
    v = x_n @ p["wv"] + p["bv"]
    for _ in range(iters):
        slots_prev = slots
        q = _ln_ref(slots, p["g_sl"], p["b_sl"]) @ p["wq"] + p["bq"]
        dots = jnp.einsum("bid,bjd->bij", q, k) * scale
        attn = jax.nn.softmax(dots, axis=1) + eps
        attn = attn / jnp.sum(attn, axis=-1, keepdims=True)
        updates = jnp.einsum("bjd,bij->bid", v, attn)
        r = jax.nn.sigmoid(updates @ p["wir"] + p["bir"]
                           + slots_prev @ p["whr"] + p["bhr"])
        z = jax.nn.sigmoid(updates @ p["wiz"] + p["biz"]
                           + slots_prev @ p["whz"] + p["bhz"])
        n_gate = jnp.tanh(updates @ p["win"] + p["bin"]
                          + r * (slots_prev @ p["whn"] + p["bhn"]))
        slots = (1.0 - z) * n_gate + z * slots_prev
        s_n = _ln_ref(slots, p["g_ff"], p["b_ff"])
        slots = slots + (jnp.maximum(s_n @ p["w1"] + p["b1"], 0.0) @ p["w2"]
                         + p["b2"])
    return slots


if __name__ == "__main__":
    # Small deterministic config: source == target == D, num_slots = S.
    B, N, D, S, H = 8, 64, 32, 8, 64          # H = max(D, hidden_dim)
    ITERS, EPS = 3, 1e-8

    key = jax.random.PRNGKey(0)
    ks = jax.random.split(key, 32)

    def w(k, shape, s=0.1):
        return (s * jax.random.normal(k, shape)).astype(jnp.float32)

    params = {
        # layernorms (gamma/beta as (1, D) for lane broadcasting)
        "g_in": jnp.ones((1, D), jnp.float32), "b_in": jnp.zeros((1, D), jnp.float32),
        "g_sl": jnp.ones((1, D), jnp.float32), "b_sl": jnp.zeros((1, D), jnp.float32),
        "g_ff": jnp.ones((1, D), jnp.float32), "b_ff": jnp.zeros((1, D), jnp.float32),
        # to_k / to_v / to_q  (weights stored transposed: (in, out))
        "wk": w(ks[0], (D, D)), "bk": w(ks[1], (1, D)),
        "wv": w(ks[2], (D, D)), "bv": w(ks[3], (1, D)),
        "wq": w(ks[4], (D, D)), "bq": w(ks[5], (1, D)),
        # GRUCell: weight_ih / weight_hh pre-split (r,z,n), pre-transposed (D, D)
        "wir": w(ks[6], (D, D)), "wiz": w(ks[7], (D, D)), "win": w(ks[8], (D, D)),
        "whr": w(ks[9], (D, D)), "whz": w(ks[10], (D, D)), "whn": w(ks[11], (D, D)),
        "bir": w(ks[12], (1, D)), "biz": w(ks[13], (1, D)), "bin": w(ks[14], (1, D)),
        "bhr": w(ks[15], (1, D)), "bhz": w(ks[16], (1, D)), "bhn": w(ks[17], (1, D)),
        # fc1 / fc2
        "w1": w(ks[18], (D, H)), "b1": w(ks[19], (1, H)),
        "w2": w(ks[20], (H, D)), "b2": w(ks[21], (1, D)),
    }

    # inputs (B, N, D)  — e.g. an 8x8 feature map flattened to N=64 tokens
    x = jax.random.normal(ks[22], (B, N, D), jnp.float32)

    # slots = torch.normal(mu.expand(...), sigma.expand(...))  -> glue in JAX
    # TODO(synk): random slot sampling stays outside the kernel (host RNG).
    slots_mu = jax.random.normal(ks[23], (1, 1, D), jnp.float32)
    slots_sigma = jax.random.uniform(ks[24], (1, 1, D), jnp.float32)
    noise = jax.random.normal(ks[25], (B, S, D), jnp.float32)
    slots_init = slots_mu + slots_sigma * noise

    ref = slot_attention_ref(x, slots_init, params, iters=ITERS, eps=EPS)

    # f32 path, generation-aware default grid — tight tolerance.
    out = slot_attention(x, slots_init, params, iters=ITERS, eps=EPS)
    out = jax.block_until_ready(out)
    np.testing.assert_allclose(np.asarray(out), np.asarray(ref),
                               rtol=1e-4, atol=1e-4)

    # bf16-MXU path with an explicit grid of 2 (exercises batch folding +
    # the "parallel" grid axis) — looser tolerance for bf16 operand rounding.
    out_bf16 = slot_attention(x, slots_init, params, iters=ITERS, eps=EPS,
                              block_b=4, matmul_dtype=jnp.bfloat16)
    out_bf16 = jax.block_until_ready(out_bf16)
    np.testing.assert_allclose(np.asarray(out_bf16), np.asarray(ref),
                               rtol=5e-2, atol=5e-2)

    print("KERNEL_OK")
</pallas_src>

<mosaic_0001>
module attributes {stable_mosaic.version = 11 : i64} {
  func.func @slot_attention_kernel(%arg0: i32, %arg1: memref<8x64x32xf32, #tpu.memory_space<vmem>>, %arg2: memref<8x8x32xf32, #tpu.memory_space<vmem>>, %arg3: memref<5x128xf32, #tpu.memory_space<vmem>>, %arg4: memref<32x64xf32, #tpu.memory_space<vmem>>, %arg5: memref<32x32xf32, #tpu.memory_space<vmem>>, %arg6: memref<64x128xf32, #tpu.memory_space<vmem>>, %arg7: memref<32x64xf32, #tpu.memory_space<vmem>>, %arg8: memref<64x32xf32, #tpu.memory_space<vmem>>, %arg9: memref<8x8x32xf32, #tpu.memory_space<vmem>>) attributes {dimension_semantics = [#tpu.dimension_semantics<parallel>], iteration_bounds = array<i64: 1>, scalar_prefetch = 0 : i64, scratch_operands = 0 : i64, tpu.core_type = #tpu.core_type<tc>, window_params = [{transform_indices = @transform_0, window_bounds = array<i64: 8, 64, 32>}, {transform_indices = @transform_1, window_bounds = array<i64: 8, 8, 32>}, {pipeline_mode = #tpu.pipeline_mode<synchronous>, transform_indices = @transform_2, window_bounds = array<i64: 5, 128>}, {pipeline_mode = #tpu.pipeline_mode<synchronous>, transform_indices = @transform_3, window_bounds = array<i64: 32, 64>}, {pipeline_mode = #tpu.pipeline_mode<synchronous>, transform_indices = @transform_4, window_bounds = array<i64: 32, 32>}, {pipeline_mode = #tpu.pipeline_mode<synchronous>, transform_indices = @transform_5, window_bounds = array<i64: 64, 128>}, {pipeline_mode = #tpu.pipeline_mode<synchronous>, transform_indices = @transform_6, window_bounds = array<i64: 32, 64>}, {pipeline_mode = #tpu.pipeline_mode<synchronous>, transform_indices = @transform_7, window_bounds = array<i64: 64, 32>}, {transform_indices = @transform_8, window_bounds = array<i64: 8, 8, 32>}]} {
    %c0 = arith.constant 0 : index
    %c0_0 = arith.constant 0 : index
    %0 = vector.load %arg3[%c0, %c0_0] : memref<5x128xf32, #tpu.memory_space<vmem>>, vector<1x64xf32>
    %c1 = arith.constant 1 : index
    %c0_1 = arith.constant 0 : index
    %1 = vector.load %arg3[%c1, %c0_1] : memref<5x128xf32, #tpu.memory_space<vmem>>, vector<1x32xf32>
    %2 = vector.shape_cast %1 : vector<1x32xf32> to vector<1x32xf32>
    %3 = vector.broadcast %2 : vector<1x32xf32> to vector<64x32xf32>
    %c2 = arith.constant 2 : index
    %c0_2 = arith.constant 0 : index
    %4 = vector.load %arg3[%c2, %c0_2] : memref<5x128xf32, #tpu.memory_space<vmem>>, vector<1x128xf32>
    %5 = vector.shape_cast %4 : vector<1x128xf32> to vector<1x128xf32>
    %6 = vector.broadcast %5 : vector<1x128xf32> to vector<64x128xf32>
    %c3 = arith.constant 3 : index
    %c0_3 = arith.constant 0 : index
    %7 = vector.load %arg3[%c3, %c0_3] : memref<5x128xf32, #tpu.memory_space<vmem>>, vector<1x64xf32>
    %8 = vector.shape_cast %7 : vector<1x64xf32> to vector<1x64xf32>
    %9 = vector.broadcast %8 : vector<1x64xf32> to vector<64x64xf32>
    %c4 = arith.constant 4 : index
    %c0_4 = arith.constant 0 : index
    %10 = vector.load %arg3[%c4, %c0_4] : memref<5x128xf32, #tpu.memory_space<vmem>>, vector<1x32xf32>
    %11 = vector.shape_cast %10 : vector<1x32xf32> to vector<1x32xf32>
    %12 = vector.broadcast %11 : vector<1x32xf32> to vector<64x32xf32>
    %c0_5 = arith.constant 0 : index
    %c0_6 = arith.constant 0 : index
    %13 = vector.load %arg4[%c0_5, %c0_6] : memref<32x64xf32, #tpu.memory_space<vmem>>, vector<32x64xf32>
    %c0_7 = arith.constant 0 : index
    %c0_8 = arith.constant 0 : index
    %14 = vector.load %arg5[%c0_7, %c0_8] : memref<32x32xf32, #tpu.memory_space<vmem>>, vector<32x32xf32>
    %c0_9 = arith.constant 0 : index
    %c0_10 = arith.constant 0 : index
    %15 = vector.load %arg6[%c0_9, %c0_10] : memref<64x128xf32, #tpu.memory_space<vmem>>, vector<64x128xf32>
    %c0_11 = arith.constant 0 : index
    %c0_12 = arith.constant 0 : index
    %16 = vector.load %arg7[%c0_11, %c0_12] : memref<32x64xf32, #tpu.memory_space<vmem>>, vector<32x64xf32>
    %c0_13 = arith.constant 0 : index
    %c0_14 = arith.constant 0 : index
    %17 = vector.load %arg8[%c0_13, %c0_14] : memref<64x32xf32, #tpu.memory_space<vmem>>, vector<64x32xf32>
    %c0_15 = arith.constant 0 : index
    %c0_16 = arith.constant 0 : index
    %c0_17 = arith.constant 0 : index
    %18 = vector.load %arg1[%c0_15, %c0_16, %c0_17] : memref<8x64x32xf32, #tpu.memory_space<vmem>>, vector<8x64x32xf32>
    %19 = vector.shape_cast %18 : vector<8x64x32xf32> to vector<512x32xf32>
    %c0_18 = arith.constant 0 : index
    %c0_19 = arith.constant 0 : index
    %c0_20 = arith.constant 0 : index
    %20 = vector.load %arg2[%c0_18, %c0_19, %c0_20] : memref<8x8x32xf32, #tpu.memory_space<vmem>>, vector<8x8x32xf32>
    %21 = vector.shape_cast %20 : vector<8x8x32xf32> to vector<64x32xf32>
    %cst = arith.constant dense<0.000000e+00> : vector<512xf32>
    %22 = vector.multi_reduction <add>, %19, %cst [1] : vector<512x32xf32> to vector<512xf32>
    %23 = vector.shape_cast %22 : vector<512xf32> to vector<512x1xf32>
    %cst_21 = arith.constant 3.200000e+01 : f32
    %24 = vector.broadcast %cst_21 : f32 to vector<512x1xf32>
    %25 = arith.divf %23, %24 : vector<512x1xf32>
    %26 = vector.broadcast %25 : vector<512x1xf32> to vector<512x32xf32>
    %27 = arith.subf %19, %26 : vector<512x32xf32>
    %28 = arith.mulf %27, %27 : vector<512x32xf32>
    %cst_22 = arith.constant dense<0.000000e+00> : vector<512xf32>
    %29 = vector.multi_reduction <add>, %28, %cst_22 [1] : vector<512x32xf32> to vector<512xf32>
    %30 = vector.shape_cast %29 : vector<512xf32> to vector<512x1xf32>
    %cst_23 = arith.constant 3.200000e+01 : f32
    %31 = vector.broadcast %cst_23 : f32 to vector<512x1xf32>
    %32 = arith.divf %30, %31 : vector<512x1xf32>
    %33 = vector.broadcast %25 : vector<512x1xf32> to vector<512x32xf32>
    %34 = arith.subf %19, %33 : vector<512x32xf32>
    %cst_24 = arith.constant 9.99999974E-6 : f32
    %35 = vector.broadcast %cst_24 : f32 to vector<512x1xf32>
    %36 = arith.addf %32, %35 : vector<512x1xf32>
    %37 = math.rsqrt %36 : vector<512x1xf32>
    %38 = vector.broadcast %37 : vector<512x1xf32> to vector<512x32xf32>
    %39 = arith.mulf %34, %38 : vector<512x32xf32>
    %cst_25 = arith.constant dense<0.000000e+00> : vector<512x64xf32>
    %40 = tpu.matmul %39, %13, %cst_25 {dimension_numbers = #tpu.dot_dimension_numbers<[1], [0], [0], [1], [0, 0, 1, 1], [], []>} : vector<512x32xf32>, vector<32x64xf32>, vector<512x64xf32> -> vector<512x64xf32>
    %41 = vector.broadcast %0 : vector<1x64xf32> to vector<512x64xf32>
    %42 = arith.addf %40, %41 : vector<512x64xf32>
    %43 = vector.extract_strided_slice %42 {offsets = [0, 0], sizes = [512, 32], strides = [1, 1]} : vector<512x64xf32> to vector<512x32xf32>
    %44 = vector.shape_cast %43 : vector<512x32xf32> to vector<8x64x32xf32>
    %45 = tpu.transpose %44, [0, 2, 1] : vector<8x64x32xf32> -> vector<8x32x64xf32>
    %46 = vector.extract_strided_slice %42 {offsets = [0, 32], sizes = [512, 32], strides = [1, 1]} : vector<512x64xf32> to vector<512x32xf32>
    %47 = vector.shape_cast %46 : vector<512x32xf32> to vector<8x64x32xf32>
    %cst_26 = arith.constant dense<0.000000e+00> : vector<64xf32>
    %48 = vector.multi_reduction <add>, %21, %cst_26 [1] : vector<64x32xf32> to vector<64xf32>
    %49 = vector.shape_cast %48 : vector<64xf32> to vector<64x1xf32>
    %cst_27 = arith.constant 3.200000e+01 : f32
    %50 = vector.broadcast %cst_27 : f32 to vector<64x1xf32>
    %51 = arith.divf %49, %50 : vector<64x1xf32>
    %52 = vector.broadcast %51 : vector<64x1xf32> to vector<64x32xf32>
    %53 = arith.subf %21, %52 : vector<64x32xf32>
    %54 = arith.mulf %53, %53 : vector<64x32xf32>
    %cst_28 = arith.constant dense<0.000000e+00> : vector<64xf32>
    %55 = vector.multi_reduction <add>, %54, %cst_28 [1] : vector<64x32xf32> to vector<64xf32>
    %56 = vector.shape_cast %55 : vector<64xf32> to vector<64x1xf32>
    %cst_29 = arith.constant 3.200000e+01 : f32
    %57 = vector.broadcast %cst_29 : f32 to vector<64x1xf32>
    %58 = arith.divf %56, %57 : vector<64x1xf32>
    %59 = vector.broadcast %51 : vector<64x1xf32> to vector<64x32xf32>
    %60 = arith.subf %21, %59 : vector<64x32xf32>
    %cst_30 = arith.constant 9.99999974E-6 : f32
    %61 = vector.broadcast %cst_30 : f32 to vector<64x1xf32>
    %62 = arith.addf %58, %61 : vector<64x1xf32>
    %63 = math.rsqrt %62 : vector<64x1xf32>
    %64 = vector.broadcast %63 : vector<64x1xf32> to vector<64x32xf32>
    %65 = arith.mulf %60, %64 : vector<64x32xf32>
    %cst_31 = arith.constant dense<0.000000e+00> : vector<64x32xf32>
    %66 = tpu.matmul %65, %14, %cst_31 {dimension_numbers = #tpu.dot_dimension_numbers<[1], [0], [0], [1], [0, 0, 1, 1], [], []>} : vector<64x32xf32>, vector<32x32xf32>, vector<64x32xf32> -> vector<64x32xf32>
    %67 = arith.addf %66, %3 : vector<64x32xf32>
    %68 = vector.shape_cast %67 : vector<64x32xf32> to vector<8x8x32xf32>
    "tpu.trace_start"() <{level = 10 : i32, message = "bid,bdj->bij"}> : () -> ()
    %cst_32 = arith.constant dense<0.000000e+00> : vector<8x8x64xf32>
    %69 = tpu.matmul %68, %45, %cst_32 {dimension_numbers = #tpu.dot_dimension_numbers<[2], [1], [1], [2], [0, 0, 0, 1, 1, 2], [0], [0]>} : vector<8x8x32xf32>, vector<8x32x64xf32>, vector<8x8x64xf32> -> vector<8x8x64xf32>
    "tpu.trace_stop"() : () -> ()
    %cst_33 = arith.constant dense<0xFF800000> : vector<8x64xf32>
    %70 = vector.multi_reduction <maximumf>, %69, %cst_33 [1] : vector<8x8x64xf32> to vector<8x64xf32>
    %71 = vector.shape_cast %70 : vector<8x64xf32> to vector<8x1x64xf32>
    %72 = vector.broadcast %71 : vector<8x1x64xf32> to vector<8x8x64xf32>
    %73 = arith.subf %69, %72 : vector<8x8x64xf32>
    %74 = math.exp %73 : vector<8x8x64xf32>
    %cst_34 = arith.constant dense<0.000000e+00> : vector<8x64xf32>
    %75 = vector.multi_reduction <add>, %74, %cst_34 [1] : vector<8x8x64xf32> to vector<8x64xf32>
    %76 = vector.shape_cast %75 : vector<8x64xf32> to vector<8x1x64xf32>
    %77 = tpu.reciprocal %76 : vector<8x1x64xf32> -> vector<8x1x64xf32>
    %78 = vector.broadcast %77 : vector<8x1x64xf32> to vector<8x8x64xf32>
    %79 = arith.mulf %74, %78 : vector<8x8x64xf32>
    %cst_35 = arith.constant 9.99999993E-9 : f32
    %80 = vector.broadcast %cst_35 : f32 to vector<8x8x64xf32>
    %81 = arith.addf %79, %80 : vector<8x8x64xf32>
    %cst_36 = arith.constant dense<0.000000e+00> : vector<8x8xf32>
    %82 = vector.multi_reduction <add>, %81, %cst_36 [2] : vector<8x8x64xf32> to vector<8x8xf32>
    %83 = vector.shape_cast %82 : vector<8x8xf32> to vector<8x8x1xf32>
    %84 = tpu.reciprocal %83 : vector<8x8x1xf32> -> vector<8x8x1xf32>
    %85 = vector.broadcast %84 : vector<8x8x1xf32> to vector<8x8x64xf32>
    %86 = arith.mulf %81, %85 : vector<8x8x64xf32>
    "tpu.trace_start"() <{level = 10 : i32, message = "bij,bjd->bid"}> : () -> ()
    %cst_37 = arith.constant dense<0.000000e+00> : vector<8x8x32xf32>
    %87 = tpu.matmul %86, %47, %cst_37 {dimension_numbers = #tpu.dot_dimension_numbers<[2], [1], [1], [2], [0, 0, 0, 1, 1, 2], [0], [0]>} : vector<8x8x64xf32>, vector<8x64x32xf32>, vector<8x8x32xf32> -> vector<8x8x32xf32>
    "tpu.trace_stop"() : () -> ()
    %88 = vector.shape_cast %87 : vector<8x8x32xf32> to vector<64x32xf32>
    %89 = tpu.concatenate %88, %21 in 1 : vector<64x32xf32>, vector<64x32xf32> -> vector<64x64xf32>
    %cst_38 = arith.constant dense<0.000000e+00> : vector<64x128xf32>
    %90 = tpu.matmul %89, %15, %cst_38 {dimension_numbers = #tpu.dot_dimension_numbers<[1], [0], [0], [1], [0, 0, 1, 1], [], []>} : vector<64x64xf32>, vector<64x128xf32>, vector<64x128xf32> -> vector<64x128xf32>
    %91 = arith.addf %90, %6 : vector<64x128xf32>
    %92 = vector.extract_strided_slice %91 {offsets = [0, 0], sizes = [64, 32], strides = [1, 1]} : vector<64x128xf32> to vector<64x32xf32>
    %93 = arith.negf %92 : vector<64x32xf32>
    %94 = math.exp %93 : vector<64x32xf32>
    %cst_39 = arith.constant 1.000000e+00 : f32
    %95 = vector.broadcast %cst_39 : f32 to vector<64x32xf32>
    %96 = arith.addf %95, %94 : vector<64x32xf32>
    %97 = arith.divf %95, %96 : vector<64x32xf32>
    %98 = vector.extract_strided_slice %91 {offsets = [0, 32], sizes = [64, 32], strides = [1, 1]} : vector<64x128xf32> to vector<64x32xf32>
    %99 = arith.negf %98 : vector<64x32xf32>
    %100 = math.exp %99 : vector<64x32xf32>
    %cst_40 = arith.constant 1.000000e+00 : f32
    %101 = vector.broadcast %cst_40 : f32 to vector<64x32xf32>
    %102 = arith.addf %101, %100 : vector<64x32xf32>
    %103 = arith.divf %101, %102 : vector<64x32xf32>
    %104 = vector.extract_strided_slice %91 {offsets = [0, 64], sizes = [64, 32], strides = [1, 1]} : vector<64x128xf32> to vector<64x32xf32>
    %105 = vector.extract_strided_slice %91 {offsets = [0, 96], sizes = [64, 32], strides = [1, 1]} : vector<64x128xf32> to vector<64x32xf32>
    %106 = arith.mulf %97, %105 : vector<64x32xf32>
    %107 = arith.addf %104, %106 : vector<64x32xf32>
    %108 = math.tanh %107 : vector<64x32xf32>
    %cst_41 = arith.constant 1.000000e+00 : f32
    %109 = vector.broadcast %cst_41 : f32 to vector<64x32xf32>
    %110 = arith.subf %109, %103 : vector<64x32xf32>
    %111 = arith.mulf %110, %108 : vector<64x32xf32>
    %112 = arith.mulf %103, %21 : vector<64x32xf32>
    %113 = arith.addf %111, %112 : vector<64x32xf32>
    %cst_42 = arith.constant dense<0.000000e+00> : vector<64xf32>
    %114 = vector.multi_reduction <add>, %113, %cst_42 [1] : vector<64x32xf32> to vector<64xf32>
    %115 = vector.shape_cast %114 : vector<64xf32> to vector<64x1xf32>
    %cst_43 = arith.constant 3.200000e+01 : f32
    %116 = vector.broadcast %cst_43 : f32 to vector<64x1xf32>
    %117 = arith.divf %115, %116 : vector<64x1xf32>
    %118 = vector.broadcast %117 : vector<64x1xf32> to vector<64x32xf32>
    %119 = arith.subf %113, %118 : vector<64x32xf32>
    %120 = arith.mulf %119, %119 : vector<64x32xf32>
    %cst_44 = arith.constant dense<0.000000e+00> : vector<64xf32>
    %121 = vector.multi_reduction <add>, %120, %cst_44 [1] : vector<64x32xf32> to vector<64xf32>
    %122 = vector.shape_cast %121 : vector<64xf32> to vector<64x1xf32>
    %cst_45 = arith.constant 3.200000e+01 : f32
    %123 = vector.broadcast %cst_45 : f32 to vector<64x1xf32>
    %124 = arith.divf %122, %123 : vector<64x1xf32>
    %125 = vector.broadcast %117 : vector<64x1xf32> to vector<64x32xf32>
    %126 = arith.subf %113, %125 : vector<64x32xf32>
    %cst_46 = arith.constant 9.99999974E-6 : f32
    %127 = vector.broadcast %cst_46 : f32 to vector<64x1xf32>
    %128 = arith.addf %124, %127 : vector<64x1xf32>
    %129 = math.rsqrt %128 : vector<64x1xf32>
    %130 = vector.broadcast %129 : vector<64x1xf32> to vector<64x32xf32>
    %131 = arith.mulf %126, %130 : vector<64x32xf32>
    %cst_47 = arith.constant dense<0.000000e+00> : vector<64x64xf32>
    %132 = tpu.matmul %131, %16, %cst_47 {dimension_numbers = #tpu.dot_dimension_numbers<[1], [0], [0], [1], [0, 0, 1, 1], [], []>} : vector<64x32xf32>, vector<32x64xf32>, vector<64x64xf32> -> vector<64x64xf32>
    %133 = arith.addf %132, %9 : vector<64x64xf32>
    %cst_48 = arith.constant 0.000000e+00 : f32
    %134 = vector.broadcast %cst_48 : f32 to vector<64x64xf32>
    %135 = arith.maximumf %133, %134 : vector<64x64xf32>
    %cst_49 = arith.constant dense<0.000000e+00> : vector<64x32xf32>
    %136 = tpu.matmul %135, %17, %cst_49 {dimension_numbers = #tpu.dot_dimension_numbers<[1], [0], [0], [1], [0, 0, 1, 1], [], []>} : vector<64x64xf32>, vector<64x32xf32>, vector<64x32xf32> -> vector<64x32xf32>
    %137 = arith.addf %113, %136 : vector<64x32xf32>
    %138 = arith.addf %137, %12 : vector<64x32xf32>
    %cst_50 = arith.constant dense<0.000000e+00> : vector<64xf32>
    %139 = vector.multi_reduction <add>, %138, %cst_50 [1] : vector<64x32xf32> to vector<64xf32>
    %140 = vector.shape_cast %139 : vector<64xf32> to vector<64x1xf32>
    %cst_51 = arith.constant 3.200000e+01 : f32
    %141 = vector.broadcast %cst_51 : f32 to vector<64x1xf32>
    %142 = arith.divf %140, %141 : vector<64x1xf32>
    %143 = vector.broadcast %142 : vector<64x1xf32> to vector<64x32xf32>
    %144 = arith.subf %138, %143 : vector<64x32xf32>
    %145 = arith.mulf %144, %144 : vector<64x32xf32>
    %cst_52 = arith.constant dense<0.000000e+00> : vector<64xf32>
    %146 = vector.multi_reduction <add>, %145, %cst_52 [1] : vector<64x32xf32> to vector<64xf32>
    %147 = vector.shape_cast %146 : vector<64xf32> to vector<64x1xf32>
    %cst_53 = arith.constant 3.200000e+01 : f32
    %148 = vector.broadcast %cst_53 : f32 to vector<64x1xf32>
    %149 = arith.divf %147, %148 : vector<64x1xf32>
    %150 = vector.broadcast %142 : vector<64x1xf32> to vector<64x32xf32>
    %151 = arith.subf %138, %150 : vector<64x32xf32>
    %cst_54 = arith.constant 9.99999974E-6 : f32
    %152 = vector.broadcast %cst_54 : f32 to vector<64x1xf32>
    %153 = arith.addf %149, %152 : vector<64x1xf32>
    %154 = math.rsqrt %153 : vector<64x1xf32>
    %155 = vector.broadcast %154 : vector<64x1xf32> to vector<64x32xf32>
    %156 = arith.mulf %151, %155 : vector<64x32xf32>
    %cst_55 = arith.constant dense<0.000000e+00> : vector<64x32xf32>
    %157 = tpu.matmul %156, %14, %cst_55 {dimension_numbers = #tpu.dot_dimension_numbers<[1], [0], [0], [1], [0, 0, 1, 1], [], []>} : vector<64x32xf32>, vector<32x32xf32>, vector<64x32xf32> -> vector<64x32xf32>
    %158 = arith.addf %157, %3 : vector<64x32xf32>
    %159 = vector.shape_cast %158 : vector<64x32xf32> to vector<8x8x32xf32>
    "tpu.trace_start"() <{level = 10 : i32, message = "bid,bdj->bij"}> : () -> ()
    %cst_56 = arith.constant dense<0.000000e+00> : vector<8x8x64xf32>
    %160 = tpu.matmul %159, %45, %cst_56 {dimension_numbers = #tpu.dot_dimension_numbers<[2], [1], [1], [2], [0, 0, 0, 1, 1, 2], [0], [0]>} : vector<8x8x32xf32>, vector<8x32x64xf32>, vector<8x8x64xf32> -> vector<8x8x64xf32>
    "tpu.trace_stop"() : () -> ()
    %cst_57 = arith.constant dense<0xFF800000> : vector<8x64xf32>
    %161 = vector.multi_reduction <maximumf>, %160, %cst_57 [1] : vector<8x8x64xf32> to vector<8x64xf32>
    %162 = vector.shape_cast %161 : vector<8x64xf32> to vector<8x1x64xf32>
    %163 = vector.broadcast %162 : vector<8x1x64xf32> to vector<8x8x64xf32>
    %164 = arith.subf %160, %163 : vector<8x8x64xf32>
    %165 = math.exp %164 : vector<8x8x64xf32>
    %cst_58 = arith.constant dense<0.000000e+00> : vector<8x64xf32>
    %166 = vector.multi_reduction <add>, %165, %cst_58 [1] : vector<8x8x64xf32> to vector<8x64xf32>
    %167 = vector.shape_cast %166 : vector<8x64xf32> to vector<8x1x64xf32>
    %168 = tpu.reciprocal %167 : vector<8x1x64xf32> -> vector<8x1x64xf32>
    %169 = vector.broadcast %168 : vector<8x1x64xf32> to vector<8x8x64xf32>
    %170 = arith.mulf %165, %169 : vector<8x8x64xf32>
    %cst_59 = arith.constant 9.99999993E-9 : f32
    %171 = vector.broadcast %cst_59 : f32 to vector<8x8x64xf32>
    %172 = arith.addf %170, %171 : vector<8x8x64xf32>
    %cst_60 = arith.constant dense<0.000000e+00> : vector<8x8xf32>
    %173 = vector.multi_reduction <add>, %172, %cst_60 [2] : vector<8x8x64xf32> to vector<8x8xf32>
    %174 = vector.shape_cast %173 : vector<8x8xf32> to vector<8x8x1xf32>
    %175 = tpu.reciprocal %174 : vector<8x8x1xf32> -> vector<8x8x1xf32>
    %176 = vector.broadcast %175 : vector<8x8x1xf32> to vector<8x8x64xf32>
    %177 = arith.mulf %172, %176 : vector<8x8x64xf32>
    "tpu.trace_start"() <{level = 10 : i32, message = "bij,bjd->bid"}> : () -> ()
    %cst_61 = arith.constant dense<0.000000e+00> : vector<8x8x32xf32>
    %178 = tpu.matmul %177, %47, %cst_61 {dimension_numbers = #tpu.dot_dimension_numbers<[2], [1], [1], [2], [0, 0, 0, 1, 1, 2], [0], [0]>} : vector<8x8x64xf32>, vector<8x64x32xf32>, vector<8x8x32xf32> -> vector<8x8x32xf32>
    "tpu.trace_stop"() : () -> ()
    %179 = vector.shape_cast %178 : vector<8x8x32xf32> to vector<64x32xf32>
    %180 = tpu.concatenate %179, %138 in 1 : vector<64x32xf32>, vector<64x32xf32> -> vector<64x64xf32>
    %cst_62 = arith.constant dense<0.000000e+00> : vector<64x128xf32>
    %181 = tpu.matmul %180, %15, %cst_62 {dimension_numbers = #tpu.dot_dimension_numbers<[1], [0], [0], [1], [0, 0, 1, 1], [], []>} : vector<64x64xf32>, vector<64x128xf32>, vector<64x128xf32> -> vector<64x128xf32>
    %182 = arith.addf %181, %6 : vector<64x128xf32>
    %183 = vector.extract_strided_slice %182 {offsets = [0, 0], sizes = [64, 32], strides = [1, 1]} : vector<64x128xf32> to vector<64x32xf32>
    %184 = arith.negf %183 : vector<64x32xf32>
    %185 = math.exp %184 : vector<64x32xf32>
    %cst_63 = arith.constant 1.000000e+00 : f32
    %186 = vector.broadcast %cst_63 : f32 to vector<64x32xf32>
    %187 = arith.addf %186, %185 : vector<64x32xf32>
    %188 = arith.divf %186, %187 : vector<64x32xf32>
    %189 = vector.extract_strided_slice %182 {offsets = [0, 32], sizes = [64, 32], strides = [1, 1]} : vector<64x128xf32> to vector<64x32xf32>
    %190 = arith.negf %189 : vector<64x32xf32>
    %191 = math.exp %190 : vector<64x32xf32>
    %cst_64 = arith.constant 1.000000e+00 : f32
    %192 = vector.broadcast %cst_64 : f32 to vector<64x32xf32>
    %193 = arith.addf %192, %191 : vector<64x32xf32>
    %194 = arith.divf %192, %193 : vector<64x32xf32>
    %195 = vector.extract_strided_slice %182 {offsets = [0, 64], sizes = [64, 32], strides = [1, 1]} : vector<64x128xf32> to vector<64x32xf32>
    %196 = vector.extract_strided_slice %182 {offsets = [0, 96], sizes = [64, 32], strides = [1, 1]} : vector<64x128xf32> to vector<64x32xf32>
    %197 = arith.mulf %188, %196 : vector<64x32xf32>
    %198 = arith.addf %195, %197 : vector<64x32xf32>
    %199 = math.tanh %198 : vector<64x32xf32>
    %cst_65 = arith.constant 1.000000e+00 : f32
    %200 = vector.broadcast %cst_65 : f32 to vector<64x32xf32>
    %201 = arith.subf %200, %194 : vector<64x32xf32>
    %202 = arith.mulf %201, %199 : vector<64x32xf32>
    %203 = arith.mulf %194, %138 : vector<64x32xf32>
    %204 = arith.addf %202, %203 : vector<64x32xf32>
    %cst_66 = arith.constant dense<0.000000e+00> : vector<64xf32>
    %205 = vector.multi_reduction <add>, %204, %cst_66 [1] : vector<64x32xf32> to vector<64xf32>
    %206 = vector.shape_cast %205 : vector<64xf32> to vector<64x1xf32>
    %cst_67 = arith.constant 3.200000e+01 : f32
    %207 = vector.broadcast %cst_67 : f32 to vector<64x1xf32>
    %208 = arith.divf %206, %207 : vector<64x1xf32>
    %209 = vector.broadcast %208 : vector<64x1xf32> to vector<64x32xf32>
    %210 = arith.subf %204, %209 : vector<64x32xf32>
    %211 = arith.mulf %210, %210 : vector<64x32xf32>
    %cst_68 = arith.constant dense<0.000000e+00> : vector<64xf32>
    %212 = vector.multi_reduction <add>, %211, %cst_68 [1] : vector<64x32xf32> to vector<64xf32>
    %213 = vector.shape_cast %212 : vector<64xf32> to vector<64x1xf32>
    %cst_69 = arith.constant 3.200000e+01 : f32
    %214 = vector.broadcast %cst_69 : f32 to vector<64x1xf32>
    %215 = arith.divf %213, %214 : vector<64x1xf32>
    %216 = vector.broadcast %208 : vector<64x1xf32> to vector<64x32xf32>
    %217 = arith.subf %204, %216 : vector<64x32xf32>
    %cst_70 = arith.constant 9.99999974E-6 : f32
    %218 = vector.broadcast %cst_70 : f32 to vector<64x1xf32>
    %219 = arith.addf %215, %218 : vector<64x1xf32>
    %220 = math.rsqrt %219 : vector<64x1xf32>
    %221 = vector.broadcast %220 : vector<64x1xf32> to vector<64x32xf32>
    %222 = arith.mulf %217, %221 : vector<64x32xf32>
    %cst_71 = arith.constant dense<0.000000e+00> : vector<64x64xf32>
    %223 = tpu.matmul %222, %16, %cst_71 {dimension_numbers = #tpu.dot_dimension_numbers<[1], [0], [0], [1], [0, 0, 1, 1], [], []>} : vector<64x32xf32>, vector<32x64xf32>, vector<64x64xf32> -> vector<64x64xf32>
    %224 = arith.addf %223, %9 : vector<64x64xf32>
    %cst_72 = arith.constant 0.000000e+00 : f32
    %225 = vector.broadcast %cst_72 : f32 to vector<64x64xf32>
    %226 = arith.maximumf %224, %225 : vector<64x64xf32>
    %cst_73 = arith.constant dense<0.000000e+00> : vector<64x32xf32>
    %227 = tpu.matmul %226, %17, %cst_73 {dimension_numbers = #tpu.dot_dimension_numbers<[1], [0], [0], [1], [0, 0, 1, 1], [], []>} : vector<64x64xf32>, vector<64x32xf32>, vector<64x32xf32> -> vector<64x32xf32>
    %228 = arith.addf %204, %227 : vector<64x32xf32>
    %229 = arith.addf %228, %12 : vector<64x32xf32>
    %cst_74 = arith.constant dense<0.000000e+00> : vector<64xf32>
    %230 = vector.multi_reduction <add>, %229, %cst_74 [1] : vector<64x32xf32> to vector<64xf32>
    %231 = vector.shape_cast %230 : vector<64xf32> to vector<64x1xf32>
    %cst_75 = arith.constant 3.200000e+01 : f32
    %232 = vector.broadcast %cst_75 : f32 to vector<64x1xf32>
    %233 = arith.divf %231, %232 : vector<64x1xf32>
    %234 = vector.broadcast %233 : vector<64x1xf32> to vector<64x32xf32>
    %235 = arith.subf %229, %234 : vector<64x32xf32>
    %236 = arith.mulf %235, %235 : vector<64x32xf32>
    %cst_76 = arith.constant dense<0.000000e+00> : vector<64xf32>
    %237 = vector.multi_reduction <add>, %236, %cst_76 [1] : vector<64x32xf32> to vector<64xf32>
    %238 = vector.shape_cast %237 : vector<64xf32> to vector<64x1xf32>
    %cst_77 = arith.constant 3.200000e+01 : f32
    %239 = vector.broadcast %cst_77 : f32 to vector<64x1xf32>
    %240 = arith.divf %238, %239 : vector<64x1xf32>
    %241 = vector.broadcast %233 : vector<64x1xf32> to vector<64x32xf32>
    %242 = arith.subf %229, %241 : vector<64x32xf32>
    %cst_78 = arith.constant 9.99999974E-6 : f32
    %243 = vector.broadcast %cst_78 : f32 to vector<64x1xf32>
    %244 = arith.addf %240, %243 : vector<64x1xf32>
    %245 = math.rsqrt %244 : vector<64x1xf32>
    %246 = vector.broadcast %245 : vector<64x1xf32> to vector<64x32xf32>
    %247 = arith.mulf %242, %246 : vector<64x32xf32>
    %cst_79 = arith.constant dense<0.000000e+00> : vector<64x32xf32>
    %248 = tpu.matmul %247, %14, %cst_79 {dimension_numbers = #tpu.dot_dimension_numbers<[1], [0], [0], [1], [0, 0, 1, 1], [], []>} : vector<64x32xf32>, vector<32x32xf32>, vector<64x32xf32> -> vector<64x32xf32>
    %249 = arith.addf %248, %3 : vector<64x32xf32>
    %250 = vector.shape_cast %249 : vector<64x32xf32> to vector<8x8x32xf32>
    "tpu.trace_start"() <{level = 10 : i32, message = "bid,bdj->bij"}> : () -> ()
    %cst_80 = arith.constant dense<0.000000e+00> : vector<8x8x64xf32>
    %251 = tpu.matmul %250, %45, %cst_80 {dimension_numbers = #tpu.dot_dimension_numbers<[2], [1], [1], [2], [0, 0, 0, 1, 1, 2], [0], [0]>} : vector<8x8x32xf32>, vector<8x32x64xf32>, vector<8x8x64xf32> -> vector<8x8x64xf32>
    "tpu.trace_stop"() : () -> ()
    %cst_81 = arith.constant dense<0xFF800000> : vector<8x64xf32>
    %252 = vector.multi_reduction <maximumf>, %251, %cst_81 [1] : vector<8x8x64xf32> to vector<8x64xf32>
    %253 = vector.shape_cast %252 : vector<8x64xf32> to vector<8x1x64xf32>
    %254 = vector.broadcast %253 : vector<8x1x64xf32> to vector<8x8x64xf32>
    %255 = arith.subf %251, %254 : vector<8x8x64xf32>
    %256 = math.exp %255 : vector<8x8x64xf32>
    %cst_82 = arith.constant dense<0.000000e+00> : vector<8x64xf32>
    %257 = vector.multi_reduction <add>, %256, %cst_82 [1] : vector<8x8x64xf32> to vector<8x64xf32>
    %258 = vector.shape_cast %257 : vector<8x64xf32> to vector<8x1x64xf32>
    %259 = tpu.reciprocal %258 : vector<8x1x64xf32> -> vector<8x1x64xf32>
    %260 = vector.broadcast %259 : vector<8x1x64xf32> to vector<8x8x64xf32>
    %261 = arith.mulf %256, %260 : vector<8x8x64xf32>
    %cst_83 = arith.constant 9.99999993E-9 : f32
    %262 = vector.broadcast %cst_83 : f32 to vector<8x8x64xf32>
    %263 = arith.addf %261, %262 : vector<8x8x64xf32>
    %cst_84 = arith.constant dense<0.000000e+00> : vector<8x8xf32>
    %264 = vector.multi_reduction <add>, %263, %cst_84 [2] : vector<8x8x64xf32> to vector<8x8xf32>
    %265 = vector.shape_cast %264 : vector<8x8xf32> to vector<8x8x1xf32>
    %266 = tpu.reciprocal %265 : vector<8x8x1xf32> -> vector<8x8x1xf32>
    %267 = vector.broadcast %266 : vector<8x8x1xf32> to vector<8x8x64xf32>
    %268 = arith.mulf %263, %267 : vector<8x8x64xf32>
    "tpu.trace_start"() <{level = 10 : i32, message = "bij,bjd->bid"}> : () -> ()
    %cst_85 = arith.constant dense<0.000000e+00> : vector<8x8x32xf32>
    %269 = tpu.matmul %268, %47, %cst_85 {dimension_numbers = #tpu.dot_dimension_numbers<[2], [1], [1], [2], [0, 0, 0, 1, 1, 2], [0], [0]>} : vector<8x8x64xf32>, vector<8x64x32xf32>, vector<8x8x32xf32> -> vector<8x8x32xf32>
    "tpu.trace_stop"() : () -> ()
    %270 = vector.shape_cast %269 : vector<8x8x32xf32> to vector<64x32xf32>
    %271 = tpu.concatenate %270, %229 in 1 : vector<64x32xf32>, vector<64x32xf32> -> vector<64x64xf32>
    %cst_86 = arith.constant dense<0.000000e+00> : vector<64x128xf32>
    %272 = tpu.matmul %271, %15, %cst_86 {dimension_numbers = #tpu.dot_dimension_numbers<[1], [0], [0], [1], [0, 0, 1, 1], [], []>} : vector<64x64xf32>, vector<64x128xf32>, vector<64x128xf32> -> vector<64x128xf32>
    %273 = arith.addf %272, %6 : vector<64x128xf32>
    %274 = vector.extract_strided_slice %273 {offsets = [0, 0], sizes = [64, 32], strides = [1, 1]} : vector<64x128xf32> to vector<64x32xf32>
    %275 = arith.negf %274 : vector<64x32xf32>
    %276 = math.exp %275 : vector<64x32xf32>
    %cst_87 = arith.constant 1.000000e+00 : f32
    %277 = vector.broadcast %cst_87 : f32 to vector<64x32xf32>
    %278 = arith.addf %277, %276 : vector<64x32xf32>
    %279 = arith.divf %277, %278 : vector<64x32xf32>
    %280 = vector.extract_strided_slice %273 {offsets = [0, 32], sizes = [64, 32], strides = [1, 1]} : vector<64x128xf32> to vector<64x32xf32>
    %281 = arith.negf %280 : vector<64x32xf32>
    %282 = math.exp %281 : vector<64x32xf32>
    %cst_88 = arith.constant 1.000000e+00 : f32
    %283 = vector.broadcast %cst_88 : f32 to vector<64x32xf32>
    %284 = arith.addf %283, %282 : vector<64x32xf32>
    %285 = arith.divf %283, %284 : vector<64x32xf32>
    %286 = vector.extract_strided_slice %273 {offsets = [0, 64], sizes = [64, 32], strides = [1, 1]} : vector<64x128xf32> to vector<64x32xf32>
    %287 = vector.extract_strided_slice %273 {offsets = [0, 96], sizes = [64, 32], strides = [1, 1]} : vector<64x128xf32> to vector<64x32xf32>
    %288 = arith.mulf %279, %287 : vector<64x32xf32>
    %289 = arith.addf %286, %288 : vector<64x32xf32>
    %290 = math.tanh %289 : vector<64x32xf32>
    %cst_89 = arith.constant 1.000000e+00 : f32
    %291 = vector.broadcast %cst_89 : f32 to vector<64x32xf32>
    %292 = arith.subf %291, %285 : vector<64x32xf32>
    %293 = arith.mulf %292, %290 : vector<64x32xf32>
    %294 = arith.mulf %285, %229 : vector<64x32xf32>
    %295 = arith.addf %293, %294 : vector<64x32xf32>
    %cst_90 = arith.constant dense<0.000000e+00> : vector<64xf32>
    %296 = vector.multi_reduction <add>, %295, %cst_90 [1] : vector<64x32xf32> to vector<64xf32>
    %297 = vector.shape_cast %296 : vector<64xf32> to vector<64x1xf32>
    %cst_91 = arith.constant 3.200000e+01 : f32
    %298 = vector.broadcast %cst_91 : f32 to vector<64x1xf32>
    %299 = arith.divf %297, %298 : vector<64x1xf32>
    %300 = vector.broadcast %299 : vector<64x1xf32> to vector<64x32xf32>
    %301 = arith.subf %295, %300 : vector<64x32xf32>
    %302 = arith.mulf %301, %301 : vector<64x32xf32>
    %cst_92 = arith.constant dense<0.000000e+00> : vector<64xf32>
    %303 = vector.multi_reduction <add>, %302, %cst_92 [1] : vector<64x32xf32> to vector<64xf32>
    %304 = vector.shape_cast %303 : vector<64xf32> to vector<64x1xf32>
    %cst_93 = arith.constant 3.200000e+01 : f32
    %305 = vector.broadcast %cst_93 : f32 to vector<64x1xf32>
    %306 = arith.divf %304, %305 : vector<64x1xf32>
    %307 = vector.broadcast %299 : vector<64x1xf32> to vector<64x32xf32>
    %308 = arith.subf %295, %307 : vector<64x32xf32>
    %cst_94 = arith.constant 9.99999974E-6 : f32
    %309 = vector.broadcast %cst_94 : f32 to vector<64x1xf32>
    %310 = arith.addf %306, %309 : vector<64x1xf32>
    %311 = math.rsqrt %310 : vector<64x1xf32>
    %312 = vector.broadcast %311 : vector<64x1xf32> to vector<64x32xf32>
    %313 = arith.mulf %308, %312 : vector<64x32xf32>
    %cst_95 = arith.constant dense<0.000000e+00> : vector<64x64xf32>
    %314 = tpu.matmul %313, %16, %cst_95 {dimension_numbers = #tpu.dot_dimension_numbers<[1], [0], [0], [1], [0, 0, 1, 1], [], []>} : vector<64x32xf32>, vector<32x64xf32>, vector<64x64xf32> -> vector<64x64xf32>
    %315 = arith.addf %314, %9 : vector<64x64xf32>
    %cst_96 = arith.constant 0.000000e+00 : f32
    %316 = vector.broadcast %cst_96 : f32 to vector<64x64xf32>
    %317 = arith.maximumf %315, %316 : vector<64x64xf32>
    %cst_97 = arith.constant dense<0.000000e+00> : vector<64x32xf32>
    %318 = tpu.matmul %317, %17, %cst_97 {dimension_numbers = #tpu.dot_dimension_numbers<[1], [0], [0], [1], [0, 0, 1, 1], [], []>} : vector<64x64xf32>, vector<64x32xf32>, vector<64x32xf32> -> vector<64x32xf32>
    %319 = arith.addf %295, %318 : vector<64x32xf32>
    %320 = arith.addf %319, %12 : vector<64x32xf32>
    %321 = vector.shape_cast %320 : vector<64x32xf32> to vector<8x8x32xf32>
    %c0_98 = arith.constant 0 : index
    %c0_99 = arith.constant 0 : index
    %c0_100 = arith.constant 0 : index
    %322 = vector.load %arg9[%c0_98, %c0_99, %c0_100] : memref<8x8x32xf32, #tpu.memory_space<vmem>>, vector<8x8x32xf32>
    tpu.vector_store %arg9[%c0_98, %c0_99, %c0_100], %321 {strides = array<i32>} : memref<8x8x32xf32, #tpu.memory_space<vmem>>, vector<8x8x32xf32>,
    return
  }
  func.func @transform_0(%arg0: i32) -> (i32, i32, i32) {
    %c0_i32 = arith.constant 0 : i32
    %c0_i32_0 = arith.constant 0 : i32
    %c0_i32_1 = arith.constant 0 : i32
    return %arg0, %c0_i32, %c0_i32_0 : i32, i32, i32
  }
  func.func @transform_1(%arg0: i32) -> (i32, i32, i32) {
    %c0_i32 = arith.constant 0 : i32
    %c0_i32_0 = arith.constant 0 : i32
    %c0_i32_1 = arith.constant 0 : i32
    return %arg0, %c0_i32, %c0_i32_0 : i32, i32, i32
  }
  func.func @transform_2(%arg0: i32) -> (i32, i32) {
    %c0_i32 = arith.constant 0 : i32
    %c0_i32_0 = arith.constant 0 : i32
    %c0_i32_1 = arith.constant 0 : i32
    return %c0_i32, %c0_i32_0 : i32, i32
  }
  func.func @transform_3(%arg0: i32) -> (i32, i32) {
    %c0_i32 = arith.constant 0 : i32
    %c0_i32_0 = arith.constant 0 : i32
    %c0_i32_1 = arith.constant 0 : i32
    return %c0_i32, %c0_i32_0 : i32, i32
  }
  func.func @transform_4(%arg0: i32) -> (i32, i32) {
    %c0_i32 = arith.constant 0 : i32
    %c0_i32_0 = arith.constant 0 : i32
    %c0_i32_1 = arith.constant 0 : i32
    return %c0_i32, %c0_i32_0 : i32, i32
  }
  func.func @transform_5(%arg0: i32) -> (i32, i32) {
    %c0_i32 = arith.constant 0 : i32
    %c0_i32_0 = arith.constant 0 : i32
    %c0_i32_1 = arith.constant 0 : i32
    return %c0_i32, %c0_i32_0 : i32, i32
  }
  func.func @transform_6(%arg0: i32) -> (i32, i32) {
    %c0_i32 = arith.constant 0 : i32
    %c0_i32_0 = arith.constant 0 : i32
    %c0_i32_1 = arith.constant 0 : i32
    return %c0_i32, %c0_i32_0 : i32, i32
  }
  func.func @transform_7(%arg0: i32) -> (i32, i32) {
    %c0_i32 = arith.constant 0 : i32
    %c0_i32_0 = arith.constant 0 : i32
    %c0_i32_1 = arith.constant 0 : i32
    return %c0_i32, %c0_i32_0 : i32, i32
  }
  func.func @transform_8(%arg0: i32) -> (i32, i32, i32) {
    %c0_i32 = arith.constant 0 : i32
    %c0_i32_0 = arith.constant 0 : i32
    %c0_i32_1 = arith.constant 0 : i32
    return %arg0, %c0_i32, %c0_i32_0 : i32, i32, i32
  }
}

</mosaic_0001>

<bundles_post_ra>
// kernel: tpu_custom_call.1
= control target key start
LH: loop header
LB: loop body
LE: loop exit
PB: predicated region body
PF: predicated region fallthrough
CT: control target
= control target key end

     0   :  { %vm151_vm0 = vcmask 261120   ;;  %s17330_s0 = inlined_call_operand.vmem [shape: f32[8,64,32], index: 0, kind: input, shape index: {}]   ;;  %s17331_s1 = inlined_call_operand.vmem [shape: f32[8,8,32], index: 1, kind: input, shape index: {}]   ;;  %s17332_s2 = inlined_call_operand.vmem [shape: f32[5,128], index: 2, kind: input, shape index: {}]   ;;  %s17333_s3 = inlined_call_operand.vmem [shape: f32[32,64], index: 3, kind: input, shape index: {}]   ;;  %s17334_s4 = inlined_call_operand.vmem [shape: f32[32,32], index: 4, kind: input, shape index: {}]   ;;  %s17335_s5 = inlined_call_operand.vmem [shape: f32[64,128], index: 5, kind: input, shape index: {}]   ;;  %s17336_s6 = inlined_call_operand.vmem [shape: f32[32,64], index: 6, kind: input, shape index: {}]   ;;  %s17337_s7 = inlined_call_operand.vmem [shape: f32[64,32], index: 7, kind: input, shape index: {}]   ;;  %s17338_s8 = inlined_call_operand.hbm [shape: f32[8,8,32], index: 8, kind: output, shape index: {}]  }
   0x1   :  { %v13520_v0 = vld [vmem:[%s17330_s0] sm:$0xff]  ;;  %v13525_v1 = vld [vmem:[%s17330_s0 + $0x10] sm:$0xff]  ;;  %v13530_v2 = vld [vmem:[%s17330_s0 + $0x8] sm:$0xff] }
   0x2   :  { %v152_v3 = vsel %vm151_vm0, %v13520_v0, 0.0  ;;  %v158_v4 = vsel %vm151_vm0, %v13525_v1, 0.0  ;;  %v13539_v5 = vld [vmem:[%s17330_s0 + $0x18] sm:$0xff]  ;;  %v155_v6 = vsel %vm151_vm0, %v13530_v2, 0.0  ;;  %v13548_v8 = vld [vmem:[%s17330_s0 + $0x20] sm:$0xff]  ;;  %v13553_v9 = vld [vmem:[%s17330_s0 + $0x28] sm:$0xff] }
   0x3   :  { %153 = vadd.xlane.f32.xlu0 %v152_v3  ;;  %159 = vadd.xlane.f32.xlu1 %v158_v4  ;;  %v161_v7 = vsel %vm151_vm0, %v13539_v5, 0.0  ;;  %v164_v10 = vsel %vm151_vm0, %v13548_v8, 0.0  ;;  %v167_v11 = vsel %vm151_vm0, %v13553_v9, 0.0  ;;  %v13562_v12 = vld [vmem:[%s17330_s0 + $0x30] sm:$0xff]  ;;  %v13567_v13 = vld [vmem:[%s17330_s0 + $0x38] sm:$0xff]  ;;  %v13576_v16 = vld [vmem:[%s17330_s0 + $0x40] sm:$0xff] }
   0x4   :  { %v170_v14 = vsel %vm151_vm0, %v13562_v12, 0.0  ;;  %v173_v15 = vsel %vm151_vm0, %v13567_v13, 0.0  ;;  %v13581_v17 = vld [vmem:[%s17330_s0 + $0x48] sm:$0xff]  ;;  %v176_v18 = vsel %vm151_vm0, %v13576_v16, 0.0  ;;  %v13590_v20 = vld [vmem:[%s17331_s1] sm:$0xff] }
   0x5   :  { %v179_v19 = vsel %vm151_vm0, %v13581_v17, 0.0  ;;  %v13595_v21 = vld [vmem:[%s17331_s1 + $0x8] sm:$0xff]  ;;  %v1566_v22 = vsel %vm151_vm0, %v13590_v20, 0.0 }
   0x6   :  { %v1569_v23 = vsel %vm151_vm0, %v13595_v21, 0.0 }
   0x7   :  { %156 = vadd.xlane.f32.xlu0 %v155_v6  ;;  %162 = vadd.xlane.f32.xlu1 %v161_v7 }
   0xb   :  { %165 = vadd.xlane.f32.xlu0 %v164_v10  ;;  %168 = vadd.xlane.f32.xlu1 %v167_v11 }
   0xf   :  { %171 = vadd.xlane.f32.xlu0 %v170_v14  ;;  %174 = vadd.xlane.f32.xlu1 %v173_v15 }
  0x13   :  { %177 = vadd.xlane.f32.xlu0 %v176_v18  ;;  %180 = vadd.xlane.f32.xlu1 %v179_v19 }
  0x14   :  { %13 = vsyncpa [#allocation3], 0  ;;  %v13604_v24 = vld [vmem:[%s17330_s0 + $0x50] sm:$0xff]  ;;  %v13609_v25 = vld [vmem:[%s17330_s0 + $0x58] sm:$0xff]  ;;  %s13464_s9 = smov 96   ;;  %vm13465_vm2 = vmmov 0  }
  0x15   :  { %v182_v26 = vsel %vm151_vm0, %v13604_v24, 0.0  ;;  %v185_v27 = vsel %vm151_vm0, %v13609_v25, 0.0  ;;  %v13618_v28 = vld [vmem:[%s17330_s0 + $0x60] sm:$0xff]  ;;  %v13623_v29 = vld [vmem:[%s17330_s0 + $0x68] sm:$0xff]  ;;  %v13632_v32 = vld [vmem:[%s17330_s0 + $0x78] sm:$0xff]  ;;  %vm2575_vm3 = vcmask 523264  }
  0x16   :  { %v188_v30 = vsel %vm151_vm0, %v13618_v28, 0.0  ;;  %v191_v31 = vsel %vm151_vm0, %v13623_v29, 0.0  ;;  %v13637_v33 = vld [vmem:[%s17330_s0 + $0x70] sm:$0xff]  ;;  %v197_v34 = vsel %vm151_vm0, %v13632_v32, 0.0  ;;  %v13646_v36 = vld [vmem:[%s17330_s0 + $0x88] sm:$0xff]  ;;  %v13651_v37 = vld [vmem:[%s17330_s0 + $0x80] sm:$0xff] }
  0x17   :  { %1567 = vadd.xlane.f32.xlu0 %v1566_v22  ;;  %1570 = vadd.xlane.f32.xlu1 %v1569_v23  ;;  %v194_v35 = vsel %vm151_vm0, %v13637_v33, 0.0  ;;  %v203_v38 = vsel %vm151_vm0, %v13646_v36, 0.0  ;;  %v200_v39 = vsel %vm151_vm0, %v13651_v37, 0.0  ;;  %v13660_v40 = vld [vmem:[%s17330_s0 + $0x98] sm:$0xff]  ;;  %v13665_v41 = vld [vmem:[%s17330_s0 + $0x90] sm:$0xff]  ;;  %v13674_v44 = vld [vmem:[%s17330_s0 + $0xa8] sm:$0xff] }
  0x18   :  { %v209_v42 = vsel %vm151_vm0, %v13660_v40, 0.0  ;;  %v206_v43 = vsel %vm151_vm0, %v13665_v41, 0.0  ;;  %v13679_v45 = vld [vmem:[%s17330_s0 + $0xa0] sm:$0xff]  ;;  %v215_v46 = vsel %vm151_vm0, %v13674_v44, 0.0  ;;  %v13688_v48 = vld [vmem:[%s17330_s0 + $0xb8] sm:$0xff]  ;;  %v13693_v49 = vld [vmem:[%s17330_s0 + $0xb0] sm:$0xff] }
  0x19   :  { %v212_v47 = vsel %vm151_vm0, %v13679_v45, 0.0  ;;  %v221_v50 = vsel %vm151_vm0, %v13688_v48, 0.0  ;;  %v218_v51 = vsel %vm151_vm0, %v13693_v49, 0.0  ;;  %v13702_v52 = vld [vmem:[%s17330_s0 + $0xc8] sm:$0xff]  ;;  %v13707_v53 = vld [vmem:[%s17330_s0 + $0xc0] sm:$0xff]  ;;  %v13716_v56 = vld [vmem:[%s17330_s0 + $0xd8] sm:$0xff] }
  0x1a   :  { %v227_v54 = vsel %vm151_vm0, %v13702_v52, 0.0  ;;  %v224_v55 = vsel %vm151_vm0, %v13707_v53, 0.0  ;;  %v13721_v57 = vld [vmem:[%s17330_s0 + $0xd0] sm:$0xff]  ;;  %v233_v58 = vsel %vm151_vm0, %v13716_v56, 0.0  ;;  %v13730_v60 = vld [vmem:[%s17330_s0 + $0xe8] sm:$0xff]  ;;  %v13735_v61 = vld [vmem:[%s17330_s0 + $0xe0] sm:$0xff] }
  0x1b   :  { %183 = vadd.xlane.f32.xlu0 %v182_v26  ;;  %186 = vadd.xlane.f32.xlu1 %v185_v27  ;;  %v230_v59 = vsel %vm151_vm0, %v13721_v57, 0.0  ;;  %v239_v62 = vsel %vm151_vm0, %v13730_v60, 0.0  ;;  %v236_v63 = vsel %vm151_vm0, %v13735_v61, 0.0  ;;  %v13744_v3 = vld [vmem:[%s17330_s0 + $0xf8] sm:$0xff]  ;;  %v13749_v4 = vld [vmem:[%s17330_s0 + $0xf0] sm:$0xff]  ;;  %v13758_v10 = vld [vmem:[%s17330_s0 + $0x108] sm:$0xff] }
  0x1c   :  { %v245_v6 = vsel %vm151_vm0, %v13744_v3, 0.0  ;;  %v242_v7 = vsel %vm151_vm0, %v13749_v4, 0.0  ;;  %v13763_v11 = vld [vmem:[%s17330_s0 + $0x100] sm:$0xff]  ;;  %v251_v14 = vsel %vm151_vm0, %v13758_v10, 0.0  ;;  %v13772_v18 = vld [vmem:[%s17330_s0 + $0x118] sm:$0xff]  ;;  %v13777_v19 = vld [vmem:[%s17330_s0 + $0x110] sm:$0xff] }
  0x1d   :  { %v248_v15 = vsel %vm151_vm0, %v13763_v11, 0.0  ;;  %v257_v22 = vsel %vm151_vm0, %v13772_v18, 0.0  ;;  %v254_v23 = vsel %vm151_vm0, %v13777_v19, 0.0  ;;  %v13786_v26 = vld [vmem:[%s17330_s0 + $0x128] sm:$0xff]  ;;  %v13791_v27 = vld [vmem:[%s17330_s0 + $0x120] sm:$0xff]  ;;  %vm14662_vm1 = vmpackc.low %vm151_vm0, %vm151_vm0  ;;  %s13467_s14 = smov 32  }
  0x1e   :  { %s13468_s21 = smov 64  }
  0x1f   :  { %189 = vadd.xlane.f32.xlu0 %v188_v30  ;;  %192 = vadd.xlane.f32.xlu1 %v191_v31  ;;  %v263_v30 = vsel %vm151_vm0, %v13786_v26, 0.0  ;;  %v260_v31 = vsel %vm151_vm0, %v13791_v27, 0.0 }
  0x23   :  { %198 = vadd.xlane.f32.xlu1 %v197_v34  ;;  %195 = vadd.xlane.f32.xlu0 %v194_v35  ;;  %v13800_v34 = vld [vmem:[%s17330_s0 + $0x138] sm:$0xff]  ;;  %v13805_v35 = vld [vmem:[%s17330_s0 + $0x130] sm:$0xff] }
  0x27   :  { %204 = vadd.xlane.f32.xlu1 %v203_v38  ;;  %201 = vadd.xlane.f32.xlu0 %v200_v39  ;;  %v269_v38 = vsel %vm151_vm0, %v13800_v34, 0.0  ;;  %v266_v39 = vsel %vm151_vm0, %v13805_v35, 0.0 }
  0x2b   :  { %210 = vadd.xlane.f32.xlu1 %v209_v42  ;;  %207 = vadd.xlane.f32.xlu0 %v206_v43  ;;  %v13814_v42 = vld [vmem:[%s17330_s0 + $0x148] sm:$0xff]  ;;  %v13819_v43 = vld [vmem:[%s17330_s0 + $0x140] sm:$0xff] }
  0x2f   :  { %216 = vadd.xlane.f32.xlu1 %v215_v46  ;;  %213 = vadd.xlane.f32.xlu0 %v212_v47  ;;  %v275_v46 = vsel %vm151_vm0, %v13814_v42, 0.0  ;;  %v272_v47 = vsel %vm151_vm0, %v13819_v43, 0.0 }
  0x33   :  { %222 = vadd.xlane.f32.xlu1 %v221_v50  ;;  %219 = vadd.xlane.f32.xlu0 %v218_v51  ;;  %v13828_v50 = vld [vmem:[%s17331_s1 + $0x18] sm:$0xff]  ;;  %v13833_v51 = vld [vmem:[%s17331_s1 + $0x10] sm:$0xff] }
  0x37   :  { %228 = vadd.xlane.f32.xlu1 %v227_v54  ;;  %225 = vadd.xlane.f32.xlu0 %v224_v55  ;;  %v1575_v54 = vsel %vm151_vm0, %v13828_v50, 0.0  ;;  %v1572_v55 = vsel %vm151_vm0, %v13833_v51, 0.0 }
  0x3b   :  { %234 = vadd.xlane.f32.xlu1 %v233_v58  ;;  %231 = vadd.xlane.f32.xlu0 %v230_v59  ;;  %v13842_v58 = vld [vmem:[%s17330_s0 + $0x158] sm:$0xff]  ;;  %v13847_v59 = vld [vmem:[%s17330_s0 + $0x150] sm:$0xff] }
  0x3f   :  { %240 = vadd.xlane.f32.xlu1 %v239_v62  ;;  %237 = vadd.xlane.f32.xlu0 %v236_v63  ;;  %v281_v62 = vsel %vm151_vm0, %v13842_v58, 0.0  ;;  %v278_v63 = vsel %vm151_vm0, %v13847_v59, 0.0 }
  0x43   :  { %246 = vadd.xlane.f32.xlu1 %v245_v6  ;;  %243 = vadd.xlane.f32.xlu0 %v242_v7  ;;  %v13856_v6 = vld [vmem:[%s17330_s0 + $0x168] sm:$0xff]  ;;  %v13861_v7 = vld [vmem:[%s17330_s0 + $0x160] sm:$0xff] }
  0x44   :  { %17492 = vst [vmem:[#allocation5_spill] sm:$0xff] %v13861_v7 }
  0x47   :  { %252 = vadd.xlane.f32.xlu1 %v251_v14  ;;  %249 = vadd.xlane.f32.xlu0 %v248_v15  ;;  %v287_v14 = vsel %vm151_vm0, %v13856_v6, 0.0  ;;  %v284_v15 = vsel %vm151_vm0, %v13861_v7, 0.0 }
  0x4b   :  { %258 = vadd.xlane.f32.xlu1 %v257_v22  ;;  %255 = vadd.xlane.f32.xlu0 %v254_v23  ;;  %v13870_v22 = vld [vmem:[%s17330_s0 + $0x178] sm:$0xff]  ;;  %v13875_v23 = vld [vmem:[%s17330_s0 + $0x170] sm:$0xff] }
  0x4c   :  { %17493 = vst [vmem:[#allocation6_spill] sm:$0xff] %v13875_v23 }
  0x4f   :  { %264 = vadd.xlane.f32.xlu1 %v263_v30  ;;  %261 = vadd.xlane.f32.xlu0 %v260_v31  ;;  %v293_v30 = vsel %vm151_vm0, %v13870_v22, 0.0  ;;  %v290_v31 = vsel %vm151_vm0, %v13875_v23, 0.0 }
  0x53   :  { %270 = vadd.xlane.f32.xlu1 %v269_v38  ;;  %267 = vadd.xlane.f32.xlu0 %v266_v39  ;;  %v13884_v38 = vld [vmem:[%s17330_s0 + $0x190] sm:$0xff]  ;;  %v13889_v39 = vld [vmem:[%s17330_s0 + $0x180] sm:$0xff] }
  0x54   :  { %17494 = vst [vmem:[#allocation7_spill] sm:$0xff] %v13884_v38  ;;  %17495 = vst [vmem:[#allocation8_spill] sm:$0xff] %v13889_v39 }
  0x57   :  { %276 = vadd.xlane.f32.xlu1 %v275_v46  ;;  %273 = vadd.xlane.f32.xlu0 %v272_v47  ;;  %v302_v46 = vsel %vm151_vm0, %v13884_v38, 0.0  ;;  %v296_v47 = vsel %vm151_vm0, %v13889_v39, 0.0 }
  0x5b   :  { %1576 = vadd.xlane.f32.xlu1 %v1575_v54  ;;  %1573 = vadd.xlane.f32.xlu0 %v1572_v55  ;;  %v13898_v54 = vld [vmem:[%s17330_s0 + $0x198] sm:$0xff]  ;;  %v13903_v55 = vld [vmem:[%s17330_s0 + $0x188] sm:$0xff] }
  0x5c   :  { %17496 = vst [vmem:[#allocation9_spill] sm:$0xff] %v13898_v54 }
  0x5f   :  { %282 = vadd.xlane.f32.xlu1 %v281_v62  ;;  %279 = vadd.xlane.f32.xlu0 %v278_v63  ;;  %v305_v62 = vsel %vm151_vm0, %v13898_v54, 0.0  ;;  %v299_v63 = vsel %vm151_vm0, %v13903_v55, 0.0 }
  0x63   :  { %288 = vadd.xlane.f32.xlu1 %v287_v14  ;;  %285 = vadd.xlane.f32.xlu0 %v284_v15  ;;  %v13912_v14 = vld [vmem:[%s17330_s0 + $0x1a0] sm:$0xff] }
  0x64   :  { %17497 = vst [vmem:[#allocation10_spill] sm:$0xff] %v13912_v14  ;;  %v308_v15 = vsel %vm151_vm0, %v13912_v14, 0.0 }
  0x67   :  { %294 = vadd.xlane.f32.xlu1 %v293_v30  ;;  %291 = vadd.xlane.f32.xlu0 %v290_v31  ;;  %v13919_v30 = vld [vmem:[%s17330_s0 + $0x1a8] sm:$0xff] }
  0x68   :  { %17498 = vst [vmem:[#allocation11_spill] sm:$0xff] %v13919_v30  ;;  %v311_v31 = vsel %vm151_vm0, %v13919_v30, 0.0 }
  0x6b   :  { %303 = vadd.xlane.f32.xlu1 %v302_v46  ;;  %297 = vadd.xlane.f32.xlu0 %v296_v47  ;;  %v13926_v46 = vld [vmem:[%s17330_s0 + $0x1b0] sm:$0xff] }
  0x6c   :  { %17499 = vst [vmem:[#allocation12_spill] sm:$0xff] %v13926_v46  ;;  %v314_v47 = vsel %vm151_vm0, %v13926_v46, 0.0 }
  0x6f   :  { %306 = vadd.xlane.f32.xlu1 %v305_v62  ;;  %300 = vadd.xlane.f32.xlu0 %v299_v63 }
  0x73   :  { %309 = vadd.xlane.f32.xlu1 %v308_v15 }
  0x77   :  { %312 = vadd.xlane.f32.xlu1 %v311_v31 }
  0x7b   :  { %315 = vadd.xlane.f32.xlu1 %v314_v47 }
  0x90   :  { %v154_v62 = vpop.xlane.xlu0 %153  ;;  %v160_v63 = vpop.xlane.xlu1 %159 }
  0x91   :  { %v345_v14 = vmul.f32 0.03125, %v154_v62  ;;  %v347_v38 = vmul.f32 0.03125, %v160_v63 }
  0x93   :  { %v13931_v39 = vsub.f32 %v13520_v0, %v345_v14  ;;  %v13934_v15 = vsub.f32 %v13525_v1, %v347_v38 }
  0x94   :  { %v157_v30 = vpop.xlane.xlu0 %156  ;;  %v163_v23 = vpop.xlane.xlu1 %162 }
  0x95   :  { %17500 = vst [vmem:[#allocation13_spill] sm:$0xff] %v13934_v15  ;;  %v346_v54 = vmul.f32 0.03125, %v157_v30  ;;  %v348_v7 = vmul.f32 0.03125, %v163_v23  ;;  %v473_v31 = vmul.f32 %v13931_v39, %v13931_v39  ;;  %v475_v47 = vmul.f32 %v13934_v15, %v13934_v15 }
  0x97   :  { %v13941_v46 = vsub.f32 %v13530_v2, %v346_v54  ;;  %v13944_v62 = vsub.f32 %v13539_v5, %v348_v7  ;;  %v537_v0 = vsel %vm151_vm0, %v473_v31, 0.0  ;;  %v543_v14 = vsel %vm151_vm0, %v475_v47, 0.0 }
  0x98   :  { %538 = vadd.xlane.f32.xlu0 %v537_v0  ;;  %v166_v1 = vpop.xlane.xlu0 %165  ;;  %v169_v38 = vpop.xlane.xlu1 %168 }
  0x99   :  { %v349_v23 = vmul.f32 0.03125, %v166_v1  ;;  %v350_v30 = vmul.f32 0.03125, %v169_v38  ;;  %v474_v63 = vmul.f32 %v13941_v46, %v13941_v46  ;;  %v476_v15 = vmul.f32 %v13944_v62, %v13944_v62 }
  0x9b   :  { %v13953_v2 = vsub.f32 %v13548_v8, %v349_v23  ;;  %v13956_v5 = vsub.f32 %v13553_v9, %v350_v30  ;;  %v540_v7 = vsel %vm151_vm0, %v474_v63, 0.0  ;;  %v546_v47 = vsel %vm151_vm0, %v476_v15, 0.0 }
  0x9c   :  { %544 = vadd.xlane.f32.xlu0 %v543_v14  ;;  %541 = vadd.xlane.f32.xlu1 %v540_v7  ;;  %v172_v54 = vpop.xlane.xlu0 %171  ;;  %v175_v31 = vpop.xlane.xlu1 %174 }
  0x9d   :  { %v351_v0 = vmul.f32 0.03125, %v172_v54  ;;  %v352_v1 = vmul.f32 0.03125, %v175_v31  ;;  %v477_v38 = vmul.f32 %v13953_v2, %v13953_v2  ;;  %v478_v8 = vmul.f32 %v13956_v5, %v13956_v5 }
  0x9f   :  { %v13965_v23 = vsub.f32 %v13562_v12, %v351_v0  ;;  %v13968_v9 = vsub.f32 %v13567_v13, %v352_v1  ;;  %v549_v14 = vsel %vm151_vm0, %v477_v38, 0.0  ;;  %v552_v63 = vsel %vm151_vm0, %v478_v8, 0.0 }
  0xa0   :  { %547 = vadd.xlane.f32.xlu1 %v546_v47  ;;  %550 = vadd.xlane.f32.xlu0 %v549_v14  ;;  %v178_v30 = vpop.xlane.xlu0 %177  ;;  %v181_v15 = vpop.xlane.xlu1 %180 }
  0xa1   :  { %v353_v7 = vmul.f32 0.03125, %v178_v30  ;;  %v354_v54 = vmul.f32 0.03125, %v181_v15  ;;  %v479_v31 = vmul.f32 %v13965_v23, %v13965_v23  ;;  %v480_v12 = vmul.f32 %v13968_v9, %v13968_v9 }
  0xa3   :  { %v13977_v0 = vsub.f32 %v13576_v16, %v353_v7  ;;  %v13980_v13 = vsub.f32 %v13581_v17, %v354_v54  ;;  %v555_v47 = vsel %vm151_vm0, %v479_v31, 0.0  ;;  %v558_v14 = vsel %vm151_vm0, %v480_v12, 0.0 }
  0xa4   :  { %553 = vadd.xlane.f32.xlu1 %v552_v63  ;;  %556 = vadd.xlane.f32.xlu0 %v555_v47  ;;  %v1568_v1 = vpop.xlane.xlu0 %1567  ;;  %v1571_v38 = vpop.xlane.xlu1 %1570 }
  0xa5   :  { %17501 = vst [vmem:[#allocation14_spill] sm:$0xff] %v13977_v0  ;;  %v1590_v8 = vmul.f32 0.03125, %v1568_v1  ;;  %v481_v30 = vmul.f32 %v13977_v0, %v13977_v0  ;;  %v482_v15 = vmul.f32 %v13980_v13, %v13980_v13  ;;  %v1591_v17 = vmul.f32 0.03125, %v1571_v38 }
  0xa7   :  { %v13989_v16 = vsub.f32 %v13590_v20, %v1590_v8  ;;  %v561_v7 = vsel %vm151_vm0, %v481_v30, 0.0  ;;  %v564_v12 = vsel %vm151_vm0, %v482_v15, 0.0  ;;  %v13994_v1 = vsub.f32 %v13595_v21, %v1591_v17 }
  0xa8   :  { %559 = vadd.xlane.f32.xlu1 %v558_v14  ;;  %562 = vadd.xlane.f32.xlu0 %v561_v7  ;;  %v184_v63 = vpop.xlane.xlu0 %183  ;;  %v187_v54 = vpop.xlane.xlu1 %186 }
  0xa9   :  { %v355_v31 = vmul.f32 0.03125, %v184_v63  ;;  %v356_v47 = vmul.f32 0.03125, %v187_v54  ;;  %17502 = vst [vmem:[#allocation15_spill] sm:$0xff] %v13994_v1  ;;  %v1606_v38 = vmul.f32 %v13989_v16, %v13989_v16  ;;  %v1607_v63 = vmul.f32 %v13994_v1, %v13994_v1  ;;  %v14061_v1 = vld [vmem:[%s17330_s0 + $0x1c8] sm:$0xff] }
  0xab   :  { %v13997_v0 = vsub.f32 %v13604_v24, %v355_v31  ;;  %v14000_v20 = vsub.f32 %v13609_v25, %v356_v47  ;;  %v1614_v24 = vsel %vm151_vm0, %v1606_v38, 0.0 }
  0xac   :  { %565 = vadd.xlane.f32.xlu1 %v564_v12  ;;  %v190_v8 = vpop.xlane.xlu0 %189  ;;  %v193_v14 = vpop.xlane.xlu1 %192 }
  0xad   :  { %17503 = vst [vmem:[#allocation16_spill] sm:$0xff] %v14000_v20  ;;  %v483_v30 = vmul.f32 %v13997_v0, %v13997_v0  ;;  %v357_v7 = vmul.f32 0.03125, %v190_v8  ;;  %v358_v15 = vmul.f32 0.03125, %v193_v14  ;;  %v484_v21 = vmul.f32 %v14000_v20, %v14000_v20  ;;  %v52_v14 = vld [vmem:[%s17333_s3 + $0x8] sm:$0xff]  ;;  %v14042_v20 = vld [vmem:[%s17330_s0 + $0x1c0] sm:$0xff] }
  0xaf   :  { %v567_v17 = vsel %vm151_vm0, %v483_v30, 0.0  ;;  %v14011_v25 = vsub.f32 %v13618_v28, %v357_v7  ;;  %v14016_v47 = vsub.f32 %v13623_v29, %v358_v15  ;;  %v570_v12 = vsel %vm151_vm0, %v484_v21, 0.0  ;;  %v51_v28 = vld [vmem:[%s17333_s3] sm:$0xff]  ;;  %v14030_v30 = vld [vmem:[%s17330_s0 + $0x1b8] sm:$0xff] }
  0xb0   :  { %1615 = vadd.xlane.f32.xlu1 %v1614_v24  ;;  %568 = vadd.xlane.f32.xlu0 %v567_v17  ;;  %v199_v54 = vpop.xlane.xlu1 %198  ;;  %v196_v31 = vpop.xlane.xlu0 %195  ;;  %v11912_v29 = vpack.c.bf16 %v52_v14, %v51_v28  ;;  %v1617_v7 = vsel %vm151_vm0, %v1607_v63, 0.0  ;;  %v317_v17 = vsel %vm151_vm0, %v14030_v30, 0.0 }
  0xb1   :  { %17504 = vst [vmem:[#allocation17_spill] sm:$0xff] %v14011_v25  ;;  %17505 = vst [vmem:[#allocation18_spill] sm:$0xff] %v14016_v47  ;;  %v485_v38 = vmul.f32 %v14011_v25, %v14011_v25  ;;  %v359_v8 = vmul.f32 0.03125, %v196_v31  ;;  %v360_v15 = vmul.f32 0.03125, %v199_v54  ;;  %v486_v63 = vmul.f32 %v14016_v47, %v14016_v47  ;;  %v53_v54 = vld [vmem:[%s17333_s3 + $0x10] sm:$0xff] }
  0xb2   :  { %11913 = vmatprep.subr.bf16.mxu0 %v11912_v29 }
  0xb3   :  { %v573_v31 = vsel %vm151_vm0, %v485_v38, 0.0  ;;  %v14037_v25 = vsub.f32 %v13637_v33, %v359_v8  ;;  %11915 = vmatpush3.bf16.msra.mxu0 %v11912_v29  ;;  %v14053_v38 = vsub.f32 %v13632_v32, %v360_v15  ;;  %v320_v8 = vsel %vm151_vm0, %v14042_v20, 0.0 }
  0xb4   :  { %1618 = vadd.xlane.f32.xlu1 %v1617_v7  ;;  %571 = vadd.xlane.f32.xlu0 %v570_v12  ;;  %v205_v21 = vpop.xlane.xlu1 %204  ;;  %v202_v24 = vpop.xlane.xlu0 %201  ;;  %v54_v12 = vld [vmem:[%s17333_s3 + $0x18] sm:$0xff]  ;;  %v576_v7 = vsel %vm151_vm0, %v486_v63, 0.0 }
  0xb5   :  { %17506 = vst [vmem:[#allocation19_spill] sm:$0xff] %v14037_v25  ;;  %v11916_v33 = vpack.c.bf16 %v54_v12, %v53_v54  ;;  %17507 = vst [vmem:[#allocation20_spill] sm:$0xff] %v14053_v38  ;;  %v487_v29 = vmul.f32 %v14037_v25, %v14037_v25  ;;  %v361_v32 = vmul.f32 0.03125, %v202_v24  ;;  %v362_v15 = vmul.f32 0.03125, %v205_v21  ;;  %v14077_v24 = vld [vmem:[%s17331_s1 + $0x28] sm:$0xff] }
  0xb6   :  { %17510 = vst [vmem:[#allocation23_spill] sm:$0xff] %v14077_v24  ;;  %v488_v21 = vmul.f32 %v14053_v38, %v14053_v38 }
  0xb7   :  { %11917 = vmatprep.subr.bf16.mxu0 %v11916_v33  ;;  %v579_v12 = vsel %vm151_vm0, %v487_v29, 0.0 }
  0xb8   :  { %318 = vadd.xlane.f32.xlu1 %v317_v17  ;;  %574 = vadd.xlane.f32.xlu0 %v573_v31  ;;  %v211_v28 = vpop.xlane.xlu1 %210  ;;  %v208_v14 = vpop.xlane.xlu0 %207  ;;  %v323_v17 = vsel %vm151_vm0, %v14061_v1, 0.0 }
  0xb9   :  { %v364_v47 = vmul.f32 0.03125, %v211_v28  ;;  %11919 = vmatpush3.bf16.msra.mxu0 %v11916_v33  ;;  %v14072_v28 = vsub.f32 %v13651_v37, %v361_v32  ;;  %v1581_v33 = vsel %vm151_vm0, %v14077_v24, 0.0  ;;  %v582_v37 = vsel %vm151_vm0, %v488_v21, 0.0 }
  0xba   :  { %v363_v32 = vmul.f32 0.03125, %v208_v14 }
  0xbb   :  { %v14068_v54 = vsub.f32 %v13660_v40, %v364_v47  ;;  %17509 = vst [vmem:[#allocation22_spill] sm:$0xff] %v14072_v28  ;;  %v489_v29 = vmul.f32 %v14072_v28, %v14072_v28 }
  0xbc   :  { %321 = vadd.xlane.f32.xlu1 %v320_v8  ;;  %577 = vadd.xlane.f32.xlu0 %v576_v7  ;;  %v217_v31 = vpop.xlane.xlu1 %216  ;;  %v214_v63 = vpop.xlane.xlu0 %213  ;;  %v14084_v8 = vsub.f32 %v13646_v36, %v362_v15  ;;  %v14098_v15 = vld [vmem:[%s17330_s0 + $0x1d0] sm:$0xff]  ;;  %v14101_v21 = vsub.f32 %v13665_v41, %v363_v32  ;;  %v56_v41 = vld [vmem:[%s17334_s4 + $0x8] sm:$0xff] }
  0xbd   :  { %17508 = vst [vmem:[#allocation21_spill] sm:$0xff] %v14068_v54  ;;  %v492_v7 = vmul.f32 %v14068_v54, %v14068_v54  ;;  %v585_v25 = vsel %vm151_vm0, %v489_v29, 0.0  ;;  %17512 = vst [vmem:[#allocation25_spill] sm:$0xff] %v14098_v15  ;;  %v365_v29 = vmul.f32 0.03125, %v214_v63  ;;  %v55_v54 = vld [vmem:[%s17334_s4] sm:$0xff]  ;;  %v366_v63 = vmul.f32 0.03125, %v217_v31 }
  0xbe   :  { %17511 = vst [vmem:[#allocation24_spill] sm:$0xff] %v14084_v8  ;;  %v490_v36 = vmul.f32 %v14084_v8, %v14084_v8  ;;  %17513 = vst [vmem:[#allocation26_spill] sm:$0xff] %v14101_v21 }
  0xbf   :  { %v594_v38 = vsel %vm151_vm0, %v492_v7, 0.0 }
  0xc0   :  { %324 = vadd.xlane.f32.xlu1 %v323_v17  ;;  %580 = vadd.xlane.f32.xlu0 %v579_v12  ;;  %v223_v40 = vpop.xlane.xlu1 %222  ;;  %v220_v47 = vpop.xlane.xlu0 %219  ;;  %v588_v7 = vsel %vm151_vm0, %v490_v36, 0.0 }
  0xc1   :  { %v368_v24 = vmul.f32 0.03125, %v223_v40  ;;  %v326_v40 = vsel %vm151_vm0, %v14098_v15, 0.0  ;;  %v14136_v15 = vsub.f32 %v13679_v45, %v365_v29  ;;  %v14151_v45 = vsub.f32 %v13674_v44, %v366_v63 }
  0xc3   :  { %v493_v44 = vmul.f32 %v14136_v15, %v14136_v15 }
  0xc4   :  { %1582 = vadd.xlane.f32.xlu1 %v1581_v33  ;;  %583 = vadd.xlane.f32.xlu0 %v582_v37  ;;  %v229_v17 = vpop.xlane.xlu1 %228  ;;  %v226_v12 = vpop.xlane.xlu0 %225  ;;  %v14104_v37 = vsub.f32 %v13688_v48, %v368_v24  ;;  %v14123_v48 = vld [vmem:[%s17331_s1 + $0x20] sm:$0xff]  ;;  %v491_v24 = vmul.f32 %v14101_v21, %v14101_v21 }
  0xc5   :  { %17516 = vst [vmem:[#allocation29_spill] sm:$0xff] %v14123_v48  ;;  %v1578_v28 = vsel %vm151_vm0, %v14123_v48, 0.0  ;;  %v367_v48 = vmul.f32 0.03125, %v220_v47  ;;  %v494_v47 = vmul.f32 %v14151_v45, %v14151_v45 }
  0xc6   :  { %17514 = vst [vmem:[#allocation27_spill] sm:$0xff] %v14104_v37  ;;  %v496_v31 = vmul.f32 %v14104_v37, %v14104_v37  ;;  %v591_v29 = vsel %vm151_vm0, %v491_v24, 0.0 }
  0xc7   :  { %v14171_v63 = vsub.f32 %v13693_v49, %v367_v48 }
  0xc8   :  { %595 = vadd.xlane.f32.xlu1 %v594_v38  ;;  %586 = vadd.xlane.f32.xlu0 %v585_v25  ;;  %v235_v14 = vpop.xlane.xlu1 %234  ;;  %v232_v33 = vpop.xlane.xlu0 %231  ;;  %v14118_v25 = vld [vmem:[%s17330_s0 + $0x1d8] sm:$0xff]  ;;  %v14125_v38 = vpack.c.bf16 %v56_v41, %v55_v54  ;;  %v57_v54 = vld [vmem:[%s17334_s4 + $0x10] sm:$0xff]  ;;  %v606_v21 = vsel %vm151_vm0, %v496_v31, 0.0  ;;  %v597_v31 = vsel %vm151_vm0, %v493_v44, 0.0 }
  0xc9   :  { %17515 = vst [vmem:[#allocation28_spill] sm:$0xff] %v14118_v25  ;;  %v329_v8 = vsel %vm151_vm0, %v14118_v25, 0.0  ;;  %v372_v25 = vmul.f32 0.03125, %v235_v14  ;;  %17519 = vst [vmem:[#allocation32_spill] sm:$0xff] %v14171_v63  ;;  %v495_v48 = vmul.f32 %v14171_v63, %v14171_v63  ;;  %v371_v44 = vmul.f32 0.03125, %v232_v33 }
  0xca   :  { %17517 = vst [vmem:[#allocation30_spill] sm:$0xff] %v14125_v38  ;;  %11921 = vmatprep.subr.bf16.mxu1 %v14125_v38 }
  0xcb   :  { %11923 = vmatpush3.bf16.msra.mxu1 %v14125_v38  ;;  %v14160_v38 = vld [vmem:[%s17330_s0 + $0x1e0] sm:$0xff]  ;;  %v14174_v24 = vsub.f32 %v13716_v56, %v372_v25  ;;  %v600_v25 = vsel %vm151_vm0, %v494_v47, 0.0 }
  0xcc   :  { %327 = vadd.xlane.f32.xlu1 %v326_v40  ;;  %589 = vadd.xlane.f32.xlu0 %v588_v7  ;;  %v14129_v32 = vpop.xlane.xlu1 %240  ;;  %v238_v36 = vpop.xlane.xlu0 %237  ;;  %v58_v40 = vld [vmem:[%s17334_s4 + $0x18] sm:$0xff] }
  0xcd   :  { %v14148_v7 = vpack.c.bf16 %v58_v40, %v57_v54  ;;  %17520 = vst [vmem:[#allocation33_spill] sm:$0xff] %v14174_v24  ;;  %v369_v54 = vmul.f32 0.03125, %v226_v12  ;;  %v370_v40 = vmul.f32 0.03125, %v229_v17  ;;  %v500_v12 = vmul.f32 %v14174_v24, %v14174_v24  ;;  %v14204_v24 = vld [vmem:[%s17330_s0 + $0x1f0] sm:$0xff] }
  0xce   :  { %v338_v33 = vsel %vm151_vm0, %v14204_v24, 0.0 }
  0xcf   :  { %17518 = vst [vmem:[#allocation31_spill] sm:$0xff] %v14148_v7  ;;  %11925 = vmatprep.subr.bf16.mxu1 %v14148_v7  ;;  %v14187_v56 = vsub.f32 %v13707_v53, %v369_v54  ;;  %v14195_v17 = vsub.f32 %v13702_v52, %v370_v40  ;;  %v618_v53 = vsel %vm151_vm0, %v500_v12, 0.0  ;;  %v603_v54 = vsel %vm151_vm0, %v495_v48, 0.0 }
  0xd0   :  { %330 = vadd.xlane.f32.xlu1 %v329_v8  ;;  %1579 = vadd.xlane.f32.xlu0 %v1578_v28  ;;  %v247_v41 = vpop.xlane.xlu1 %246  ;;  %v14154_v37 = vpop.xlane.xlu0 %243  ;;  %v332_v28 = vsel %vm151_vm0, %v14160_v38, 0.0  ;;  %v14209_v40 = vsub.f32 %v13721_v57, %v371_v44  ;;  %v373_v12 = vmul.f32 0.03125, %v238_v36  ;;  %v14224_v57 = vld [vmem:[%s17330_s0 + $0x1f8] sm:$0xff]  ;;  %v374_v44 = vmul.f32 0.03125, %v14129_v32 }
  0xd1   :  { %11927 = vmatpush3.bf16.msra.mxu1 %v14148_v7  ;;  %17521 = vst [vmem:[#allocation34_spill] sm:$0xff] %v14187_v56  ;;  %17522 = vst [vmem:[#allocation35_spill] sm:$0xff] %v14195_v17  ;;  %v376_v47 = vmul.f32 0.03125, %v247_v41  ;;  %v497_v52 = vmul.f32 %v14187_v56, %v14187_v56 }
  0xd2   :  { %17523 = vst [vmem:[#allocation36_spill] sm:$0xff] %v14209_v40  ;;  %v499_v36 = vmul.f32 %v14209_v40, %v14209_v40 }
  0xd3   :  { %v14218_v48 = vsub.f32 %v13744_v3, %v376_v47  ;;  %v609_v56 = vsel %vm151_vm0, %v497_v52, 0.0 }
  0xd4   :  { %607 = vadd.xlane.f32.xlu1 %v606_v21  ;;  %592 = vadd.xlane.f32.xlu0 %v591_v29  ;;  %v253_v8 = vpop.xlane.xlu1 %252  ;;  %v250_v14 = vpop.xlane.xlu0 %249  ;;  %v14180_v21 = vld [vmem:[%s17330_s0 + $0x1e8] sm:$0xff]  ;;  %v615_v40 = vsel %vm151_vm0, %v499_v36, 0.0 }
  0xd5   :  { %v335_v29 = vsel %vm151_vm0, %v14180_v21, 0.0  ;;  %v378_v63 = vmul.f32 0.03125, %v253_v8  ;;  %v14234_v8 = vsub.f32 %v13735_v61, %v373_v12  ;;  %v504_v32 = vmul.f32 %v14218_v48, %v14218_v48 }
  0xd7   :  { %v14237_v47 = vsub.f32 %v13758_v10, %v378_v63  ;;  %v630_v10 = vsel %vm151_vm0, %v504_v32, 0.0 }
  0xd8   :  { %333 = vadd.xlane.f32.xlu1 %v332_v28  ;;  %598 = vadd.xlane.f32.xlu0 %v597_v31  ;;  %v259_v7 = vpop.xlane.xlu1 %258  ;;  %v14184_v49 = vpop.xlane.xlu0 %255 }
  0xd9   :  { %v380_v12 = vmul.f32 0.03125, %v259_v7  ;;  %v506_v63 = vmul.f32 %v14237_v47, %v14237_v47 }
  0xdb   :  { %v14260_v7 = vsub.f32 %v13772_v18, %v380_v12 }
  0xdc   :  { %336 = vadd.xlane.f32.xlu1 %v335_v29  ;;  %601 = vadd.xlane.f32.xlu0 %v600_v25  ;;  %v265_v28 = vpop.xlane.xlu1 %264  ;;  %v14197_v31 = vpop.xlane.xlu0 %261  ;;  %v498_v29 = vmul.f32 %v14195_v17, %v14195_v17 }
  0xdd   :  { %17524 = vst [vmem:[#allocation37_spill] sm:$0xff] %v14260_v7  ;;  %v382_v36 = vmul.f32 0.03125, %v265_v28 }
  0xde   :  { %v612_v52 = vsel %vm151_vm0, %v498_v29, 0.0  ;;  %v501_v29 = vmul.f32 %v14234_v8, %v14234_v8 }
  0xdf   :  { %v14279_v12 = vsub.f32 %v13786_v26, %v382_v36 }
  0xe0   :  { %619 = vadd.xlane.f32.xlu1 %v618_v53  ;;  %604 = vadd.xlane.f32.xlu0 %v603_v54  ;;  %v271_v41 = vpop.xlane.xlu1 %270  ;;  %v14215_v25 = vpop.xlane.xlu0 %267  ;;  %v341_v53 = vsel %vm151_vm0, %v14224_v57, 0.0  ;;  %v621_v32 = vsel %vm151_vm0, %v501_v29, 0.0  ;;  %v508_v29 = vmul.f32 %v14260_v7, %v14260_v7 }
  0xe1   :  { %v510_v36 = vmul.f32 %v14279_v12, %v14279_v12 }
  0xe4   :  { %339 = vadd.xlane.f32.xlu1 %v338_v33  ;;  %610 = vadd.xlane.f32.xlu0 %v609_v56  ;;  %v277_v3 = vpop.xlane.xlu1 %276  ;;  %v14231_v54 = vpop.xlane.xlu0 %273  ;;  %v14243_v56 = vsub.f32 %v13730_v60, %v374_v44  ;;  %v375_v33 = vmul.f32 0.03125, %v14154_v37  ;;  %v377_v37 = vmul.f32 0.03125, %v250_v14 }
  0xe6   :  { %v14255_v60 = vsub.f32 %v13749_v4, %v375_v33  ;;  %v502_v44 = vmul.f32 %v14243_v56, %v14243_v56  ;;  %v14267_v4 = vld [vmem:[%s17331_s1 + $0x38] sm:$0xff] }
  0xe7   :  { %v1587_v18 = vsel %vm151_vm0, %v14267_v4, 0.0 }
  0xe8   :  { %342 = vadd.xlane.f32.xlu1 %v341_v53  ;;  %613 = vadd.xlane.f32.xlu0 %v612_v52  ;;  %v1577_v17 = vpop.xlane.xlu1 %1576  ;;  %v14247_v61 = vpop.xlane.xlu0 %1573  ;;  %v636_v52 = vsel %vm151_vm0, %v506_v63, 0.0  ;;  %v503_v28 = vmul.f32 %v14255_v60, %v14255_v60  ;;  %v624_v63 = vsel %vm151_vm0, %v502_v44, 0.0  ;;  %v642_v44 = vsel %vm151_vm0, %v508_v29, 0.0 }
  0xec   :  { %631 = vadd.xlane.f32.xlu1 %v630_v10  ;;  %616 = vadd.xlane.f32.xlu0 %v615_v40  ;;  %v283_v53 = vpop.xlane.xlu1 %282  ;;  %v14269_v14 = vpop.xlane.xlu0 %279  ;;  %v14272_v40 = vsub.f32 %v13763_v11, %v377_v37  ;;  %v384_v10 = vmul.f32 0.03125, %v271_v41  ;;  %v379_v11 = vmul.f32 0.03125, %v14184_v49  ;;  %v627_v37 = vsel %vm151_vm0, %v503_v28, 0.0 }
  0xed   :  { %v386_v41 = vmul.f32 0.03125, %v277_v3  ;;  %v648_v3 = vsel %vm151_vm0, %v510_v36, 0.0  ;;  %v385_v36 = vmul.f32 0.03125, %v14231_v54 }
  0xee   :  { %v14291_v26 = vsub.f32 %v13800_v34, %v384_v10  ;;  %v14297_v49 = vsub.f32 %v13777_v19, %v379_v11  ;;  %v1593_v34 = vmul.f32 0.03125, %v1577_v17  ;;  %v14310_v19 = vld [vmem:[%s17331_s1 + $0x30] sm:$0xff]  ;;  %v383_v11 = vmul.f32 0.03125, %v14215_v25 }
  0xef   :  { %v14342_v54 = vsub.f32 %v13819_v43, %v385_v36 }
  0xf0   :  { %637 = vadd.xlane.f32.xlu1 %v636_v52  ;;  %622 = vadd.xlane.f32.xlu0 %v621_v32  ;;  %v289_v33 = vpop.xlane.xlu1 %288  ;;  %v505_v52 = vmul.f32 %v14272_v40, %v14272_v40  ;;  %v14288_v32 = vpop.xlane.xlu0 %285  ;;  %v512_v10 = vmul.f32 %v14291_v26, %v14291_v26  ;;  %v507_v17 = vmul.f32 %v14297_v49, %v14297_v49 }
  0xf1   :  { %v14329_v25 = vsub.f32 %v13805_v35, %v383_v11  ;;  %v1592_v11 = vmul.f32 0.03125, %v14247_v61  ;;  %v387_v61 = vmul.f32 0.03125, %v14269_v14  ;;  %v389_v14 = vmul.f32 0.03125, %v14288_v32 }
  0xf2   :  { %v633_v28 = vsel %vm151_vm0, %v505_v52, 0.0  ;;  %v14323_v52 = vsub.f32 %v13828_v50, %v1593_v34  ;;  %v390_v34 = vmul.f32 0.03125, %v289_v33 }
  0xf4   :  { %1588 = vadd.xlane.f32.xlu1 %v1587_v18  ;;  %625 = vadd.xlane.f32.xlu0 %v624_v63  ;;  %v295_v7 = vpop.xlane.xlu1 %294  ;;  %v381_v18 = vmul.f32 0.03125, %v14197_v31  ;;  %v14302_v63 = vsub.f32 %v13814_v42, %v386_v41  ;;  %v292_v29 = vpop.xlane.xlu0 %291  ;;  %v1584_v42 = vsel %vm151_vm0, %v14310_v19, 0.0  ;;  %v388_v41 = vmul.f32 0.03125, %v283_v53 }
  0xf5   :  { %v1609_v35 = vmul.f32 %v14323_v52, %v14323_v52  ;;  %v14349_v33 = vsub.f32 %v13856_v6, %v390_v34  ;;  %v513_v6 = vmul.f32 %v14342_v54, %v14342_v54  ;;  %v391_v32 = vmul.f32 0.03125, %v292_v29 }
  0xf6   :  { %v14313_v31 = vsub.f32 %v13791_v27, %v381_v18  ;;  %v514_v27 = vmul.f32 %v14302_v63, %v14302_v63  ;;  %v639_v18 = vsel %vm151_vm0, %v507_v17, 0.0  ;;  %v14336_v53 = vsub.f32 %v13842_v58, %v388_v41 }
  0xf7   :  { %v511_v58 = vmul.f32 %v14329_v25, %v14329_v25  ;;  %v392_v17 = vmul.f32 0.03125, %v295_v7  ;;  %v1623_v41 = vsel %vm151_vm0, %v1609_v35, 0.0  ;;  %v518_v34 = vmul.f32 %v14349_v33, %v14349_v33 }
  0xf8   :  { %643 = vadd.xlane.f32.xlu1 %v642_v44  ;;  %628 = vadd.xlane.f32.xlu0 %v627_v37  ;;  %v14320_v37 = vpop.xlane.xlu1 %303  ;;  %v654_v44 = vsel %vm151_vm0, %v512_v10, 0.0  ;;  %v298_v50 = vpop.xlane.xlu0 %297  ;;  %v657_v35 = vsel %vm151_vm0, %v513_v6, 0.0 }
  0xf9   :  { %v651_v36 = vsel %vm151_vm0, %v511_v58, 0.0  ;;  %v14362_v7 = vsub.f32 %v13870_v22, %v392_v17 }
  0xfb   :  { %v520_v17 = vmul.f32 %v14362_v7, %v14362_v7 }
  0xfc   :  { %649 = vadd.xlane.f32.xlu1 %v648_v3  ;;  %634 = vadd.xlane.f32.xlu0 %v633_v28  ;;  %v509_v28 = vmul.f32 %v14313_v31, %v14313_v31  ;;  %v660_v3 = vsel %vm151_vm0, %v514_v27, 0.0  ;;  %v307_v10 = vpop.xlane.xlu1 %306  ;;  %v301_v43 = vpop.xlane.xlu0 %300  ;;  %v14355_v27 = vsub.f32 %v13833_v51, %v1592_v11 }
  0xfd   :  { %v394_v51 = vmul.f32 0.03125, %v301_v43  ;;  %v396_v22 = vmul.f32 0.03125, %v307_v10 }
  0xfe   :  { %v1608_v11 = vmul.f32 %v14355_v27, %v14355_v27 }
  0xff   :  { %v14376_v58 = vsub.f32 %v13903_v55, %v394_v51  ;;  %v678_v55 = vsel %vm151_vm0, %v520_v17, 0.0 }
 0x100   :  { %655 = vadd.xlane.f32.xlu1 %v654_v44  ;;  %1585 = vadd.xlane.f32.xlu0 %v1584_v42  ;;  %v645_v42 = vsel %vm151_vm0, %v509_v28, 0.0  ;;  %v516_v44 = vmul.f32 %v14336_v53, %v14336_v53  ;;  %v1620_v43 = vsel %vm151_vm0, %v1608_v11, 0.0  ;;  %v17529_v11 = vld [vmem:[#allocation11_spill] sm:$0xff] }
 0x102   :  { %v666_v28 = vsel %vm151_vm0, %v516_v44, 0.0 }
 0x104   :  { %661 = vadd.xlane.f32.xlu1 %v660_v3  ;;  %640 = vadd.xlane.f32.xlu0 %v639_v18  ;;  %v310_v18 = vpop.xlane.xlu1 %309  ;;  %v14368_v3 = vsub.f32 %v13847_v59, %v387_v61  ;;  %v17526_v61 = vld [vmem:[#allocation9_spill] sm:$0xff] }
 0x106   :  { %v515_v10 = vmul.f32 %v14368_v3, %v14368_v3 }
 0x108   :  { %1624 = vadd.xlane.f32.xlu1 %v1623_v41  ;;  %646 = vadd.xlane.f32.xlu0 %v645_v42  ;;  %v672_v42 = vsel %vm151_vm0, %v518_v34, 0.0  ;;  %v313_v59 = vpop.xlane.xlu1 %312  ;;  %v17525_v41 = vld [vmem:[#allocation5_spill] sm:$0xff]  ;;  %v17528_v34 = vld [vmem:[#allocation6_spill] sm:$0xff]  ;;  %v663_v29 = vsel %vm151_vm0, %v515_v10, 0.0 }
 0x109   :  { %v14381_v44 = vsub.f32 %v17525_v41, %v389_v14  ;;  %v398_v6 = vmul.f32 0.03125, %v313_v59  ;;  %v14393_v51 = vsub.f32 %v17528_v34, %v391_v32  ;;  %v395_v59 = vmul.f32 0.03125, %v14320_v37  ;;  %v17531_v32 = vld [vmem:[#allocation8_spill] sm:$0xff] }
 0x10a   :  { %v397_v37 = vmul.f32 0.03125, %v310_v18  ;;  %v17535_v18 = vld [vmem:[#allocation12_spill] sm:$0xff] }
 0x10b   :  { %v517_v14 = vmul.f32 %v14381_v44, %v14381_v44 }
 0x10c   :  { %667 = vadd.xlane.f32.xlu1 %v666_v28  ;;  %652 = vadd.xlane.f32.xlu0 %v651_v36  ;;  %v14387_v36 = vsub.f32 %v17526_v61, %v396_v22  ;;  %v522_v28 = vmul.f32 %v14376_v58, %v14376_v58  ;;  %v14399_v22 = vsub.f32 %v17529_v11, %v398_v6 }
 0x10d   :  { %v669_v41 = vsel %vm151_vm0, %v517_v14, 0.0  ;;  %v316_v14 = vpop.xlane.xlu1 %315 }
 0x10e   :  { %17527 = vst [vmem:[#allocation5_spill] sm:$0xff] %v14387_v36  ;;  %17530 = vst [vmem:[#allocation9_spill] sm:$0xff] %v14399_v22  ;;  %v524_v17 = vmul.f32 %v14387_v36, %v14387_v36  ;;  %v526_v61 = vmul.f32 %v14399_v22, %v14399_v22 }
 0x110   :  { %673 = vadd.xlane.f32.xlu1 %v672_v42  ;;  %658 = vadd.xlane.f32.xlu0 %v657_v35  ;;  %v393_v35 = vmul.f32 0.03125, %v298_v50  ;;  %v684_v42 = vsel %vm151_vm0, %v522_v28, 0.0  ;;  %v690_v10 = vsel %vm151_vm0, %v524_v17, 0.0  ;;  %v519_v50 = vmul.f32 %v14393_v51, %v14393_v51 }
 0x111   :  { %v696_v34 = vsel %vm151_vm0, %v526_v61, 0.0  ;;  %v399_v17 = vmul.f32 0.03125, %v316_v14 }
 0x112   :  { %v675_v28 = vsel %vm151_vm0, %v519_v50, 0.0 }
 0x114   :  { %679 = vadd.xlane.f32.xlu1 %v678_v55  ;;  %1621 = vadd.xlane.f32.xlu0 %v1620_v43  ;;  %v14407_v43 = vsub.f32 %v17531_v32, %v393_v35  ;;  %v17532_v55 = vld [vmem:[#allocation7_spill] sm:$0xff]  ;;  %v17533_v35 = vld [vmem:[#allocation10_spill] sm:$0xff] }
 0x115   :  { %v14415_v6 = vsub.f32 %v17532_v55, %v395_v59  ;;  %v14422_v11 = vsub.f32 %v17533_v35, %v397_v37 }
 0x117   :  { %17534 = vst [vmem:[#allocation6_spill] sm:$0xff] %v14422_v11  ;;  %v523_v59 = vmul.f32 %v14415_v6, %v14415_v6  ;;  %v525_v50 = vmul.f32 %v14422_v11, %v14422_v11 }
 0x118   :  { %664 = vadd.xlane.f32.xlu0 %v663_v29  ;;  %685 = vadd.xlane.f32.xlu1 %v684_v42  ;;  %v521_v29 = vmul.f32 %v14407_v43, %v14407_v43 }
 0x11a   :  { %v681_v42 = vsel %vm151_vm0, %v521_v29, 0.0 }
 0x11c   :  { %670 = vadd.xlane.f32.xlu0 %v669_v41  ;;  %691 = vadd.xlane.f32.xlu1 %v690_v10  ;;  %v14428_v41 = vsub.f32 %v17535_v18, %v399_v17  ;;  %v687_v10 = vsel %vm151_vm0, %v523_v59, 0.0 }
 0x11e   :  { %17536 = vst [vmem:[#allocation11_spill] sm:$0xff] %v14428_v41  ;;  %v527_v29 = vmul.f32 %v14428_v41, %v14428_v41 }
 0x120   :  { %676 = vadd.xlane.f32.xlu0 %v675_v28  ;;  %697 = vadd.xlane.f32.xlu1 %v696_v34  ;;  %v693_v34 = vsel %vm151_vm0, %v525_v50, 0.0  ;;  %v699_v22 = vsel %vm151_vm0, %v527_v29, 0.0 }
 0x124   :  { %682 = vadd.xlane.f32.xlu0 %v681_v42 }
 0x125   :  { %v539_v32 = vpop.xlane.xlu0 %538 }
 0x126   :  { %v729_v61 = vmul.f32 0.03125, %v539_v32 }
 0x128   :  { %v793_v55 = vadd.f32 1e-05, %v729_v61  ;;  %688 = vadd.xlane.f32.xlu0 %v687_v10 }
 0x129   :  { %v542_v37 = vpop.xlane.xlu1 %541  ;;  %v545_v28 = vpop.xlane.xlu0 %544 }
 0x12a   :  { %12913 = vrsqrt.f32 %v793_v55  ;;  %v730_v14 = vmul.f32 0.03125, %v542_v37  ;;  %v731_v35 = vmul.f32 0.03125, %v545_v28 }
 0x12c   :  { %v794_v42 = vadd.f32 1e-05, %v730_v14  ;;  %v795_v17 = vadd.f32 1e-05, %v731_v35  ;;  %694 = vadd.xlane.f32.xlu0 %v693_v34 }
 0x12d   :  { %v548_v59 = vpop.xlane.xlu1 %547  ;;  %v551_v18 = vpop.xlane.xlu0 %550 }
 0x12e   :  { %12915 = vrsqrt.f32 %v794_v42  ;;  %v732_v32 = vmul.f32 0.03125, %v548_v59  ;;  %v733_v10 = vmul.f32 0.03125, %v551_v18 }
 0x12f   :  { %12917 = vrsqrt.f32 %v795_v17 }
 0x130   :  { %v796_v61 = vadd.f32 1e-05, %v732_v32  ;;  %v797_v11 = vadd.f32 1e-05, %v733_v10  ;;  %700 = vadd.xlane.f32.xlu0 %v699_v22 }
 0x131   :  { %v554_v50 = vpop.xlane.xlu1 %553  ;;  %v557_v36 = vpop.xlane.xlu0 %556 }
 0x132   :  { %12919 = vrsqrt.f32 %v796_v61  ;;  %v734_v55 = vmul.f32 0.03125, %v554_v50  ;;  %v735_v37 = vmul.f32 0.03125, %v557_v36  ;;  %v17537_v61 = vld [vmem:[#allocation13_spill] sm:$0xff] }
 0x133   :  { %12921 = vrsqrt.f32 %v797_v11 }
 0x134   :  { %v12914_v28 = vpop.eup %12913  ;;  %v798_v14 = vadd.f32 1e-05, %v734_v55  ;;  %v799_v34 = vadd.f32 1e-05, %v735_v37 }
 0x135   :  { %v560_v35 = vpop.xlane.xlu1 %559  ;;  %v563_v41 = vpop.xlane.xlu0 %562  ;;  %v921_v29 = vmul.f32 %v12914_v28, %v13931_v39 }
 0x136   :  { %12923 = vrsqrt.f32 %v798_v14  ;;  %v736_v42 = vmul.f32 0.03125, %v560_v35  ;;  %v737_v59 = vmul.f32 0.03125, %v563_v41 }
 0x137   :  { %12925 = vrsqrt.f32 %v799_v34  ;;  %10616 = vmatprep.mubr.msk.f32.mxu0 %vm151_vm0, %v921_v29 }
 0x138   :  { %v12916_v22 = vpop.eup %12915  ;;  %v800_v17 = vadd.f32 1e-05, %v736_v42  ;;  %v801_v18 = vadd.f32 1e-05, %v737_v59 }
 0x139   :  { %v12918_v32 = vpop.eup %12917  ;;  %v566_v10 = vpop.xlane.xlu1 %565  ;;  %v922_v36 = vmul.f32 %v12916_v22, %v13941_v46 }
 0x13a   :  { %12927 = vrsqrt.f32 %v800_v17  ;;  %v738_v11 = vmul.f32 0.03125, %v566_v10  ;;  %v923_v50 = vmul.f32 %v12918_v32, %v17537_v61 }
 0x13b   :  { %12929 = vrsqrt.f32 %v801_v18  ;;  %10617 = vmatmul.mubr.msk.f32.vlgmr.msra.gmra.mrb[0].mxu0 %vm151_vm0, %v922_v36 }
 0x13c   :  { %v12920_v39 = vpop.eup %12919  ;;  %v802_v55 = vadd.f32 1e-05, %v738_v11  ;;  %10619 = vmatprep.mubr.msk.f32.mxu0 %vm151_vm0, %v923_v50 }
 0x13d   :  { %v12922_v41 = vpop.eup %12921  ;;  %v1616_v37 = vpop.xlane.xlu1 %1615  ;;  %v924_v14 = vmul.f32 %v12920_v39, %v13944_v62 }
 0x13e   :  { %v569_v28 = vpop.xlane.xlu0 %568  ;;  %12931 = vrsqrt.f32 %v802_v55  ;;  %v1638_v34 = vmul.f32 0.03125, %v1616_v37  ;;  %v925_v46 = vmul.f32 %v12922_v41, %v13953_v2 }
 0x13f   :  { %v739_v35 = vmul.f32 0.03125, %v569_v28  ;;  %10620 = vmatmul.mubr.msk.f32.gmra.mrb[2].mxu0 %vm151_vm0, %v924_v14  ;;  %v17538_v28 = vld [vmem:[#allocation14_spill] sm:$0xff] }
 0x140   :  { %v12924_v29 = vpop.eup %12923  ;;  %v1646_v42 = vadd.f32 1e-05, %v1638_v34  ;;  %10622 = vmatprep.mubr.msk.f32.mxu0 %vm151_vm0, %v925_v46 }
 0x141   :  { %v803_v59 = vadd.f32 1e-05, %v739_v35  ;;  %v12926_v22 = vpop.eup %12925  ;;  %v1619_v17 = vpop.xlane.xlu1 %1618  ;;  %v926_v32 = vmul.f32 %v12924_v29, %v13956_v5 }
 0x142   :  { %v572_v18 = vpop.xlane.xlu0 %571  ;;  %12933 = vrsqrt.f32 %v1646_v42  ;;  %v1639_v10 = vmul.f32 0.03125, %v1619_v17  ;;  %v927_v36 = vmul.f32 %v12926_v22, %v13965_v23 }
 0x143   :  { %v740_v62 = vmul.f32 0.03125, %v572_v18  ;;  %12935 = vrsqrt.f32 %v803_v59  ;;  %10623 = vmatmul.mubr.msk.f32.gmra.mrb[4].mxu0 %vm151_vm0, %v926_v32 }
 0x144   :  { %v12928_v2 = vpop.eup %12927  ;;  %v1647_v11 = vadd.f32 1e-05, %v1639_v10  ;;  %10625 = vmatprep.mubr.msk.f32.mxu0 %vm151_vm0, %v927_v36 }
 0x145   :  { %v804_v61 = vadd.f32 1e-05, %v740_v62  ;;  %v12930_v50 = vpop.eup %12929  ;;  %v319_v39 = vpop.xlane.xlu1 %318  ;;  %v928_v41 = vmul.f32 %v12928_v2, %v13968_v9 }
 0x146   :  { %v575_v55 = vpop.xlane.xlu0 %574  ;;  %12937 = vrsqrt.f32 %v1647_v11  ;;  %v400_v5 = vmul.f32 0.03125, %v319_v39  ;;  %v929_v14 = vmul.f32 %v12930_v50, %v17538_v28  ;;  %v17539_v28 = vld [vmem:[#allocation15_spill] sm:$0xff] }
 0x147   :  { %v741_v37 = vmul.f32 0.03125, %v575_v55  ;;  %12939 = vrsqrt.f32 %v804_v61  ;;  %10626 = vmatmul.mubr.msk.f32.gmra.mrb[6].mxu0 %vm151_vm0, %v928_v41 }
 0x148   :  { %v12932_v23 = vpop.eup %12931  ;;  %v14455_v34 = vsub.f32 %v14030_v30, %v400_v5  ;;  %10628 = vmatprep.mubr.msk.f32.mxu0 %vm151_vm0, %v929_v14 }
 0x149   :  { %v805_v35 = vadd.f32 1e-05, %v741_v37  ;;  %v322_v46 = vpop.xlane.xlu1 %321  ;;  %v930_v42 = vmul.f32 %v12932_v23, %v13980_v13 }
 0x14a   :  { %v578_v29 = vpop.xlane.xlu0 %577  ;;  %v401_v9 = vmul.f32 0.03125, %v322_v46  ;;  %v528_v22 = vmul.f32 %v14455_v34, %v14455_v34 }
 0x14b   :  { %12941 = vrsqrt.f32 %v805_v35  ;;  %v742_v59 = vmul.f32 0.03125, %v578_v29  ;;  %10629 = vmatmul.mubr.msk.f32.gmra.mrb[8].mxu0 %vm151_vm0, %v930_v42  ;;  %v17540_v35 = vld [vmem:[#allocation16_spill] sm:$0xff]  ;;  %v17541_v42 = vld [vmem:[#allocation23_spill] sm:$0xff] }
 0x14c   :  { %v12934_v17 = vpop.eup %12933  ;;  %v14463_v18 = vsub.f32 %v14042_v20, %v401_v9  ;;  %v702_v32 = vsel %vm151_vm0, %v528_v22, 0.0 }
 0x14d   :  { %v806_v30 = vadd.f32 1e-05, %v742_v59  ;;  %v12936_v10 = vpop.eup %12935  ;;  %v325_v62 = vpop.xlane.xlu1 %324  ;;  %703 = vadd.xlane.f32.xlu1 %v702_v32  ;;  %v1662_v13 = vmul.f32 %v12934_v17, %v13989_v16  ;;  %v17542_v32 = vld [vmem:[#allocation17_spill] sm:$0xff] }
 0x14e   :  { %v581_v36 = vpop.xlane.xlu0 %580  ;;  %v402_v2 = vmul.f32 0.03125, %v325_v62  ;;  %v931_v61 = vmul.f32 %v12936_v10, %v13997_v0  ;;  %v529_v20 = vmul.f32 %v14463_v18, %v14463_v18 }
 0x14f   :  { %12943 = vrsqrt.f32 %v806_v30  ;;  %v743_v11 = vmul.f32 0.03125, %v581_v36  ;;  %10720 = vmatprep.mubr.msk.f32.mxu1 %vm151_vm0, %v1662_v13 }
 0x150   :  { %v12938_v50 = vpop.eup %12937  ;;  %v14472_v39 = vsub.f32 %v14061_v1, %v402_v2  ;;  %10631 = vmatprep.mubr.msk.f32.mxu0 %vm151_vm0, %v931_v61  ;;  %v705_v16 = vsel %vm151_vm0, %v529_v20, 0.0 }
 0x151   :  { %v807_v55 = vadd.f32 1e-05, %v743_v11  ;;  %v12940_v41 = vpop.eup %12939  ;;  %v1583_v5 = vpop.xlane.xlu1 %1582  ;;  %v1663_v14 = vmul.f32 %v12938_v50, %v17539_v28  ;;  %706 = vadd.xlane.f32.xlu0 %v705_v16  ;;  %v17543_v50 = vld [vmem:[#allocation18_spill] sm:$0xff] }
 0x152   :  { %v584_v37 = vpop.xlane.xlu0 %583  ;;  %v1595_v0 = vmul.f32 0.03125, %v1583_v5  ;;  %v932_v46 = vmul.f32 %v12940_v41, %v17540_v35  ;;  %v530_v1 = vmul.f32 %v14472_v39, %v14472_v39 }
 0x153   :  { %12945 = vrsqrt.f32 %v807_v55  ;;  %v744_v23 = vmul.f32 0.03125, %v584_v37  ;;  %10721 = vmatmul.mubr.msk.f32.vlgmr.msra.gmra.mrb[0].mxu1 %vm151_vm0, %v1663_v14 }
 0x154   :  { %v14482_v9 = vsub.f32 %v17541_v42, %v1595_v0  ;;  %10632 = vmatmul.mubr.msk.f32.gmra.mrb[10].mxu0 %vm151_vm0, %v932_v46  ;;  %v708_v17 = vsel %vm151_vm0, %v530_v1, 0.0  ;;  %v17545_v46 = vld [vmem:[#allocation25_spill] sm:$0xff] }
 0x155   :  { %v12942_v29 = vpop.eup %12941  ;;  %v808_v59 = vadd.f32 1e-05, %v744_v23  ;;  %v596_v22 = vpop.xlane.xlu1 %595  ;;  %709 = vadd.xlane.f32.xlu1 %v708_v17  ;;  %v17544_v23 = vld [vmem:[#allocation19_spill] sm:$0xff]  ;;  %v17546_v17 = vld [vmem:[#allocation28_spill] sm:$0xff] }
 0x156   :  { %v587_v30 = vpop.xlane.xlu0 %586  ;;  %v933_v10 = vmul.f32 %v12942_v29, %v17542_v32  ;;  %v1611_v36 = vmul.f32 %v14482_v9, %v14482_v9  ;;  %v748_v28 = vmul.f32 0.03125, %v596_v22  ;;  %v17547_v32 = vld [vmem:[#allocation29_spill] sm:$0xff] }
 0x157   :  { %12947 = vrsqrt.f32 %v808_v59  ;;  %v745_v62 = vmul.f32 0.03125, %v587_v30 }
 0x158   :  { %10634 = vmatprep.mubr.msk.f32.mxu0 %vm151_vm0, %v933_v10  ;;  %v1629_v11 = vsel %vm151_vm0, %v1611_v36, 0.0  ;;  %v812_v22 = vadd.f32 1e-05, %v748_v28 }
 0x159   :  { %v12944_v13 = vpop.eup %12943  ;;  %v809_v2 = vadd.f32 1e-05, %v745_v62  ;;  %v328_v61 = vpop.xlane.xlu1 %327  ;;  %1630 = vadd.xlane.f32.xlu1 %v1629_v11 }
 0x15a   :  { %v590_v20 = vpop.xlane.xlu0 %589  ;;  %v934_v55 = vmul.f32 %v12944_v13, %v17543_v50  ;;  %v403_v41 = vmul.f32 0.03125, %v328_v61  ;;  %v17548_v13 = vld [vmem:[#allocation20_spill] sm:$0xff] }
 0x15b   :  { %v746_v5 = vmul.f32 0.03125, %v590_v20  ;;  %12949 = vrsqrt.f32 %v809_v2 }
 0x15c   :  { %10635 = vmatmul.mubr.msk.f32.gmra.mrb[12].mxu0 %vm151_vm0, %v934_v55  ;;  %v14495_v1 = vsub.f32 %v17545_v46, %v403_v41 }
 0x15d   :  { %v12946_v16 = vpop.eup %12945  ;;  %v810_v37 = vadd.f32 1e-05, %v746_v5  ;;  %v331_v14 = vpop.xlane.xlu1 %330 }
 0x15e   :  { %v1580_v0 = vpop.xlane.xlu0 %1579  ;;  %v935_v35 = vmul.f32 %v12946_v16, %v17544_v23  ;;  %v404_v29 = vmul.f32 0.03125, %v331_v14  ;;  %v531_v50 = vmul.f32 %v14495_v1, %v14495_v1  ;;  %v17549_v23 = vld [vmem:[#allocation22_spill] sm:$0xff] }
 0x15f   :  { %12951 = vrsqrt.f32 %v810_v37  ;;  %v1594_v42 = vmul.f32 0.03125, %v1580_v0 }
 0x160   :  { %10637 = vmatprep.mubr.msk.f32.mxu0 %vm151_vm0, %v935_v35  ;;  %v14499_v30 = vsub.f32 %v17546_v17, %v404_v29  ;;  %12953 = vrsqrt.f32 %v812_v22  ;;  %v711_v46 = vsel %vm151_vm0, %v531_v50, 0.0 }
 0x161   :  { %v12948_v59 = vpop.eup %12947  ;;  %v14502_v10 = vsub.f32 %v17547_v32, %v1594_v42  ;;  %v608_v62 = vpop.xlane.xlu1 %607 }
 0x162   :  { %v593_v36 = vpop.xlane.xlu0 %592  ;;  %v936_v2 = vmul.f32 %v12948_v59, %v17548_v13  ;;  %v532_v61 = vmul.f32 %v14499_v30, %v14499_v30  ;;  %v752_v17 = vmul.f32 0.03125, %v608_v62 }
 0x163   :  { %v747_v11 = vmul.f32 0.03125, %v593_v36  ;;  %v1610_v20 = vmul.f32 %v14502_v10, %v14502_v10  ;;  %v17550_v36 = vld [vmem:[#allocation24_spill] sm:$0xff] }
 0x164   :  { %10638 = vmatmul.mubr.msk.f32.gmra.mrb[14].mxu0 %vm151_vm0, %v936_v2  ;;  %v714_v41 = vsel %vm151_vm0, %v532_v61, 0.0 }
 0x165   :  { %v811_v55 = vadd.f32 1e-05, %v747_v11  ;;  %v1626_v5 = vsel %vm151_vm0, %v1610_v20, 0.0  ;;  %v12950_v16 = vpop.eup %12949  ;;  %v334_v37 = vpop.xlane.xlu1 %333  ;;  %715 = vadd.xlane.f32.xlu1 %v714_v41  ;;  %v816_v41 = vadd.f32 1e-05, %v752_v17  ;;  %v17552_v17 = vld [vmem:[#allocation21_spill] sm:$0xff] }
 0x166   :  { %1627 = vadd.xlane.f32.xlu0 %v1626_v5  ;;  %v599_v28 = vpop.xlane.xlu0 %598  ;;  %v405_v14 = vmul.f32 0.03125, %v334_v37  ;;  %v937_v35 = vmul.f32 %v12950_v16, %v17549_v23 }
 0x167   :  { %v749_v0 = vmul.f32 0.03125, %v599_v28  ;;  %12955 = vrsqrt.f32 %v811_v55 }
 0x168   :  { %v14517_v42 = vsub.f32 %v14160_v38, %v405_v14  ;;  %10640 = vmatprep.mubr.msk.f32.mxu0 %vm151_vm0, %v937_v35 }
 0x169   :  { %v12952_v29 = vpop.eup %12951  ;;  %v813_v59 = vadd.f32 1e-05, %v749_v0  ;;  %v337_v32 = vpop.xlane.xlu1 %336 }
 0x16a   :  { %712 = vadd.xlane.f32.xlu0 %v711_v46  ;;  %v602_v22 = vpop.xlane.xlu0 %601  ;;  %v938_v13 = vmul.f32 %v12952_v29, %v17550_v36  ;;  %v406_v2 = vmul.f32 0.03125, %v337_v32  ;;  %v533_v61 = vmul.f32 %v14517_v42, %v14517_v42  ;;  %v12954_v37 = vpop.eup %12953  ;;  %v17551_v29 = vld [vmem:[#allocation26_spill] sm:$0xff] }
 0x16b   :  { %12957 = vrsqrt.f32 %v813_v59  ;;  %v750_v11 = vmul.f32 0.03125, %v602_v22  ;;  %v940_v32 = vmul.f32 %v12954_v37, %v17552_v17 }
 0x16c   :  { %10641 = vmatmul.mubr.msk.f32.gmra.mrb[16].mxu0 %vm151_vm0, %v938_v13  ;;  %v14525_v38 = vsub.f32 %v14180_v21, %v406_v2  ;;  %v717_v50 = vsel %vm151_vm0, %v533_v61, 0.0 }
 0x16d   :  { %v814_v20 = vadd.f32 1e-05, %v750_v11  ;;  %v620_v62 = vpop.xlane.xlu1 %619 }
 0x16e   :  { %718 = vadd.xlane.f32.xlu0 %v717_v50  ;;  %v605_v55 = vpop.xlane.xlu0 %604  ;;  %v534_v16 = vmul.f32 %v14525_v38, %v14525_v38  ;;  %v756_v2 = vmul.f32 0.03125, %v620_v62 }
 0x16f   :  { %12959 = vrsqrt.f32 %v814_v20  ;;  %v751_v5 = vmul.f32 0.03125, %v605_v55 }
 0x170   :  { %v720_v14 = vsel %vm151_vm0, %v534_v16, 0.0  ;;  %12961 = vrsqrt.f32 %v816_v41 }
 0x171   :  { %v815_v28 = vadd.f32 1e-05, %v751_v5  ;;  %v12956_v0 = vpop.eup %12955  ;;  %v340_v23 = vpop.xlane.xlu1 %339  ;;  %721 = vadd.xlane.f32.xlu1 %v720_v14  ;;  %v820_v14 = vadd.f32 1e-05, %v756_v2 }
 0x172   :  { %v611_v21 = vpop.xlane.xlu0 %610  ;;  %v407_v35 = vmul.f32 0.03125, %v340_v23  ;;  %v939_v59 = vmul.f32 %v12956_v0, %v17551_v29 }
 0x173   :  { %v753_v46 = vmul.f32 0.03125, %v611_v21  ;;  %12963 = vrsqrt.f32 %v815_v28 }
 0x174   :  { %v14534_v36 = vsub.f32 %v14204_v24, %v407_v35  ;;  %10643 = vmatprep.mubr.msk.f32.mxu0 %vm151_vm0, %v939_v59 }
 0x175   :  { %v12958_v22 = vpop.eup %12957  ;;  %v817_v13 = vadd.f32 1e-05, %v753_v46  ;;  %10644 = vmatmul.mubr.msk.f32.gmra.mrb[18].mxu0 %vm151_vm0, %v940_v32  ;;  %v343_v11 = vpop.xlane.xlu1 %342  ;;  %v17553_v32 = vld [vmem:[#allocation32_spill] sm:$0xff] }
 0x176   :  { %v614_v61 = vpop.xlane.xlu0 %613  ;;  %v941_v20 = vmul.f32 %v12958_v22, %v14136_v15  ;;  %v408_v50 = vmul.f32 0.03125, %v343_v11  ;;  %v535_v41 = vmul.f32 %v14534_v36, %v14534_v36  ;;  %v17554_v22 = vld [vmem:[#allocation27_spill] sm:$0xff] }
 0x177   :  { %12965 = vrsqrt.f32 %v817_v13  ;;  %v754_v55 = vmul.f32 0.03125, %v614_v61 }
 0x178   :  { %10646 = vmatprep.mubr.msk.f32.mxu0 %vm151_vm0, %v941_v20  ;;  %v14543_v5 = vsub.f32 %v14224_v57, %v408_v50  ;;  %v723_v62 = vsel %vm151_vm0, %v535_v41, 0.0 }
 0x179   :  { %v12960_v24 = vpop.eup %12959  ;;  %v818_v16 = vadd.f32 1e-05, %v754_v55  ;;  %v632_v37 = vpop.xlane.xlu1 %631  ;;  %724 = vadd.xlane.f32.xlu0 %v723_v62  ;;  %v17555_v55 = vld [vmem:[#allocation34_spill] sm:$0xff] }
 0x17a   :  { %v617_v28 = vpop.xlane.xlu0 %616  ;;  %v942_v15 = vmul.f32 %v12960_v24, %v14151_v45  ;;  %v536_v23 = vmul.f32 %v14543_v5, %v14543_v5  ;;  %v12962_v21 = vpop.eup %12961  ;;  %v760_v61 = vmul.f32 0.03125, %v632_v37  ;;  %v17556_v37 = vld [vmem:[#allocation35_spill] sm:$0xff] }
 0x17b   :  { %12967 = vrsqrt.f32 %v818_v16  ;;  %v755_v0 = vmul.f32 0.03125, %v617_v28  ;;  %v944_v13 = vmul.f32 %v12962_v21, %v17554_v22 }
 0x17c   :  { %10647 = vmatmul.mubr.msk.f32.gmra.mrb[20].mxu0 %vm151_vm0, %v942_v15  ;;  %v726_v57 = vsel %vm151_vm0, %v536_v23, 0.0  ;;  %12969 = vrsqrt.f32 %v820_v14  ;;  %v824_v14 = vadd.f32 1e-05, %v760_v61  ;;  %v17558_v61 = vld [vmem:[#allocation33_spill] sm:$0xff] }
 0x17d   :  { %v819_v35 = vadd.f32 1e-05, %v755_v0  ;;  %v12964_v46 = vpop.eup %12963  ;;  %v638_v29 = vpop.xlane.xlu1 %637  ;;  %727 = vadd.xlane.f32.xlu1 %v726_v57 }
 0x17e   :  { %v623_v59 = vpop.xlane.xlu0 %622  ;;  %v943_v45 = vmul.f32 %v12964_v46, %v17553_v32 }
 0x17f   :  { %v757_v17 = vmul.f32 0.03125, %v623_v59  ;;  %12971 = vrsqrt.f32 %v819_v35  ;;  %v762_v35 = vmul.f32 0.03125, %v638_v29 }
 0x180   :  { %10649 = vmatprep.mubr.msk.f32.mxu0 %vm151_vm0, %v943_v45 }
 0x181   :  { %v12966_v2 = vpop.eup %12965  ;;  %v821_v11 = vadd.f32 1e-05, %v757_v17  ;;  %10650 = vmatmul.mubr.msk.f32.gmra.mrb[22].mxu0 %vm151_vm0, %v944_v13  ;;  %v1589_v20 = vpop.xlane.xlu1 %1588  ;;  %v826_v13 = vadd.f32 1e-05, %v762_v35 }
 0x182   :  { %v626_v50 = vpop.xlane.xlu0 %625  ;;  %v945_v41 = vmul.f32 %v12966_v2, %v17555_v55  ;;  %v1597_v24 = vmul.f32 0.03125, %v1589_v20 }
 0x183   :  { %v758_v16 = vmul.f32 0.03125, %v626_v50  ;;  %12973 = vrsqrt.f32 %v821_v11  ;;  %v17557_v11 = vld [vmem:[#allocation36_spill] sm:$0xff] }
 0x184   :  { %10652 = vmatprep.mubr.msk.f32.mxu0 %vm151_vm0, %v945_v41  ;;  %v14558_v28 = vsub.f32 %v14267_v4, %v1597_v24 }
 0x185   :  { %v12968_v62 = vpop.eup %12967  ;;  %v822_v15 = vadd.f32 1e-05, %v758_v16  ;;  %v644_v0 = vpop.xlane.xlu1 %643 }
 0x186   :  { %v629_v23 = vpop.xlane.xlu0 %628  ;;  %v946_v21 = vmul.f32 %v12968_v62, %v17556_v37  ;;  %v1613_v46 = vmul.f32 %v14558_v28, %v14558_v28  ;;  %v12970_v59 = vpop.eup %12969  ;;  %v764_v16 = vmul.f32 0.03125, %v644_v0 }
 0x187   :  { %12975 = vrsqrt.f32 %v822_v15  ;;  %v759_v57 = vmul.f32 0.03125, %v629_v23  ;;  %v948_v20 = vmul.f32 %v12970_v59, %v17558_v61 }
 0x188   :  { %10653 = vmatmul.mubr.msk.f32.gmra.mrb[24].mxu0 %vm151_vm0, %v946_v21  ;;  %v1635_v32 = vsel %vm151_vm0, %v1613_v46, 0.0  ;;  %12977 = vrsqrt.f32 %v824_v14  ;;  %v828_v46 = vadd.f32 1e-05, %v764_v16 }
 0x189   :  { %v823_v17 = vadd.f32 1e-05, %v759_v57  ;;  %v12972_v4 = vpop.eup %12971  ;;  %v650_v45 = vpop.xlane.xlu1 %649  ;;  %1636 = vadd.xlane.f32.xlu1 %v1635_v32 }
 0x18a   :  { %v635_v22 = vpop.xlane.xlu0 %634  ;;  %v947_v29 = vmul.f32 %v12972_v4, %v17557_v11  ;;  %v766_v37 = vmul.f32 0.03125, %v650_v45 }
 0x18b   :  { %v761_v2 = vmul.f32 0.03125, %v635_v22  ;;  %12979 = vrsqrt.f32 %v823_v17 }
 0x18c   :  { %10655 = vmatprep.mubr.msk.f32.mxu0 %vm151_vm0, %v947_v29  ;;  %12981 = vrsqrt.f32 %v826_v13  ;;  %v830_v45 = vadd.f32 1e-05, %v766_v37 }
 0x18d   :  { %v825_v50 = vadd.f32 1e-05, %v761_v2  ;;  %v12974_v55 = vpop.eup %12973  ;;  %10656 = vmatmul.mubr.msk.f32.gmra.mrb[26].mxu0 %vm151_vm0, %v948_v20  ;;  %v656_v41 = vpop.xlane.xlu1 %655 }
 0x18e   :  { %v1586_v24 = vpop.xlane.xlu0 %1585  ;;  %v949_v15 = vmul.f32 %v12974_v55, %v14234_v8  ;;  %v768_v13 = vmul.f32 0.03125, %v656_v41 }
 0x18f   :  { %v1596_v62 = vmul.f32 0.03125, %v1586_v24  ;;  %12983 = vrsqrt.f32 %v825_v50 }
 0x190   :  { %10658 = vmatprep.mubr.msk.f32.mxu0 %vm151_vm0, %v949_v15  ;;  %12985 = vrsqrt.f32 %v828_v46  ;;  %v832_v16 = vadd.f32 1e-05, %v768_v13 }
 0x191   :  { %v12976_v14 = vpop.eup %12975  ;;  %v14571_v23 = vsub.f32 %v14310_v19, %v1596_v62  ;;  %v662_v21 = vpop.xlane.xlu1 %661  ;;  %v17380_v19 = vmov 0.0|0.0  }
 0x192   :  { %v641_v35 = vpop.xlane.xlu0 %640  ;;  %v950_v57 = vmul.f32 %v12976_v14, %v14243_v56  ;;  %v12978_v8 = vpop.eup %12977  ;;  %11928 = vmatprep.subr.bf16.mxu1 %v17380_v19  ;;  %11976 = vmatprep.subr.bf16.mxu0 %v17380_v19  ;;  %v770_v62 = vmul.f32 0.03125, %v662_v21 }
 0x193   :  { %v763_v59 = vmul.f32 0.03125, %v641_v35  ;;  %v1612_v0 = vmul.f32 %v14571_v23, %v14571_v23  ;;  %v952_v29 = vmul.f32 %v12978_v8, %v14218_v48 }
 0x194   :  { %10659 = vmatmul.mubr.msk.f32.gmra.mrb[28].mxu0 %vm151_vm0, %v950_v57  ;;  %v834_v35 = vadd.f32 1e-05, %v770_v62 }
 0x195   :  { %v827_v17 = vadd.f32 1e-05, %v763_v59  ;;  %v1632_v32 = vsel %vm151_vm0, %v1612_v0, 0.0  ;;  %v12980_v4 = vpop.eup %12979  ;;  %v1625_v22 = vpop.xlane.xlu1 %1624 }
 0x196   :  { %1633 = vadd.xlane.f32.xlu0 %v1632_v32  ;;  %v647_v56 = vpop.xlane.xlu0 %646  ;;  %v951_v11 = vmul.f32 %v12980_v4, %v14255_v60  ;;  %v12982_v61 = vpop.eup %12981  ;;  %v1641_v57 = vmul.f32 0.03125, %v1625_v22 }
 0x197   :  { %v765_v2 = vmul.f32 0.03125, %v647_v56  ;;  %12987 = vrsqrt.f32 %v827_v17  ;;  %v954_v60 = vmul.f32 %v12982_v61, %v14237_v47  ;;  %v17559_v56 = vld [vmem:[#allocation37_spill] sm:$0xff] }
 0x198   :  { %10661 = vmatprep.mubr.msk.f32.mxu0 %vm151_vm0, %v951_v11  ;;  %12989 = vrsqrt.f32 %v830_v45  ;;  %v1649_v47 = vadd.f32 1e-05, %v1641_v57 }
 0x199   :  { %v829_v20 = vadd.f32 1e-05, %v765_v2  ;;  %v12984_v50 = vpop.eup %12983  ;;  %10662 = vmatmul.mubr.msk.f32.gmra.mrb[30].mxu0 %vm151_vm0, %v952_v29  ;;  %v668_v55 = vpop.xlane.xlu1 %667 }
 0x19a   :  { %v653_v24 = vpop.xlane.xlu0 %652  ;;  %v953_v41 = vmul.f32 %v12984_v50, %v14272_v40  ;;  %v12986_v59 = vpop.eup %12985  ;;  %v772_v8 = vmul.f32 0.03125, %v668_v55 }
 0x19b   :  { %v767_v15 = vmul.f32 0.03125, %v653_v24  ;;  %12991 = vrsqrt.f32 %v829_v20  ;;  %v956_v13 = vmul.f32 %v12986_v59, %v17559_v56 }
 0x19c   :  { %10664 = vmatprep.mubr.msk.f32.mxu0 %vm151_vm0, %v953_v41  ;;  %12993 = vrsqrt.f32 %v832_v16  ;;  %v836_v11 = vadd.f32 1e-05, %v772_v8 }
 0x19d   :  { %v831_v14 = vadd.f32 1e-05, %v767_v15  ;;  %10665 = vmatmul.mubr.msk.f32.gmra.mrb[32].mxu0 %vm151_vm0, %v954_v60  ;;  %v674_v48 = vpop.xlane.xlu1 %673 }
 0x19e   :  { %v659_v37 = vpop.xlane.xlu0 %658  ;;  %v774_v61 = vmul.f32 0.03125, %v674_v48 }
 0x19f   :  { %v769_v46 = vmul.f32 0.03125, %v659_v37  ;;  %12995 = vrsqrt.f32 %v831_v14 }
 0x1a0   :  { %12997 = vrsqrt.f32 %v834_v35  ;;  %v838_v41 = vadd.f32 1e-05, %v774_v61 }
 0x1a1   :  { %v833_v21 = vadd.f32 1e-05, %v769_v46  ;;  %v12988_v0 = vpop.eup %12987  ;;  %v680_v40 = vpop.xlane.xlu1 %679 }
 0x1a2   :  { %v1622_v17 = vpop.xlane.xlu0 %1621  ;;  %v955_v4 = vmul.f32 %v12988_v0, %v14297_v49  ;;  %v12990_v45 = vpop.eup %12989  ;;  %v776_v60 = vmul.f32 0.03125, %v680_v40 }
 0x1a3   :  { %v1640_v32 = vmul.f32 0.03125, %v1622_v17  ;;  %12999 = vrsqrt.f32 %v833_v21  ;;  %v958_v49 = vmul.f32 %v12990_v45, %v14279_v12 }
 0x1a4   :  { %10667 = vmatprep.mubr.msk.f32.mxu0 %vm151_vm0, %v955_v4  ;;  %13001 = vrsqrt.f32 %v1649_v47  ;;  %v840_v21 = vadd.f32 1e-05, %v776_v60 }
 0x1a5   :  { %v1648_v2 = vadd.f32 1e-05, %v1640_v32  ;;  %v12992_v22 = vpop.eup %12991  ;;  %10668 = vmatmul.mubr.msk.f32.gmra.mrb[34].mxu0 %vm151_vm0, %v956_v13  ;;  %v686_v20 = vpop.xlane.xlu1 %685 }
 0x1a6   :  { %v665_v29 = vpop.xlane.xlu0 %664  ;;  %v957_v55 = vmul.f32 %v12992_v22, %v14313_v31  ;;  %v12994_v24 = vpop.eup %12993  ;;  %v778_v46 = vmul.f32 0.03125, %v686_v20 }
 0x1a7   :  { %v771_v50 = vmul.f32 0.03125, %v665_v29  ;;  %13003 = vrsqrt.f32 %v1648_v2  ;;  %v960_v31 = vmul.f32 %v12994_v24, %v14291_v26 }
 0x1a8   :  { %10670 = vmatprep.mubr.msk.f32.mxu0 %vm151_vm0, %v957_v55  ;;  %13005 = vrsqrt.f32 %v836_v11  ;;  %v842_v47 = vadd.f32 1e-05, %v778_v46 }
 0x1a9   :  { %v835_v16 = vadd.f32 1e-05, %v771_v50  ;;  %v12996_v62 = vpop.eup %12995  ;;  %10671 = vmatmul.mubr.msk.f32.gmra.mrb[36].mxu0 %vm151_vm0, %v958_v49  ;;  %v692_v35 = vpop.xlane.xlu1 %691 }
 0x1aa   :  { %v671_v15 = vpop.xlane.xlu0 %670  ;;  %v959_v48 = vmul.f32 %v12996_v62, %v14329_v25  ;;  %v12998_v37 = vpop.eup %12997  ;;  %v780_v32 = vmul.f32 0.03125, %v692_v35 }
 0x1ab   :  { %v773_v14 = vmul.f32 0.03125, %v671_v15  ;;  %13007 = vrsqrt.f32 %v835_v16  ;;  %v962_v25 = vmul.f32 %v12998_v37, %v14302_v63 }
 0x1ac   :  { %10673 = vmatprep.mubr.msk.f32.mxu0 %vm151_vm0, %v959_v48  ;;  %13009 = vrsqrt.f32 %v838_v41  ;;  %v844_v11 = vadd.f32 1e-05, %v780_v32 }
 0x1ad   :  { %v837_v12 = vadd.f32 1e-05, %v773_v14  ;;  %v13000_v57 = vpop.eup %12999  ;;  %10674 = vmatmul.mubr.msk.f32.gmra.mrb[38].mxu0 %vm151_vm0, %v960_v31  ;;  %v698_v45 = vpop.xlane.xlu1 %697 }
 0x1ae   :  { %v677_v59 = vpop.xlane.xlu0 %676  ;;  %v961_v8 = vmul.f32 %v13000_v57, %v14342_v54  ;;  %v13002_v40 = vpop.eup %13001  ;;  %v782_v29 = vmul.f32 0.03125, %v698_v45 }
 0x1af   :  { %v775_v0 = vmul.f32 0.03125, %v677_v59  ;;  %13011 = vrsqrt.f32 %v837_v12  ;;  %v1665_v54 = vmul.f32 %v13002_v40, %v14323_v52  ;;  %v17562_v40 = vld [vmem:[#allocation9_spill] sm:$0xff] }
 0x1b0   :  { %10676 = vmatprep.mubr.msk.f32.mxu0 %vm151_vm0, %v961_v8  ;;  %13013 = vrsqrt.f32 %v840_v21  ;;  %v846_v24 = vadd.f32 1e-05, %v782_v29  ;;  %v17560_v21 = vld [vmem:[#allocation5_spill] sm:$0xff] }
 0x1b1   :  { %v839_v26 = vadd.f32 1e-05, %v775_v0  ;;  %v13004_v17 = vpop.eup %13003  ;;  %10677 = vmatmul.mubr.msk.f32.gmra.mrb[40].mxu0 %vm151_vm0, %v962_v25 }
 0x1b2   :  { %v683_v4 = vpop.xlane.xlu0 %682  ;;  %v1664_v13 = vmul.f32 %v13004_v17, %v14355_v27  ;;  %v13006_v2 = vpop.eup %13005  ;;  %v17563_v17 = vld [vmem:[#allocation11_spill] sm:$0xff] }
 0x1b3   :  { %v777_v56 = vmul.f32 0.03125, %v683_v4  ;;  %13015 = vrsqrt.f32 %v839_v26  ;;  %v964_v27 = vmul.f32 %v13006_v2, %v14336_v53 }
 0x1b4   :  { %10723 = vmatprep.mubr.msk.f32.mxu1 %vm151_vm0, %v1664_v13  ;;  %13017 = vrsqrt.f32 %v842_v47 }
 0x1b5   :  { %v841_v63 = vadd.f32 1e-05, %v777_v56  ;;  %v13008_v22 = vpop.eup %13007  ;;  %10724 = vmatmul.mubr.msk.f32.gmra.mrb[2].mxu1 %vm151_vm0, %v1665_v54 }
 0x1b6   :  { %v689_v61 = vpop.xlane.xlu0 %688  ;;  %v963_v50 = vmul.f32 %v13008_v22, %v14368_v3  ;;  %v13010_v55 = vpop.eup %13009 }
 0x1b7   :  { %13019 = vrsqrt.f32 %v841_v63  ;;  %v779_v20 = vmul.f32 0.03125, %v689_v61  ;;  %v966_v41 = vmul.f32 %v13010_v55, %v14349_v33 }
 0x1b8   :  { %10679 = vmatprep.mubr.msk.f32.mxu0 %vm151_vm0, %v963_v50  ;;  %13021 = vrsqrt.f32 %v844_v11 }
 0x1b9   :  { %v843_v49 = vadd.f32 1e-05, %v779_v20  ;;  %v13012_v52 = vpop.eup %13011  ;;  %10680 = vmatmul.mubr.msk.f32.gmra.mrb[42].mxu0 %vm151_vm0, %v964_v27 }
 0x1ba   :  { %v695_v16 = vpop.xlane.xlu0 %694  ;;  %v965_v15 = vmul.f32 %v13012_v52, %v14381_v44  ;;  %v13014_v60 = vpop.eup %13013 }
 0x1bb   :  { %13023 = vrsqrt.f32 %v843_v49  ;;  %v781_v62 = vmul.f32 0.03125, %v695_v16  ;;  %v968_v35 = vmul.f32 %v13014_v60, %v14362_v7 }
 0x1bc   :  { %10682 = vmatprep.mubr.msk.f32.mxu0 %vm151_vm0, %v965_v15  ;;  %13025 = vrsqrt.f32 %v846_v24 }
 0x1bd   :  { %v845_v3 = vadd.f32 1e-05, %v781_v62  ;;  %v13016_v53 = vpop.eup %13015  ;;  %10683 = vmatmul.mubr.msk.f32.gmra.mrb[44].mxu0 %vm151_vm0, %v966_v41 }
 0x1be   :  { %v701_v14 = vpop.xlane.xlu0 %700  ;;  %v967_v31 = vmul.f32 %v13016_v53, %v14393_v51  ;;  %v13018_v37 = vpop.eup %13017 }
 0x1bf   :  { %13027 = vrsqrt.f32 %v845_v3  ;;  %v783_v48 = vmul.f32 0.03125, %v701_v14  ;;  %v970_v46 = vmul.f32 %v13018_v37, %v14376_v58 }
 0x1c0   :  { %10685 = vmatprep.mubr.msk.f32.mxu0 %vm151_vm0, %v967_v31 }
 0x1c1   :  { %v13020_v12 = vpop.eup %13019  ;;  %v847_v44 = vadd.f32 1e-05, %v783_v48  ;;  %10686 = vmatmul.mubr.msk.f32.gmra.mrb[46].mxu0 %vm151_vm0, %v968_v35 }
 0x1c2   :  { %v969_v33 = vmul.f32 %v13020_v12, %v14407_v43  ;;  %v13022_v57 = vpop.eup %13021  ;;  %v17561_v43 = vld [vmem:[#allocation6_spill] sm:$0xff] }
 0x1c3   :  { %13029 = vrsqrt.f32 %v847_v44  ;;  %v972_v0 = vmul.f32 %v13022_v57, %v17560_v21 }
 0x1c4   :  { %10688 = vmatprep.mubr.msk.f32.mxu0 %vm151_vm0, %v969_v33 }
 0x1c5   :  { %v13024_v59 = vpop.eup %13023  ;;  %10689 = vmatmul.mubr.msk.f32.gmra.mrb[48].mxu0 %vm151_vm0, %v970_v46 }
 0x1c6   :  { %v971_v51 = vmul.f32 %v13024_v59, %v14415_v6  ;;  %v13026_v7 = vpop.eup %13025 }
 0x1c7   :  { %v974_v26 = vmul.f32 %v13026_v7, %v17562_v40 }
 0x1c8   :  { %10691 = vmatprep.mubr.msk.f32.mxu0 %vm151_vm0, %v971_v51 }
 0x1c9   :  { %v13028_v8 = vpop.eup %13027  ;;  %10692 = vmatmul.mubr.msk.f32.gmra.mrb[50].mxu0 %vm151_vm0, %v972_v0 }
 0x1ca   :  { %v973_v25 = vmul.f32 %v13028_v8, %v17561_v43 }
 0x1cc   :  { %10694 = vmatprep.mubr.msk.f32.mxu0 %vm151_vm0, %v973_v25 }
 0x1cd   :  { %v13030_v58 = vpop.eup %13029  ;;  %10695 = vmatmul.mubr.msk.f32.gmra.mrb[52].mxu0 %vm151_vm0, %v974_v26 }
 0x1ce   :  { %v975_v47 = vmul.f32 %v13030_v58, %v17563_v17 }
 0x1d0   :  { %10697 = vmatprep.mubr.msk.f32.mxu0 %vm151_vm0, %v975_v47 }
 0x1da   :  { %v704_v6 = vpop.xlane.xlu1 %703 }
 0x1db   :  { %v784_v32 = vmul.f32 0.03125, %v704_v6 }
 0x1dd   :  { %v848_v4 = vadd.f32 1e-05, %v784_v32 }
 0x1de   :  { %v707_v45 = vpop.xlane.xlu0 %706 }
 0x1df   :  { %13031 = vrsqrt.f32 %v848_v4  ;;  %v785_v56 = vmul.f32 0.03125, %v707_v45 }
 0x1e1   :  { %v849_v13 = vadd.f32 1e-05, %v785_v56 }
 0x1e2   :  { %v710_v2 = vpop.xlane.xlu1 %709 }
 0x1e3   :  { %13033 = vrsqrt.f32 %v849_v13  ;;  %v786_v54 = vmul.f32 0.03125, %v710_v2 }
 0x1e5   :  { %v850_v63 = vadd.f32 1e-05, %v786_v54 }
 0x1e6   :  { %v1631_v29 = vpop.xlane.xlu1 %1630 }
 0x1e7   :  { %13035 = vrsqrt.f32 %v850_v63  ;;  %v1643_v20 = vmul.f32 0.03125, %v1631_v29 }
 0x1e9   :  { %v13032_v22 = vpop.eup %13031  ;;  %v1651_v52 = vadd.f32 1e-05, %v1643_v20 }
 0x1ea   :  { %v976_v11 = vmul.f32 %v13032_v22, %v14455_v34 }
 0x1eb   :  { %13037 = vrsqrt.f32 %v1651_v52 }
 0x1ec   :  { %10698 = vmatmul.mubr.msk.f32.gmra.mrb[54].mxu0 %vm151_vm0, %v976_v11 }
 0x1ed   :  { %v13034_v61 = vpop.eup %13033 }
 0x1ee   :  { %v977_v50 = vmul.f32 %v13034_v61, %v14463_v18 }
 0x1f0   :  { %10700 = vmatprep.mubr.msk.f32.mxu0 %vm151_vm0, %v977_v50 }
 0x1f1   :  { %v13036_v27 = vpop.eup %13035 }
 0x1f2   :  { %v716_v55 = vpop.xlane.xlu1 %715  ;;  %v978_v62 = vmul.f32 %v13036_v27, %v14472_v39 }
 0x1f3   :  { %v1628_v49 = vpop.xlane.xlu0 %1627  ;;  %v788_v24 = vmul.f32 0.03125, %v716_v55 }
 0x1f4   :  { %v1642_v16 = vmul.f32 0.03125, %v1628_v49  ;;  %10701 = vmatmul.mubr.msk.f32.gmra.mrb[56].mxu0 %vm151_vm0, %v978_v62 }
 0x1f5   :  { %v852_v34 = vadd.f32 1e-05, %v788_v24  ;;  %v13038_v37 = vpop.eup %13037 }
 0x1f6   :  { %v1650_v15 = vadd.f32 1e-05, %v1642_v16  ;;  %v1667_v33 = vmul.f32 %v13038_v37, %v14482_v9  ;;  %v17378_v16 = vmov 0.0  }
 0x1f7   :  { %v713_v41 = vpop.xlane.xlu0 %712 }
 0x1f8   :  { %v787_v60 = vmul.f32 0.03125, %v713_v41  ;;  %13039 = vrsqrt.f32 %v1650_v15 }
 0x1f9   :  { %13041 = vrsqrt.f32 %v852_v34 }
 0x1fa   :  { %v851_v3 = vadd.f32 1e-05, %v787_v60 }
 0x1fb   :  { %v719_v18 = vpop.xlane.xlu0 %718 }
 0x1fc   :  { %13043 = vrsqrt.f32 %v851_v3  ;;  %v789_v53 = vmul.f32 0.03125, %v719_v18 }
 0x1fe   :  { %v853_v14 = vadd.f32 1e-05, %v789_v53  ;;  %v722_v48 = vpop.xlane.xlu1 %721 }
 0x1ff   :  { %v790_v31 = vmul.f32 0.03125, %v722_v48 }
 0x200   :  { %13045 = vrsqrt.f32 %v853_v14 }
 0x201   :  { %v854_v35 = vadd.f32 1e-05, %v790_v31 }
 0x202   :  { %v13040_v39 = vpop.eup %13039 }
 0x203   :  { %13047 = vrsqrt.f32 %v854_v35  ;;  %v1666_v12 = vmul.f32 %v13040_v39, %v14502_v10  ;;  %v13042_v44 = vpop.eup %13041 }
 0x204   :  { %v980_v7 = vmul.f32 %v13042_v44, %v14499_v30 }
 0x205   :  { %10726 = vmatprep.mubr.msk.f32.mxu1 %vm151_vm0, %v1666_v12 }
 0x206   :  { %v13044_v57 = vpop.eup %13043  ;;  %10727 = vmatmul.mubr.msk.f32.gmra.mrb[4].mxu1 %vm151_vm0, %v1667_v33  ;;  %v725_v46 = vpop.xlane.xlu0 %724 }
 0x207   :  { %v979_v59 = vmul.f32 %v13044_v57, %v14495_v1  ;;  %v791_v51 = vmul.f32 0.03125, %v725_v46  ;;  %v14654_v1 = vld [vmem:[%s17332_s2] ss:$0 sm:$0xff] }
 0x209   :  { %10703 = vmatprep.mubr.msk.f32.mxu0 %vm151_vm0, %v979_v59  ;;  %v855_v0 = vadd.f32 1e-05, %v791_v51 }
 0x20a   :  { %v13046_v21 = vpop.eup %13045  ;;  %10704 = vmatmul.mubr.msk.f32.gmra.mrb[58].mxu0 %vm151_vm0, %v980_v7  ;;  %v728_v10 = vpop.xlane.xlu1 %727 }
 0x20b   :  { %v981_v9 = vmul.f32 %v13046_v21, %v14517_v42  ;;  %13049 = vrsqrt.f32 %v855_v0  ;;  %v792_v8 = vmul.f32 0.03125, %v728_v10 }
 0x20d   :  { %10706 = vmatprep.mubr.msk.f32.mxu0 %vm151_vm0, %v981_v9  ;;  %v13048_v43 = vpop.eup %13047  ;;  %v856_v30 = vadd.f32 1e-05, %v792_v8 }
 0x20e   :  { %v10618_v25 = vpop.f32.mrb[0].mxu0  ;;  %v982_v40 = vmul.f32 %v13048_v43, %v14525_v38 }
 0x20f   :  { %13051 = vrsqrt.f32 %v856_v30  ;;  %v1253_v26 = vadd.f32 %v10618_v25, %v14654_v1  ;;  %v1247_v58 = vpop.f32.mrb[1].mxu0 }
 0x210   :  { %v1248_v42 = vadd.f32 %v14654_v1, %v1247_v58  ;;  %10707 = vmatmul.mubr.msk.f32.gmra.mrb[60].mxu0 %vm151_vm0, %v982_v40  ;;  %v14727_v40 = vld [vmem:[%s17332_s2 + $0x1] ss:$0 sm:$0xff] }
 0x212   :  { %v12753_v47 = vpack.i.bf16 %v1253_v26, %v1248_v42  ;;  %v14666_v6 = vpack.c.bf16 %v1253_v26, %v1248_v42  ;;  %v10621_v32 = vpop.f32.mrb[2].mxu0 }
 0x213   :  { %v1263_v38 = vadd.f32 %v10621_v32, %v14654_v1  ;;  %v1257_v4 = vpop.f32.mrb[3].mxu0 }
 0x214   :  { %v1258_v45 = vadd.f32 %v14654_v1, %v1257_v4  ;;  %12754 = vrot.lane.b32.xlu1 %v12753_v47, %s13464_s9  ;;  %11931 = vmatpush3.bf16.xpose.msk.msra.mxu1 %vm14662_vm1, %v14666_v6 }
 0x215   :  { %v13050_v56 = vpop.eup %13049  ;;  %11932 = vmatprep.subr.bf16.mxu1 %v17380_v19 }
 0x216   :  { %v12758_v13 = vpack.i.bf16 %v1263_v38, %v1258_v45  ;;  %v14675_v2 = vpack.c.bf16 %v1263_v38, %v1258_v45  ;;  %v10624_v54 = vpop.f32.mrb[4].mxu0  ;;  %v983_v63 = vmul.f32 %v13050_v56, %v14534_v36  ;;  %v1637_v49 = vpop.xlane.xlu1 %1636 }
 0x217   :  { %v1273_v22 = vadd.f32 %v10624_v54, %v14654_v1  ;;  %v1267_v11 = vpop.f32.mrb[5].mxu0 }
 0x218   :  { %17566 = vst [vmem:[#allocation8_spill] sm:$0xff] %v14675_v2  ;;  %v1268_v29 = vadd.f32 %v14654_v1, %v1267_v11  ;;  %10709 = vmatprep.mubr.msk.f32.mxu0 %vm151_vm0, %v983_v63  ;;  %12759 = vrot.lane.b32.xlu0 %v12758_v13, %s13464_s9 }
 0x219   :  { %v13052_v61 = vpop.eup %13051 }
 0x21a   :  { %v12763_v20 = vpack.i.bf16 %v1273_v22, %v1268_v29  ;;  %v14682_v50 = vpack.c.bf16 %v1273_v22, %v1268_v29  ;;  %v10627_v27 = vpop.f32.mrb[6].mxu0  ;;  %v984_v55 = vmul.f32 %v13052_v61, %v14543_v5  ;;  %v1645_v5 = vmul.f32 0.03125, %v1637_v49 }
 0x21b   :  { %v1283_v52 = vadd.f32 %v10627_v27, %v14654_v1  ;;  %v1277_v36 = vpop.f32.mrb[7].mxu0 }
 0x21c   :  { %17567 = vst [vmem:[#allocation7_spill] sm:$0xff] %v14682_v50  ;;  %v1278_v24 = vadd.f32 %v14654_v1, %v1277_v36  ;;  %10710 = vmatmul.mubr.msk.f32.gmra.mrb[62].mxu0 %vm151_vm0, %v984_v55  ;;  %12764 = vrot.lane.b32.xlu0 %v12763_v20, %s13464_s9  ;;  %v1653_v18 = vadd.f32 1e-05, %v1645_v5 }
 0x21d   :  { %11935 = vmatpush3.bf16.xpose.msk.msra.mxu1 %vm14662_vm1, %v14675_v2  ;;  %10805 = vmatprep.mubr.msk.f32.mxu0 %vm13465_vm2, %v17378_v16 }
 0x21e   :  { %v12768_v62 = vpack.i.bf16 %v1283_v52, %v1278_v24  ;;  %v14694_v15 = vpack.c.bf16 %v1283_v52, %v1278_v24  ;;  %v10630_v34 = vpop.f32.mrb[8].mxu0  ;;  %11936 = vmatprep.subr.bf16.mxu1 %v17380_v19  ;;  %13053 = vrsqrt.f32 %v1653_v18 }
 0x21f   :  { %v1293_v41 = vadd.f32 %v10630_v34, %v14654_v1  ;;  %v1287_v60 = vpop.f32.mrb[9].mxu0 }
 0x220   :  { %17568 = vst [vmem:[#allocation10_spill] sm:$0xff] %v14694_v15  ;;  %v1288_v3 = vadd.f32 %v14654_v1, %v1287_v60  ;;  %12769 = vrot.lane.b32.xlu0 %v12768_v62, %s13464_s9 }
 0x222   :  { %v12773_v53 = vpack.i.bf16 %v1293_v41, %v1288_v3  ;;  %v14700_v14 = vpack.c.bf16 %v1293_v41, %v1288_v3 }
 0x223   :  { %v1634_v48 = vpop.xlane.xlu0 %1633 }
 0x224   :  { %v1644_v31 = vmul.f32 0.03125, %v1634_v48  ;;  %12774 = vrot.lane.b32.xlu0 %v12773_v53, %s13464_s9 }
 0x225   :  { %11939 = vmatpush3.bf16.xpose.msk.msra.mxu1 %vm14662_vm1, %v14682_v50 }
 0x226   :  { %v1652_v37 = vadd.f32 1e-05, %v1644_v31  ;;  %v14706_v35 = vpop.f32.mrb[0].mxu1  ;;  %11940 = vmatprep.subr.bf16.mxu1 %v17380_v19 }
 0x227   :  { %v10633_v39 = vpop.f32.mrb[10].mxu0  ;;  %v1760_v12 = vpop.f32.mrb[1].mxu1  ;;  %v1766_v60 = vadd.f32 %v14706_v35, %v14727_v40 }
 0x228   :  { %13055 = vrsqrt.f32 %v1652_v37  ;;  %v1303_v44 = vadd.f32 %v10633_v39, %v14654_v1  ;;  %v1297_v33 = vpop.f32.mrb[11].mxu0  ;;  %v13054_v0 = vpop.eup %13053  ;;  %v1761_v58 = vadd.f32 %v14727_v40, %v1760_v12 }
 0x229   :  { %v1298_v57 = vadd.f32 %v14654_v1, %v1297_v33  ;;  %v1669_v25 = vmul.f32 %v13054_v0, %v14558_v28 }
 0x22b   :  { %v12778_v46 = vpack.i.bf16 %v1303_v44, %v1298_v57  ;;  %v14711_v59 = vpack.c.bf16 %v1303_v44, %v1298_v57 }
 0x22d   :  { %12779 = vrot.lane.b32.xlu0 %v12778_v46, %s13464_s9  ;;  %11943 = vmatpush3.bf16.xpose.msk.msra.mxu1 %vm14662_vm1, %v14694_v15 }
 0x22e   :  { %11944 = vmatprep.subr.bf16.mxu1 %v17380_v19 }
 0x22f   :  { %v10636_v51 = vpop.f32.mrb[12].mxu0 }
 0x230   :  { %v1313_v7 = vadd.f32 %v10636_v51, %v14654_v1  ;;  %v1307_v21 = vpop.f32.mrb[13].mxu0 }
 0x231   :  { %v1308_v10 = vadd.f32 %v14654_v1, %v1307_v21 }
 0x232   :  { %v13056_v9 = vpop.eup %13055 }
 0x233   :  { %v12783_v8 = vpack.i.bf16 %v1313_v7, %v1308_v10  ;;  %v14720_v43 = vpack.c.bf16 %v1313_v7, %v1308_v10  ;;  %v1668_v30 = vmul.f32 %v13056_v9, %v14571_v23 }
 0x235   :  { %10729 = vmatprep.mubr.msk.f32.mxu1 %vm151_vm0, %v1668_v30  ;;  %12784 = vrot.lane.b32.xlu0 %v12783_v8, %s13464_s9 }
 0x236   :  { %10730 = vmatmul.mubr.msk.f32.gmra.mrb[6].mxu1 %vm151_vm0, %v1669_v25 }
 0x237   :  { %v10639_v26 = vpop.f32.mrb[14].mxu0  ;;  %10748 = vmatprep.mubr.msk.f32.mxu1 %vm13465_vm2, %v17378_v16 }
 0x238   :  { %v1323_v23 = vadd.f32 %v10639_v26, %v14654_v1  ;;  %v1317_v28 = vpop.f32.mrb[15].mxu0 }
 0x239   :  { %v1318_v42 = vadd.f32 %v14654_v1, %v1317_v28 }
 0x23a   :  { %10749 = vmatmul.mubr.msk.f32.vlgmr.msra.gmra.mrb[8].mxu1 %vm151_vm0, %v1761_v58 }
 0x23b   :  { %v12788_v47 = vpack.i.bf16 %v1323_v23, %v1318_v42  ;;  %v14738_v32 = vpack.c.bf16 %v1323_v23, %v1318_v42  ;;  %11947 = vmatpush3.bf16.xpose.msk.msra.mxu1 %vm14662_vm1, %v14700_v14  ;;  %10767 = vmatprep.mubr.msk.f32.mxu1 %vm13465_vm2, %v17378_v16 }
 0x23c   :  { %11948 = vmatprep.subr.bf16.mxu1 %v17380_v19 }
 0x23d   :  { %17569 = vst [vmem:[#allocation12_spill] sm:$0xff] %v14738_v32  ;;  %12789 = vrot.lane.b32.xlu0 %v12788_v47, %s13464_s9 }
 0x23f   :  { %v10642_v38 = vpop.f32.mrb[16].mxu0 }
 0x240   :  { %v1333_v4 = vadd.f32 %v10642_v38, %v14654_v1  ;;  %v1327_v45 = vpop.f32.mrb[17].mxu0 }
 0x241   :  { %v1328_v56 = vadd.f32 %v14654_v1, %v1327_v45 }
 0x243   :  { %v12793_v13 = vpack.i.bf16 %v1333_v4, %v1328_v56  ;;  %v14749_v54 = vpack.c.bf16 %v1333_v4, %v1328_v56  ;;  %11951 = vmatpush3.bf16.xpose.msk.msra.mxu1 %vm14662_vm1, %v14711_v59 }
 0x244   :  { %11952 = vmatprep.subr.bf16.mxu1 %v17380_v19 }
 0x245   :  { %17570 = vst [vmem:[#allocation13_spill] sm:$0xff] %v14749_v54  ;;  %12794 = vrot.lane.b32.xlu1 %v12793_v13, %s13464_s9 }
 0x248   :  { %v10645_v63 = vpop.f32.mrb[18].mxu0 }
 0x249   :  { %v1343_v22 = vadd.f32 %v10645_v63, %v14654_v1  ;;  %v1337_v11 = vpop.f32.mrb[19].mxu0 }
 0x24a   :  { %v1338_v29 = vadd.f32 %v14654_v1, %v1337_v11 }
 0x24b   :  { %11955 = vmatpush3.bf16.xpose.msk.msra.mxu1 %vm14662_vm1, %v14720_v43 }
 0x24c   :  { %11956 = vmatprep.subr.bf16.mxu1 %v17380_v19  ;;  %v12798_v61 = vpack.i.bf16 %v1343_v22, %v1338_v29  ;;  %v14762_v20 = vpack.c.bf16 %v1343_v22, %v1338_v29 }
 0x24e   :  { %17571 = vst [vmem:[#allocation14_spill] sm:$0xff] %v14762_v20  ;;  %12799 = vrot.lane.b32.xlu1 %v12798_v61, %s13464_s9 }
 0x24f   :  { %v10648_v27 = vpop.f32.mrb[20].mxu0 }
 0x250   :  { %v1353_v55 = vadd.f32 %v10648_v27, %v14654_v1  ;;  %v1347_v49 = vpop.f32.mrb[21].mxu0 }
 0x251   :  { %v1348_v52 = vadd.f32 %v14654_v1, %v1347_v49 }
 0x253   :  { %v12803_v36 = vpack.i.bf16 %v1353_v55, %v1348_v52  ;;  %v14767_v24 = vpack.c.bf16 %v1353_v55, %v1348_v52  ;;  %11959 = vmatpush3.bf16.xpose.msk.msra.mxu1 %vm14662_vm1, %v14738_v32 }
 0x254   :  { %11960 = vmatprep.subr.bf16.mxu1 %v17380_v19  ;;  %v10651_v5 = vpop.f32.mrb[22].mxu0 }
 0x255   :  { %17572 = vst [vmem:[#allocation15_spill] sm:$0xff] %v14767_v24  ;;  %12804 = vrot.lane.b32.xlu1 %v12803_v36, %s13464_s9  ;;  %v1363_v62 = vadd.f32 %v10651_v5, %v14654_v1  ;;  %v1357_v34 = vpop.f32.mrb[23].mxu0 }
 0x256   :  { %v1358_v41 = vadd.f32 %v14654_v1, %v1357_v34 }
 0x258   :  { %v12808_v3 = vpack.i.bf16 %v1363_v62, %v1358_v41  ;;  %v14778_v18 = vpack.c.bf16 %v1363_v62, %v1358_v41 }
 0x25a   :  { %17573 = vst [vmem:[#allocation16_spill] sm:$0xff] %v14778_v18  ;;  %10768 = vmatmul.mubr.msk.f32.vlgmr.msra.gmra.mrb[10].mxu1 %vm151_vm0, %v1766_v60  ;;  %12809 = vrot.lane.b32.xlu1 %v12808_v3, %s13464_s9 }
 0x25b   :  { %11963 = vmatpush3.bf16.xpose.msk.msra.mxu1 %vm14662_vm1, %v14749_v54  ;;  %v10654_v53 = vpop.f32.mrb[24].mxu0  ;;  %10786 = vmatprep.mubr.msk.f32.mxu1 %vm13465_vm2, %v17378_v16 }
 0x25c   :  { %v1373_v48 = vadd.f32 %v10654_v53, %v14654_v1  ;;  %v1367_v31 = vpop.f32.mrb[25].mxu0  ;;  %11964 = vmatprep.subr.bf16.mxu1 %v17380_v19 }
 0x25d   :  { %v1368_v37 = vadd.f32 %v14654_v1, %v1367_v31 }
 0x25f   :  { %v12813_v35 = vpack.i.bf16 %v1373_v48, %v1368_v37  ;;  %v14790_v39 = vpack.c.bf16 %v1373_v48, %v1368_v37 }
 0x260   :  { %v10657_v12 = vpop.f32.mrb[26].mxu0 }
 0x261   :  { %17574 = vst [vmem:[#allocation23_spill] sm:$0xff] %v14790_v39  ;;  %11979 = vmatpush3.bf16.xpose.msk.msra.mxu0 %vm14662_vm1, %v14790_v39  ;;  %12814 = vrot.lane.b32.xlu1 %v12813_v35, %s13464_s9  ;;  %v1383_v44 = vadd.f32 %v10657_v12, %v14654_v1  ;;  %v1377_v33 = vpop.f32.mrb[27].mxu0 }
 0x262   :  { %11980 = vmatprep.subr.bf16.mxu0 %v17380_v19  ;;  %v1378_v57 = vadd.f32 %v14654_v1, %v1377_v33 }
 0x263   :  { %11967 = vmatpush3.bf16.xpose.msk.msra.mxu1 %vm14662_vm1, %v14762_v20 }
 0x264   :  { %11968 = vmatprep.subr.bf16.mxu1 %v17380_v19  ;;  %v12818_v46 = vpack.i.bf16 %v1383_v44, %v1378_v57  ;;  %v14803_v51 = vpack.c.bf16 %v1383_v44, %v1378_v57 }
 0x266   :  { %17575 = vst [vmem:[#allocation17_spill] sm:$0xff] %v14803_v51  ;;  %12819 = vrot.lane.b32.xlu0 %v12818_v46, %s13464_s9 }
 0x267   :  { %v10660_v7 = vpop.f32.mrb[28].mxu0 }
 0x268   :  { %v1393_v21 = vadd.f32 %v10660_v7, %v14654_v1  ;;  %v1387_v0 = vpop.f32.mrb[29].mxu0 }
 0x269   :  { %v1388_v10 = vadd.f32 %v14654_v1, %v1387_v0  ;;  %11983 = vmatpush3.bf16.xpose.msk.msra.mxu0 %vm14662_vm1, %v14803_v51 }
 0x26a   :  { %11984 = vmatprep.subr.bf16.mxu0 %v17380_v19 }
 0x26b   :  { %v12823_v9 = vpack.i.bf16 %v1393_v21, %v1388_v10  ;;  %v14812_v8 = vpack.c.bf16 %v1393_v21, %v1388_v10  ;;  %11971 = vmatpush3.bf16.xpose.msk.msra.mxu1 %vm14662_vm1, %v14767_v24 }
 0x26c   :  { %11972 = vmatprep.subr.bf16.mxu1 %v17380_v19  ;;  %v10663_v30 = vpop.f32.mrb[30].mxu0 }
 0x26d   :  { %17576 = vst [vmem:[#allocation18_spill] sm:$0xff] %v14812_v8  ;;  %12824 = vrot.lane.b32.xlu1 %v12823_v9, %s13464_s9  ;;  %v1403_v25 = vadd.f32 %v10663_v30, %v14654_v1  ;;  %v1397_v26 = vpop.f32.mrb[31].mxu0 }
 0x26e   :  { %v1398_v58 = vadd.f32 %v14654_v1, %v1397_v26 }
 0x270   :  { %v12828_v23 = vpack.i.bf16 %v1403_v25, %v1398_v58  ;;  %v14821_v28 = vpack.c.bf16 %v1403_v25, %v1398_v58  ;;  %v10666_v42 = vpop.f32.mrb[32].mxu0 }
 0x271   :  { %11987 = vmatpush3.bf16.xpose.msk.msra.mxu0 %vm14662_vm1, %v14812_v8  ;;  %v1413_v47 = vadd.f32 %v10666_v42, %v14654_v1  ;;  %v1407_v38 = vpop.f32.mrb[33].mxu0 }
 0x272   :  { %17577 = vst [vmem:[#allocation19_spill] sm:$0xff] %v14821_v28  ;;  %11988 = vmatprep.subr.bf16.mxu0 %v17380_v19  ;;  %v1408_v4 = vadd.f32 %v14654_v1, %v1407_v38  ;;  %12829 = vrot.lane.b32.xlu1 %v12828_v23, %s13464_s9 }
 0x273   :  { %11975 = vmatpush3.bf16.xpose.msk.msra.mxu1 %vm14662_vm1, %v14778_v18 }
 0x274   :  { %11992 = vmatprep.subr.bf16.mxu1 %v17380_v19  ;;  %v12833_v45 = vpack.i.bf16 %v1413_v47, %v1408_v4  ;;  %v14834_v56 = vpack.c.bf16 %v1413_v47, %v1408_v4 }
 0x276   :  { %17578 = vst [vmem:[#allocation25_spill] sm:$0xff] %v14834_v56  ;;  %12834 = vrot.lane.b32.xlu0 %v12833_v45, %s13464_s9 }
 0x278   :  { %v10669_v13 = vpop.f32.mrb[34].mxu0 }
 0x279   :  { %11991 = vmatpush3.bf16.xpose.msk.msra.mxu0 %vm14662_vm1, %v14821_v28  ;;  %v1423_v63 = vadd.f32 %v10669_v13, %v14654_v1  ;;  %v1417_v22 = vpop.f32.mrb[35].mxu0 }
 0x27a   :  { %12008 = vmatprep.subr.bf16.mxu0 %v17380_v19  ;;  %v1418_v11 = vadd.f32 %v14654_v1, %v1417_v22 }
 0x27c   :  { %v12838_v29 = vpack.i.bf16 %v1423_v63, %v1418_v11  ;;  %v14843_v61 = vpack.c.bf16 %v1423_v63, %v1418_v11  ;;  %v10672_v27 = vpop.f32.mrb[36].mxu0 }
 0x27d   :  { %v1433_v55 = vadd.f32 %v10672_v27, %v14654_v1  ;;  %v1427_v49 = vpop.f32.mrb[37].mxu0 }
 0x27e   :  { %17579 = vst [vmem:[#allocation28_spill] sm:$0xff] %v14843_v61  ;;  %v1428_v52 = vadd.f32 %v14654_v1, %v1427_v49  ;;  %12839 = vrot.lane.b32.xlu1 %v12838_v29, %s13464_s9 }
 0x280   :  { %v12843_v36 = vpack.i.bf16 %v1433_v55, %v1428_v52  ;;  %v14848_v5 = vpack.c.bf16 %v1433_v55, %v1428_v52  ;;  %v10675_v62 = vpop.f32.mrb[38].mxu0 }
 0x281   :  { %v1443_v34 = vadd.f32 %v10675_v62, %v14654_v1  ;;  %v1437_v41 = vpop.f32.mrb[39].mxu0 }
 0x282   :  { %17580 = vst [vmem:[#allocation29_spill] sm:$0xff] %v14848_v5  ;;  %v1438_v60 = vadd.f32 %v14654_v1, %v1437_v41  ;;  %12844 = vrot.lane.b32.xlu0 %v12843_v36, %s13464_s9 }
 0x284   :  { %v12848_v3 = vpack.i.bf16 %v1443_v34, %v1438_v60  ;;  %v14853_v53 = vpack.c.bf16 %v1443_v34, %v1438_v60  ;;  %v10678_v48 = vpop.f32.mrb[40].mxu0 }
 0x285   :  { %v1453_v31 = vadd.f32 %v10678_v48, %v14654_v1  ;;  %v1447_v37 = vpop.f32.mrb[41].mxu0 }
 0x286   :  { %17581 = vst [vmem:[#allocation20_spill] sm:$0xff] %v14853_v53  ;;  %v1448_v35 = vadd.f32 %v14654_v1, %v1447_v37  ;;  %12849 = vrot.lane.b32.xlu0 %v12848_v3, %s13464_s9 }
 0x288   :  { %v12853_v12 = vpack.i.bf16 %v1453_v31, %v1448_v35  ;;  %v14858_v44 = vpack.c.bf16 %v1453_v31, %v1448_v35  ;;  %v10725_v33 = vpop.f32.mrb[2].mxu1 }
 0x289   :  { %v1776_v57 = vadd.f32 %v10725_v33, %v14727_v40  ;;  %v1770_v46 = vpop.f32.mrb[3].mxu1 }
 0x28a   :  { %17582 = vst [vmem:[#allocation22_spill] sm:$0xff] %v14858_v44  ;;  %v1771_v7 = vadd.f32 %v14727_v40, %v1770_v46  ;;  %12854 = vrot.lane.b32.xlu1 %v12853_v12, %s13464_s9 }
 0x28b   :  { %10806 = vmatmul.mubr.msk.f32.vlgmr.msra.gmra.mrb[64].mxu0 %vm151_vm0, %v1776_v57 }
 0x28c   :  { %12011 = vmatpush3.bf16.xpose.msk.msra.mxu0 %vm14662_vm1, %v14858_v44  ;;  %v10681_v21 = vpop.f32.mrb[42].mxu0  ;;  %10787 = vmatmul.mubr.msk.f32.vlgmr.msra.gmra.mrb[12].mxu1 %vm151_vm0, %v1771_v7 }
 0x28d   :  { %v1463_v0 = vadd.f32 %v10681_v21, %v14654_v1  ;;  %11995 = vmatpush3.bf16.xpose.msk.msra.mxu1 %vm14662_vm1, %v14834_v56  ;;  %v1457_v10 = vpop.f32.mrb[43].mxu0  ;;  %12012 = vmatprep.subr.bf16.mxu0 %v17380_v19 }
 0x28e   :  { %v1458_v9 = vadd.f32 %v14654_v1, %v1457_v10  ;;  %11996 = vmatprep.subr.bf16.mxu1 %v17380_v19  ;;  %10843 = vmatprep.mubr.msk.f32.mxu0 %vm13465_vm2, %v17378_v16 }
 0x28f   :  { %10824 = vmatprep.mubr.msk.f32.mxu1 %vm13465_vm2, %v17378_v16 }
 0x290   :  { %v12858_v30 = vpack.i.bf16 %v1463_v0, %v1458_v9  ;;  %v14879_v25 = vpack.c.bf16 %v1463_v0, %v1458_v9  ;;  %v10684_v26 = vpop.f32.mrb[44].mxu0 }
 0x291   :  { %v1473_v58 = vadd.f32 %v10684_v26, %v14654_v1  ;;  %v1467_v23 = vpop.f32.mrb[45].mxu0 }
 0x292   :  { %17583 = vst [vmem:[#allocation24_spill] sm:$0xff] %v14879_v25  ;;  %v1468_v42 = vadd.f32 %v14654_v1, %v1467_v23  ;;  %12859 = vrot.lane.b32.xlu1 %v12858_v30, %s13464_s9 }
 0x294   :  { %v12863_v47 = vpack.i.bf16 %v1473_v58, %v1468_v42  ;;  %v14884_v38 = vpack.c.bf16 %v1473_v58, %v1468_v42  ;;  %12015 = vmatpush3.bf16.xpose.msk.msra.mxu0 %vm14662_vm1, %v14879_v25  ;;  %v10687_v4 = vpop.f32.mrb[46].mxu0 }
 0x295   :  { %v1483_v45 = vadd.f32 %v10687_v4, %v14654_v1  ;;  %11999 = vmatpush3.bf16.xpose.msk.msra.mxu1 %vm14662_vm1, %v14843_v61  ;;  %v1477_v13 = vpop.f32.mrb[47].mxu0  ;;  %12016 = vmatprep.subr.bf16.mxu0 %v17380_v19 }
 0x296   :  { %17584 = vst [vmem:[#allocation26_spill] sm:$0xff] %v14884_v38  ;;  %v1478_v63 = vadd.f32 %v14654_v1, %v1477_v13  ;;  %12864 = vrot.lane.b32.xlu1 %v12863_v47, %s13464_s9  ;;  %12000 = vmatprep.subr.bf16.mxu1 %v17380_v19 }
 0x298   :  { %v12868_v22 = vpack.i.bf16 %v1483_v45, %v1478_v63  ;;  %v14897_v11 = vpack.c.bf16 %v1483_v45, %v1478_v63  ;;  %v10690_v29 = vpop.f32.mrb[48].mxu0 }
 0x299   :  { %v1493_v27 = vadd.f32 %v10690_v29, %v14654_v1  ;;  %v1487_v55 = vpop.f32.mrb[49].mxu0 }
 0x29a   :  { %17585 = vst [vmem:[#allocation21_spill] sm:$0xff] %v14897_v11  ;;  %v1488_v49 = vadd.f32 %v14654_v1, %v1487_v55  ;;  %12869 = vrot.lane.b32.xlu1 %v12868_v22, %s13464_s9 }
 0x29c   :  { %v12873_v52 = vpack.i.bf16 %v1493_v27, %v1488_v49  ;;  %v14902_v36 = vpack.c.bf16 %v1493_v27, %v1488_v49  ;;  %12019 = vmatpush3.bf16.xpose.msk.msra.mxu0 %vm14662_vm1, %v14884_v38  ;;  %v10693_v62 = vpop.f32.mrb[50].mxu0 }
 0x29d   :  { %v14908_v34 = vadd.f32 %v10693_v62, %v14654_v1  ;;  %12003 = vmatpush3.bf16.xpose.msk.msra.mxu1 %vm14662_vm1, %v14848_v5  ;;  %v1497_v41 = vpop.f32.mrb[51].mxu0  ;;  %12020 = vmatprep.subr.bf16.mxu0 %v17380_v19 }
 0x29e   :  { %17586 = vst [vmem:[#allocation32_spill] sm:$0xff] %v14902_v36  ;;  %v14915_v60 = vadd.f32 %v14654_v1, %v1497_v41  ;;  %12874 = vrot.lane.b32.xlu0 %v12873_v52, %s13464_s9  ;;  %12004 = vmatprep.subr.bf16.mxu1 %v17380_v19 }
 0x2a0   :  { %v14923_v48 = vpack.c.bf16 %v14908_v34, %v14915_v60  ;;  %v10696_v31 = vpop.f32.mrb[52].mxu0 }
 0x2a1   :  { %v14926_v37 = vadd.f32 %v10696_v31, %v14654_v1  ;;  %v1507_v35 = vpop.f32.mrb[53].mxu0 }
 0x2a2   :  { %17587 = vst [vmem:[#allocation27_spill] sm:$0xff] %v14923_v48  ;;  %v14929_v12 = vadd.f32 %v14654_v1, %v1507_v35 }
 0x2a4   :  { %v14935_v57 = vpack.c.bf16 %v14926_v37, %v14929_v12  ;;  %12023 = vmatpush3.bf16.xpose.msk.msra.mxu0 %vm14662_vm1, %v14897_v11 }
 0x2a5   :  { %12007 = vmatpush3.bf16.xpose.msk.msra.mxu1 %vm14662_vm1, %v14853_v53  ;;  %12040 = vmatprep.subr.bf16.mxu0 %v17380_v19 }
 0x2a6   :  { %17588 = vst [vmem:[#allocation34_spill] sm:$0xff] %v14935_v57  ;;  %12024 = vmatprep.subr.bf16.mxu1 %v17380_v19 }
 0x2bf   :  { %v10699_v46 = vpop.f32.mrb[54].mxu0 }
 0x2c0   :  { %v14946_v7 = vadd.f32 %v10699_v46, %v14654_v1  ;;  %v1517_v21 = vpop.f32.mrb[55].mxu0 }
 0x2c1   :  { %v14949_v0 = vadd.f32 %v14654_v1, %v1517_v21 }
 0x2c3   :  { %v14955_v9 = vpack.c.bf16 %v14946_v7, %v14949_v0 }
 0x2c5   :  { %17589 = vst [vmem:[#allocation35_spill] sm:$0xff] %v14955_v9 }
 0x2c7   :  { %v10702_v30 = vpop.f32.mrb[56].mxu0 }
 0x2c8   :  { %v1533_v26 = vadd.f32 %v10702_v30, %v14654_v1  ;;  %v1527_v58 = vpop.f32.mrb[57].mxu0 }
 0x2c9   :  { %v1528_v23 = vadd.f32 %v14654_v1, %v1527_v58 }
 0x2cb   :  { %v12878_v42 = vpack.i.bf16 %v1533_v26, %v1528_v23  ;;  %v14959_v47 = vpack.c.bf16 %v1533_v26, %v1528_v23 }
 0x2cd   :  { %17590 = vst [vmem:[#allocation36_spill] sm:$0xff] %v14959_v47  ;;  %12879 = vrot.lane.b32.xlu1 %v12878_v42, %s13464_s9 }
 0x2d9   :  { %v10728_v4 = vpop.f32.mrb[4].mxu1 }
 0x2da   :  { %v1786_v45 = vadd.f32 %v10728_v4, %v14727_v40  ;;  %v1780_v13 = vpop.f32.mrb[5].mxu1 }
 0x2db   :  { %v1781_v63 = vadd.f32 %v14727_v40, %v1780_v13  ;;  %v12760_v13 = vpop.permute.xlu0 %12759 }
 0x2dc   :  { %10844 = vmatmul.mubr.msk.f32.vlgmr.msra.gmra.mrb[66].mxu0 %vm151_vm0, %v1786_v45 }
 0x2dd   :  { %v10705_v22 = vpop.f32.mrb[58].mxu0  ;;  %12043 = vmatpush3.bf16.xpose.msk.msra.mxu0 %vm14662_vm1, %v14959_v47  ;;  %10825 = vmatmul.mubr.msk.f32.vlgmr.msra.gmra.mrb[14].mxu1 %vm151_vm0, %v1781_v63 }
 0x2de   :  { %v14969_v29 = vadd.f32 %v10705_v22, %v14654_v1  ;;  %v1537_v27 = vpop.f32.mrb[59].mxu0  ;;  %12027 = vmatpush3.bf16.xpose.msk.msra.mxu1 %vm14662_vm1, %v14902_v36  ;;  %12044 = vmatprep.subr.bf16.mxu0 %v17380_v19 }
 0x2df   :  { %v14976_v55 = vadd.f32 %v14654_v1, %v1537_v27  ;;  %12028 = vmatprep.subr.bf16.mxu1 %v17380_v19  ;;  %10881 = vmatprep.mubr.msk.f32.mxu0 %vm13465_vm2, %v17378_v16  ;;  %v12765_v33 = vpop.permute.xlu0 %12764 }
 0x2e0   :  { %10862 = vmatprep.mubr.msk.f32.mxu1 %vm13465_vm2, %v17378_v16 }
 0x2e1   :  { %v14986_v52 = vpack.c.bf16 %v14969_v29, %v14976_v55 }
 0x2e3   :  { %17591 = vst [vmem:[#allocation33_spill] sm:$0xff] %v14986_v52  ;;  %v10708_v62 = vpop.f32.mrb[60].mxu0 }
 0x2e4   :  { %v14991_v41 = vadd.f32 %v10708_v62, %v14654_v1  ;;  %v1547_v31 = vpop.f32.mrb[61].mxu0 }
 0x2e5   :  { %12047 = vmatpush3.bf16.xpose.msk.msra.mxu0 %vm14662_vm1, %v14986_v52  ;;  %v14997_v35 = vadd.f32 %v14654_v1, %v1547_v31 }
 0x2e6   :  { %12031 = vmatpush3.bf16.xpose.msk.msra.mxu1 %vm14662_vm1, %v14923_v48  ;;  %12048 = vmatprep.subr.bf16.mxu0 %v17380_v19 }
 0x2e7   :  { %v15007_v21 = vpack.c.bf16 %v14991_v41, %v14997_v35  ;;  %12032 = vmatprep.subr.bf16.mxu1 %v17380_v19 }
 0x2e9   :  { %17592 = vst [vmem:[#allocation37_spill] sm:$0xff] %v15007_v21 }
 0x2ed   :  { %12051 = vmatpush3.bf16.xpose.msk.msra.mxu0 %vm14662_vm1, %v15007_v21 }
 0x2ee   :  { %12035 = vmatpush3.bf16.xpose.msk.msra.mxu1 %vm14662_vm1, %v14935_v57  ;;  %12052 = vmatprep.subr.bf16.mxu0 %v17380_v19 }
 0x2ef   :  { %v10711_v30 = vpop.f32.mrb[62].mxu0  ;;  %12036 = vmatprep.subr.bf16.mxu1 %v17380_v19 }
 0x2f0   :  { %v15019_v26 = vadd.f32 %v10711_v30, %v14654_v1  ;;  %v1557_v58 = vpop.f32.mrb[63].mxu0 }
 0x2f1   :  { %v15022_v23 = vadd.f32 %v14654_v1, %v1557_v58  ;;  %v12755_v1 = vpop.permute.xlu1 %12754 }
 0x2f2   :  { %v12757_v62 = vunpack.i.h.bf16 %v12755_v1  ;;  %v12756_v31 = vunpack.i.l.bf16 %v12755_v1 }
 0x2f3   :  { %v15028_v4 = vpack.c.bf16 %v15019_v26, %v15022_v23 }
 0x2f5   :  { %17593 = vst [vmem:[#allocation5_spill] sm:$0xff] %v15028_v4  ;;  %12055 = vmatpush3.bf16.xpose.msk.msra.mxu0 %vm14662_vm1, %v15028_v4  ;;  %v12795_v45 = vpop.permute.xlu1 %12794  ;;  %v12761_v4 = vunpack.i.l.bf16 %v12760_v13 }
 0x2f6   :  { %12039 = vmatpush3.bf16.xpose.msk.msra.mxu1 %vm14662_vm1, %v14955_v9  ;;  %12080 = vmatprep.subr.bf16.mxu0 %v17380_v19  ;;  %v12797_v22 = vunpack.i.h.bf16 %v12795_v45  ;;  %v12796_v27 = vunpack.i.l.bf16 %v12795_v45  ;;  %v12762_v9 = vunpack.i.h.bf16 %v12760_v13 }
 0x2f7   :  { %12056 = vmatprep.subr.bf16.mxu1 %v17380_v19  ;;  %v15042_v19 = vpack.c.bf16 %v12757_v62, %v12756_v31  ;;  %v12766_v31 = vunpack.i.l.bf16 %v12765_v33 }
 0x2f8   :  { %v15039_v46 = vpack.c.bf16 %v12797_v22, %v12796_v27  ;;  %v17596_v27 = vmov 0.0|0.0   ;;  %v15055_v13 = vpack.c.bf16 %v12762_v9, %v12761_v4 }
 0x2f9   :  { %v12800_v63 = vpop.permute.xlu1 %12799  ;;  %17595 = vst [vmem:[#allocation9_spill] sm:$0xff] %v15042_v19 }
 0x2fa   :  { %17594 = vst [vmem:[#allocation6_spill] sm:$0xff] %v15039_v46  ;;  %v12802_v49 = vunpack.i.h.bf16 %v12800_v63  ;;  %v12801_v3 = vunpack.i.l.bf16 %v12800_v63  ;;  %17599 = vst [vmem:[#allocation38_spill] sm:$0xff] %v15055_v13 }
 0x2fc   :  { %v15050_v63 = vpack.c.bf16 %v12802_v49, %v12801_v3 }
 0x2fd   :  { %v12805_v58 = vpop.permute.xlu1 %12804 }
 0x2fe   :  { %17597 = vst [vmem:[#allocation11_spill] sm:$0xff] %v15050_v63 }
 0x309   :  { %v10731_v30 = vpop.f32.mrb[6].mxu1 }
 0x30a   :  { %v1796_v10 = vadd.f32 %v10731_v30, %v14727_v40  ;;  %v1790_v42 = vpop.f32.mrb[7].mxu1  ;;  %v12810_v30 = vpop.permute.xlu1 %12809 }
 0x30b   :  { %v1791_v16 = vadd.f32 %v14727_v40, %v1790_v42  ;;  %v12807_v40 = vunpack.i.h.bf16 %v12805_v58  ;;  %v12806_v42 = vunpack.i.l.bf16 %v12805_v58  ;;  %v12812_v49 = vunpack.i.h.bf16 %v12810_v30 }
 0x30c   :  { %10882 = vmatmul.mubr.msk.f32.vlgmr.msra.gmra.mrb[68].mxu0 %vm151_vm0, %v1796_v10  ;;  %v17598_v10 = vmov 0.0   ;;  %v12811_v58 = vunpack.i.l.bf16 %v12810_v30 }
 0x30d   :  { %12082 = vmatpush3.bf16.msra.mxu0 %v15039_v46  ;;  %v1892_v1 = vpop.f32.mrb[8].mxu1  ;;  %10863 = vmatmul.mubr.msk.f32.vlgmr.msra.gmra.mrb[16].mxu1 %vm151_vm0, %v1791_v16  ;;  %v12767_v16 = vunpack.i.h.bf16 %v12765_v33  ;;  %v15062_v3 = vpack.c.bf16 %v12807_v40, %v12806_v42 }
 0x30e   :  { %v2576_v45 = vsel %vm2575_vm3, %v1892_v1, -inf  ;;  %12058 = vmatpush3.bf16.msra.mxu1 %v15042_v19  ;;  %v10750_v22 = vpop.f32.mrb[9].mxu1  ;;  %12083 = vmatprep.subr.bf16.mxu0 %v17596_v27 }
 0x30f   :  { %v2577_v62 = vrot.slane %v2576_v45, 4  ;;  %12059 = vmatprep.subr.bf16.mxu1 %v17596_v27  ;;  %10900 = vmatprep.mubr.msk.f32.mxu1 %vm13465_vm2, %v17598_v10  ;;  %v12770_v22 = vpop.permute.xlu0 %12769  ;;  %17600 = vst [vmem:[#allocation39_spill] sm:$0xff] %v15062_v3  ;;  %v15065_v33 = vpack.c.bf16 %v12767_v16, %v12766_v31 }
 0x310   :  { %10938 = vmatprep.mubr.msk.f32.mxu0 %vm13465_vm2, %v17598_v10  ;;  %v12772_v4 = vunpack.i.h.bf16 %v12770_v22  ;;  %v12771_v19 = vunpack.i.l.bf16 %v12770_v22 }
 0x311   :  { %v2578_v46 = vmax.f32 %v2576_v45, %v2577_v62  ;;  %12085 = vmatpush3.bf16.msra.mxu0 %v15050_v63  ;;  %17601 = vst [vmem:[#allocation40_spill] sm:$0xff] %v15065_v33  ;;  %v15070_v45 = vpack.c.bf16 %v12812_v49, %v12811_v58 }
 0x312   :  { %12061 = vmatpush3.bf16.msra.mxu1 %v15055_v13  ;;  %12086 = vmatprep.subr.bf16.mxu0 %v17596_v27  ;;  %v15073_v42 = vpack.c.bf16 %v12772_v4, %v12771_v19 }
 0x313   :  { %v2579_v9 = vrot.slane %v2578_v46, 2  ;;  %12062 = vmatprep.subr.bf16.mxu1 %v17596_v27  ;;  %17602 = vst [vmem:[#allocation41_spill] sm:$0xff] %v15070_v45 }
 0x314   :  { %17603 = vst [vmem:[#allocation42_spill] sm:$0xff] %v15073_v42 }
 0x315   :  { %v2580_v57 = vmax.f32 %v2578_v46, %v2579_v9  ;;  %12088 = vmatpush3.bf16.msra.mxu0 %v15062_v3 }
 0x316   :  { %12064 = vmatpush3.bf16.msra.mxu1 %v15065_v33  ;;  %12089 = vmatprep.subr.bf16.mxu0 %v17596_v27 }
 0x317   :  { %v2581_v40 = vrot.slane %v2580_v57, 1  ;;  %12065 = vmatprep.subr.bf16.mxu1 %v17596_v27 }
 0x319   :  { %v2582_v62 = vmax.f32 %v2580_v57, %v2581_v40  ;;  %12091 = vmatpush3.bf16.msra.mxu0 %v15070_v45 }
 0x31a   :  { %12067 = vmatpush3.bf16.msra.mxu1 %v15073_v42  ;;  %12104 = vmatprep.subr.bf16.mxu0 %v17596_v27 }
 0x31b   :  { %v2632_v46 = vsub.f32 %v1892_v1, %v2582_v62  ;;  %12068 = vmatprep.subr.bf16.mxu1 %v17596_v27 }
 0x31d   :  { %v2640_v16 = vmul.f32 1.442695, %v2632_v46 }
 0x31f   :  { %13057 = vpow2.f32 %v2640_v16 }
 0x329   :  { %v13058_v31 = vpop.eup %13057 }
 0x32a   :  { %v2656_v30 = vsel %vm2575_vm3, %v13058_v31, 0.0 }
 0x32b   :  { %v2657_v22 = vrot.slane %v2656_v30, 4 }
 0x32d   :  { %v2658_v49 = vadd.f32 %v2657_v22, %v2656_v30  ;;  %v1989_v58 = vpop.f32.mrb[10].mxu1 }
 0x32e   :  { %v2583_v19 = vsel %vm2575_vm3, %v1989_v58, -inf  ;;  %v10769_v57 = vpop.f32.mrb[11].mxu1 }
 0x32f   :  { %v2659_v9 = vrot.slane %v2658_v49, 2  ;;  %v2584_v4 = vrot.slane %v2583_v19, 4 }
 0x331   :  { %v2660_v40 = vadd.f32 %v2659_v9, %v2658_v49  ;;  %v2585_v45 = vmax.f32 %v2583_v19, %v2584_v4 }
 0x333   :  { %v2586_v3 = vrot.slane %v2585_v45, 2  ;;  %v2661_v63 = vrot.slane %v2660_v40, 1 }
 0x335   :  { %v2587_v1 = vmax.f32 %v2585_v45, %v2586_v3  ;;  %v2662_v62 = vadd.f32 %v2661_v63, %v2660_v40 }
 0x337   :  { %v2588_v42 = vrot.slane %v2587_v1, 1  ;;  %13059 = vrcp.f32 %v2662_v62 }
 0x339   :  { %v2589_v46 = vmax.f32 %v2587_v1, %v2588_v42 }
 0x33b   :  { %v2633_v16 = vsub.f32 %v1989_v58, %v2589_v46 }
 0x33d   :  { %v2642_v33 = vmul.f32 1.442695, %v2633_v16 }
 0x33f   :  { %13061 = vpow2.f32 %v2642_v33 }
 0x341   :  { %v13060_v13 = vpop.eup %13059 }
 0x342   :  { %v2720_v30 = vmul.f32 %v13060_v13, %v13058_v31  ;;  %v17604_v13 = vpack.i.bf16 %v14908_v34, %v14915_v60 }
 0x344   :  { %v15081_v22 = vadd.f32 1e-08, %v2720_v30 }
 0x346   :  { %v2736_v57 = vsel %vm2575_vm3, %v15081_v22, 0.0 }
 0x347   :  { %2737 = vadd.xlane.f32.xlu0 %v2736_v57 }
 0x349   :  { %v13062_v49 = vpop.eup %13061 }
 0x34a   :  { %v2663_v19 = vsel %vm2575_vm3, %v13062_v49, 0.0 }
 0x34b   :  { %v2664_v9 = vrot.slane %v2663_v19, 4 }
 0x34d   :  { %v2665_v3 = vadd.f32 %v2664_v9, %v2663_v19 }
 0x34f   :  { %v2666_v63 = vrot.slane %v2665_v3, 2 }
 0x351   :  { %v2667_v45 = vadd.f32 %v2666_v63, %v2665_v3 }
 0x353   :  { %v2668_v4 = vrot.slane %v2667_v45, 1 }
 0x355   :  { %v2669_v42 = vadd.f32 %v2668_v4, %v2667_v45 }
 0x357   :  { %13063 = vrcp.f32 %v2669_v42 }
 0x35d   :  { %12884 = vrot.lane.b32.xlu0 %v17604_v13, %s13464_s9 }
 0x35e   :  { %v2183_v33 = vpop.f32.mrb[64].mxu0 }
 0x35f   :  { %v2597_v31 = vsel %vm2575_vm3, %v2183_v33, -inf  ;;  %v2086_v58 = vpop.f32.mrb[12].mxu1  ;;  %v10807_v40 = vpop.f32.mrb[65].mxu0 }
 0x360   :  { %v2598_v62 = vrot.slane %v2597_v31, 4  ;;  %v2590_v46 = vsel %vm2575_vm3, %v2086_v58, -inf  ;;  %v10788_v16 = vpop.f32.mrb[13].mxu1 }
 0x361   :  { %v13064_v1 = vpop.eup %13063  ;;  %v2591_v30 = vrot.slane %v2590_v46, 4 }
 0x362   :  { %v2721_v57 = vmul.f32 %v13064_v1, %v13062_v49  ;;  %v2599_v19 = vmax.f32 %v2597_v31, %v2598_v62  ;;  %v17605_v31 = vpack.i.bf16 %v14969_v29, %v14976_v55 }
 0x363   :  { %v2592_v9 = vmax.f32 %v2590_v46, %v2591_v30 }
 0x364   :  { %v15092_v3 = vadd.f32 1e-08, %v2721_v57  ;;  %v2600_v63 = vrot.slane %v2599_v19, 2 }
 0x365   :  { %v2593_v45 = vrot.slane %v2592_v9, 2 }
 0x366   :  { %v2739_v34 = vsel %vm2575_vm3, %v15092_v3, 0.0  ;;  %v2601_v60 = vmax.f32 %v2599_v19, %v2600_v63 }
 0x367   :  { %2740 = vadd.xlane.f32.xlu1 %v2739_v34  ;;  %v2594_v4 = vmax.f32 %v2592_v9, %v2593_v45 }
 0x368   :  { %v2602_v42 = vrot.slane %v2601_v60, 1 }
 0x369   :  { %v2595_v13 = vrot.slane %v2594_v4, 1 }
 0x36a   :  { %v2603_v40 = vmax.f32 %v2601_v60, %v2602_v42 }
 0x36b   :  { %v2596_v21 = vmax.f32 %v2594_v4, %v2595_v13 }
 0x36c   :  { %v2635_v48 = vsub.f32 %v2183_v33, %v2603_v40 }
 0x36d   :  { %v2634_v16 = vsub.f32 %v2086_v58, %v2596_v21 }
 0x36e   :  { %v2646_v52 = vmul.f32 1.442695, %v2635_v48 }
 0x36f   :  { %v2644_v49 = vmul.f32 1.442695, %v2634_v16 }
 0x370   :  { %13065 = vpow2.f32 %v2646_v52 }
 0x371   :  { %13067 = vpow2.f32 %v2644_v49 }
 0x378   :  { %12889 = vrot.lane.b32.xlu1 %v17605_v31, %s13464_s9  ;;  %v15110_v31 = vpop.permute.xlu0 %12774 }
 0x37a   :  { %v13066_v1 = vpop.eup %13065 }
 0x37b   :  { %v13068_v62 = vpop.eup %13067  ;;  %v2677_v46 = vsel %vm2575_vm3, %v13066_v1, 0.0 }
 0x37c   :  { %v2678_v30 = vrot.slane %v2677_v46, 4  ;;  %v2670_v57 = vsel %vm2575_vm3, %v13068_v62, 0.0 }
 0x37d   :  { %v2671_v19 = vrot.slane %v2670_v57, 4 }
 0x37e   :  { %v2679_v9 = vadd.f32 %v2678_v30, %v2677_v46 }
 0x37f   :  { %v2672_v33 = vadd.f32 %v2671_v19, %v2670_v57 }
 0x380   :  { %v2680_v21 = vrot.slane %v2679_v9, 2 }
 0x381   :  { %v2673_v48 = vrot.slane %v2672_v33, 2 }
 0x382   :  { %v2681_v58 = vadd.f32 %v2680_v21, %v2679_v9 }
 0x383   :  { %v2674_v52 = vadd.f32 %v2673_v48, %v2672_v33 }
 0x384   :  { %v2682_v63 = vrot.slane %v2681_v58, 1 }
 0x385   :  { %v2675_v45 = vrot.slane %v2674_v52, 1 }
 0x386   :  { %v2683_v34 = vadd.f32 %v2682_v63, %v2681_v58 }
 0x387   :  { %v2676_v60 = vadd.f32 %v2675_v45, %v2674_v52 }
 0x388   :  { %13069 = vrcp.f32 %v2683_v34 }
 0x389   :  { %13071 = vrcp.f32 %v2676_v60 }
 0x392   :  { %v13070_v29 = vpop.eup %13069 }
 0x393   :  { %v13072_v55 = vpop.eup %13071  ;;  %v2723_v4 = vmul.f32 %v13070_v29, %v13066_v1 }
 0x394   :  { %v2722_v42 = vmul.f32 %v13072_v55, %v13068_v62  ;;  %v15113_v62 = vpop.permute.xlu0 %12779 }
 0x395   :  { %v15104_v40 = vadd.f32 1e-08, %v2723_v4 }
 0x396   :  { %v15102_v13 = vadd.f32 1e-08, %v2722_v42 }
 0x397   :  { %v2745_v49 = vsel %vm2575_vm3, %v15104_v40, 0.0 }
 0x398   :  { %v2742_v16 = vsel %vm2575_vm3, %v15102_v13, 0.0  ;;  %v15116_v52 = vpop.permute.xlu0 %12784 }
 0x399   :  { %2743 = vadd.xlane.f32.xlu0 %v2742_v16 }
 0x39c   :  { %2746 = vadd.xlane.f32.xlu1 %v2745_v49  ;;  %v15118_v29 = vpop.permute.xlu0 %12789 }
 0x3a0   :  { %v15120_v49 = vpop.permute.xlu0 %12819 }
 0x3af   :  { %v2377_v46 = vpop.f32.mrb[66].mxu0 }
 0x3b0   :  { %v2611_v30 = vsel %vm2575_vm3, %v2377_v46, -inf  ;;  %v2280_v57 = vpop.f32.mrb[14].mxu1  ;;  %v10845_v1 = vpop.f32.mrb[67].mxu0 }
 0x3b1   :  { %v2612_v19 = vrot.slane %v2611_v30, 4  ;;  %v2604_v9 = vsel %vm2575_vm3, %v2280_v57, -inf  ;;  %v10826_v33 = vpop.f32.mrb[15].mxu1 }
 0x3b2   :  { %v2605_v21 = vrot.slane %v2604_v9, 4 }
 0x3b3   :  { %v2613_v48 = vmax.f32 %v2611_v30, %v2612_v19  ;;  %v15122_v30 = vpop.permute.xlu0 %12834 }
 0x3b4   :  { %v2606_v58 = vmax.f32 %v2604_v9, %v2605_v21  ;;  %v15126_v9 = vpop.permute.xlu1 %12814 }
 0x3b5   :  { %v2614_v63 = vrot.slane %v2613_v48, 2 }
 0x3b6   :  { %v2607_v45 = vrot.slane %v2606_v58, 2 }
 0x3b7   :  { %v2615_v34 = vmax.f32 %v2613_v48, %v2614_v63  ;;  %v15124_v19 = vpop.permute.xlu0 %12844 }
 0x3b8   :  { %v2608_v60 = vmax.f32 %v2606_v58, %v2607_v45  ;;  %v15130_v63 = vpop.permute.xlu1 %12824 }
 0x3b9   :  { %v2616_v55 = vrot.slane %v2615_v34, 1 }
 0x3ba   :  { %v2609_v4 = vrot.slane %v2608_v60, 1 }
 0x3bb   :  { %v2617_v42 = vmax.f32 %v2615_v34, %v2616_v55  ;;  %v15128_v48 = vpop.permute.xlu0 %12849 }
 0x3bc   :  { %v2610_v16 = vmax.f32 %v2608_v60, %v2609_v4  ;;  %v15136_v4 = vpop.permute.xlu1 %12829 }
 0x3bd   :  { %v2637_v1 = vsub.f32 %v2377_v46, %v2617_v42 }
 0x3be   :  { %v2636_v36 = vsub.f32 %v2280_v57, %v2610_v16 }
 0x3bf   :  { %v2650_v33 = vmul.f32 1.442695, %v2637_v1  ;;  %v15134_v34 = vpop.permute.xlu0 %12874 }
 0x3c0   :  { %v2648_v47 = vmul.f32 1.442695, %v2636_v36  ;;  %v15138_v11 = vpop.permute.xlu1 %12839 }
 0x3c1   :  { %13073 = vpow2.f32 %v2650_v33 }
 0x3c2   :  { %13075 = vpow2.f32 %v2648_v47 }
 0x3c4   :  { %v15140_v25 = vpop.permute.xlu1 %12854 }
 0x3cb   :  { %v13074_v21 = vpop.eup %13073 }
 0x3cc   :  { %v13076_v58 = vpop.eup %13075  ;;  %v2691_v45 = vsel %vm2575_vm3, %v13074_v21, 0.0 }
 0x3cd   :  { %v2692_v46 = vrot.slane %v2691_v45, 4  ;;  %v2684_v57 = vsel %vm2575_vm3, %v13076_v58, 0.0 }
 0x3ce   :  { %v2685_v36 = vrot.slane %v2684_v57, 4 }
 0x3cf   :  { %v2693_v60 = vadd.f32 %v2692_v46, %v2691_v45  ;;  %v12777_v45 = vunpack.i.h.bf16 %v15110_v31  ;;  %v12776_v46 = vunpack.i.l.bf16 %v15110_v31 }
 0x3d0   :  { %v2686_v47 = vadd.f32 %v2685_v36, %v2684_v57  ;;  %v15144_v36 = vpop.permute.xlu1 %12859 }
 0x3d1   :  { %v2694_v55 = vrot.slane %v2693_v60, 2 }
 0x3d2   :  { %v2687_v42 = vrot.slane %v2686_v47, 2 }
 0x3d3   :  { %v2695_v16 = vadd.f32 %v2694_v55, %v2693_v60 }
 0x3d4   :  { %v2738_v1 = vpop.xlane.xlu0 %2737  ;;  %v2688_v33 = vadd.f32 %v2687_v42, %v2686_v47  ;;  %v15146_v47 = vpack.c.bf16 %v12777_v45, %v12776_v46  ;;  %v12786_v46 = vunpack.i.l.bf16 %v15116_v52 }
 0x3d5   :  { %13077 = vrcp.f32 %v2738_v1  ;;  %v2696_v53 = vrot.slane %v2695_v16, 1 }
 0x3d6   :  { %v2689_v5 = vrot.slane %v2688_v33, 1  ;;  %17606 = vst [vmem:[#allocation43_spill] sm:$0xff] %v15146_v47 }
 0x3d7   :  { %v2697_v38 = vadd.f32 %v2696_v53, %v2695_v16  ;;  %v12782_v53 = vunpack.i.h.bf16 %v15113_v62 }
 0x3d8   :  { %v2690_v61 = vadd.f32 %v2689_v5, %v2688_v33 }
 0x3d9   :  { %13079 = vrcp.f32 %v2697_v38 }
 0x3da   :  { %13081 = vrcp.f32 %v2690_v61  ;;  %v12781_v61 = vunpack.i.l.bf16 %v15113_v62 }
 0x3df   :  { %v13078_v57 = vpop.eup %13077  ;;  %v2571_v60 = vpop.f32.mrb[68].mxu0 }
 0x3e0   :  { %v2625_v55 = vsel %vm2575_vm3, %v2571_v60, -inf  ;;  %v2474_v42 = vpop.f32.mrb[16].mxu1  ;;  %v10883_v1 = vpop.f32.mrb[69].mxu0  ;;  %v2768_v5 = vmul.f32 %v13078_v57, %v15081_v22  ;;  %v12787_v22 = vunpack.i.h.bf16 %v15116_v52 }
 0x3e1   :  { %v2626_v38 = vrot.slane %v2625_v55, 4  ;;  %v2618_v16 = vsel %vm2575_vm3, %v2474_v42, -inf  ;;  %v10864_v31 = vpop.f32.mrb[17].mxu1  ;;  %v15160_v1 = vpack.c.bf16 %v12782_v53, %v12781_v61  ;;  %v12792_v53 = vunpack.i.h.bf16 %v15118_v29 }
 0x3e2   :  { %v2619_v33 = vrot.slane %v2618_v16, 4  ;;  %10901 = vmatmul.mubr.msk.f32.vlgmr.msra.gmra.mrb[18].mxu1 %vm2575_vm3, %v2768_v5  ;;  %v15162_v5 = vpop.permute.xlu1 %12864  ;;  %v15167_v28 = vpack.c.bf16 %v12787_v22, %v12786_v46 }
 0x3e3   :  { %v2627_v56 = vmax.f32 %v2625_v55, %v2626_v38  ;;  %12070 = vmatpush3.bf16.msra.mxu1 %v15146_v47  ;;  %10919 = vmatprep.mubr.msk.f32.mxu1 %vm13465_vm2, %v17598_v10  ;;  %v13080_v45 = vpop.eup %13079  ;;  %17607 = vst [vmem:[#allocation44_spill] sm:$0xff] %v15160_v1 }
 0x3e4   :  { %v2620_v57 = vmax.f32 %v2618_v16, %v2619_v33  ;;  %12071 = vmatprep.subr.bf16.mxu1 %v17596_v27  ;;  %v13082_v62 = vpop.eup %13081  ;;  %v2725_v44 = vmul.f32 %v13080_v45, %v13074_v21  ;;  %17608 = vst [vmem:[#allocation45_spill] sm:$0xff] %v15167_v28  ;;  %v12791_v21 = vunpack.i.l.bf16 %v15118_v29 }
 0x3e5   :  { %v2628_v31 = vrot.slane %v2627_v56, 2  ;;  %v2724_v38 = vmul.f32 %v13082_v62, %v13076_v58 }
 0x3e6   :  { %v2621_v55 = vrot.slane %v2620_v57, 2  ;;  %v15165_v18 = vadd.f32 1e-08, %v2725_v44  ;;  %v15179_v45 = vpop.permute.xlu1 %12869  ;;  %v15182_v46 = vpack.c.bf16 %v12792_v53, %v12791_v21  ;;  %v12816_v53 = vunpack.i.l.bf16 %v15126_v9 }
 0x3e7   :  { %v2629_v47 = vmax.f32 %v2627_v56, %v2628_v31  ;;  %12073 = vmatpush3.bf16.msra.mxu1 %v15160_v1  ;;  %v15170_v16 = vadd.f32 1e-08, %v2724_v38 }
 0x3e8   :  { %v2622_v52 = vmax.f32 %v2620_v57, %v2621_v55  ;;  %12074 = vmatprep.subr.bf16.mxu1 %v17596_v27  ;;  %v2751_v58 = vsel %vm2575_vm3, %v15165_v18, 0.0  ;;  %17609 = vst [vmem:[#allocation46_spill] sm:$0xff] %v15182_v46 }
 0x3e9   :  { %v2630_v61 = vrot.slane %v2629_v47, 1  ;;  %2752 = vadd.xlane.f32.xlu0 %v2751_v58  ;;  %v2748_v44 = vsel %vm2575_vm3, %v15170_v16, 0.0 }
 0x3ea   :  { %v2623_v56 = vrot.slane %v2622_v52, 1  ;;  %2749 = vadd.xlane.f32.xlu1 %v2748_v44  ;;  %v15185_v31 = vpop.permute.xlu1 %12879  ;;  %v17707_v17 = vld [vmem:[#allocation44_spill] sm:$0xff] }
 0x3eb   :  { %v2631_v33 = vmax.f32 %v2629_v47, %v2630_v61  ;;  %12076 = vmatpush3.bf16.msra.mxu1 %v15167_v28 }
 0x3ec   :  { %v2624_v22 = vmax.f32 %v2622_v52, %v2623_v56  ;;  %12077 = vmatprep.subr.bf16.mxu1 %v17596_v27 }
 0x3ed   :  { %v2639_v29 = vsub.f32 %v2571_v60, %v2631_v33  ;;  %v17610_v60 = vpack.i.bf16 %v14991_v41, %v14997_v35  ;;  %v12822_v35 = vunpack.i.h.bf16 %v15120_v49 }
 0x3ee   :  { %v2638_v57 = vsub.f32 %v2474_v42, %v2624_v22  ;;  %v12817_v42 = vunpack.i.h.bf16 %v15126_v9  ;;  %v12821_v9 = vunpack.i.l.bf16 %v15120_v49 }
 0x3ef   :  { %v2654_v62 = vmul.f32 1.442695, %v2639_v29  ;;  %12079 = vmatpush3.bf16.msra.mxu1 %v15182_v46  ;;  %v17611_v29 = vpack.i.bf16 %v14926_v37, %v14929_v12 }
 0x3f0   :  { %v2652_v55 = vmul.f32 1.442695, %v2638_v57  ;;  %12092 = vmatprep.subr.bf16.mxu1 %v17596_v27  ;;  %v15201_v41 = vpack.c.bf16 %v12817_v42, %v12816_v53  ;;  %v15210_v12 = vpack.c.bf16 %v12822_v35, %v12821_v9 }
 0x3f1   :  { %13083 = vpow2.f32 %v2654_v62 }
 0x3f2   :  { %13085 = vpow2.f32 %v2652_v55 }
 0x3f4   :  { %v2741_v47 = vpop.xlane.xlu1 %2740 }
 0x3f5   :  { %13087 = vrcp.f32 %v2741_v47 }
 0x3fb   :  { %v13084_v38 = vpop.eup %13083  ;;  %12899 = vrot.lane.b32.xlu1 %v17610_v60, %s13464_s9 }
 0x3fc   :  { %v13086_v52 = vpop.eup %13085  ;;  %v2705_v61 = vsel %vm2575_vm3, %v13084_v38, 0.0 }
 0x3fd   :  { %v2706_v21 = vrot.slane %v2705_v61, 4  ;;  %v2698_v58 = vsel %vm2575_vm3, %v13086_v52, 0.0 }
 0x3fe   :  { %v2699_v56 = vrot.slane %v2698_v58, 4 }
 0x3ff   :  { %v13088_v44 = vpop.eup %13087  ;;  %v2707_v33 = vadd.f32 %v2706_v21, %v2705_v61  ;;  %12894 = vrot.lane.b32.xlu0 %v17611_v29, %s13464_s9  ;;  %v12826_v61 = vunpack.i.l.bf16 %v15130_v63 }
 0x400   :  { %v2700_v22 = vadd.f32 %v2699_v56, %v2698_v58  ;;  %v2769_v57 = vmul.f32 %v13088_v44, %v15092_v3  ;;  %v12827_v3 = vunpack.i.h.bf16 %v15130_v63  ;;  %v12832_v58 = vunpack.i.h.bf16 %v15136_v4 }
 0x401   :  { %v2708_v62 = vrot.slane %v2707_v33, 2  ;;  %v12831_v56 = vunpack.i.l.bf16 %v15136_v4 }
 0x402   :  { %v2701_v55 = vrot.slane %v2700_v22, 2  ;;  %10920 = vmatmul.mubr.msk.f32.vlgmr.msra.gmra.mrb[20].mxu1 %vm2575_vm3, %v2769_v57  ;;  %v15216_v21 = vpack.c.bf16 %v12827_v3, %v12826_v61  ;;  %v17612_v3 = vpack.i.bf16 %v15019_v26, %v15022_v23  ;;  %v17613_v26 = vpack.i.bf16 %v14946_v7, %v14949_v0 }
 0x403   :  { %v2709_v47 = vadd.f32 %v2708_v62, %v2707_v33  ;;  %12094 = vmatpush3.bf16.msra.mxu1 %v15201_v41  ;;  %10957 = vmatprep.mubr.msk.f32.mxu1 %vm13465_vm2, %v17598_v10  ;;  %v15222_v63 = vpack.c.bf16 %v12832_v58, %v12831_v56  ;;  %v15234_v62 = vpop.permute.xlu0 %12884  ;;  %v12842_v56 = vunpack.i.h.bf16 %v15138_v11  ;;  %v12847_v0 = vunpack.i.h.bf16 %v15124_v19 }
 0x404   :  { %v2702_v37 = vadd.f32 %v2701_v55, %v2700_v22  ;;  %12095 = vmatprep.subr.bf16.mxu1 %v17596_v27  ;;  %v15236_v55 = vpop.permute.xlu1 %12889 }
 0x405   :  { %v2710_v49 = vrot.slane %v2709_v47, 1 }
 0x406   :  { %v2703_v60 = vrot.slane %v2702_v37, 1 }
 0x407   :  { %12097 = vmatpush3.bf16.msra.mxu1 %v15210_v12  ;;  %v2711_v42 = vadd.f32 %v2710_v49, %v2709_v47  ;;  %v12857_v49 = vunpack.i.h.bf16 %v15140_v25 }
 0x408   :  { %12098 = vmatprep.subr.bf16.mxu1 %v17596_v27  ;;  %v2704_v53 = vadd.f32 %v2703_v60, %v2702_v37  ;;  %v12836_v37 = vunpack.i.l.bf16 %v15122_v30  ;;  %v12856_v60 = vunpack.i.l.bf16 %v15140_v25  ;;  %v12862_v25 = vunpack.i.h.bf16 %v15144_v36 }
 0x409   :  { %13089 = vrcp.f32 %v2711_v42 }
 0x40a   :  { %13091 = vrcp.f32 %v2704_v53 }
 0x40b   :  { %12100 = vmatpush3.bf16.msra.mxu1 %v15216_v21 }
 0x40c   :  { %12101 = vmatprep.subr.bf16.mxu1 %v17596_v27 }
 0x40f   :  { %12103 = vmatpush3.bf16.msra.mxu1 %v15222_v63 }
 0x410   :  { %12116 = vmatprep.subr.bf16.mxu1 %v17596_v27 }
 0x413   :  { %v13090_v44 = vpop.eup %13089 }
 0x414   :  { %v13092_v33 = vpop.eup %13091  ;;  %v2727_v29 = vmul.f32 %v13090_v44, %v13084_v38  ;;  %v12837_v38 = vunpack.i.h.bf16 %v15122_v30  ;;  %v12841_v44 = vunpack.i.l.bf16 %v15138_v11  ;;  %v15257_v30 = vpack.c.bf16 %v12857_v49, %v12856_v60  ;;  %v13425_v11 = vld [vmem:[%s17331_s1 + $0x8] sm:$0xff]  ;;  %v13431_v49 = vld [vmem:[%s17331_s1 + $0x38] sm:$0xff]  ;;  %v13432_v60 = vld [vmem:[%s17331_s1 + $0x30] sm:$0xff] }
 0x415   :  { %v2726_v22 = vmul.f32 %v13092_v33, %v13086_v52 }
 0x416   :  { %v15228_v35 = vadd.f32 1e-08, %v2727_v29  ;;  %v15247_v58 = vpack.c.bf16 %v12837_v38, %v12836_v37  ;;  %v15268_v7 = vpack.c.bf16 %v12842_v56, %v12841_v44  ;;  %v12866_v29 = vunpack.i.l.bf16 %v15162_v5 }
 0x417   :  { %v15226_v57 = vadd.f32 1e-08, %v2726_v22  ;;  %v12867_v22 = vunpack.i.h.bf16 %v15162_v5  ;;  %v13428_v5 = vld [vmem:[%s17331_s1 + $0x10] sm:$0xff]  ;;  %v12872_v38 = vunpack.i.h.bf16 %v15179_v45  ;;  %v12871_v37 = vunpack.i.l.bf16 %v15179_v45  ;;  %v13430_v45 = vld [vmem:[%s17331_s1 + $0x20] sm:$0xff] }
 0x418   :  { %v2757_v9 = vsel %vm2575_vm3, %v15228_v35, 0.0  ;;  %v12882_v56 = vunpack.i.h.bf16 %v15185_v31  ;;  %v12881_v44 = vunpack.i.l.bf16 %v15185_v31  ;;  %v12887_v31 = vunpack.i.h.bf16 %v15234_v62 }
 0x419   :  { %v2754_v4 = vsel %vm2575_vm3, %v15226_v57, 0.0 }
 0x41e   :  { %2755 = vadd.xlane.f32.xlu0 %v2754_v4 }
 0x41f   :  { %2758 = vadd.xlane.f32.xlu1 %v2757_v9  ;;  %v12852_v9 = vunpack.i.h.bf16 %v15128_v48 }
 0x426   :  { %v2744_v47 = vpop.xlane.xlu0 %2743 }
 0x427   :  { %13093 = vrcp.f32 %v2744_v47  ;;  %v12851_v47 = vunpack.i.l.bf16 %v15128_v48  ;;  %v13429_v48 = vld [vmem:[%s17331_s1 + $0x28] sm:$0xff] }
 0x429   :  { %v2747_v52 = vpop.xlane.xlu1 %2746 }
 0x42a   :  { %13095 = vrcp.f32 %v2747_v52  ;;  %v15302_v52 = vpack.c.bf16 %v12867_v22, %v12866_v29 }
 0x430   :  { %12909 = vrot.lane.b32.xlu1 %v17612_v3, %s13464_s9  ;;  %v15312_v3 = vpack.c.bf16 %v12852_v9, %v12851_v47 }
 0x431   :  { %v13094_v61 = vpop.eup %13093 }
 0x432   :  { %v2770_v42 = vmul.f32 %v13094_v61, %v15102_v13  ;;  %v12861_v13 = vunpack.i.l.bf16 %v15144_v36  ;;  %v13426_v36 = vld [vmem:[%s17331_s1] sm:$0xff]  ;;  %v15320_v61 = vpack.c.bf16 %v12872_v38, %v12871_v37 }
 0x434   :  { %v13096_v53 = vpop.eup %13095  ;;  %10939 = vmatmul.mubr.msk.f32.vlgmr.msra.gmra.mrb[70].mxu0 %vm2575_vm3, %v2770_v42  ;;  %12904 = vrot.lane.b32.xlu0 %v17613_v26, %s13464_s9  ;;  %v15280_v33 = vpack.c.bf16 %v12862_v25, %v12861_v13  ;;  %17614 = vst [vmem:[#allocation47_spill] sm:$0xff] %v15320_v61  ;;  %v12877_v26 = vunpack.i.h.bf16 %v15134_v34 }
 0x435   :  { %v2771_v23 = vmul.f32 %v13096_v53, %v15104_v40  ;;  %12106 = vmatpush3.bf16.msra.mxu0 %v15247_v58  ;;  %3562 = vrot.lane.b32.xlu1 %v13425_v11, %s13467_s14  ;;  %v12846_v40 = vunpack.i.l.bf16 %v15124_v19  ;;  %v13427_v19 = vld [vmem:[%s17331_s1 + $0x18] sm:$0xff] }
 0x436   :  { %12107 = vmatprep.subr.bf16.mxu0 %v17596_v27  ;;  %10976 = vmatprep.mubr.msk.f32.mxu0 %vm13465_vm2, %v17598_v10 }
 0x437   :  { %10958 = vmatmul.mubr.msk.f32.vlgmr.msra.gmra.mrb[22].mxu1 %vm2575_vm3, %v2771_v23  ;;  %v15292_v4 = vpack.c.bf16 %v12847_v0, %v12846_v40  ;;  %v12876_v23 = vunpack.i.l.bf16 %v15134_v34  ;;  %v15339_v0 = vpack.c.bf16 %v12882_v56, %v12881_v44  ;;  %v12892_v40 = vunpack.i.h.bf16 %v15236_v55 }
 0x438   :  { %12118 = vmatpush3.bf16.msra.mxu1 %v15257_v30  ;;  %10995 = vmatprep.mubr.msk.f32.mxu1 %vm13465_vm2, %v17598_v10 }
 0x439   :  { %12119 = vmatprep.subr.bf16.mxu1 %v17596_v27  ;;  %3560 = vrot.lane.b32.xlu0 %v13426_v36, %s13467_s14  ;;  %17615 = vst [vmem:[#allocation48_spill] sm:$0xff] %v15339_v0  ;;  %v12891_v36 = vunpack.i.l.bf16 %v15236_v55  ;;  %v15344_v29 = vpack.c.bf16 %v12877_v26, %v12876_v23 }
 0x43a   :  { %12109 = vmatpush3.bf16.msra.mxu0 %v15268_v7  ;;  %3566 = vrot.lane.b32.xlu1 %v13427_v19, %s13467_s14  ;;  %v12886_v19 = vunpack.i.l.bf16 %v15234_v62 }
 0x43b   :  { %12110 = vmatprep.subr.bf16.mxu0 %v17596_v27  ;;  %17616 = vst [vmem:[#allocation49_spill] sm:$0xff] %v15344_v29 }
 0x43c   :  { %12121 = vmatpush3.bf16.msra.mxu1 %v15280_v33  ;;  %v15358_v62 = vpack.c.bf16 %v12887_v31, %v12886_v19  ;;  %v62_v31 = vld [vmem:[%s17335_s5 + $0x18] sm:$0xff] }
 0x43d   :  { %12122 = vmatprep.subr.bf16.mxu1 %v17596_v27  ;;  %3564 = vrot.lane.b32.xlu0 %v13428_v5, %s13467_s14 }
 0x43e   :  { %12112 = vmatpush3.bf16.msra.mxu0 %v15292_v4  ;;  %3570 = vrot.lane.b32.xlu1 %v13429_v48, %s13467_s14  ;;  %17618 = vst [vmem:[#allocation51_spill] sm:$0xff] %v15358_v62 }
 0x43f   :  { %12113 = vmatprep.subr.bf16.mxu0 %v17596_v27 }
 0x440   :  { %12124 = vmatpush3.bf16.msra.mxu1 %v15302_v52 }
 0x441   :  { %12125 = vmatprep.subr.bf16.mxu1 %v17596_v27  ;;  %3568 = vrot.lane.b32.xlu0 %v13430_v45, %s13467_s14 }
 0x442   :  { %12115 = vmatpush3.bf16.msra.mxu0 %v15312_v3  ;;  %3574 = vrot.lane.b32.xlu1 %v13431_v49, %s13467_s14  ;;  %v59_v49 = vld [vmem:[%s17335_s5] sm:$0xff] }
 0x443   :  { %12128 = vmatprep.subr.bf16.mxu0 %v17596_v27 }
 0x444   :  { %12127 = vmatpush3.bf16.msra.mxu1 %v15320_v61 }
 0x445   :  { %12140 = vmatprep.subr.bf16.mxu1 %v17596_v27  ;;  %3572 = vrot.lane.b32.xlu0 %v13432_v60, %s13467_s14  ;;  %v60_v60 = vld [vmem:[%s17335_s5 + $0x8] sm:$0xff] }
 0x476   :  { %v2753_v42 = vpop.xlane.xlu0 %2752 }
 0x477   :  { %13097 = vrcp.f32 %v2753_v42  ;;  %v2750_v53 = vpop.xlane.xlu1 %2749 }
 0x478   :  { %13099 = vrcp.f32 %v2750_v53 }
 0x47a   :  { %v12895_v34 = vpop.permute.xlu0 %12894 }
 0x47b   :  { %v12900_v9 = vpop.permute.xlu1 %12899  ;;  %v12897_v47 = vunpack.i.h.bf16 %v12895_v34  ;;  %v12896_v5 = vunpack.i.l.bf16 %v12895_v34 }
 0x47c   :  { %v12901_v55 = vunpack.i.l.bf16 %v12900_v9 }
 0x47d   :  { %v15368_v37 = vpack.c.bf16 %v12897_v47, %v12896_v5 }
 0x47f   :  { %17620 = vst [vmem:[#allocation53_spill] sm:$0xff] %v15368_v37 }
 0x481   :  { %v13098_v25 = vpop.eup %13097 }
 0x482   :  { %v13100_v13 = vpop.eup %13099  ;;  %v2773_v11 = vmul.f32 %v13098_v25, %v15165_v18  ;;  %v15353_v18 = vpack.c.bf16 %v12892_v40, %v12891_v36  ;;  %v15380_v25 = vpack.c.bf16 %v60_v60, %v59_v49  ;;  %v66_v49 = vld [vmem:[%s17335_s5 + $0x38] sm:$0xff] }
 0x483   :  { %v2772_v22 = vmul.f32 %v13100_v13, %v15170_v16  ;;  %v12902_v16 = vunpack.i.h.bf16 %v12900_v9 }
 0x484   :  { %10996 = vmatmul.mubr.msk.f32.vlgmr.msra.gmra.mrb[24].mxu1 %vm2575_vm3, %v2773_v11  ;;  %17617 = vst [vmem:[#allocation50_spill] sm:$0xff] %v15353_v18  ;;  %17621 = vst [vmem:[#allocation54_spill] sm:$0xff] %v15380_v25 }
 0x485   :  { %12142 = vmatpush3.bf16.msra.mxu1 %v15339_v0  ;;  %10977 = vmatmul.mubr.msk.f32.vlgmr.msra.gmra.mrb[72].mxu0 %vm2575_vm3, %v2772_v22  ;;  %v15365_v38 = vpack.c.bf16 %v12902_v16, %v12901_v55  ;;  %v61_v22 = vld [vmem:[%s17335_s5 + $0x10] sm:$0xff] }
 0x486   :  { %12130 = vmatpush3.bf16.msra.mxu0 %v15344_v29  ;;  %12143 = vmatprep.subr.bf16.mxu1 %v17596_v27  ;;  %v15399_v47 = vpack.c.bf16 %v62_v31, %v61_v22 }
 0x487   :  { %12131 = vmatprep.subr.bf16.mxu0 %v17596_v27  ;;  %11014 = vmatprep.mubr.msk.f32.mxu0 %vm13465_vm2, %v17598_v10  ;;  %17619 = vst [vmem:[#allocation52_spill] sm:$0xff] %v15365_v38 }
 0x488   :  { %11033 = vmatprep.mubr.msk.f32.mxu1 %vm13465_vm2, %v17598_v10  ;;  %17624 = vst [vmem:[#allocation57_spill] sm:$0xff] %v15399_v47 }
 0x489   :  { %12145 = vmatpush3.bf16.msra.mxu1 %v15353_v18 }
 0x48a   :  { %12133 = vmatpush3.bf16.msra.mxu0 %v15358_v62  ;;  %12146 = vmatprep.subr.bf16.mxu1 %v17596_v27 }
 0x48b   :  { %12134 = vmatprep.subr.bf16.mxu0 %v17596_v27 }
 0x48d   :  { %12148 = vmatpush3.bf16.msra.mxu1 %v15365_v38 }
 0x48e   :  { %12136 = vmatpush3.bf16.msra.mxu0 %v15368_v37  ;;  %12149 = vmatprep.subr.bf16.mxu1 %v17596_v27 }
 0x48f   :  { %12137 = vmatprep.subr.bf16.mxu0 %v17596_v27 }
 0x4ab   :  { %v2756_v48 = vpop.xlane.xlu0 %2755 }
 0x4ac   :  { %13101 = vrcp.f32 %v2756_v48  ;;  %v2759_v45 = vpop.xlane.xlu1 %2758  ;;  %v63_v48 = vld [vmem:[%s17335_s5 + $0x20] sm:$0xff] }
 0x4ad   :  { %13103 = vrcp.f32 %v2759_v45  ;;  %v64_v45 = vld [vmem:[%s17335_s5 + $0x28] sm:$0xff] }
 0x4af   :  { %v12905_v42 = vpop.permute.xlu0 %12904 }
 0x4b0   :  { %v12907_v53 = vunpack.i.h.bf16 %v12905_v42  ;;  %v12906_v56 = vunpack.i.l.bf16 %v12905_v42  ;;  %v12910_v44 = vpop.permute.xlu1 %12909  ;;  %v17627_v42 = vld [vmem:[#allocation30_spill] sm:$0xff] }
 0x4b1   :  { %v12912_v26 = vunpack.i.h.bf16 %v12910_v44  ;;  %v12911_v23 = vunpack.i.l.bf16 %v12910_v44 }
 0x4b2   :  { %v15382_v13 = vpack.c.bf16 %v12907_v53, %v12906_v56 }
 0x4b3   :  { %v15384_v11 = vpack.c.bf16 %v12912_v26, %v12911_v23  ;;  %v15395_v9 = vpop.permute.xlu0 %3560  ;;  %v17628_v23 = vld [vmem:[#allocation31_spill] sm:$0xff] }
 0x4b4   :  { %17622 = vst [vmem:[#allocation55_spill] sm:$0xff] %v15382_v13  ;;  %12139 = vmatpush3.bf16.msra.mxu0 %v15382_v13  ;;  %v15430_v53 = vpop.permute.xlu1 %3562 }
 0x4b5   :  { %17623 = vst [vmem:[#allocation56_spill] sm:$0xff] %v15384_v11  ;;  %v2869_v40 = vpop.f32.mrb[18].mxu1  ;;  %12151 = vmatpush3.bf16.msra.mxu1 %v15384_v11  ;;  %12153 = vmatprep.subr.bf16.mxu0 %v15380_v25 }
 0x4b6   :  { %v10902_v36 = vpop.f32.mrb[19].mxu1  ;;  %v13102_v19 = vpop.eup %13101  ;;  %v3584_v5 = vsel %vm151_vm0, %v2869_v40, %v15395_v9 }
 0x4b7   :  { %v13104_v34 = vpop.eup %13103  ;;  %v2774_v16 = vmul.f32 %v13102_v19, %v15226_v57  ;;  %v15414_v57 = vpack.c.bf16 %v64_v45, %v63_v48  ;;  %v15439_v40 = vpop.permute.xlu0 %3564 }
 0x4b8   :  { %v2775_v55 = vmul.f32 %v13104_v34, %v15228_v35  ;;  %v65_v35 = vld [vmem:[%s17335_s5 + $0x30] sm:$0xff]  ;;  %v15441_v22 = vpop.permute.xlu1 %3566 }
 0x4b9   :  { %11015 = vmatmul.mubr.msk.f32.vlgmr.msra.gmra.mrb[74].mxu0 %vm2575_vm3, %v2774_v16  ;;  %17625 = vst [vmem:[#allocation58_spill] sm:$0xff] %v15414_v57  ;;  %v15424_v60 = vpack.c.bf16 %v66_v49, %v65_v35 }
 0x4ba   :  { %11034 = vmatmul.mubr.msk.f32.vlgmr.msra.gmra.mrb[26].mxu1 %vm2575_vm3, %v2775_v55  ;;  %11052 = vmatprep.mubr.msk.f32.mxu0 %vm2575_vm3, %v3584_v5 }
 0x4bb   :  { %12155 = vmatpush3.bf16.msra.mxu0 %v15380_v25  ;;  %17626 = vst [vmem:[#allocation59_spill] sm:$0xff] %v15424_v60  ;;  %v15449_v5 = vpop.permute.xlu0 %3568 }
 0x4bc   :  { %12157 = vmatprep.subr.bf16.mxu0 %v15399_v47  ;;  %v15451_v48 = vpop.permute.xlu1 %3570 }
 0x4bf   :  { %12159 = vmatpush3.bf16.msra.mxu0 %v15399_v47 }
 0x4c0   :  { %12161 = vmatprep.subr.bf16.mxu0 %v15414_v57 }
 0x4c3   :  { %12163 = vmatpush3.bf16.msra.mxu0 %v15414_v57 }
 0x4c4   :  { %12165 = vmatprep.subr.bf16.mxu0 %v15424_v60 }
 0x4c7   :  { %12167 = vmatpush3.bf16.msra.mxu0 %v15424_v60 }
 0x4c8   :  { %12193 = vmatprep.subr.bf16.mxu0 %v17627_v42 }
 0x4d5   :  { %v2966_v56 = vpop.f32.mrb[20].mxu1 }
 0x4d6   :  { %v3585_v44 = vsel %vm151_vm0, %v2966_v56, %v15430_v53  ;;  %v10921_v26 = vpop.f32.mrb[21].mxu1 }
 0x4d7   :  { %11053 = vmatmul.mubr.msk.f32.vlgmr.msra.gmra.mrb[76].mxu0 %vm2575_vm3, %v3585_v44 }
 0x4d8   :  { %12195 = vmatpush3.bf16.msra.mxu0 %v17627_v42 }
 0x4d9   :  { %12197 = vmatprep.subr.bf16.mxu0 %v17628_v23 }
 0x4dc   :  { %12199 = vmatpush3.bf16.msra.mxu0 %v17628_v23 }
 0x4dd   :  { %12216 = vmatprep.subr.bf16.mxu0 %v17596_v27 }
 0x507   :  { %v3063_v36 = vpop.f32.mrb[70].mxu0 }
 0x508   :  { %v10940_v31 = vpop.f32.mrb[71].mxu0  ;;  %v3586_v19 = vsel %vm151_vm0, %v3063_v36, %v15439_v40  ;;  %v15459_v36 = vpop.permute.xlu0 %3572 }
 0x509   :  { %11055 = vmatprep.mubr.msk.f32.mxu0 %vm2575_vm3, %v3586_v19  ;;  %v15461_v31 = vpop.permute.xlu1 %3574 }
 0x50a   :  { %v3160_v34 = vpop.f32.mrb[22].mxu1 }
 0x50b   :  { %v3587_v16 = vsel %vm151_vm0, %v3160_v34, %v15441_v22  ;;  %v10959_v55 = vpop.f32.mrb[23].mxu1 }
 0x50c   :  { %11056 = vmatmul.mubr.msk.f32.gmra.mrb[78].mxu0 %vm2575_vm3, %v3587_v16 }
 0x557   :  { %v3354_v45 = vpop.f32.mrb[24].mxu1 }
 0x558   :  { %v3257_v35 = vpop.f32.mrb[72].mxu0  ;;  %v10997_v49 = vpop.f32.mrb[25].mxu1  ;;  %v3589_v26 = vsel %vm151_vm0, %v3354_v45, %v15451_v48  ;;  %v9512_v45 = vld [vmem:[%s17332_s2 + $0x2] ss:$0 sm:$0xff] }
 0x559   :  { %v10978_v56 = vpop.f32.mrb[73].mxu0  ;;  %v3588_v44 = vsel %vm151_vm0, %v3257_v35, %v15449_v5 }
 0x55a   :  { %11058 = vmatprep.mubr.msk.f32.mxu0 %vm2575_vm3, %v3588_v44 }
 0x55b   :  { %11059 = vmatmul.mubr.msk.f32.gmra.mrb[80].mxu0 %vm2575_vm3, %v3589_v26 }
 0x58c   :  { %v3451_v19 = vpop.f32.mrb[74].mxu0 }
 0x58d   :  { %v3590_v34 = vsel %vm151_vm0, %v3451_v19, %v15459_v36  ;;  %v11016_v16 = vpop.f32.mrb[75].mxu0  ;;  %v3548_v55 = vpop.f32.mrb[26].mxu1 }
 0x58e   :  { %v3591_v35 = vsel %vm151_vm0, %v3548_v55, %v15461_v31  ;;  %v11035_v49 = vpop.f32.mrb[27].mxu1  ;;  %11061 = vmatprep.mubr.msk.f32.mxu0 %vm2575_vm3, %v3590_v34 }
 0x58f   :  { %11062 = vmatmul.mubr.msk.f32.gmra.mrb[82].mxu0 %vm2575_vm3, %v3591_v35 }
 0x5aa   :  { %v11054_v56 = vpop.f32.mrb[76].mxu0 }
 0x5ab   :  { %v15472_v44 = vadd.f32 %v11054_v56, %v9512_v45  ;;  %v3682_v26 = vpop.f32.mrb[77].mxu0 }
 0x5ac   :  { %v15474_v23 = vadd.f32 %v9512_v45, %v3682_v26 }
 0x5ad   :  { %3779 = vrot.lane.b32.xlu1 %v15472_v44, %s13467_s14  ;;  %v9677_v35 = vmul.f32 -1.442695, %v15472_v44 }
 0x5ae   :  { %3777 = vrot.lane.b32.xlu0 %v15474_v23, %s13467_s14  ;;  %v9676_v49 = vmul.f32 -1.442695, %v15474_v23 }
 0x5af   :  { %13105 = vpow2.f32 %v9677_v35 }
 0x5b0   :  { %13107 = vpow2.f32 %v9676_v49 }
 0x5b9   :  { %v13106_v56 = vpop.eup %13105 }
 0x5ba   :  { %v13108_v26 = vpop.eup %13107  ;;  %v3746_v42 = vadd.f32 1.0, %v13106_v56 }
 0x5bc   :  { %13109 = vrcp.f32 %v3746_v42 }
 0x5df   :  { %v11057_v19 = vpop.f32.mrb[78].mxu0 }
 0x5e0   :  { %v15480_v34 = vadd.f32 %v11057_v19, %v9512_v45  ;;  %v3692_v16 = vpop.f32.mrb[79].mxu0  ;;  %v3745_v19 = vadd.f32 1.0, %v13108_v26 }
 0x5e1   :  { %v15482_v55 = vadd.f32 %v9512_v45, %v3692_v16  ;;  %v15490_v16 = vpop.eup %13109 }
 0x5e2   :  { %3783 = vrot.lane.b32.xlu1 %v15480_v34, %s13467_s14  ;;  %13111 = vrcp.f32 %v3745_v19 }
 0x5e3   :  { %3781 = vrot.lane.b32.xlu0 %v15482_v55, %s13467_s14 }
 0x5ec   :  { %v15492_v57 = vpop.eup %13111 }
 0x61f   :  { %v3780_v60 = vpop.permute.xlu1 %3779 }
 0x620   :  { %v3802_v47 = vmul.f32 %v15490_v16, %v3780_v60  ;;  %v3778_v25 = vpop.permute.xlu0 %3777  ;;  %v9679_v60 = vmul.f32 -1.442695, %v15480_v34 }
 0x621   :  { %v3801_v13 = vmul.f32 %v15492_v57, %v3778_v25  ;;  %v9678_v25 = vmul.f32 -1.442695, %v15482_v55 }
 0x622   :  { %3819 = vrot.lane.b32.xlu1 %v3802_v47, %s13468_s21  ;;  %13113 = vpow2.f32 %v9679_v60 }
 0x623   :  { %3817 = vrot.lane.b32.xlu0 %v3801_v13, %s13468_s21  ;;  %13115 = vpow2.f32 %v9678_v25 }
 0x62c   :  { %v13114_v47 = vpop.eup %13113 }
 0x62d   :  { %v13116_v13 = vpop.eup %13115  ;;  %v3748_v26 = vadd.f32 1.0, %v13114_v47 }
 0x62e   :  { %v11060_v35 = vpop.f32.mrb[80].mxu0  ;;  %v3747_v19 = vadd.f32 1.0, %v13116_v13 }
 0x62f   :  { %v15498_v49 = vadd.f32 %v11060_v35, %v9512_v45  ;;  %v3702_v42 = vpop.f32.mrb[81].mxu0  ;;  %13117 = vrcp.f32 %v3748_v26 }
 0x630   :  { %v15500_v56 = vadd.f32 %v9512_v45, %v3702_v42  ;;  %13119 = vrcp.f32 %v3747_v19 }
 0x631   :  { %3787 = vrot.lane.b32.xlu1 %v15498_v49, %s13467_s14  ;;  %v9681_v26 = vmul.f32 -1.442695, %v15498_v49 }
 0x632   :  { %3785 = vrot.lane.b32.xlu0 %v15500_v56, %s13467_s14 }
 0x633   :  { %13121 = vpow2.f32 %v9681_v26 }
 0x639   :  { %v15508_v35 = vpop.eup %13117 }
 0x63a   :  { %v15510_v11 = vpop.eup %13119 }
 0x654   :  { %v3784_v42 = vpop.permute.xlu1 %3783 }
 0x655   :  { %v3804_v37 = vmul.f32 %v15508_v35, %v3784_v42  ;;  %v3782_v38 = vpop.permute.xlu0 %3781 }
 0x656   :  { %v3803_v62 = vmul.f32 %v15510_v11, %v3782_v38  ;;  %v9680_v38 = vmul.f32 -1.442695, %v15500_v56 }
 0x657   :  { %3823 = vrot.lane.b32.xlu1 %v3804_v37, %s13468_s21  ;;  %v13122_v37 = vpop.eup %13121 }
 0x658   :  { %3821 = vrot.lane.b32.xlu0 %v3803_v62, %s13468_s21  ;;  %13123 = vpow2.f32 %v9680_v38  ;;  %v3750_v19 = vadd.f32 1.0, %v13122_v37 }
 0x65a   :  { %13125 = vrcp.f32 %v3750_v19 }
 0x662   :  { %v11063_v60 = vpop.f32.mrb[82].mxu0  ;;  %v13124_v62 = vpop.eup %13123 }
 0x663   :  { %v15516_v25 = vadd.f32 %v11063_v60, %v9512_v45  ;;  %v3712_v47 = vpop.f32.mrb[83].mxu0  ;;  %v3749_v42 = vadd.f32 1.0, %v13124_v62 }
 0x664   :  { %v15518_v13 = vadd.f32 %v9512_v45, %v3712_v47  ;;  %v15528_v29 = vpop.eup %13125 }
 0x665   :  { %3791 = vrot.lane.b32.xlu1 %v15516_v25, %s13467_s14  ;;  %13127 = vrcp.f32 %v3749_v42 }
 0x666   :  { %3789 = vrot.lane.b32.xlu0 %v15518_v13, %s13467_s14 }
 0x66f   :  { %v15530_v61 = vpop.eup %13127 }
 0x694   :  { %v3820_v60 = vpop.permute.xlu1 %3819 }
 0x695   :  { %v3818_v45 = vpop.permute.xlu0 %3817  ;;  %v3842_v47 = vadd.f32 %v3820_v60, %v15472_v44 }
 0x696   :  { %v3841_v18 = vadd.f32 %v3818_v45, %v15474_v23  ;;  %v9682_v23 = vmul.f32 -1.442695, %v15518_v13 }
 0x697   :  { %13129 = vtanh.f32 %v3842_v47 }
 0x698   :  { %13131 = vtanh.f32 %v3841_v18  ;;  %v9683_v18 = vmul.f32 -1.442695, %v15516_v25 }
 0x69a   :  { %13133 = vpow2.f32 %v9683_v18 }
 0x69b   :  { %13135 = vpow2.f32 %v9682_v23 }
 0x6a1   :  { %v13130_v62 = vpop.eup %13129 }
 0x6a2   :  { %v13132_v44 = vpop.eup %13131 }
 0x6a3   :  { %v3788_v0 = vpop.permute.xlu1 %3787 }
 0x6a4   :  { %v3806_v26 = vmul.f32 %v15528_v29, %v3788_v0  ;;  %v3786_v38 = vpop.permute.xlu0 %3785  ;;  %v13134_v0 = vpop.eup %13133 }
 0x6a5   :  { %v3805_v37 = vmul.f32 %v15530_v61, %v3786_v38  ;;  %v13136_v19 = vpop.eup %13135  ;;  %v3752_v42 = vadd.f32 1.0, %v13134_v0 }
 0x6a6   :  { %3827 = vrot.lane.b32.xlu1 %v3806_v26, %s13468_s21  ;;  %v3751_v60 = vadd.f32 1.0, %v13136_v19 }
 0x6a7   :  { %3825 = vrot.lane.b32.xlu0 %v3805_v37, %s13468_s21  ;;  %13137 = vrcp.f32 %v3752_v42 }
 0x6a8   :  { %13139 = vrcp.f32 %v3751_v60 }
 0x6aa   :  { %3875 = vrot.lane.b32.xlu1 %v13130_v62, %s13464_s9 }
 0x6ab   :  { %3873 = vrot.lane.b32.xlu0 %v13132_v44, %s13464_s9 }
 0x6b1   :  { %v15542_v37 = vpop.eup %13137 }
 0x6b2   :  { %v15544_v44 = vpop.eup %13139 }
 0x6c9   :  { %v3824_v45 = vpop.permute.xlu1 %3823 }
 0x6ca   :  { %v3822_v47 = vpop.permute.xlu0 %3821  ;;  %v3844_v26 = vadd.f32 %v3824_v45, %v15480_v34 }
 0x6cb   :  { %v3843_v38 = vadd.f32 %v3822_v47, %v15482_v55  ;;  %v3858_v47 = vsub.f32 1.0, %v15490_v16 }
 0x6cc   :  { %13141 = vtanh.f32 %v3844_v26 }
 0x6cd   :  { %13143 = vtanh.f32 %v3843_v38  ;;  %v3857_v38 = vsub.f32 1.0, %v15492_v57 }
 0x6d6   :  { %v13142_v19 = vpop.eup %13141 }
 0x6d7   :  { %v3792_v62 = vpop.permute.xlu1 %3791  ;;  %v13144_v34 = vpop.eup %13143 }
 0x6d8   :  { %v3808_v18 = vmul.f32 %v15542_v37, %v3792_v62  ;;  %v3790_v23 = vpop.permute.xlu0 %3789  ;;  %v3906_v62 = vmul.f32 %v15490_v16, %v15430_v53 }
 0x6d9   :  { %v3807_v0 = vmul.f32 %v15544_v44, %v3790_v23 }
 0x6da   :  { %3831 = vrot.lane.b32.xlu1 %v3808_v18, %s13468_s21 }
 0x6db   :  { %3829 = vrot.lane.b32.xlu0 %v3807_v0, %s13468_s21  ;;  %v3905_v0 = vmul.f32 %v15492_v57, %v15395_v9  ;;  %v3860_v57 = vsub.f32 1.0, %v15508_v35 }
 0x6de   :  { %3879 = vrot.lane.b32.xlu1 %v13142_v19, %s13464_s9 }
 0x6df   :  { %3877 = vrot.lane.b32.xlu0 %v13144_v34, %s13464_s9 }
 0x718   :  { %v3828_v55 = vpop.permute.xlu1 %3827 }
 0x719   :  { %v3846_v42 = vadd.f32 %v3828_v55, %v15498_v49  ;;  %v3826_v60 = vpop.permute.xlu0 %3825 }
 0x71a   :  { %v3845_v45 = vadd.f32 %v3826_v60, %v15500_v56 }
 0x71b   :  { %13145 = vtanh.f32 %v3846_v42 }
 0x71c   :  { %13147 = vtanh.f32 %v3845_v45  ;;  %v3876_v26 = vpop.permute.xlu1 %3875  ;;  %v3908_v45 = vmul.f32 %v15508_v35, %v15441_v22 }
 0x71d   :  { %v3898_v18 = vmul.f32 %v3876_v26, %v3858_v47  ;;  %v3874_v23 = vpop.permute.xlu0 %3873  ;;  %v3859_v26 = vsub.f32 1.0, %v15510_v11 }
 0x71e   :  { %v3897_v19 = vmul.f32 %v3874_v23, %v3857_v38 }
 0x71f   :  { %v15560_v49 = vadd.f32 %v3906_v62, %v3898_v18 }
 0x720   :  { %v15562_v34 = vadd.f32 %v3905_v0, %v3897_v19  ;;  %v3862_v19 = vsub.f32 1.0, %v15528_v29 }
 0x721   :  { %3931 = vrot.lane.b32.xlu1 %v15560_v49, %s13464_s9 }
 0x722   :  { %3929 = vrot.lane.b32.xlu0 %v15562_v34, %s13464_s9 }
 0x725   :  { %v13146_v56 = vpop.eup %13145 }
 0x726   :  { %v13148_v55 = vpop.eup %13147  ;;  %3883 = vrot.lane.b32.xlu1 %v13146_v56, %s13464_s9 }
 0x727   :  { %3881 = vrot.lane.b32.xlu0 %v13148_v55, %s13464_s9 }
 0x74c   :  { %v3832_v53 = vpop.permute.xlu1 %3831 }
 0x74d   :  { %v3830_v16 = vpop.permute.xlu0 %3829  ;;  %v3848_v42 = vadd.f32 %v3832_v53, %v15516_v25 }
 0x74e   :  { %v3847_v9 = vadd.f32 %v3830_v16, %v15518_v13  ;;  %v3907_v13 = vmul.f32 %v15510_v11, %v15439_v40  ;;  %v3861_v11 = vsub.f32 1.0, %v15530_v61  ;;  %v3910_v40 = vmul.f32 %v15528_v29, %v15451_v48 }
 0x74f   :  { %v3909_v16 = vmul.f32 %v15530_v61, %v15449_v5  ;;  %v3911_v29 = vmul.f32 %v15544_v44, %v15459_v36  ;;  %v3864_v61 = vsub.f32 1.0, %v15542_v37 }
 0x750   :  { %13149 = vtanh.f32 %v3847_v9  ;;  %v3880_v60 = vpop.permute.xlu1 %3879 }
 0x751   :  { %v3900_v47 = vmul.f32 %v3880_v60, %v3860_v57  ;;  %v3878_v38 = vpop.permute.xlu0 %3877  ;;  %13151 = vtanh.f32 %v3848_v42  ;;  %v3863_v60 = vsub.f32 1.0, %v15544_v44 }
 0x752   :  { %v3899_v18 = vmul.f32 %v3878_v38, %v3859_v26  ;;  %v3912_v26 = vmul.f32 %v15542_v37, %v15461_v31 }
 0x753   :  { %v15576_v62 = vadd.f32 %v3908_v45, %v3900_v47 }
 0x754   :  { %v15582_v25 = vadd.f32 %v3907_v13, %v3899_v18 }
 0x755   :  { %3935 = vrot.lane.b32.xlu0 %v15576_v62, %s13464_s9 }
 0x759   :  { %3933 = vrot.lane.b32.xlu0 %v15582_v25, %s13464_s9 }
 0x75a   :  { %v13150_v22 = vpop.eup %13149 }
 0x75b   :  { %3885 = vrot.lane.b32.xlu1 %v13150_v22, %s13464_s9  ;;  %v13152_v35 = vpop.eup %13151 }
 0x75f   :  { %3887 = vrot.lane.b32.xlu1 %v13152_v35, %s13464_s9 }
 0x793   :  { %v3932_v23 = vpop.permute.xlu1 %3931 }
 0x794   :  { %v3930_v0 = vpop.permute.xlu0 %3929  ;;  %v3956_v35 = vsel %vm151_vm0, %v3932_v23, 0.0 }
 0x795   :  { %v3953_v36 = vsel %vm151_vm0, %v3930_v0, 0.0 }
 0x798   :  { %v3884_v56 = vpop.permute.xlu1 %3883 }
 0x799   :  { %v3902_v55 = vmul.f32 %v3884_v56, %v3862_v19  ;;  %v3882_v53 = vpop.permute.xlu0 %3881 }
 0x79a   :  { %v3901_v9 = vmul.f32 %v3882_v53, %v3861_v11 }
 0x79b   :  { %v15594_v57 = vadd.f32 %v3910_v40, %v3902_v55 }
 0x79c   :  { %v15596_v42 = vadd.f32 %v3909_v16, %v3901_v9 }
 0x79d   :  { %3939 = vrot.lane.b32.xlu1 %v15594_v57, %s13464_s9 }
 0x79e   :  { %3937 = vrot.lane.b32.xlu0 %v15596_v42, %s13464_s9 }
 0x7c7   :  { %v3936_v13 = vpop.permute.xlu0 %3935 }
 0x7c8   :  { %v3962_v31 = vsel %vm151_vm0, %v3936_v13, 0.0 }
 0x7cb   :  { %v3934_v44 = vpop.permute.xlu0 %3933 }
 0x7cc   :  { %v3959_v22 = vsel %vm151_vm0, %v3934_v44, 0.0 }
 0x7cd   :  { %v3886_v45 = vpop.permute.xlu1 %3885 }
 0x7ce   :  { %v3903_v48 = vmul.f32 %v3886_v45, %v3863_v60 }
 0x7d0   :  { %v15605_v47 = vadd.f32 %v3911_v29, %v3903_v48 }
 0x7d1   :  { %v3888_v5 = vpop.permute.xlu1 %3887 }
 0x7d2   :  { %v3904_v38 = vmul.f32 %v3888_v5, %v3864_v61  ;;  %3941 = vrot.lane.b32.xlu0 %v15605_v47, %s13464_s9 }
 0x7d4   :  { %v15612_v18 = vadd.f32 %v3912_v26, %v3904_v38 }
 0x7d6   :  { %3943 = vrot.lane.b32.xlu1 %v15612_v18, %s13464_s9 }
 0x7f1   :  { %3954 = vadd.xlane.f32.xlu0 %v3953_v36 }
 0x7f5   :  { %3960 = vadd.xlane.f32.xlu0 %v3959_v22 }
 0x7fa   :  { %3957 = vadd.xlane.f32.xlu1 %v3956_v35 }
 0x7fe   :  { %3963 = vadd.xlane.f32.xlu1 %v3962_v31 }
 0x80f   :  { %v3940_v37 = vpop.permute.xlu1 %3939 }
 0x810   :  { %v3938_v19 = vpop.permute.xlu0 %3937  ;;  %v3968_v56 = vsel %vm151_vm0, %v3940_v37, 0.0 }
 0x811   :  { %3969 = vadd.xlane.f32.xlu1 %v3968_v56  ;;  %v3965_v11 = vsel %vm151_vm0, %v3938_v19, 0.0 }
 0x812   :  { %3966 = vadd.xlane.f32.xlu0 %v3965_v11 }
 0x844   :  { %v3942_v0 = vpop.permute.xlu0 %3941 }
 0x845   :  { %v3971_v48 = vsel %vm151_vm0, %v3942_v0, 0.0 }
 0x848   :  { %v3944_v16 = vpop.permute.xlu1 %3943 }
 0x849   :  { %v3974_v38 = vsel %vm151_vm0, %v3944_v16, 0.0 }
 0x87e   :  { %v3955_v40 = vpop.xlane.xlu0 %3954 }
 0x87f   :  { %v3977_v55 = vmul.f32 0.03125, %v3955_v40 }
 0x881   :  { %v15623_v53 = vsub.f32 %v15562_v34, %v3977_v55 }
 0x882   :  { %v3961_v61 = vpop.xlane.xlu0 %3960 }
 0x883   :  { %v3993_v23 = vmul.f32 %v15623_v53, %v15623_v53  ;;  %v3979_v5 = vmul.f32 0.03125, %v3961_v61 }
 0x885   :  { %4009 = vrot.lane.b32.xlu0 %v3993_v23, %s13464_s9  ;;  %v15637_v13 = vsub.f32 %v15582_v25, %v3979_v5 }
 0x887   :  { %v3958_v9 = vpop.xlane.xlu1 %3957  ;;  %v3995_v22 = vmul.f32 %v15637_v13, %v15637_v13 }
 0x888   :  { %v3978_v60 = vmul.f32 0.03125, %v3958_v9 }
 0x88a   :  { %v15629_v45 = vsub.f32 %v15560_v49, %v3978_v60 }
 0x88b   :  { %v3964_v44 = vpop.xlane.xlu1 %3963 }
 0x88c   :  { %v3994_v29 = vmul.f32 %v15629_v45, %v15629_v45  ;;  %v3980_v31 = vmul.f32 0.03125, %v3964_v44 }
 0x88e   :  { %4011 = vrot.lane.b32.xlu1 %v3994_v29, %s13464_s9  ;;  %v15648_v56 = vsub.f32 %v15576_v62, %v3980_v31 }
 0x890   :  { %v3996_v0 = vmul.f32 %v15648_v56, %v15648_v56 }
 0x89e   :  { %v3970_v37 = vpop.xlane.xlu1 %3969 }
 0x89f   :  { %v3967_v26 = vpop.xlane.xlu0 %3966  ;;  %v3982_v11 = vmul.f32 0.03125, %v3970_v37 }
 0x8a0   :  { %v3981_v36 = vmul.f32 0.03125, %v3967_v26 }
 0x8a1   :  { %v15654_v40 = vsub.f32 %v15594_v57, %v3982_v11 }
 0x8a2   :  { %v15642_v35 = vsub.f32 %v15596_v42, %v3981_v36 }
 0x8a3   :  { %v3998_v55 = vmul.f32 %v15654_v40, %v15654_v40 }
 0x8a4   :  { %3972 = vadd.xlane.f32.xlu0 %v3971_v48  ;;  %v3997_v19 = vmul.f32 %v15642_v35, %v15642_v35 }
 0x8b2   :  { %3975 = vadd.xlane.f32.xlu1 %v3974_v38 }
 0x8ba   :  { %4013 = vrot.lane.b32.xlu0 %v3995_v22, %s13464_s9 }
 0x8be   :  { %4017 = vrot.lane.b32.xlu0 %v3997_v19, %s13464_s9 }
 0x8c3   :  { %4015 = vrot.lane.b32.xlu1 %v3996_v0, %s13464_s9 }
 0x8c7   :  { %4019 = vrot.lane.b32.xlu1 %v3998_v55, %s13464_s9 }
 0x8f7   :  { %v4010_v16 = vpop.permute.xlu0 %4009 }
 0x8f8   :  { %v4033_v23 = vsel %vm151_vm0, %v4010_v16, 0.0 }
 0x8f9   :  { %4034 = vadd.xlane.f32.xlu0 %v4033_v23 }
 0x900   :  { %v4012_v9 = vpop.permute.xlu1 %4011 }
 0x901   :  { %v4036_v60 = vsel %vm151_vm0, %v4012_v9, 0.0 }
 0x902   :  { %4037 = vadd.xlane.f32.xlu1 %v4036_v60 }
 0x931   :  { %v3973_v29 = vpop.xlane.xlu0 %3972 }
 0x932   :  { %v3983_v26 = vmul.f32 0.03125, %v3973_v29  ;;  %v67_v29 = vld [vmem:[%s17336_s6] sm:$0xff] }
 0x934   :  { %v15665_v44 = vsub.f32 %v15605_v47, %v3983_v26  ;;  %v70_v26 = vld [vmem:[%s17336_s6 + $0x18] sm:$0xff] }
 0x935   :  { %v4014_v48 = vpop.permute.xlu0 %4013 }
 0x936   :  { %v4039_v61 = vsel %vm151_vm0, %v4014_v48, 0.0  ;;  %v3999_v22 = vmul.f32 %v15665_v44, %v15665_v44  ;;  %v68_v48 = vld [vmem:[%s17336_s6 + $0x8] sm:$0xff] }
 0x937   :  { %4040 = vadd.xlane.f32.xlu0 %v4039_v61  ;;  %v15684_v61 = vpack.c.bf16 %v68_v48, %v67_v29 }
 0x939   :  { %v4018_v11 = vpop.permute.xlu0 %4017  ;;  %17629 = vst [vmem:[#allocation60_spill] sm:$0xff] %v15684_v61  ;;  %12169 = vmatprep.subr.bf16.mxu1 %v15684_v61 }
 0x93a   :  { %v4045_v0 = vsel %vm151_vm0, %v4018_v11, 0.0  ;;  %12171 = vmatpush3.bf16.msra.mxu1 %v15684_v61 }
 0x93f   :  { %v3976_v5 = vpop.xlane.xlu1 %3975 }
 0x940   :  { %v3984_v31 = vmul.f32 0.03125, %v3976_v5  ;;  %v69_v5 = vld [vmem:[%s17336_s6 + $0x10] sm:$0xff] }
 0x942   :  { %v15671_v37 = vsub.f32 %v15612_v18, %v3984_v31 }
 0x943   :  { %v4016_v38 = vpop.permute.xlu1 %4015 }
 0x944   :  { %v4042_v36 = vsel %vm151_vm0, %v4016_v38, 0.0  ;;  %v4000_v19 = vmul.f32 %v15671_v37, %v15671_v37  ;;  %v15693_v38 = vpack.c.bf16 %v70_v26, %v69_v5 }
 0x945   :  { %4043 = vadd.xlane.f32.xlu1 %v4042_v36 }
 0x946   :  { %17630 = vst [vmem:[#allocation61_spill] sm:$0xff] %v15693_v38  ;;  %12173 = vmatprep.subr.bf16.mxu1 %v15693_v38 }
 0x947   :  { %v4020_v55 = vpop.permute.xlu1 %4019  ;;  %12175 = vmatpush3.bf16.msra.mxu1 %v15693_v38 }
 0x948   :  { %v4048_v16 = vsel %vm151_vm0, %v4020_v55, 0.0 }
 0x94d   :  { %4021 = vrot.lane.b32.xlu0 %v3999_v22, %s13464_s9 }
 0x956   :  { %4023 = vrot.lane.b32.xlu1 %v4000_v19, %s13464_s9 }
 0x96c   :  { %4046 = vadd.xlane.f32.xlu0 %v4045_v0 }
 0x97a   :  { %4049 = vadd.xlane.f32.xlu1 %v4048_v16 }
 0x986   :  { %v4035_v23 = vpop.xlane.xlu0 %4034 }
 0x987   :  { %v4057_v9 = vmul.f32 0.03125, %v4035_v23 }
 0x989   :  { %v4065_v60 = vadd.f32 1e-05, %v4057_v9 }
 0x98b   :  { %13153 = vrsqrt.f32 %v4065_v60 }
 0x98f   :  { %v4038_v36 = vpop.xlane.xlu1 %4037 }
 0x990   :  { %v4058_v22 = vmul.f32 0.03125, %v4038_v36 }
 0x992   :  { %v4066_v31 = vadd.f32 1e-05, %v4058_v22 }
 0x994   :  { %13155 = vrsqrt.f32 %v4066_v31 }
 0x995   :  { %v13154_v19 = vpop.eup %13153 }
 0x996   :  { %v4081_v11 = vmul.f32 %v13154_v19, %v15623_v53 }
 0x998   :  { %4097 = vrot.lane.b32.xlu0 %v4081_v11, %s13464_s9 }
 0x99e   :  { %v13156_v0 = vpop.eup %13155 }
 0x99f   :  { %v4082_v55 = vmul.f32 %v13156_v0, %v15629_v45 }
 0x9a1   :  { %4099 = vrot.lane.b32.xlu1 %v4082_v55, %s13464_s9 }
 0x9c4   :  { %v4041_v16 = vpop.xlane.xlu0 %4040 }
 0x9c5   :  { %v4059_v9 = vmul.f32 0.03125, %v4041_v16 }
 0x9c7   :  { %v4067_v29 = vadd.f32 1e-05, %v4059_v9 }
 0x9c8   :  { %v4022_v23 = vpop.permute.xlu0 %4021 }
 0x9c9   :  { %v4051_v60 = vsel %vm151_vm0, %v4022_v23, 0.0  ;;  %13157 = vrsqrt.f32 %v4067_v29 }
 0x9ca   :  { %4052 = vadd.xlane.f32.xlu0 %v4051_v60 }
 0x9d2   :  { %v4044_v48 = vpop.xlane.xlu1 %4043 }
 0x9d3   :  { %v4060_v5 = vmul.f32 0.03125, %v4044_v48  ;;  %v13158_v22 = vpop.eup %13157 }
 0x9d4   :  { %v4083_v45 = vmul.f32 %v13158_v22, %v15637_v13  ;;  %v71_v13 = vld [vmem:[%s17337_s7] sm:$0xff] }
 0x9d5   :  { %v4068_v26 = vadd.f32 1e-05, %v4060_v5 }
 0x9d6   :  { %v4024_v36 = vpop.permute.xlu1 %4023 }
 0x9d7   :  { %v4054_v53 = vsel %vm151_vm0, %v4024_v36, 0.0  ;;  %13159 = vrsqrt.f32 %v4068_v26 }
 0x9d8   :  { %4055 = vadd.xlane.f32.xlu1 %v4054_v53 }
 0x9e0   :  { %4101 = vrot.lane.b32.xlu0 %v4083_v45, %s13464_s9 }
 0x9e1   :  { %v13160_v31 = vpop.eup %13159 }
 0x9e2   :  { %v4084_v19 = vmul.f32 %v13160_v31, %v15648_v56  ;;  %v72_v56 = vld [vmem:[%s17337_s7 + $0x8] sm:$0xff]  ;;  %v73_v31 = vld [vmem:[%s17337_s7 + $0x10] sm:$0xff] }
 0x9e3   :  { %v15717_v5 = vpack.c.bf16 %v72_v56, %v71_v13 }
 0x9e5   :  { %12177 = vmatprep.subr.bf16.mxu1 %v15717_v5 }
 0x9e9   :  { %4103 = vrot.lane.b32.xlu1 %v4084_v19, %s13464_s9  ;;  %v74_v19 = vld [vmem:[%s17337_s7 + $0x18] sm:$0xff] }
 0x9f9   :  { %v4047_v11 = vpop.xlane.xlu0 %4046 }
 0x9fa   :  { %v4061_v0 = vmul.f32 0.03125, %v4047_v11 }
 0x9fc   :  { %v4069_v55 = vadd.f32 1e-05, %v4061_v0  ;;  %v15730_v0 = vpack.c.bf16 %v74_v19, %v73_v31  ;;  %v9513_v31 = vld [vmem:[%s17332_s2 + $0x3] ss:$0 sm:$0xff] }
 0x9fe   :  { %13161 = vrsqrt.f32 %v4069_v55  ;;  %v76_v55 = vld [vmem:[%s17337_s7 + $0x28] sm:$0xff] }
 0xa07   :  { %v4050_v16 = vpop.xlane.xlu1 %4049 }
 0xa08   :  { %v13162_v23 = vpop.eup %13161  ;;  %v4062_v9 = vmul.f32 0.03125, %v4050_v16  ;;  %v77_v16 = vld [vmem:[%s17337_s7 + $0x30] sm:$0xff] }
 0xa09   :  { %v4085_v60 = vmul.f32 %v13162_v23, %v15642_v35 }
 0xa0a   :  { %v4070_v29 = vadd.f32 1e-05, %v4062_v9  ;;  %v4098_v48 = vpop.permute.xlu0 %4097  ;;  %v78_v9 = vld [vmem:[%s17337_s7 + $0x38] sm:$0xff] }
 0xa0b   :  { %4105 = vrot.lane.b32.xlu0 %v4085_v60, %s13464_s9  ;;  %11072 = vmatprep.mubr.msk.f32.mxu1 %vm151_vm0, %v4098_v48  ;;  %v15750_v60 = vpack.c.bf16 %v78_v9, %v77_v16 }
 0xa0c   :  { %13163 = vrsqrt.f32 %v4070_v29 }
 0xa13   :  { %v4100_v35 = vpop.permute.xlu1 %4099 }
 0xa14   :  { %11073 = vmatmul.mubr.msk.f32.vlgmr.msra.gmra.mrb[28].mxu1 %vm151_vm0, %v4100_v35 }
 0xa15   :  { %12179 = vmatpush3.bf16.msra.mxu1 %v15717_v5 }
 0xa16   :  { %v13164_v26 = vpop.eup %13163  ;;  %12181 = vmatprep.subr.bf16.mxu1 %v15730_v0 }
 0xa17   :  { %v4086_v36 = vmul.f32 %v13164_v26, %v15654_v40  ;;  %v75_v40 = vld [vmem:[%s17337_s7 + $0x20] sm:$0xff] }
 0xa18   :  { %v15743_v23 = vpack.c.bf16 %v76_v55, %v75_v40 }
 0xa19   :  { %4107 = vrot.lane.b32.xlu1 %v4086_v36, %s13464_s9  ;;  %12183 = vmatpush3.bf16.msra.mxu1 %v15730_v0 }
 0xa1a   :  { %12185 = vmatprep.subr.bf16.mxu1 %v15743_v23 }
 0xa1d   :  { %12187 = vmatpush3.bf16.msra.mxu1 %v15743_v23 }
 0xa1e   :  { %12189 = vmatprep.subr.bf16.mxu1 %v15750_v60 }
 0xa21   :  { %12191 = vmatpush3.bf16.msra.mxu1 %v15750_v60 }
 0xa22   :  { %12200 = vmatprep.subr.bf16.mxu1 %v17596_v27 }
 0xa57   :  { %v4053_v53 = vpop.xlane.xlu0 %4052 }
 0xa58   :  { %v4063_v22 = vmul.f32 0.03125, %v4053_v53 }
 0xa5a   :  { %v4071_v45 = vadd.f32 1e-05, %v4063_v22 }
 0xa5b   :  { %v4102_v11 = vpop.permute.xlu0 %4101 }
 0xa5c   :  { %13165 = vrsqrt.f32 %v4071_v45  ;;  %11075 = vmatprep.mubr.msk.f32.mxu1 %vm151_vm0, %v4102_v11 }
 0xa65   :  { %v4056_v29 = vpop.xlane.xlu1 %4055 }
 0xa66   :  { %v13166_v48 = vpop.eup %13165  ;;  %v4064_v13 = vmul.f32 0.03125, %v4056_v29 }
 0xa67   :  { %v4087_v56 = vmul.f32 %v13166_v48, %v15665_v44 }
 0xa68   :  { %v4072_v35 = vadd.f32 1e-05, %v4064_v13 }
 0xa69   :  { %v4104_v26 = vpop.permute.xlu1 %4103  ;;  %4109 = vrot.lane.b32.xlu0 %v4087_v56, %s13464_s9 }
 0xa6a   :  { %13167 = vrsqrt.f32 %v4072_v35  ;;  %11076 = vmatmul.mubr.msk.f32.gmra.mrb[30].mxu1 %vm151_vm0, %v4104_v26 }
 0xa74   :  { %v13168_v36 = vpop.eup %13167 }
 0xa75   :  { %v4088_v53 = vmul.f32 %v13168_v36, %v15671_v37 }
 0xa77   :  { %4111 = vrot.lane.b32.xlu1 %v4088_v53, %s13464_s9 }
 0xa7d   :  { %v4106_v22 = vpop.permute.xlu0 %4105 }
 0xa7e   :  { %11078 = vmatprep.mubr.msk.f32.mxu1 %vm151_vm0, %v4106_v22 }
 0xa8b   :  { %v4108_v45 = vpop.permute.xlu1 %4107 }
 0xa8c   :  { %11079 = vmatmul.mubr.msk.f32.gmra.mrb[32].mxu1 %vm151_vm0, %v4108_v45 }
 0xadb   :  { %v4110_v44 = vpop.permute.xlu0 %4109 }
 0xadc   :  { %11081 = vmatprep.mubr.msk.f32.mxu1 %vm151_vm0, %v4110_v44 }
 0xae7   :  { %v11074_v19 = vpop.f32.mrb[28].mxu1 }
 0xae8   :  { %v4201_v11 = vadd.f32 %v11074_v19, %v9513_v31  ;;  %v4195_v40 = vpop.f32.mrb[29].mxu1 }
 0xae9   :  { %v4196_v55 = vadd.f32 %v9513_v31, %v4195_v40  ;;  %v4112_v37 = vpop.permute.xlu1 %4111 }
 0xaea   :  { %11082 = vmatmul.mubr.msk.f32.gmra.mrb[34].mxu1 %vm151_vm0, %v4112_v37  ;;  %v4235_v9 = vmax.f32 %v4201_v11, 0.0 }
 0xaeb   :  { %v4234_v16 = vmax.f32 %v4196_v55, 0.0 }
 0xaed   :  { %11100 = vmatprep.mubr.msk.f32.mxu1 %vm2575_vm3, %v4234_v16 }
 0xaee   :  { %11101 = vmatmul.mubr.msk.f32.vlgmr.msra.gmra.mrb[36].mxu1 %vm2575_vm3, %v4235_v9 }
 0xaef   :  { %12203 = vmatpush3.bf16.xpose.msk.msra.mxu1 %vm14662_vm1, %v14666_v6 }
 0xaf0   :  { %12204 = vmatprep.subr.bf16.mxu1 %v17596_v27 }
 0xaf7   :  { %12207 = vmatpush3.bf16.xpose.msk.msra.mxu1 %vm14662_vm1, %v14675_v2 }
 0xaf8   :  { %12208 = vmatprep.subr.bf16.mxu1 %v17596_v27 }
 0xaff   :  { %12211 = vmatpush3.bf16.xpose.msk.msra.mxu1 %vm14662_vm1, %v14682_v50 }
 0xb00   :  { %12212 = vmatprep.subr.bf16.mxu1 %v17596_v27 }
 0xb07   :  { %12215 = vmatpush3.bf16.xpose.msk.msra.mxu1 %vm14662_vm1, %v14694_v15 }
 0xb08   :  { %12232 = vmatprep.subr.bf16.mxu1 %v17596_v27 }
 0xb3d   :  { %v11077_v29 = vpop.f32.mrb[30].mxu1 }
 0xb3e   :  { %v4211_v48 = vadd.f32 %v11077_v29, %v9513_v31  ;;  %v4205_v13 = vpop.f32.mrb[31].mxu1 }
 0xb3f   :  { %v4206_v56 = vadd.f32 %v9513_v31, %v4205_v13  ;;  %v9514_v13 = vld [vmem:[%s17332_s2 + $0x4] ss:$0 sm:$0xff] }
 0xb40   :  { %v4237_v26 = vmax.f32 %v4211_v48, 0.0 }
 0xb41   :  { %v4236_v35 = vmax.f32 %v4206_v56, 0.0 }
 0xb43   :  { %11103 = vmatprep.mubr.msk.f32.mxu1 %vm2575_vm3, %v4236_v35 }
 0xb44   :  { %11104 = vmatmul.mubr.msk.f32.gmra.mrb[38].mxu1 %vm2575_vm3, %v4237_v26 }
 0xb5f   :  { %v11080_v36 = vpop.f32.mrb[32].mxu1 }
 0xb60   :  { %v4221_v53 = vadd.f32 %v11080_v36, %v9513_v31  ;;  %v4215_v22 = vpop.f32.mrb[33].mxu1 }
 0xb61   :  { %v4216_v45 = vadd.f32 %v9513_v31, %v4215_v22 }
 0xb62   :  { %v4239_v19 = vmax.f32 %v4221_v53, 0.0 }
 0xb63   :  { %v4238_v44 = vmax.f32 %v4216_v45, 0.0 }
 0xb65   :  { %11106 = vmatprep.mubr.msk.f32.mxu1 %vm2575_vm3, %v4238_v44 }
 0xb66   :  { %11107 = vmatmul.mubr.msk.f32.gmra.mrb[40].mxu1 %vm2575_vm3, %v4239_v19 }
 0xbbd   :  { %v11083_v11 = vpop.f32.mrb[34].mxu1 }
 0xbbe   :  { %v4231_v40 = vadd.f32 %v11083_v11, %v9513_v31  ;;  %v4225_v55 = vpop.f32.mrb[35].mxu1 }
 0xbbf   :  { %v4226_v37 = vadd.f32 %v9513_v31, %v4225_v55 }
 0xbc0   :  { %v4241_v29 = vmax.f32 %v4231_v40, 0.0 }
 0xbc1   :  { %v4240_v16 = vmax.f32 %v4226_v37, 0.0  ;;  %v11102_v9 = vpop.f32.mrb[36].mxu1 }
 0xbc2   :  { %4381 = vrot.lane.b32.xlu1 %v11102_v9, %s13467_s14  ;;  %v4332_v48 = vpop.f32.mrb[37].mxu1 }
 0xbc3   :  { %11109 = vmatprep.mubr.msk.f32.mxu1 %vm2575_vm3, %v4240_v16  ;;  %4379 = vrot.lane.b32.xlu0 %v4332_v48, %s13467_s14 }
 0xbc4   :  { %11110 = vmatmul.mubr.msk.f32.gmra.mrb[42].mxu1 %vm2575_vm3, %v4241_v29 }
 0xbc5   :  { %11148 = vmatprep.mubr.msk.f32.mxu1 %vm13465_vm2, %v17598_v10 }
 0xbc7   :  { %4412 = vrot.lane.b32.xlu0 %v9514_v13, %s13467_s14 }
 0xc17   :  { %v11105_v31 = vpop.f32.mrb[38].mxu1 }
 0xc18   :  { %v4342_v56 = vpop.f32.mrb[39].mxu1  ;;  %4385 = vrot.lane.b32.xlu0 %v11105_v31, %s13467_s14 }
 0xc19   :  { %4383 = vrot.lane.b32.xlu1 %v4342_v56, %s13467_s14 }
 0xc34   :  { %v4382_v35 = vpop.permute.xlu1 %4381 }
 0xc35   :  { %v4380_v26 = vpop.permute.xlu0 %4379  ;;  %v4404_v36 = vadd.f32 %v4382_v35, %v15560_v49 }
 0xc36   :  { %v4403_v53 = vadd.f32 %v4380_v26, %v15562_v34 }
 0xc39   :  { %v11108_v22 = vpop.f32.mrb[40].mxu1  ;;  %v15804_v45 = vpop.permute.xlu0 %4412 }
 0xc3a   :  { %17631 = vst [vmem:[#allocation62_spill] sm:$0xff] %v15804_v45  ;;  %v4352_v44 = vpop.f32.mrb[41].mxu1  ;;  %v15807_v19 = vadd.f32 %v15804_v45, %v4404_v36  ;;  %v15810_v11 = vadd.f32 %v15804_v45, %v4403_v53 }
 0xc3c   :  { %4433 = vrot.lane.b32.xlu0 %v15807_v19, %s13464_s9  ;;  %4431 = vrot.lane.b32.xlu1 %v15810_v11, %s13464_s9 }
 0xc40   :  { %4389 = vrot.lane.b32.xlu0 %v11108_v22, %s13467_s14  ;;  %4387 = vrot.lane.b32.xlu1 %v4352_v44, %s13467_s14 }
 0xc8a   :  { %v4386_v49 = vpop.permute.xlu0 %4385 }
 0xc8b   :  { %v4406_v34 = vadd.f32 %v4386_v49, %v15576_v62  ;;  %v4384_v40 = vpop.permute.xlu1 %4383 }
 0xc8c   :  { %v4405_v37 = vadd.f32 %v4384_v40, %v15582_v25 }
 0xc8d   :  { %v15820_v55 = vadd.f32 %v15804_v45, %v4406_v34 }
 0xc8e   :  { %v15826_v16 = vadd.f32 %v15804_v45, %v4405_v37 }
 0xc8f   :  { %4437 = vrot.lane.b32.xlu1 %v15820_v55, %s13464_s9 }
 0xc93   :  { %4435 = vrot.lane.b32.xlu1 %v15826_v16, %s13464_s9 }
 0xc97   :  { %v11111_v9 = vpop.f32.mrb[42].mxu1 }
 0xc98   :  { %v4362_v29 = vpop.f32.mrb[43].mxu1 }
 0xc99   :  { %4391 = vrot.lane.b32.xlu0 %v4362_v29, %s13467_s14 }
 0xc9d   :  { %4393 = vrot.lane.b32.xlu0 %v11111_v9, %s13467_s14 }
 0xcae   :  { %v4432_v62 = vpop.permute.xlu1 %4431  ;;  %v4434_v48 = vpop.permute.xlu0 %4433 }
 0xcaf   :  { %v4458_v34 = vsel %vm151_vm0, %v4434_v48, 0.0  ;;  %v4455_v9 = vsel %vm151_vm0, %v4432_v62, 0.0 }
 0xcb2   :  { %v4388_v13 = vpop.permute.xlu1 %4387  ;;  %v4390_v31 = vpop.permute.xlu0 %4389 }
 0xcb3   :  { %v4407_v25 = vadd.f32 %v4388_v13, %v15596_v42  ;;  %v4408_v56 = vadd.f32 %v4390_v31, %v15594_v57 }
 0xcb5   :  { %v15835_v35 = vadd.f32 %v15804_v45, %v4407_v25  ;;  %v15838_v26 = vadd.f32 %v15804_v45, %v4408_v56 }
 0xcb7   :  { %4439 = vrot.lane.b32.xlu0 %v15835_v35, %s13464_s9  ;;  %4441 = vrot.lane.b32.xlu1 %v15838_v26, %s13464_s9 }
 0xd01   :  { %v4438_v49 = vpop.permute.xlu1 %4437 }
 0xd05   :  { %v4436_v40 = vpop.permute.xlu1 %4435 }
 0xd06   :  { %v4461_v29 = vsel %vm151_vm0, %v4436_v40, 0.0 }
 0xd0b   :  { %v4392_v36 = vpop.permute.xlu0 %4391 }
 0xd0c   :  { %v4409_v53 = vadd.f32 %v4392_v36, %v15605_v47  ;;  %v4464_v47 = vsel %vm151_vm0, %v4438_v49, 0.0 }
 0xd0e   :  { %v15846_v22 = vadd.f32 %v15804_v45, %v4409_v53 }
 0xd0f   :  { %v4394_v42 = vpop.permute.xlu0 %4393 }
 0xd10   :  { %v4410_v57 = vadd.f32 %v4394_v42, %v15612_v18  ;;  %4443 = vrot.lane.b32.xlu0 %v15846_v22, %s13464_s9 }
 0xd12   :  { %v15852_v44 = vadd.f32 %v15804_v45, %v4410_v57 }
 0xd14   :  { %4445 = vrot.lane.b32.xlu1 %v15852_v44, %s13464_s9 }
 0xd29   :  { %v4442_v37 = vpop.permute.xlu1 %4441  ;;  %v4440_v13 = vpop.permute.xlu0 %4439 }
 0xd2a   :  { %v4470_v18 = vsel %vm151_vm0, %v4442_v37, 0.0  ;;  %v4467_v31 = vsel %vm151_vm0, %v4440_v13, 0.0 }
 0xd2f   :  { %4459 = vadd.xlane.f32.xlu0 %v4458_v34 }
 0xd33   :  { %4465 = vadd.xlane.f32.xlu0 %v4464_v47 }
 0xd37   :  { %4471 = vadd.xlane.f32.xlu0 %v4470_v18 }
 0xd38   :  { %4456 = vadd.xlane.f32.xlu1 %v4455_v9 }
 0xd3c   :  { %4462 = vadd.xlane.f32.xlu1 %v4461_v29 }
 0xd40   :  { %4468 = vadd.xlane.f32.xlu1 %v4467_v31 }
 0xd82   :  { %v4444_v48 = vpop.permute.xlu0 %4443 }
 0xd83   :  { %v4473_v40 = vsel %vm151_vm0, %v4444_v48, 0.0 }
 0xd86   :  { %v4446_v53 = vpop.permute.xlu1 %4445 }
 0xd87   :  { %v4476_v37 = vsel %vm151_vm0, %v4446_v53, 0.0 }
 0xdbc   :  { %v4460_v25 = vpop.xlane.xlu0 %4459 }
 0xdbd   :  { %v4480_v56 = vmul.f32 0.03125, %v4460_v25 }
 0xdbf   :  { %v15863_v36 = vsub.f32 %v15807_v19, %v4480_v56 }
 0xdc0   :  { %v4466_v47 = vpop.xlane.xlu0 %4465 }
 0xdc1   :  { %v4496_v42 = vmul.f32 %v15863_v36, %v15863_v36  ;;  %v4482_v18 = vmul.f32 0.03125, %v4466_v47 }
 0xdc3   :  { %4513 = vrot.lane.b32.xlu1 %v4496_v42, %s13464_s9  ;;  %v15877_v29 = vsub.f32 %v15820_v55, %v4482_v18 }
 0xdc4   :  { %v4472_v9 = vpop.xlane.xlu0 %4471 }
 0xdc5   :  { %v4457_v62 = vpop.xlane.xlu1 %4456  ;;  %v4484_v13 = vmul.f32 0.03125, %v4472_v9  ;;  %v4498_v25 = vmul.f32 %v15877_v29, %v15877_v29 }
 0xdc6   :  { %v4479_v57 = vmul.f32 0.03125, %v4457_v62 }
 0xdc7   :  { %v15882_v56 = vsub.f32 %v15838_v26, %v4484_v13 }
 0xdc8   :  { %v15869_v49 = vsub.f32 %v15810_v11, %v4479_v57 }
 0xdc9   :  { %v4463_v31 = vpop.xlane.xlu1 %4462  ;;  %v4500_v53 = vmul.f32 %v15882_v56, %v15882_v56 }
 0xdca   :  { %v4495_v34 = vmul.f32 %v15869_v49, %v15869_v49  ;;  %v4481_v42 = vmul.f32 0.03125, %v4463_v31 }
 0xdcc   :  { %4511 = vrot.lane.b32.xlu0 %v4495_v34, %s13464_s9  ;;  %v15888_v62 = vsub.f32 %v15826_v16, %v4481_v42 }
 0xdcd   :  { %v4469_v48 = vpop.xlane.xlu1 %4468 }
 0xdce   :  { %v4483_v57 = vmul.f32 0.03125, %v4469_v48  ;;  %v4497_v34 = vmul.f32 %v15888_v62, %v15888_v62 }
 0xde7   :  { %4474 = vadd.xlane.f32.xlu1 %v4473_v40  ;;  %v15894_v40 = vsub.f32 %v15835_v35, %v4483_v57 }
 0xde9   :  { %v4499_v47 = vmul.f32 %v15894_v40, %v15894_v40 }
 0xdeb   :  { %4477 = vadd.xlane.f32.xlu0 %v4476_v37 }
 0xdf8   :  { %4517 = vrot.lane.b32.xlu1 %v4498_v25, %s13464_s9 }
 0xdfc   :  { %4521 = vrot.lane.b32.xlu1 %v4500_v53, %s13464_s9 }
 0xe01   :  { %4515 = vrot.lane.b32.xlu0 %v4497_v34, %s13464_s9 }
 0xe05   :  { %4519 = vrot.lane.b32.xlu0 %v4499_v47, %s13464_s9 }
 0xe35   :  { %v4514_v37 = vpop.permute.xlu1 %4513 }
 0xe36   :  { %v4538_v18 = vsel %vm151_vm0, %v4514_v37, 0.0 }
 0xe37   :  { %4539 = vadd.xlane.f32.xlu0 %v4538_v18 }
 0xe3e   :  { %v4512_v9 = vpop.permute.xlu0 %4511 }
 0xe3f   :  { %v4535_v13 = vsel %vm151_vm0, %v4512_v9, 0.0 }
 0xe40   :  { %4536 = vadd.xlane.f32.xlu1 %v4535_v13 }
 0xe74   :  { %v4475_v31 = vpop.xlane.xlu1 %4474 }
 0xe75   :  { %v4485_v25 = vmul.f32 0.03125, %v4475_v31 }
 0xe77   :  { %v15903_v42 = vsub.f32 %v15846_v22, %v4485_v25 }
 0xe78   :  { %v4478_v48 = vpop.xlane.xlu0 %4477  ;;  %v4518_v37 = vpop.permute.xlu1 %4517 }
 0xe79   :  { %v4501_v53 = vmul.f32 %v15903_v42, %v15903_v42  ;;  %v4486_v57 = vmul.f32 0.03125, %v4478_v48  ;;  %v4544_v18 = vsel %vm151_vm0, %v4518_v37, 0.0 }
 0xe7b   :  { %v15908_v34 = vsub.f32 %v15852_v44, %v4486_v57  ;;  %4523 = vrot.lane.b32.xlu0 %v4501_v53, %s13464_s9 }
 0xe7c   :  { %v4522_v9 = vpop.permute.xlu1 %4521  ;;  %v4516_v13 = vpop.permute.xlu0 %4515 }
 0xe7d   :  { %v4502_v47 = vmul.f32 %v15908_v34, %v15908_v34  ;;  %v4550_v31 = vsel %vm151_vm0, %v4522_v9, 0.0  ;;  %v4541_v25 = vsel %vm151_vm0, %v4516_v13, 0.0 }
 0xe7f   :  { %4525 = vrot.lane.b32.xlu1 %v4502_v47, %s13464_s9 }
 0xe80   :  { %v4520_v48 = vpop.permute.xlu0 %4519 }
 0xe81   :  { %v4547_v53 = vsel %vm151_vm0, %v4520_v48, 0.0 }
 0xe9a   :  { %4545 = vadd.xlane.f32.xlu0 %v4544_v18 }
 0xe9e   :  { %4551 = vadd.xlane.f32.xlu0 %v4550_v31 }
 0xea3   :  { %4542 = vadd.xlane.f32.xlu1 %v4541_v25 }
 0xea7   :  { %4548 = vadd.xlane.f32.xlu1 %v4547_v53 }
 0xec4   :  { %v4540_v57 = vpop.xlane.xlu0 %4539 }
 0xec5   :  { %v4560_v45 = vmul.f32 0.03125, %v4540_v57 }
 0xec7   :  { %v4568_v15 = vadd.f32 1e-05, %v4560_v45 }
 0xec9   :  { %13169 = vrsqrt.f32 %v4568_v15 }
 0xecd   :  { %v4537_v47 = vpop.xlane.xlu1 %4536 }
 0xece   :  { %v4559_v50 = vmul.f32 0.03125, %v4537_v47 }
 0xed0   :  { %v4567_v37 = vadd.f32 1e-05, %v4559_v50 }
 0xed2   :  { %13171 = vrsqrt.f32 %v4567_v37 }
 0xed3   :  { %v13170_v18 = vpop.eup %13169 }
 0xed4   :  { %v4584_v2 = vmul.f32 %v13170_v18, %v15863_v36 }
 0xed6   :  { %4601 = vrot.lane.b32.xlu1 %v4584_v2, %s13464_s9 }
 0xedc   :  { %v13172_v9 = vpop.eup %13171 }
 0xedd   :  { %v4583_v13 = vmul.f32 %v13172_v9, %v15869_v49 }
 0xedf   :  { %4599 = vrot.lane.b32.xlu0 %v4583_v13, %s13464_s9 }
 0xeed   :  { %v4524_v31 = vpop.permute.xlu0 %4523 }
 0xeee   :  { %v4553_v25 = vsel %vm151_vm0, %v4524_v31, 0.0 }
 0xef1   :  { %v4526_v48 = vpop.permute.xlu1 %4525 }
 0xef2   :  { %v4556_v15 = vsel %vm151_vm0, %v4526_v48, 0.0 }
 0xefa   :  { %4554 = vadd.xlane.f32.xlu1 %v4553_v25 }
 0xefe   :  { %4557 = vadd.xlane.f32.xlu0 %v4556_v15 }
 0xf27   :  { %v4546_v50 = vpop.xlane.xlu0 %4545 }
 0xf28   :  { %v4562_v45 = vmul.f32 0.03125, %v4546_v50 }
 0xf2a   :  { %v4570_v53 = vadd.f32 1e-05, %v4562_v45 }
 0xf2b   :  { %v4552_v36 = vpop.xlane.xlu0 %4551 }
 0xf2c   :  { %13173 = vrsqrt.f32 %v4570_v53  ;;  %v4564_v57 = vmul.f32 0.03125, %v4552_v36 }
 0xf2e   :  { %v4572_v37 = vadd.f32 1e-05, %v4564_v57 }
 0xf30   :  { %v4543_v2 = vpop.xlane.xlu1 %4542 }
 0xf31   :  { %v4561_v47 = vmul.f32 0.03125, %v4543_v2 }
 0xf33   :  { %v4569_v49 = vadd.f32 1e-05, %v4561_v47 }
 0xf34   :  { %v4549_v18 = vpop.xlane.xlu1 %4548 }
 0xf35   :  { %13175 = vrsqrt.f32 %v4569_v49  ;;  %v4563_v9 = vmul.f32 0.03125, %v4549_v18 }
 0xf36   :  { %v13174_v13 = vpop.eup %13173  ;;  %13177 = vrsqrt.f32 %v4572_v37 }
 0xf37   :  { %v4571_v31 = vadd.f32 1e-05, %v4563_v9  ;;  %v4586_v25 = vmul.f32 %v13174_v13, %v15877_v29 }
 0xf39   :  { %13179 = vrsqrt.f32 %v4571_v31  ;;  %4605 = vrot.lane.b32.xlu1 %v4586_v25, %s13464_s9 }
 0xf3f   :  { %v13176_v48 = vpop.eup %13175 }
 0xf40   :  { %v4585_v15 = vmul.f32 %v13176_v48, %v15888_v62  ;;  %v13178_v50 = vpop.eup %13177 }
 0xf41   :  { %v4588_v36 = vmul.f32 %v13178_v50, %v15882_v56 }
 0xf42   :  { %4603 = vrot.lane.b32.xlu0 %v4585_v15, %s13464_s9 }
 0xf43   :  { %v13180_v45 = vpop.eup %13179 }
 0xf44   :  { %v4587_v53 = vmul.f32 %v13180_v45, %v15894_v40  ;;  %v15965_v45 = vld [vmem:[%s17332_s2 + $0x1] ss:$0 sm:$0xff] }
 0xf46   :  { %4607 = vrot.lane.b32.xlu1 %v4587_v53, %s13464_s9  ;;  %4609 = vrot.lane.b32.xlu0 %v4588_v36, %s13464_s9 }
 0xf48   :  { %v4602_v29 = vpop.permute.xlu1 %4601 }
 0xf51   :  { %v4600_v57 = vpop.permute.xlu0 %4599 }
 0xf52   :  { %11120 = vmatprep.mubr.msk.f32.mxu0 %vm151_vm0, %v4600_v57 }
 0xf53   :  { %11121 = vmatmul.mubr.msk.f32.vlgmr.msra.gmra.mrb[84].mxu0 %vm151_vm0, %v4602_v29  ;;  %v17632_v29 = vld [vmem:[#allocation19_spill] sm:$0xff] }
 0xf54   :  { %12219 = vmatpush3.bf16.xpose.msk.msra.mxu0 %vm14662_vm1, %v14700_v14 }
 0xf55   :  { %12220 = vmatprep.subr.bf16.mxu0 %v17596_v27 }
 0xf5c   :  { %12223 = vmatpush3.bf16.xpose.msk.msra.mxu0 %vm14662_vm1, %v14711_v59 }
 0xf5d   :  { %12224 = vmatprep.subr.bf16.mxu0 %v17596_v27 }
 0xf64   :  { %12227 = vmatpush3.bf16.xpose.msk.msra.mxu0 %vm14662_vm1, %v14720_v43 }
 0xf65   :  { %12228 = vmatprep.subr.bf16.mxu0 %v17596_v27 }
 0xf6c   :  { %12231 = vmatpush3.bf16.xpose.msk.msra.mxu0 %vm14662_vm1, %v14738_v32 }
 0xf6d   :  { %12248 = vmatprep.subr.bf16.mxu0 %v17596_v27 }
 0xf87   :  { %v4555_v56 = vpop.xlane.xlu1 %4554 }
 0xf88   :  { %v4565_v62 = vmul.f32 0.03125, %v4555_v56  ;;  %v17633_v56 = vld [vmem:[#allocation16_spill] sm:$0xff] }
 0xf8a   :  { %v4573_v40 = vadd.f32 1e-05, %v4565_v62 }
 0xf8b   :  { %v4558_v2 = vpop.xlane.xlu0 %4557 }
 0xf8c   :  { %13181 = vrsqrt.f32 %v4573_v40  ;;  %v4566_v47 = vmul.f32 0.03125, %v4558_v2 }
 0xf8e   :  { %v4574_v37 = vadd.f32 1e-05, %v4566_v47 }
 0xf90   :  { %13183 = vrsqrt.f32 %v4574_v37  ;;  %v17634_v37 = vld [vmem:[#allocation22_spill] sm:$0xff] }
 0xf96   :  { %v13182_v49 = vpop.eup %13181 }
 0xf97   :  { %v4589_v18 = vmul.f32 %v13182_v49, %v15903_v42 }
 0xf99   :  { %4611 = vrot.lane.b32.xlu1 %v4589_v18, %s13464_s9  ;;  %v17635_v18 = vld [vmem:[#allocation25_spill] sm:$0xff] }
 0xf9a   :  { %v13184_v9 = vpop.eup %13183 }
 0xf9b   :  { %v4590_v13 = vmul.f32 %v13184_v9, %v15908_v34 }
 0xf9d   :  { %4613 = vrot.lane.b32.xlu0 %v4590_v13, %s13464_s9  ;;  %v17636_v13 = vld [vmem:[#allocation24_spill] sm:$0xff] }
 0xfab   :  { %v4606_v31 = vpop.permute.xlu1 %4605 }
 0xfb4   :  { %v4604_v25 = vpop.permute.xlu0 %4603 }
 0xfb5   :  { %11123 = vmatprep.mubr.msk.f32.mxu0 %vm151_vm0, %v4604_v25  ;;  %v17638_v25 = vld [vmem:[#allocation26_spill] sm:$0xff] }
 0xfb6   :  { %11124 = vmatmul.mubr.msk.f32.gmra.mrb[86].mxu0 %vm151_vm0, %v4606_v31  ;;  %v17637_v31 = vld [vmem:[#allocation28_spill] sm:$0xff] }
 0xfb8   :  { %v4608_v48 = vpop.permute.xlu1 %4607  ;;  %v4610_v15 = vpop.permute.xlu0 %4609 }
 0xfb9   :  { %11126 = vmatprep.mubr.msk.f32.mxu0 %vm151_vm0, %v4608_v48  ;;  %v17639_v48 = vld [vmem:[#allocation29_spill] sm:$0xff] }
 0xfba   :  { %11127 = vmatmul.mubr.msk.f32.gmra.mrb[88].mxu0 %vm151_vm0, %v4610_v15  ;;  %v17640_v15 = vld [vmem:[#allocation21_spill] sm:$0xff] }
0x100b   :  { %v4612_v42 = vpop.permute.xlu1 %4611 }
0x100c   :  { %11129 = vmatprep.mubr.msk.f32.mxu0 %vm151_vm0, %v4612_v42  ;;  %v17641_v42 = vld [vmem:[#allocation20_spill] sm:$0xff] }
0x100f   :  { %v4614_v50 = vpop.permute.xlu0 %4613 }
0x1010   :  { %11130 = vmatmul.mubr.msk.f32.gmra.mrb[90].mxu0 %vm151_vm0, %v4614_v50 }
0x1011   :  { %11167 = vmatprep.mubr.msk.f32.mxu0 %vm13465_vm2, %v17598_v10 }
0x1026   :  { %v11122_v34 = vpop.f32.mrb[84].mxu0 }
0x1027   :  { %v4703_v53 = vadd.f32 %v15965_v45, %v11122_v34  ;;  %v4697_v36 = vpop.f32.mrb[85].mxu0 }
0x1028   :  { %v4698_v57 = vadd.f32 %v15965_v45, %v4697_v36  ;;  %v17643_v36 = vld [vmem:[#allocation32_spill] sm:$0xff] }
0x1029   :  { %11168 = vmatmul.mubr.msk.f32.vlgmr.msra.gmra.mrb[92].mxu0 %vm151_vm0, %v4703_v53  ;;  %v17642_v53 = vld [vmem:[#allocation36_spill] sm:$0xff] }
0x102a   :  { %12251 = vmatpush3.bf16.xpose.msk.msra.mxu0 %vm14662_vm1, %v14790_v39  ;;  %11149 = vmatmul.mubr.msk.f32.vlgmr.msra.gmra.mrb[44].mxu1 %vm151_vm0, %v4698_v57  ;;  %v17644_v57 = vld [vmem:[#allocation33_spill] sm:$0xff] }
0x102b   :  { %12235 = vmatpush3.bf16.xpose.msk.msra.mxu1 %vm14662_vm1, %v14749_v54  ;;  %12252 = vmatprep.subr.bf16.mxu0 %v17596_v27 }
0x102c   :  { %12236 = vmatprep.subr.bf16.mxu1 %v17596_v27  ;;  %11205 = vmatprep.mubr.msk.f32.mxu0 %vm13465_vm2, %v17598_v10 }
0x102d   :  { %11186 = vmatprep.mubr.msk.f32.mxu1 %vm13465_vm2, %v17598_v10 }
0x1032   :  { %12255 = vmatpush3.bf16.xpose.msk.msra.mxu0 %vm14662_vm1, %v14803_v51 }
0x1033   :  { %12239 = vmatpush3.bf16.xpose.msk.msra.mxu1 %vm14662_vm1, %v14762_v20  ;;  %12256 = vmatprep.subr.bf16.mxu0 %v17596_v27 }
0x1034   :  { %12240 = vmatprep.subr.bf16.mxu1 %v17596_v27 }
0x103a   :  { %12259 = vmatpush3.bf16.xpose.msk.msra.mxu0 %vm14662_vm1, %v14812_v8 }
0x103b   :  { %12243 = vmatpush3.bf16.xpose.msk.msra.mxu1 %vm14662_vm1, %v14767_v24  ;;  %12260 = vmatprep.subr.bf16.mxu0 %v17596_v27 }
0x103c   :  { %12244 = vmatprep.subr.bf16.mxu1 %v17596_v27 }
0x1042   :  { %12263 = vmatpush3.bf16.xpose.msk.msra.mxu0 %vm14662_vm1, %v17632_v29 }
0x1043   :  { %12247 = vmatpush3.bf16.xpose.msk.msra.mxu1 %vm14662_vm1, %v17633_v56  ;;  %12280 = vmatprep.subr.bf16.mxu0 %v17596_v27 }
0x1044   :  { %12264 = vmatprep.subr.bf16.mxu1 %v17596_v27 }
0x1089   :  { %v11125_v62 = vpop.f32.mrb[86].mxu0 }
0x108a   :  { %v4713_v40 = vadd.f32 %v15965_v45, %v11125_v62  ;;  %v4707_v2 = vpop.f32.mrb[87].mxu0  ;;  %v17645_v62 = vld [vmem:[#allocation27_spill] sm:$0xff] }
0x108b   :  { %v4708_v47 = vadd.f32 %v15965_v45, %v4707_v2  ;;  %v17647_v2 = vld [vmem:[#allocation34_spill] sm:$0xff] }
0x108c   :  { %11206 = vmatmul.mubr.msk.f32.vlgmr.msra.gmra.mrb[94].mxu0 %vm151_vm0, %v4713_v40  ;;  %v17646_v40 = vld [vmem:[#allocation37_spill] sm:$0xff] }
0x108d   :  { %12283 = vmatpush3.bf16.xpose.msk.msra.mxu0 %vm14662_vm1, %v17634_v37  ;;  %v11128_v49 = vpop.f32.mrb[88].mxu0  ;;  %11187 = vmatmul.mubr.msk.f32.vlgmr.msra.gmra.mrb[46].mxu1 %vm151_vm0, %v4708_v47  ;;  %v17648_v47 = vld [vmem:[#allocation5_spill] sm:$0xff] }
0x108e   :  { %12267 = vmatpush3.bf16.xpose.msk.msra.mxu1 %vm14662_vm1, %v17635_v18  ;;  %v4717_v9 = vpop.f32.mrb[89].mxu0  ;;  %12284 = vmatprep.subr.bf16.mxu0 %v17596_v27  ;;  %v4723_v50 = vadd.f32 %v15965_v45, %v11128_v49  ;;  %v17649_v49 = vld [vmem:[#allocation35_spill] sm:$0xff] }
0x108f   :  { %12268 = vmatprep.subr.bf16.mxu1 %v17596_v27  ;;  %11243 = vmatprep.mubr.msk.f32.mxu0 %vm13465_vm2, %v17598_v10  ;;  %v4718_v34 = vadd.f32 %v15965_v45, %v4717_v9 }
0x1090   :  { %11224 = vmatprep.mubr.msk.f32.mxu1 %vm13465_vm2, %v17598_v10 }
0x1095   :  { %12287 = vmatpush3.bf16.xpose.msk.msra.mxu0 %vm14662_vm1, %v17636_v13 }
0x1096   :  { %12271 = vmatpush3.bf16.xpose.msk.msra.mxu1 %vm14662_vm1, %v17637_v31  ;;  %12288 = vmatprep.subr.bf16.mxu0 %v17596_v27 }
0x1097   :  { %12272 = vmatprep.subr.bf16.mxu1 %v17596_v27 }
0x109d   :  { %12291 = vmatpush3.bf16.xpose.msk.msra.mxu0 %vm14662_vm1, %v17638_v25 }
0x109e   :  { %12275 = vmatpush3.bf16.xpose.msk.msra.mxu1 %vm14662_vm1, %v17639_v48  ;;  %12292 = vmatprep.subr.bf16.mxu0 %v17596_v27 }
0x109f   :  { %12276 = vmatprep.subr.bf16.mxu1 %v17596_v27 }
0x10a5   :  { %12295 = vmatpush3.bf16.xpose.msk.msra.mxu0 %vm14662_vm1, %v17640_v15 }
0x10a6   :  { %12279 = vmatpush3.bf16.xpose.msk.msra.mxu1 %vm14662_vm1, %v17641_v42  ;;  %12312 = vmatprep.subr.bf16.mxu0 %v17596_v27 }
0x10a7   :  { %12296 = vmatprep.subr.bf16.mxu1 %v17596_v27 }
0x10ac   :  { %11244 = vmatmul.mubr.msk.f32.vlgmr.msra.gmra.mrb[96].mxu0 %vm151_vm0, %v4723_v50 }
0x10ad   :  { %11225 = vmatmul.mubr.msk.f32.vlgmr.msra.gmra.mrb[48].mxu1 %vm151_vm0, %v4718_v34  ;;  %12315 = vmatpush3.bf16.xpose.msk.msra.mxu0 %vm14662_vm1, %v17642_v53 }
0x10ae   :  { %12299 = vmatpush3.bf16.xpose.msk.msra.mxu1 %vm14662_vm1, %v17643_v36  ;;  %12316 = vmatprep.subr.bf16.mxu0 %v17596_v27 }
0x10af   :  { %12300 = vmatprep.subr.bf16.mxu1 %v17596_v27  ;;  %11281 = vmatprep.mubr.msk.f32.mxu0 %vm13465_vm2, %v17598_v10 }
0x10b0   :  { %11262 = vmatprep.mubr.msk.f32.mxu1 %vm13465_vm2, %v17598_v10 }
0x10b5   :  { %12319 = vmatpush3.bf16.xpose.msk.msra.mxu0 %vm14662_vm1, %v17644_v57 }
0x10b6   :  { %12303 = vmatpush3.bf16.xpose.msk.msra.mxu1 %vm14662_vm1, %v17645_v62  ;;  %12320 = vmatprep.subr.bf16.mxu0 %v17596_v27 }
0x10b7   :  { %12304 = vmatprep.subr.bf16.mxu1 %v17596_v27 }
0x10bd   :  { %12323 = vmatpush3.bf16.xpose.msk.msra.mxu0 %vm14662_vm1, %v17646_v40  ;;  %v17650_v40 = vld [vmem:[#allocation43_spill] sm:$0xff] }
0x10be   :  { %12307 = vmatpush3.bf16.xpose.msk.msra.mxu1 %vm14662_vm1, %v17647_v2  ;;  %12324 = vmatprep.subr.bf16.mxu0 %v17596_v27 }
0x10bf   :  { %12308 = vmatprep.subr.bf16.mxu1 %v17596_v27 }
0x10c5   :  { %12327 = vmatpush3.bf16.xpose.msk.msra.mxu0 %vm14662_vm1, %v17648_v47  ;;  %v17651_v47 = vld [vmem:[#allocation9_spill] sm:$0xff] }
0x10c6   :  { %12311 = vmatpush3.bf16.xpose.msk.msra.mxu1 %vm14662_vm1, %v17649_v49  ;;  %12340 = vmatprep.subr.bf16.mxu0 %v17596_v27 }
0x10c7   :  { %12328 = vmatprep.subr.bf16.mxu1 %v17596_v27 }
0x10e3   :  { %v11131_v9 = vpop.f32.mrb[90].mxu0 }
0x10e4   :  { %v4733_v50 = vadd.f32 %v15965_v45, %v11131_v9  ;;  %v4727_v34 = vpop.f32.mrb[91].mxu0  ;;  %v17654_v9 = vld [vmem:[#allocation42_spill] sm:$0xff] }
0x10e5   :  { %v4728_v2 = vadd.f32 %v15965_v45, %v4727_v34  ;;  %v17652_v45 = vld [vmem:[#allocation38_spill] sm:$0xff] }
0x10e6   :  { %11282 = vmatmul.mubr.msk.f32.vlgmr.msra.gmra.mrb[98].mxu0 %vm151_vm0, %v4733_v50 }
0x10e7   :  { %12342 = vmatpush3.bf16.msra.mxu0 %v17650_v40  ;;  %11263 = vmatmul.mubr.msk.f32.vlgmr.msra.gmra.mrb[50].mxu1 %vm151_vm0, %v4728_v2  ;;  %v17653_v2 = vld [vmem:[#allocation40_spill] sm:$0xff] }
0x10e8   :  { %12330 = vmatpush3.bf16.msra.mxu1 %v17651_v47  ;;  %12343 = vmatprep.subr.bf16.mxu0 %v17596_v27 }
0x10e9   :  { %12331 = vmatprep.subr.bf16.mxu1 %v17596_v27  ;;  %11319 = vmatprep.mubr.msk.f32.mxu0 %vm13465_vm2, %v17598_v10 }
0x10ea   :  { %11300 = vmatprep.mubr.msk.f32.mxu1 %vm13465_vm2, %v17598_v10 }
0x10eb   :  { %12345 = vmatpush3.bf16.msra.mxu0 %v15160_v1 }
0x10ec   :  { %12333 = vmatpush3.bf16.msra.mxu1 %v17652_v45  ;;  %12346 = vmatprep.subr.bf16.mxu0 %v17596_v27 }
0x10ed   :  { %12334 = vmatprep.subr.bf16.mxu1 %v17596_v27 }
0x10ef   :  { %12348 = vmatpush3.bf16.msra.mxu0 %v15167_v28 }
0x10f0   :  { %12336 = vmatpush3.bf16.msra.mxu1 %v17653_v2  ;;  %12349 = vmatprep.subr.bf16.mxu0 %v17596_v27 }
0x10f1   :  { %12337 = vmatprep.subr.bf16.mxu1 %v17596_v27 }
0x10f3   :  { %12351 = vmatpush3.bf16.msra.mxu0 %v15182_v46 }
0x10f4   :  { %12339 = vmatpush3.bf16.msra.mxu1 %v17654_v9  ;;  %12364 = vmatprep.subr.bf16.mxu0 %v17596_v27 }
0x10f5   :  { %12352 = vmatprep.subr.bf16.mxu1 %v17596_v27 }
0x10fc   :  { %v4878_v50 = vpop.f32.mrb[92].mxu0 }
0x10fd   :  { %v5327_v34 = vsel %vm2575_vm3, %v4878_v50, -inf  ;;  %v4805_v45 = vpop.f32.mrb[44].mxu1  ;;  %v11169_v1 = vpop.f32.mrb[93].mxu0 }
0x10fe   :  { %v5328_v28 = vrot.slane %v5327_v34, 4  ;;  %v5320_v2 = vsel %vm2575_vm3, %v4805_v45, -inf  ;;  %v11150_v47 = vpop.f32.mrb[45].mxu1 }
0x10ff   :  { %v5321_v40 = vrot.slane %v5320_v2, 4 }
0x1100   :  { %v5329_v49 = vmax.f32 %v5327_v34, %v5328_v28 }
0x1101   :  { %v5322_v62 = vmax.f32 %v5320_v2, %v5321_v40 }
0x1102   :  { %v5330_v57 = vrot.slane %v5329_v49, 2 }
0x1103   :  { %v5323_v46 = vrot.slane %v5322_v62, 2 }
0x1104   :  { %v5331_v36 = vmax.f32 %v5329_v49, %v5330_v57 }
0x1105   :  { %v5324_v9 = vmax.f32 %v5322_v62, %v5323_v46 }
0x1106   :  { %v5332_v53 = vrot.slane %v5331_v36, 1 }
0x1107   :  { %v5325_v42 = vrot.slane %v5324_v9, 1 }
0x1108   :  { %v5333_v15 = vmax.f32 %v5331_v36, %v5332_v53 }
0x1109   :  { %v5326_v48 = vmax.f32 %v5324_v9, %v5325_v42 }
0x110a   :  { %v5377_v25 = vsub.f32 %v4878_v50, %v5333_v15 }
0x110b   :  { %v5376_v31 = vsub.f32 %v4805_v45, %v5326_v48 }
0x110c   :  { %v5386_v13 = vmul.f32 1.442695, %v5377_v25 }
0x110d   :  { %v5384_v18 = vmul.f32 1.442695, %v5376_v31 }
0x110e   :  { %13185 = vpow2.f32 %v5386_v13 }
0x110f   :  { %13187 = vpow2.f32 %v5384_v18 }
0x1118   :  { %v13186_v1 = vpop.eup %13185 }
0x1119   :  { %v13188_v37 = vpop.eup %13187  ;;  %v5407_v47 = vsel %vm2575_vm3, %v13186_v1, 0.0 }
0x111a   :  { %v5408_v28 = vrot.slane %v5407_v47, 4  ;;  %v5400_v40 = vsel %vm2575_vm3, %v13188_v37, 0.0 }
0x111b   :  { %v5401_v2 = vrot.slane %v5400_v40, 4 }
0x111c   :  { %v5409_v57 = vadd.f32 %v5408_v28, %v5407_v47 }
0x111d   :  { %v5402_v46 = vadd.f32 %v5401_v2, %v5400_v40 }
0x111e   :  { %v5410_v62 = vrot.slane %v5409_v57, 2 }
0x111f   :  { %v5403_v49 = vrot.slane %v5402_v46, 2 }
0x1120   :  { %v5411_v53 = vadd.f32 %v5410_v62, %v5409_v57 }
0x1121   :  { %v5404_v42 = vadd.f32 %v5403_v49, %v5402_v46 }
0x1122   :  { %v5412_v15 = vrot.slane %v5411_v53, 1 }
0x1123   :  { %v5405_v48 = vrot.slane %v5404_v42, 1 }
0x1124   :  { %v5413_v25 = vadd.f32 %v5412_v15, %v5411_v53 }
0x1125   :  { %v5406_v31 = vadd.f32 %v5405_v48, %v5404_v42 }
0x1126   :  { %13189 = vrcp.f32 %v5413_v25 }
0x1127   :  { %13191 = vrcp.f32 %v5406_v31 }
0x1130   :  { %v13190_v18 = vpop.eup %13189 }
0x1131   :  { %v13192_v13 = vpop.eup %13191  ;;  %v5465_v36 = vmul.f32 %v13190_v18, %v13186_v1 }
0x1132   :  { %v5464_v45 = vmul.f32 %v13192_v13, %v13188_v37 }
0x1133   :  { %v16115_v9 = vadd.f32 1e-08, %v5465_v36 }
0x1134   :  { %v16117_v50 = vadd.f32 1e-08, %v5464_v45 }
0x1135   :  { %v5483_v34 = vsel %vm2575_vm3, %v16115_v9, 0.0 }
0x1136   :  { %5484 = vadd.xlane.f32.xlu0 %v5483_v34  ;;  %v5480_v47 = vsel %vm2575_vm3, %v16117_v50, 0.0 }
0x1137   :  { %5481 = vadd.xlane.f32.xlu1 %v5480_v47 }
0x115f   :  { %v5024_v28 = vpop.f32.mrb[94].mxu0 }
0x1160   :  { %v5341_v40 = vsel %vm2575_vm3, %v5024_v28, -inf  ;;  %v4951_v2 = vpop.f32.mrb[46].mxu1  ;;  %v11207_v57 = vpop.f32.mrb[95].mxu0 }
0x1161   :  { %v5342_v46 = vrot.slane %v5341_v40, 4  ;;  %v5334_v37 = vsel %vm2575_vm3, %v4951_v2, -inf  ;;  %v11188_v1 = vpop.f32.mrb[47].mxu1 }
0x1162   :  { %v5335_v62 = vrot.slane %v5334_v37, 4 }
0x1163   :  { %v5343_v49 = vmax.f32 %v5341_v40, %v5342_v46 }
0x1164   :  { %v5336_v53 = vmax.f32 %v5334_v37, %v5335_v62 }
0x1165   :  { %v5344_v42 = vrot.slane %v5343_v49, 2 }
0x1166   :  { %v5337_v15 = vrot.slane %v5336_v53, 2 }
0x1167   :  { %v5345_v48 = vmax.f32 %v5343_v49, %v5344_v42 }
0x1168   :  { %v5338_v25 = vmax.f32 %v5336_v53, %v5337_v15 }
0x1169   :  { %v5346_v31 = vrot.slane %v5345_v48, 1 }
0x116a   :  { %v5339_v18 = vrot.slane %v5338_v25, 1 }
0x116b   :  { %v5347_v13 = vmax.f32 %v5345_v48, %v5346_v31 }
0x116c   :  { %v5340_v36 = vmax.f32 %v5338_v25, %v5339_v18 }
0x116d   :  { %v5379_v45 = vsub.f32 %v5024_v28, %v5347_v13 }
0x116e   :  { %v5378_v34 = vsub.f32 %v4951_v2, %v5340_v36 }
0x116f   :  { %v5390_v47 = vmul.f32 1.442695, %v5379_v45 }
0x1170   :  { %v5388_v56 = vmul.f32 1.442695, %v5378_v34 }
0x1171   :  { %13193 = vpow2.f32 %v5390_v47 }
0x1172   :  { %13195 = vpow2.f32 %v5388_v56 }
0x117b   :  { %v13194_v57 = vpop.eup %13193 }
0x117c   :  { %v13196_v29 = vpop.eup %13195  ;;  %v5421_v1 = vsel %vm2575_vm3, %v13194_v57, 0.0 }
0x117d   :  { %v5422_v40 = vrot.slane %v5421_v1, 4  ;;  %v5414_v46 = vsel %vm2575_vm3, %v13196_v29, 0.0 }
0x117e   :  { %v5415_v37 = vrot.slane %v5414_v46, 4 }
0x117f   :  { %v5423_v62 = vadd.f32 %v5422_v40, %v5421_v1  ;;  %v5170_v49 = vpop.f32.mrb[96].mxu0 }
0x1180   :  { %v5416_v53 = vadd.f32 %v5415_v37, %v5414_v46  ;;  %v5355_v42 = vsel %vm2575_vm3, %v5170_v49, -inf  ;;  %v5097_v15 = vpop.f32.mrb[48].mxu1  ;;  %v11245_v28 = vpop.f32.mrb[97].mxu0 }
0x1181   :  { %v5424_v2 = vrot.slane %v5423_v62, 2  ;;  %v5356_v48 = vrot.slane %v5355_v42, 4  ;;  %v5348_v25 = vsel %vm2575_vm3, %v5097_v15, -inf  ;;  %v11226_v56 = vpop.f32.mrb[49].mxu1 }
0x1182   :  { %v5417_v31 = vrot.slane %v5416_v53, 2  ;;  %v5349_v18 = vrot.slane %v5348_v25, 4 }
0x1183   :  { %v5425_v13 = vadd.f32 %v5424_v2, %v5423_v62  ;;  %v5357_v36 = vmax.f32 %v5355_v42, %v5356_v48 }
0x1184   :  { %v5418_v45 = vadd.f32 %v5417_v31, %v5416_v53  ;;  %v5350_v34 = vmax.f32 %v5348_v25, %v5349_v18 }
0x1185   :  { %v5358_v47 = vrot.slane %v5357_v36, 2  ;;  %v5426_v24 = vrot.slane %v5425_v13, 1 }
0x1186   :  { %v5351_v1 = vrot.slane %v5350_v34, 2  ;;  %v5419_v40 = vrot.slane %v5418_v45, 1 }
0x1187   :  { %v5359_v46 = vmax.f32 %v5357_v36, %v5358_v47  ;;  %v5427_v37 = vadd.f32 %v5426_v24, %v5425_v13 }
0x1188   :  { %v5352_v8 = vmax.f32 %v5350_v34, %v5351_v1  ;;  %v5420_v20 = vadd.f32 %v5419_v40, %v5418_v45 }
0x1189   :  { %v5360_v28 = vrot.slane %v5359_v46, 1  ;;  %13197 = vrcp.f32 %v5427_v37 }
0x118a   :  { %v5353_v51 = vrot.slane %v5352_v8, 1  ;;  %13199 = vrcp.f32 %v5420_v20 }
0x118b   :  { %v5361_v54 = vmax.f32 %v5359_v46, %v5360_v28 }
0x118c   :  { %v5354_v56 = vmax.f32 %v5352_v8, %v5353_v51 }
0x118d   :  { %v5381_v39 = vsub.f32 %v5170_v49, %v5361_v54 }
0x118e   :  { %v5380_v32 = vsub.f32 %v5097_v15, %v5354_v56 }
0x118f   :  { %v5394_v62 = vmul.f32 1.442695, %v5381_v39 }
0x1190   :  { %v5392_v42 = vmul.f32 1.442695, %v5380_v32 }
0x1191   :  { %13201 = vpow2.f32 %v5394_v62 }
0x1192   :  { %13203 = vpow2.f32 %v5392_v42 }
0x1193   :  { %v13198_v53 = vpop.eup %13197 }
0x1194   :  { %v13200_v2 = vpop.eup %13199  ;;  %v5467_v25 = vmul.f32 %v13198_v53, %v13194_v57 }
0x1195   :  { %v5466_v48 = vmul.f32 %v13200_v2, %v13196_v29 }
0x1196   :  { %v16133_v18 = vadd.f32 1e-08, %v5467_v25 }
0x1197   :  { %v16129_v31 = vadd.f32 1e-08, %v5466_v48 }
0x1198   :  { %v5489_v8 = vsel %vm2575_vm3, %v16133_v18, 0.0 }
0x1199   :  { %v5486_v24 = vsel %vm2575_vm3, %v16129_v31, 0.0 }
0x119a   :  { %5487 = vadd.xlane.f32.xlu0 %v5486_v24 }
0x119b   :  { %v13202_v20 = vpop.eup %13201 }
0x119c   :  { %v13204_v51 = vpop.eup %13203  ;;  %v5435_v54 = vsel %vm2575_vm3, %v13202_v20, 0.0 }
0x119d   :  { %v5436_v39 = vrot.slane %v5435_v54, 4  ;;  %v5428_v32 = vsel %vm2575_vm3, %v13204_v51, 0.0 }
0x119e   :  { %v5429_v29 = vrot.slane %v5428_v32, 4  ;;  %5490 = vadd.xlane.f32.xlu0 %v5489_v8 }
0x119f   :  { %v5437_v57 = vadd.f32 %v5436_v39, %v5435_v54 }
0x11a0   :  { %v5430_v49 = vadd.f32 %v5429_v29, %v5428_v32 }
0x11a1   :  { %v5438_v15 = vrot.slane %v5437_v57, 2 }
0x11a2   :  { %v5431_v13 = vrot.slane %v5430_v49, 2 }
0x11a3   :  { %v5439_v36 = vadd.f32 %v5438_v15, %v5437_v57 }
0x11a4   :  { %v5432_v45 = vadd.f32 %v5431_v13, %v5430_v49 }
0x11a5   :  { %v5440_v34 = vrot.slane %v5439_v36, 1 }
0x11a6   :  { %v5433_v47 = vrot.slane %v5432_v45, 1 }
0x11a7   :  { %v5441_v1 = vadd.f32 %v5440_v34, %v5439_v36 }
0x11a8   :  { %v5434_v40 = vadd.f32 %v5433_v47, %v5432_v45 }
0x11a9   :  { %13205 = vrcp.f32 %v5441_v1 }
0x11aa   :  { %13207 = vrcp.f32 %v5434_v40 }
0x11b3   :  { %v13206_v46 = vpop.eup %13205 }
0x11b4   :  { %v13208_v37 = vpop.eup %13207  ;;  %v5469_v28 = vmul.f32 %v13206_v46, %v13202_v20 }
0x11b5   :  { %v5468_v56 = vmul.f32 %v13208_v37, %v13204_v51 }
0x11b6   :  { %v16139_v62 = vadd.f32 1e-08, %v5469_v28 }
0x11b7   :  { %v16141_v42 = vadd.f32 1e-08, %v5468_v56 }
0x11b8   :  { %v5495_v53 = vsel %vm2575_vm3, %v16139_v62, 0.0 }
0x11b9   :  { %5496 = vadd.xlane.f32.xlu0 %v5495_v53  ;;  %v5492_v2 = vsel %vm2575_vm3, %v16141_v42, 0.0  ;;  %v5316_v48 = vpop.f32.mrb[98].mxu0 }
0x11ba   :  { %5493 = vadd.xlane.f32.xlu1 %v5492_v2  ;;  %v5369_v25 = vsel %vm2575_vm3, %v5316_v48, -inf  ;;  %v5243_v24 = vpop.f32.mrb[50].mxu1  ;;  %v11283_v54 = vpop.f32.mrb[99].mxu0 }
0x11bb   :  { %v5370_v39 = vrot.slane %v5369_v25, 4  ;;  %v5362_v20 = vsel %vm2575_vm3, %v5243_v24, -inf  ;;  %v11264_v51 = vpop.f32.mrb[51].mxu1 }
0x11bc   :  { %v5363_v32 = vrot.slane %v5362_v20, 4  ;;  %v17656_v51 = vld [vmem:[#allocation11_spill] sm:$0xff] }
0x11bd   :  { %v5371_v8 = vmax.f32 %v5369_v25, %v5370_v39  ;;  %v17655_v39 = vld [vmem:[#allocation6_spill] sm:$0xff] }
0x11be   :  { %v5364_v29 = vmax.f32 %v5362_v20, %v5363_v32 }
0x11bf   :  { %v5372_v57 = vrot.slane %v5371_v8, 2 }
0x11c0   :  { %v5365_v49 = vrot.slane %v5364_v29, 2 }
0x11c1   :  { %v5373_v15 = vmax.f32 %v5371_v8, %v5372_v57 }
0x11c2   :  { %v5366_v13 = vmax.f32 %v5364_v29, %v5365_v49  ;;  %v17657_v49 = vld [vmem:[#allocation39_spill] sm:$0xff] }
0x11c3   :  { %v5374_v36 = vrot.slane %v5373_v15, 1  ;;  %v5485_v45 = vpop.xlane.xlu0 %5484 }
0x11c4   :  { %v5367_v34 = vrot.slane %v5366_v13, 1  ;;  %13209 = vrcp.f32 %v5485_v45  ;;  %v5482_v47 = vpop.xlane.xlu1 %5481  ;;  %v17658_v45 = vld [vmem:[#allocation41_spill] sm:$0xff] }
0x11c5   :  { %v5375_v1 = vmax.f32 %v5373_v15, %v5374_v36  ;;  %13211 = vrcp.f32 %v5482_v47 }
0x11c6   :  { %v5368_v40 = vmax.f32 %v5366_v13, %v5367_v34 }
0x11c7   :  { %v5383_v46 = vsub.f32 %v5316_v48, %v5375_v1 }
0x11c8   :  { %v5382_v37 = vsub.f32 %v5243_v24, %v5368_v40 }
0x11c9   :  { %v5398_v28 = vmul.f32 1.442695, %v5383_v46 }
0x11ca   :  { %v5396_v56 = vmul.f32 1.442695, %v5382_v37 }
0x11cb   :  { %13213 = vpow2.f32 %v5398_v28 }
0x11cc   :  { %13215 = vpow2.f32 %v5396_v56 }
0x11ce   :  { %v13210_v53 = vpop.eup %13209 }
0x11cf   :  { %v13212_v2 = vpop.eup %13211  ;;  %v5513_v25 = vmul.f32 %v13210_v53, %v16115_v9 }
0x11d0   :  { %v5512_v54 = vmul.f32 %v13212_v2, %v16117_v50 }
0x11d1   :  { %11320 = vmatmul.mubr.msk.f32.vlgmr.msra.gmra.mrb[100].mxu0 %vm2575_vm3, %v5513_v25 }
0x11d2   :  { %12366 = vmatpush3.bf16.msra.mxu0 %v15201_v41  ;;  %11301 = vmatmul.mubr.msk.f32.vlgmr.msra.gmra.mrb[52].mxu1 %vm2575_vm3, %v5512_v54 }
0x11d3   :  { %12354 = vmatpush3.bf16.msra.mxu1 %v17655_v39  ;;  %12367 = vmatprep.subr.bf16.mxu0 %v17596_v27 }
0x11d4   :  { %12355 = vmatprep.subr.bf16.mxu1 %v17596_v27  ;;  %11338 = vmatprep.mubr.msk.f32.mxu1 %vm13465_vm2, %v17598_v10 }
0x11d5   :  { %v13214_v48 = vpop.eup %13213  ;;  %11357 = vmatprep.mubr.msk.f32.mxu0 %vm13465_vm2, %v17598_v10 }
0x11d6   :  { %v13216_v9 = vpop.eup %13215  ;;  %v5449_v50 = vsel %vm2575_vm3, %v13214_v48, 0.0  ;;  %12369 = vmatpush3.bf16.msra.mxu0 %v15210_v12 }
0x11d7   :  { %v5450_v24 = vrot.slane %v5449_v50, 4  ;;  %v5442_v20 = vsel %vm2575_vm3, %v13216_v9, 0.0  ;;  %12357 = vmatpush3.bf16.msra.mxu1 %v17656_v51  ;;  %12370 = vmatprep.subr.bf16.mxu0 %v17596_v27 }
0x11d8   :  { %v5443_v32 = vrot.slane %v5442_v20, 4  ;;  %12358 = vmatprep.subr.bf16.mxu1 %v17596_v27 }
0x11d9   :  { %v5451_v8 = vadd.f32 %v5450_v24, %v5449_v50 }
0x11da   :  { %v5444_v29 = vadd.f32 %v5443_v32, %v5442_v20  ;;  %12372 = vmatpush3.bf16.msra.mxu0 %v15216_v21 }
0x11db   :  { %v5452_v57 = vrot.slane %v5451_v8, 2  ;;  %12360 = vmatpush3.bf16.msra.mxu1 %v17657_v49  ;;  %12373 = vmatprep.subr.bf16.mxu0 %v17596_v27 }
0x11dc   :  { %v5445_v15 = vrot.slane %v5444_v29, 2  ;;  %12361 = vmatprep.subr.bf16.mxu1 %v17596_v27 }
0x11dd   :  { %v5453_v13 = vadd.f32 %v5452_v57, %v5451_v8 }
0x11de   :  { %v5446_v36 = vadd.f32 %v5445_v15, %v5444_v29  ;;  %12375 = vmatpush3.bf16.msra.mxu0 %v15222_v63 }
0x11df   :  { %12363 = vmatpush3.bf16.msra.mxu1 %v17658_v45  ;;  %v5454_v34 = vrot.slane %v5453_v13, 1  ;;  %12388 = vmatprep.subr.bf16.mxu0 %v17596_v27 }
0x11e0   :  { %v5447_v47 = vrot.slane %v5446_v36, 1  ;;  %12376 = vmatprep.subr.bf16.mxu1 %v17596_v27 }
0x11e1   :  { %v5455_v1 = vadd.f32 %v5454_v34, %v5453_v13  ;;  %v17661_v34 = vld [vmem:[#allocation49_spill] sm:$0xff] }
0x11e2   :  { %v5448_v40 = vadd.f32 %v5447_v47, %v5446_v36  ;;  %v17660_v36 = vld [vmem:[#allocation48_spill] sm:$0xff] }
0x11e3   :  { %13217 = vrcp.f32 %v5455_v1  ;;  %v17664_v47 = vld [vmem:[#allocation52_spill] sm:$0xff]  ;;  %v17665_v1 = vld [vmem:[#allocation53_spill] sm:$0xff] }
0x11e4   :  { %13219 = vrcp.f32 %v5448_v40  ;;  %v17666_v40 = vld [vmem:[#allocation56_spill] sm:$0xff] }
0x11ed   :  { %v13218_v46 = vpop.eup %13217 }
0x11ee   :  { %v13220_v37 = vpop.eup %13219  ;;  %v5471_v28 = vmul.f32 %v13218_v46, %v13214_v48  ;;  %v17667_v46 = vld [vmem:[#allocation55_spill] sm:$0xff] }
0x11ef   :  { %v5470_v56 = vmul.f32 %v13220_v37, %v13216_v9  ;;  %v17668_v37 = vld [vmem:[#allocation54_spill] sm:$0xff] }
0x11f0   :  { %v16175_v53 = vadd.f32 1e-08, %v5471_v28 }
0x11f1   :  { %v16177_v2 = vadd.f32 1e-08, %v5470_v56 }
0x11f2   :  { %v5501_v25 = vsel %vm2575_vm3, %v16175_v53, 0.0 }
0x11f3   :  { %5502 = vadd.xlane.f32.xlu0 %v5501_v25  ;;  %v5498_v54 = vsel %vm2575_vm3, %v16177_v2, 0.0 }
0x11f4   :  { %5499 = vadd.xlane.f32.xlu1 %v5498_v54 }
0x1227   :  { %v5488_v50 = vpop.xlane.xlu0 %5487 }
0x1228   :  { %13221 = vrcp.f32 %v5488_v50 }
0x122b   :  { %v5491_v24 = vpop.xlane.xlu0 %5490 }
0x122c   :  { %13223 = vrcp.f32 %v5491_v24 }
0x1232   :  { %v13222_v20 = vpop.eup %13221 }
0x1233   :  { %v5514_v48 = vmul.f32 %v13222_v20, %v16129_v31  ;;  %v17659_v31 = vld [vmem:[#allocation47_spill] sm:$0xff]  ;;  %v17669_v20 = vld [vmem:[#allocation57_spill] sm:$0xff] }
0x1235   :  { %11339 = vmatmul.mubr.msk.f32.vlgmr.msra.gmra.mrb[54].mxu1 %vm2575_vm3, %v5514_v48  ;;  %v17672_v48 = vld [vmem:[#allocation30_spill] sm:$0xff] }
0x1236   :  { %v13224_v9 = vpop.eup %13223  ;;  %12378 = vmatpush3.bf16.msra.mxu1 %v15247_v58  ;;  %11376 = vmatprep.mubr.msk.f32.mxu1 %vm13465_vm2, %v17598_v10 }
0x1237   :  { %12379 = vmatprep.subr.bf16.mxu1 %v17596_v27  ;;  %v5515_v32 = vmul.f32 %v13224_v9, %v16133_v18 }
0x1239   :  { %11358 = vmatmul.mubr.msk.f32.vlgmr.msra.gmra.mrb[102].mxu0 %vm2575_vm3, %v5515_v32 }
0x123a   :  { %12381 = vmatpush3.bf16.msra.mxu1 %v15268_v7  ;;  %12390 = vmatpush3.bf16.msra.mxu0 %v15257_v30 }
0x123b   :  { %12382 = vmatprep.subr.bf16.mxu1 %v17596_v27  ;;  %12391 = vmatprep.subr.bf16.mxu0 %v17596_v27 }
0x123c   :  { %11395 = vmatprep.mubr.msk.f32.mxu0 %vm13465_vm2, %v17598_v10 }
0x123e   :  { %12384 = vmatpush3.bf16.msra.mxu1 %v15292_v4  ;;  %12393 = vmatpush3.bf16.msra.mxu0 %v15280_v33 }
0x123f   :  { %12385 = vmatprep.subr.bf16.mxu1 %v17596_v27  ;;  %12394 = vmatprep.subr.bf16.mxu0 %v17596_v27 }
0x1242   :  { %12387 = vmatpush3.bf16.msra.mxu1 %v15312_v3  ;;  %12396 = vmatpush3.bf16.msra.mxu0 %v15302_v52 }
0x1243   :  { %12397 = vmatprep.subr.bf16.mxu0 %v17596_v27  ;;  %12400 = vmatprep.subr.bf16.mxu1 %v17596_v27 }
0x1246   :  { %12399 = vmatpush3.bf16.msra.mxu0 %v17659_v31  ;;  %v5497_v18 = vpop.xlane.xlu0 %5496 }
0x1247   :  { %13225 = vrcp.f32 %v5497_v18  ;;  %v5494_v8 = vpop.xlane.xlu1 %5493  ;;  %12412 = vmatprep.subr.bf16.mxu0 %v17596_v27 }
0x1248   :  { %13227 = vrcp.f32 %v5494_v8 }
0x1251   :  { %v13226_v29 = vpop.eup %13225 }
0x1252   :  { %v13228_v57 = vpop.eup %13227  ;;  %v5517_v15 = vmul.f32 %v13226_v29, %v16139_v62  ;;  %v17662_v62 = vld [vmem:[#allocation50_spill] sm:$0xff] }
0x1253   :  { %v5516_v13 = vmul.f32 %v13228_v57, %v16141_v42  ;;  %v17663_v42 = vld [vmem:[#allocation51_spill] sm:$0xff] }
0x1254   :  { %11396 = vmatmul.mubr.msk.f32.vlgmr.msra.gmra.mrb[104].mxu0 %vm2575_vm3, %v5517_v15  ;;  %v17673_v15 = vld [vmem:[#allocation31_spill] sm:$0xff] }
0x1255   :  { %12414 = vmatpush3.bf16.msra.mxu0 %v17660_v36  ;;  %11377 = vmatmul.mubr.msk.f32.vlgmr.msra.gmra.mrb[56].mxu1 %vm2575_vm3, %v5516_v13 }
0x1256   :  { %12402 = vmatpush3.bf16.msra.mxu1 %v17661_v34  ;;  %12415 = vmatprep.subr.bf16.mxu0 %v17596_v27 }
0x1257   :  { %12403 = vmatprep.subr.bf16.mxu1 %v17596_v27  ;;  %11433 = vmatprep.mubr.msk.f32.mxu0 %vm13465_vm2, %v17598_v10 }
0x1258   :  { %11414 = vmatprep.mubr.msk.f32.mxu1 %vm13465_vm2, %v17598_v10 }
0x1259   :  { %12417 = vmatpush3.bf16.msra.mxu0 %v17662_v62 }
0x125a   :  { %12405 = vmatpush3.bf16.msra.mxu1 %v17663_v42  ;;  %12418 = vmatprep.subr.bf16.mxu0 %v17596_v27 }
0x125b   :  { %12406 = vmatprep.subr.bf16.mxu1 %v17596_v27 }
0x125d   :  { %12420 = vmatpush3.bf16.msra.mxu0 %v17664_v47 }
0x125e   :  { %12408 = vmatpush3.bf16.msra.mxu1 %v17665_v1  ;;  %12421 = vmatprep.subr.bf16.mxu0 %v17596_v27 }
0x125f   :  { %12409 = vmatprep.subr.bf16.mxu1 %v17596_v27 }
0x1261   :  { %12423 = vmatpush3.bf16.msra.mxu0 %v17666_v40 }
0x1262   :  { %12411 = vmatpush3.bf16.msra.mxu1 %v17667_v46  ;;  %12441 = vmatprep.subr.bf16.mxu0 %v15684_v61 }
0x1263   :  { %12425 = vmatprep.subr.bf16.mxu1 %v17668_v37 }
0x1280   :  { %v5503_v28 = vpop.xlane.xlu0 %5502 }
0x1281   :  { %13229 = vrcp.f32 %v5503_v28  ;;  %v5500_v56 = vpop.xlane.xlu1 %5499 }
0x1282   :  { %13231 = vrcp.f32 %v5500_v56 }
0x128b   :  { %v13230_v25 = vpop.eup %13229 }
0x128c   :  { %v13232_v54 = vpop.eup %13231  ;;  %v5519_v50 = vmul.f32 %v13230_v25, %v16175_v53  ;;  %v17670_v53 = vld [vmem:[#allocation58_spill] sm:$0xff] }
0x128d   :  { %v5518_v24 = vmul.f32 %v13232_v54, %v16177_v2  ;;  %v17671_v2 = vld [vmem:[#allocation59_spill] sm:$0xff] }
0x128e   :  { %11434 = vmatmul.mubr.msk.f32.vlgmr.msra.gmra.mrb[106].mxu0 %vm2575_vm3, %v5519_v50 }
0x128f   :  { %11415 = vmatmul.mubr.msk.f32.vlgmr.msra.gmra.mrb[58].mxu1 %vm2575_vm3, %v5518_v24  ;;  %12443 = vmatpush3.bf16.msra.mxu0 %v15684_v61 }
0x1290   :  { %12427 = vmatpush3.bf16.msra.mxu1 %v17668_v37  ;;  %12445 = vmatprep.subr.bf16.mxu0 %v15693_v38 }
0x1291   :  { %12429 = vmatprep.subr.bf16.mxu1 %v17669_v20 }
0x1293   :  { %12447 = vmatpush3.bf16.msra.mxu0 %v15693_v38 }
0x1294   :  { %12431 = vmatpush3.bf16.msra.mxu1 %v17669_v20  ;;  %12449 = vmatprep.subr.bf16.mxu0 %v15717_v5 }
0x1295   :  { %12433 = vmatprep.subr.bf16.mxu1 %v17670_v53 }
0x1298   :  { %12435 = vmatpush3.bf16.msra.mxu1 %v17670_v53 }
0x1299   :  { %12437 = vmatprep.subr.bf16.mxu1 %v17671_v2 }
0x129c   :  { %12439 = vmatpush3.bf16.msra.mxu1 %v17671_v2 }
0x129d   :  { %12465 = vmatprep.subr.bf16.mxu1 %v17672_v48 }
0x12a4   :  { %v5662_v9 = vpop.f32.mrb[100].mxu0 }
0x12a5   :  { %v5589_v32 = vpop.f32.mrb[52].mxu1  ;;  %v11321_v18 = vpop.f32.mrb[101].mxu0  ;;  %v6105_v57 = vsel %vm151_vm0, %v5662_v9, %v15807_v19 }
0x12a6   :  { %v6104_v8 = vsel %vm151_vm0, %v5589_v32, %v15810_v11  ;;  %v11302_v29 = vpop.f32.mrb[53].mxu1 }
0x12a7   :  { %11452 = vmatprep.mubr.msk.f32.mxu1 %vm2575_vm3, %v6104_v8 }
0x12a8   :  { %11453 = vmatmul.mubr.msk.f32.vlgmr.msra.gmra.mrb[60].mxu1 %vm2575_vm3, %v6105_v57 }
0x12a9   :  { %12467 = vmatpush3.bf16.msra.mxu1 %v17672_v48 }
0x12aa   :  { %12469 = vmatprep.subr.bf16.mxu1 %v17673_v15 }
0x12ad   :  { %12471 = vmatpush3.bf16.msra.mxu1 %v17673_v15 }
0x12ae   :  { %12488 = vmatprep.subr.bf16.mxu1 %v17596_v27 }
0x1308   :  { %v5735_v13 = vpop.f32.mrb[54].mxu1 }
0x1309   :  { %v6106_v28 = vsel %vm151_vm0, %v5735_v13, %v15826_v16  ;;  %v11340_v56 = vpop.f32.mrb[55].mxu1 }
0x130a   :  { %11455 = vmatprep.mubr.msk.f32.mxu1 %vm2575_vm3, %v6106_v28 }
0x130c   :  { %v5808_v25 = vpop.f32.mrb[102].mxu0 }
0x130d   :  { %v6107_v54 = vsel %vm151_vm0, %v5808_v25, %v15820_v55  ;;  %v11359_v50 = vpop.f32.mrb[103].mxu0 }
0x130e   :  { %11456 = vmatmul.mubr.msk.f32.gmra.mrb[62].mxu1 %vm2575_vm3, %v6107_v54  ;;  %v13434_v54 = vld [vmem:[%s17332_s2 + $0x2] ss:$0 sm:$0xff] }
0x1327   :  { %v5954_v24 = vpop.f32.mrb[104].mxu0 }
0x1328   :  { %v5881_v48 = vpop.f32.mrb[56].mxu1  ;;  %v11397_v9 = vpop.f32.mrb[105].mxu0  ;;  %v6109_v8 = vsel %vm151_vm0, %v5954_v24, %v15838_v26 }
0x1329   :  { %v6108_v32 = vsel %vm151_vm0, %v5881_v48, %v15835_v35  ;;  %v11378_v18 = vpop.f32.mrb[57].mxu1 }
0x132a   :  { %11458 = vmatprep.mubr.msk.f32.mxu1 %vm2575_vm3, %v6108_v32 }
0x132b   :  { %11459 = vmatmul.mubr.msk.f32.gmra.mrb[64].mxu1 %vm2575_vm3, %v6109_v8 }
0x1361   :  { %v6100_v29 = vpop.f32.mrb[106].mxu0 }
0x1362   :  { %v6027_v57 = vpop.f32.mrb[58].mxu1  ;;  %v11435_v15 = vpop.f32.mrb[107].mxu0  ;;  %v6111_v56 = vsel %vm151_vm0, %v6100_v29, %v15852_v44 }
0x1363   :  { %v6110_v13 = vsel %vm151_vm0, %v6027_v57, %v15846_v22  ;;  %v11416_v28 = vpop.f32.mrb[59].mxu1 }
0x1364   :  { %11461 = vmatprep.mubr.msk.f32.mxu1 %vm2575_vm3, %v6110_v13 }
0x1365   :  { %11462 = vmatmul.mubr.msk.f32.gmra.mrb[66].mxu1 %vm2575_vm3, %v6111_v56 }
0x137b   :  { %v11454_v25 = vpop.f32.mrb[60].mxu1 }
0x137c   :  { %v16278_v50 = vadd.f32 %v13434_v54, %v11454_v25  ;;  %v6202_v24 = vpop.f32.mrb[61].mxu1 }
0x137d   :  { %v16280_v48 = vadd.f32 %v13434_v54, %v6202_v24 }
0x137e   :  { %6299 = vrot.lane.b32.xlu0 %v16278_v50, %s13467_s14  ;;  %v9797_v9 = vmul.f32 -1.442695, %v16278_v50 }
0x137f   :  { %6297 = vrot.lane.b32.xlu1 %v16280_v48, %s13467_s14  ;;  %v9796_v32 = vmul.f32 -1.442695, %v16280_v48 }
0x1380   :  { %13233 = vpow2.f32 %v9797_v9 }
0x1381   :  { %13235 = vpow2.f32 %v9796_v32 }
0x138a   :  { %v13234_v18 = vpop.eup %13233 }
0x138b   :  { %v13236_v8 = vpop.eup %13235  ;;  %v6266_v57 = vadd.f32 1.0, %v13234_v18 }
0x138c   :  { %v6265_v13 = vadd.f32 1.0, %v13236_v8 }
0x138d   :  { %13237 = vrcp.f32 %v6266_v57 }
0x138e   :  { %13239 = vrcp.f32 %v6265_v13 }
0x1397   :  { %v16296_v25 = vpop.eup %13237 }
0x1398   :  { %v16298_v9 = vpop.eup %13239 }
0x13e1   :  { %v11457_v29 = vpop.f32.mrb[62].mxu1 }
0x13e2   :  { %v6212_v15 = vpop.f32.mrb[63].mxu1  ;;  %v16292_v56 = vadd.f32 %v13434_v54, %v11457_v29 }
0x13e3   :  { %v16288_v28 = vadd.f32 %v13434_v54, %v6212_v15 }
0x13e5   :  { %6301 = vrot.lane.b32.xlu1 %v16288_v28, %s13467_s14 }
0x13e9   :  { %6303 = vrot.lane.b32.xlu1 %v16292_v56, %s13467_s14 }
0x13f0   :  { %v6300_v24 = vpop.permute.xlu0 %6299 }
0x13f1   :  { %v6322_v32 = vmul.f32 %v16296_v25, %v6300_v24  ;;  %v6298_v18 = vpop.permute.xlu1 %6297  ;;  %v9798_v24 = vmul.f32 -1.442695, %v16288_v28 }
0x13f2   :  { %v6321_v8 = vmul.f32 %v16298_v9, %v6298_v18 }
0x13f3   :  { %6339 = vrot.lane.b32.xlu0 %v6322_v32, %s13468_s21  ;;  %v9799_v32 = vmul.f32 -1.442695, %v16292_v56  ;;  %13241 = vpow2.f32 %v9798_v24 }
0x13f4   :  { %6337 = vrot.lane.b32.xlu1 %v6321_v8, %s13468_s21 }
0x13f5   :  { %13243 = vpow2.f32 %v9799_v32 }
0x13fd   :  { %v13242_v8 = vpop.eup %13241 }
0x13fe   :  { %v11460_v57 = vpop.f32.mrb[64].mxu1 }
0x13ff   :  { %v16304_v29 = vadd.f32 %v13434_v54, %v11460_v57  ;;  %v6222_v15 = vpop.f32.mrb[65].mxu1  ;;  %v6267_v57 = vadd.f32 1.0, %v13242_v8  ;;  %v13244_v53 = vpop.eup %13243 }
0x1400   :  { %v16306_v13 = vadd.f32 %v13434_v54, %v6222_v15  ;;  %v6268_v20 = vadd.f32 1.0, %v13244_v53 }
0x1401   :  { %6307 = vrot.lane.b32.xlu0 %v16304_v29, %s13467_s14  ;;  %13245 = vrcp.f32 %v6267_v57  ;;  %v9801_v15 = vmul.f32 -1.442695, %v16304_v29 }
0x1402   :  { %6305 = vrot.lane.b32.xlu1 %v16306_v13, %s13467_s14  ;;  %13247 = vrcp.f32 %v6268_v20  ;;  %v9800_v38 = vmul.f32 -1.442695, %v16306_v13 }
0x1403   :  { %13249 = vpow2.f32 %v9801_v15 }
0x1404   :  { %13251 = vpow2.f32 %v9800_v38 }
0x140b   :  { %v16316_v37 = vpop.eup %13245 }
0x140c   :  { %v16320_v24 = vpop.eup %13247 }
0x140d   :  { %v13250_v57 = vpop.eup %13249 }
0x140e   :  { %v6270_v38 = vadd.f32 1.0, %v13250_v57 }
0x1410   :  { %13253 = vrcp.f32 %v6270_v38 }
0x1438   :  { %v11463_v2 = vpop.f32.mrb[66].mxu1 }
0x1439   :  { %v6232_v18 = vpop.f32.mrb[67].mxu1  ;;  %v16328_v53 = vadd.f32 %v13434_v54, %v11463_v2 }
0x143a   :  { %v16322_v8 = vadd.f32 %v13434_v54, %v6232_v18 }
0x143b   :  { %v9803_v38 = vmul.f32 -1.442695, %v16328_v53 }
0x1457   :  { %v6302_v61 = vpop.permute.xlu1 %6301 }
0x1458   :  { %v6323_v46 = vmul.f32 %v16316_v37, %v6302_v61  ;;  %v13252_v61 = vpop.eup %13251 }
0x1459   :  { %v16334_v40 = vpop.eup %13253 }
0x145a   :  { %6341 = vrot.lane.b32.xlu1 %v6323_v46, %s13468_s21  ;;  %v6269_v46 = vadd.f32 1.0, %v13252_v61 }
0x145b   :  { %v6304_v32 = vpop.permute.xlu1 %6303 }
0x145c   :  { %v6324_v20 = vmul.f32 %v16320_v24, %v6304_v32  ;;  %13255 = vrcp.f32 %v6269_v46 }
0x145e   :  { %6343 = vrot.lane.b32.xlu0 %v6324_v20, %s13468_s21  ;;  %6309 = vrot.lane.b32.xlu1 %v16322_v8, %s13467_s14 }
0x1462   :  { %6311 = vrot.lane.b32.xlu0 %v16328_v53, %s13467_s14 }
0x1465   :  { %v6340_v15 = vpop.permute.xlu0 %6339 }
0x1466   :  { %v6338_v18 = vpop.permute.xlu1 %6337  ;;  %v6362_v32 = vadd.f32 %v6340_v15, %v16278_v50  ;;  %v16336_v54 = vpop.eup %13255 }
0x1467   :  { %v6361_v20 = vadd.f32 %v6338_v18, %v16280_v48  ;;  %v9802_v48 = vmul.f32 -1.442695, %v16322_v8 }
0x1468   :  { %13257 = vtanh.f32 %v6362_v32 }
0x1469   :  { %13259 = vtanh.f32 %v6361_v20 }
0x146a   :  { %13261 = vpow2.f32 %v9802_v48 }
0x146b   :  { %13263 = vpow2.f32 %v9803_v38 }
0x1472   :  { %v13258_v61 = vpop.eup %13257 }
0x1473   :  { %v6308_v2 = vpop.permute.xlu0 %6307  ;;  %v13260_v50 = vpop.eup %13259 }
0x1474   :  { %v6326_v1 = vmul.f32 %v16334_v40, %v6308_v2  ;;  %v6306_v47 = vpop.permute.xlu1 %6305  ;;  %v13262_v46 = vpop.eup %13261 }
0x1475   :  { %v6325_v57 = vmul.f32 %v16336_v54, %v6306_v47  ;;  %v6271_v15 = vadd.f32 1.0, %v13262_v46  ;;  %v13264_v18 = vpop.eup %13263 }
0x1476   :  { %6347 = vrot.lane.b32.xlu0 %v6326_v1, %s13468_s21  ;;  %v6272_v47 = vadd.f32 1.0, %v13264_v18 }
0x1477   :  { %6345 = vrot.lane.b32.xlu1 %v6325_v57, %s13468_s21  ;;  %13265 = vrcp.f32 %v6271_v15 }
0x1478   :  { %13267 = vrcp.f32 %v6272_v47 }
0x147a   :  { %6395 = vrot.lane.b32.xlu0 %v13258_v61, %s13464_s9 }
0x147b   :  { %6393 = vrot.lane.b32.xlu1 %v13260_v50, %s13464_s9 }
0x1481   :  { %v16347_v20 = vpop.eup %13265 }
0x1482   :  { %v16352_v48 = vpop.eup %13267 }
0x14cc   :  { %v6342_v1 = vpop.permute.xlu1 %6341 }
0x14cd   :  { %v6363_v32 = vadd.f32 %v6342_v1, %v16288_v28 }
0x14cf   :  { %13269 = vtanh.f32 %v6363_v32  ;;  %v6378_v32 = vsub.f32 1.0, %v16296_v25 }
0x14d0   :  { %v6344_v2 = vpop.permute.xlu0 %6343  ;;  %v6310_v57 = vpop.permute.xlu1 %6309 }
0x14d1   :  { %v6364_v61 = vadd.f32 %v6344_v2, %v16292_v56  ;;  %v6327_v50 = vmul.f32 %v16347_v20, %v6310_v57  ;;  %v6377_v57 = vsub.f32 1.0, %v16298_v9 }
0x14d3   :  { %13271 = vtanh.f32 %v6364_v61  ;;  %6349 = vrot.lane.b32.xlu1 %v6327_v50, %s13468_s21  ;;  %v6426_v61 = vmul.f32 %v16296_v25, %v15807_v19 }
0x14d4   :  { %v6312_v38 = vpop.permute.xlu0 %6311 }
0x14d5   :  { %v6328_v46 = vmul.f32 %v16352_v48, %v6312_v38 }
0x14d7   :  { %6351 = vrot.lane.b32.xlu0 %v6328_v46, %s13468_s21  ;;  %v6425_v46 = vmul.f32 %v16298_v9, %v15810_v11 }
0x14d9   :  { %v13270_v28 = vpop.eup %13269 }
0x14da   :  { %6397 = vrot.lane.b32.xlu1 %v13270_v28, %s13464_s9 }
0x14dd   :  { %v13272_v15 = vpop.eup %13271 }
0x14de   :  { %6399 = vrot.lane.b32.xlu0 %v13272_v15, %s13464_s9 }
0x14e8   :  { %v6348_v18 = vpop.permute.xlu0 %6347 }
0x14e9   :  { %v6366_v56 = vadd.f32 %v6348_v18, %v16304_v29  ;;  %v6346_v47 = vpop.permute.xlu1 %6345 }
0x14ea   :  { %v6365_v1 = vadd.f32 %v6346_v47, %v16306_v13 }
0x14eb   :  { %13273 = vtanh.f32 %v6366_v56  ;;  %v6380_v56 = vsub.f32 1.0, %v16320_v24 }
0x14ec   :  { %13275 = vtanh.f32 %v6365_v1  ;;  %v6396_v2 = vpop.permute.xlu0 %6395 }
0x14ed   :  { %v6418_v50 = vmul.f32 %v6396_v2, %v6378_v32  ;;  %v6394_v38 = vpop.permute.xlu1 %6393  ;;  %v6379_v32 = vsub.f32 1.0, %v16316_v37  ;;  %v6428_v2 = vmul.f32 %v16320_v24, %v15820_v55 }
0x14ee   :  { %v6417_v28 = vmul.f32 %v6394_v38, %v6377_v57 }
0x14ef   :  { %v16366_v29 = vadd.f32 %v6426_v61, %v6418_v50 }
0x14f0   :  { %v16368_v15 = vadd.f32 %v6425_v46, %v6417_v28  ;;  %v6382_v28 = vsub.f32 1.0, %v16334_v40 }
0x14f1   :  { %6451 = vrot.lane.b32.xlu0 %v16366_v29, %s13464_s9 }
0x14f2   :  { %6449 = vrot.lane.b32.xlu1 %v16368_v15, %s13464_s9 }
0x14f5   :  { %v13274_v13 = vpop.eup %13273 }
0x14f6   :  { %v13276_v18 = vpop.eup %13275  ;;  %6403 = vrot.lane.b32.xlu0 %v13274_v13, %s13464_s9 }
0x14f7   :  { %6401 = vrot.lane.b32.xlu1 %v13276_v18, %s13464_s9  ;;  %v6381_v18 = vsub.f32 1.0, %v16336_v54 }
0x1545   :  { %v6350_v19 = vpop.permute.xlu1 %6349 }
0x1546   :  { %v6367_v11 = vadd.f32 %v6350_v19, %v16322_v8  ;;  %v6427_v8 = vmul.f32 %v16316_v37, %v15826_v16  ;;  %v6430_v16 = vmul.f32 %v16334_v40, %v15838_v26  ;;  %v6431_v26 = vmul.f32 %v16347_v20, %v15846_v22 }
0x1548   :  { %13277 = vtanh.f32 %v6367_v11  ;;  %v6429_v11 = vmul.f32 %v16336_v54, %v15835_v35  ;;  %v6384_v35 = vsub.f32 1.0, %v16352_v48 }
0x1549   :  { %v6352_v25 = vpop.permute.xlu0 %6351 }
0x154a   :  { %v6368_v9 = vadd.f32 %v6352_v25, %v16328_v53 }
0x154c   :  { %13279 = vtanh.f32 %v6368_v9  ;;  %v6398_v47 = vpop.permute.xlu1 %6397 }
0x154d   :  { %v6419_v50 = vmul.f32 %v6398_v47, %v6379_v32  ;;  %v6383_v47 = vsub.f32 1.0, %v16347_v20 }
0x154f   :  { %v16389_v46 = vadd.f32 %v6427_v8, %v6419_v50 }
0x1550   :  { %v6400_v1 = vpop.permute.xlu0 %6399 }
0x1551   :  { %v6420_v57 = vmul.f32 %v6400_v1, %v6380_v56 }
0x1552   :  { %v13278_v61 = vpop.eup %13277 }
0x1553   :  { %v16382_v38 = vadd.f32 %v6428_v2, %v6420_v57  ;;  %6405 = vrot.lane.b32.xlu0 %v13278_v61, %s13464_s9  ;;  %v6432_v2 = vmul.f32 %v16352_v48, %v15852_v44 }
0x1555   :  { %6455 = vrot.lane.b32.xlu1 %v16382_v38, %s13464_s9 }
0x1556   :  { %v13280_v53 = vpop.eup %13279 }
0x1557   :  { %6407 = vrot.lane.b32.xlu0 %v13280_v53, %s13464_s9 }
0x1559   :  { %6453 = vrot.lane.b32.xlu1 %v16389_v46, %s13464_s9 }
0x1563   :  { %v6452_v55 = vpop.permute.xlu0 %6451 }
0x1564   :  { %v6450_v24 = vpop.permute.xlu1 %6449  ;;  %v6476_v22 = vsel %vm151_vm0, %v6452_v55, 0.0 }
0x1565   :  { %v6473_v48 = vsel %vm151_vm0, %v6450_v24, 0.0 }
0x1568   :  { %v6404_v13 = vpop.permute.xlu0 %6403 }
0x1569   :  { %v6422_v37 = vmul.f32 %v6404_v13, %v6382_v28  ;;  %v6402_v19 = vpop.permute.xlu1 %6401 }
0x156a   :  { %v6421_v25 = vmul.f32 %v6402_v19, %v6381_v18 }
0x156b   :  { %v16400_v9 = vadd.f32 %v6430_v16, %v6422_v37 }
0x156c   :  { %v16402_v56 = vadd.f32 %v6429_v11, %v6421_v25 }
0x156d   :  { %6459 = vrot.lane.b32.xlu1 %v16400_v9, %s13464_s9 }
0x156e   :  { %6457 = vrot.lane.b32.xlu0 %v16402_v56, %s13464_s9 }
0x15c5   :  { %v6406_v1 = vpop.permute.xlu0 %6405 }
0x15c6   :  { %v6423_v40 = vmul.f32 %v6406_v1, %v6383_v47 }
0x15c7   :  { %v6456_v50 = vpop.permute.xlu1 %6455 }
0x15c8   :  { %v16411_v32 = vadd.f32 %v6431_v26, %v6423_v40  ;;  %v6482_v8 = vsel %vm151_vm0, %v6456_v50, 0.0 }
0x15c9   :  { %v6408_v54 = vpop.permute.xlu0 %6407 }
0x15ca   :  { %v6424_v57 = vmul.f32 %v6408_v54, %v6384_v35  ;;  %6461 = vrot.lane.b32.xlu0 %v16411_v32, %s13464_s9 }
0x15cb   :  { %v6454_v20 = vpop.permute.xlu1 %6453 }
0x15cc   :  { %v16418_v61 = vadd.f32 %v6432_v2, %v6424_v57  ;;  %v6479_v28 = vsel %vm151_vm0, %v6454_v20, 0.0 }
0x15ce   :  { %6463 = vrot.lane.b32.xlu1 %v16418_v61, %s13464_s9 }
0x15df   :  { %v6460_v53 = vpop.permute.xlu1 %6459 }
0x15e0   :  { %v6488_v44 = vsel %vm151_vm0, %v6460_v53, 0.0  ;;  %v6458_v13 = vpop.permute.xlu0 %6457 }
0x15e1   :  { %v6485_v18 = vsel %vm151_vm0, %v6458_v13, 0.0 }
0x15e9   :  { %6477 = vadd.xlane.f32.xlu0 %v6476_v22 }
0x15ed   :  { %6483 = vadd.xlane.f32.xlu0 %v6482_v8 }
0x15f1   :  { %6489 = vadd.xlane.f32.xlu0 %v6488_v44 }
0x15f2   :  { %6474 = vadd.xlane.f32.xlu1 %v6473_v48 }
0x15f6   :  { %6480 = vadd.xlane.f32.xlu1 %v6479_v28 }
0x15fa   :  { %6486 = vadd.xlane.f32.xlu1 %v6485_v18 }
0x163c   :  { %v6462_v55 = vpop.permute.xlu0 %6461 }
0x163d   :  { %v6491_v40 = vsel %vm151_vm0, %v6462_v55, 0.0 }
0x1640   :  { %v6464_v11 = vpop.permute.xlu1 %6463 }
0x1641   :  { %v6494_v54 = vsel %vm151_vm0, %v6464_v11, 0.0 }
0x1676   :  { %v6478_v16 = vpop.xlane.xlu0 %6477 }
0x1677   :  { %v6498_v37 = vmul.f32 0.03125, %v6478_v16 }
0x1679   :  { %v16429_v19 = vsub.f32 %v16366_v29, %v6498_v37 }
0x167a   :  { %v6484_v35 = vpop.xlane.xlu0 %6483 }
0x167b   :  { %v6514_v25 = vmul.f32 %v16429_v19, %v16429_v19  ;;  %v6500_v2 = vmul.f32 0.03125, %v6484_v35 }
0x167d   :  { %6531 = vrot.lane.b32.xlu1 %v6514_v25, %s13464_s9  ;;  %v16443_v50 = vsub.f32 %v16382_v38, %v6500_v2 }
0x167e   :  { %v6490_v57 = vpop.xlane.xlu0 %6489 }
0x167f   :  { %v6475_v24 = vpop.xlane.xlu1 %6474  ;;  %v6502_v22 = vmul.f32 0.03125, %v6490_v57  ;;  %v6516_v8 = vmul.f32 %v16443_v50, %v16443_v50 }
0x1680   :  { %v6497_v47 = vmul.f32 0.03125, %v6475_v24 }
0x1681   :  { %v16448_v53 = vsub.f32 %v16400_v9, %v6502_v22 }
0x1682   :  { %v16435_v1 = vsub.f32 %v16368_v15, %v6497_v47 }
0x1683   :  { %v6481_v20 = vpop.xlane.xlu1 %6480  ;;  %v6518_v28 = vmul.f32 %v16448_v53, %v16448_v53 }
0x1684   :  { %v6513_v26 = vmul.f32 %v16435_v1, %v16435_v1  ;;  %v6499_v44 = vmul.f32 0.03125, %v6481_v20 }
0x1686   :  { %6529 = vrot.lane.b32.xlu0 %v6513_v26, %s13464_s9  ;;  %v16454_v13 = vsub.f32 %v16389_v46, %v6499_v44 }
0x1687   :  { %v6487_v48 = vpop.xlane.xlu1 %6486 }
0x1688   :  { %v6501_v18 = vmul.f32 0.03125, %v6487_v48  ;;  %v6515_v55 = vmul.f32 %v16454_v13, %v16454_v13 }
0x168a   :  { %v16460_v16 = vsub.f32 %v16402_v56, %v6501_v18 }
0x168c   :  { %v6517_v37 = vmul.f32 %v16460_v16, %v16460_v16 }
0x16a1   :  { %6492 = vadd.xlane.f32.xlu1 %v6491_v40 }
0x16a5   :  { %6495 = vadd.xlane.f32.xlu0 %v6494_v54 }
0x16b2   :  { %6535 = vrot.lane.b32.xlu1 %v6516_v8, %s13464_s9 }
0x16b6   :  { %6539 = vrot.lane.b32.xlu1 %v6518_v28, %s13464_s9 }
0x16bb   :  { %6533 = vrot.lane.b32.xlu0 %v6515_v55, %s13464_s9 }
0x16bf   :  { %6537 = vrot.lane.b32.xlu0 %v6517_v37, %s13464_s9 }
0x16ef   :  { %v6532_v11 = vpop.permute.xlu1 %6531 }
0x16f0   :  { %v6556_v25 = vsel %vm151_vm0, %v6532_v11, 0.0 }
0x16f1   :  { %6557 = vadd.xlane.f32.xlu0 %v6556_v25 }
0x16f8   :  { %v6530_v24 = vpop.permute.xlu0 %6529 }
0x16f9   :  { %v6553_v47 = vsel %vm151_vm0, %v6530_v24, 0.0 }
0x16fa   :  { %6554 = vadd.xlane.f32.xlu1 %v6553_v47 }
0x172e   :  { %v6493_v26 = vpop.xlane.xlu1 %6492 }
0x172f   :  { %v6503_v40 = vmul.f32 0.03125, %v6493_v26 }
0x1731   :  { %v16469_v35 = vsub.f32 %v16411_v32, %v6503_v40 }
0x1732   :  { %v6496_v54 = vpop.xlane.xlu0 %6495  ;;  %v6536_v8 = vpop.permute.xlu1 %6535 }
0x1733   :  { %v6519_v2 = vmul.f32 %v16469_v35, %v16469_v35  ;;  %v6504_v57 = vmul.f32 0.03125, %v6496_v54  ;;  %v6562_v44 = vsel %vm151_vm0, %v6536_v8, 0.0 }
0x1735   :  { %v16474_v22 = vsub.f32 %v16418_v61, %v6504_v57  ;;  %6541 = vrot.lane.b32.xlu0 %v6519_v2, %s13464_s9 }
0x1736   :  { %v6540_v48 = vpop.permute.xlu1 %6539  ;;  %v6534_v28 = vpop.permute.xlu0 %6533 }
0x1737   :  { %v6520_v20 = vmul.f32 %v16474_v22, %v16474_v22  ;;  %v6568_v18 = vsel %vm151_vm0, %v6540_v48, 0.0  ;;  %v6559_v55 = vsel %vm151_vm0, %v6534_v28, 0.0 }
0x1739   :  { %6543 = vrot.lane.b32.xlu1 %v6520_v20, %s13464_s9 }
0x173a   :  { %v6538_v37 = vpop.permute.xlu0 %6537 }
0x173b   :  { %v6565_v11 = vsel %vm151_vm0, %v6538_v37, 0.0 }
0x1754   :  { %6563 = vadd.xlane.f32.xlu0 %v6562_v44 }
0x1758   :  { %6569 = vadd.xlane.f32.xlu0 %v6568_v18 }
0x175d   :  { %6560 = vadd.xlane.f32.xlu1 %v6559_v55 }
0x1761   :  { %6566 = vadd.xlane.f32.xlu1 %v6565_v11 }
0x177e   :  { %v6558_v25 = vpop.xlane.xlu0 %6557 }
0x177f   :  { %v6578_v24 = vmul.f32 0.03125, %v6558_v25 }
0x1781   :  { %v6586_v47 = vadd.f32 1e-05, %v6578_v24 }
0x1783   :  { %13281 = vrsqrt.f32 %v6586_v47 }
0x1787   :  { %v6555_v26 = vpop.xlane.xlu1 %6554 }
0x1788   :  { %v6577_v40 = vmul.f32 0.03125, %v6555_v26 }
0x178a   :  { %v6585_v54 = vadd.f32 1e-05, %v6577_v40 }
0x178c   :  { %13283 = vrsqrt.f32 %v6585_v54 }
0x178d   :  { %v13282_v2 = vpop.eup %13281 }
0x178e   :  { %v6602_v57 = vmul.f32 %v13282_v2, %v16429_v19 }
0x1790   :  { %6619 = vrot.lane.b32.xlu1 %v6602_v57, %s13464_s9 }
0x1796   :  { %v13284_v20 = vpop.eup %13283 }
0x1797   :  { %v6601_v8 = vmul.f32 %v13284_v20, %v16435_v1 }
0x1799   :  { %6617 = vrot.lane.b32.xlu0 %v6601_v8, %s13464_s9 }
0x17a7   :  { %v6542_v44 = vpop.permute.xlu0 %6541 }
0x17a8   :  { %v6571_v48 = vsel %vm151_vm0, %v6542_v44, 0.0 }
0x17ab   :  { %v6544_v28 = vpop.permute.xlu1 %6543 }
0x17ac   :  { %v6574_v18 = vsel %vm151_vm0, %v6544_v28, 0.0 }
0x17b4   :  { %6572 = vadd.xlane.f32.xlu1 %v6571_v48 }
0x17b8   :  { %6575 = vadd.xlane.f32.xlu0 %v6574_v18 }
0x17e1   :  { %v6564_v55 = vpop.xlane.xlu0 %6563 }
0x17e2   :  { %v6580_v37 = vmul.f32 0.03125, %v6564_v55 }
0x17e4   :  { %v6588_v11 = vadd.f32 1e-05, %v6580_v37 }
0x17e5   :  { %v6570_v19 = vpop.xlane.xlu0 %6569 }
0x17e6   :  { %13285 = vrsqrt.f32 %v6588_v11  ;;  %v6582_v25 = vmul.f32 0.03125, %v6570_v19 }
0x17e8   :  { %v6590_v26 = vadd.f32 1e-05, %v6582_v25 }
0x17ea   :  { %v6561_v24 = vpop.xlane.xlu1 %6560 }
0x17eb   :  { %v6579_v47 = vmul.f32 0.03125, %v6561_v24 }
0x17ed   :  { %v6587_v1 = vadd.f32 1e-05, %v6579_v47 }
0x17ee   :  { %v6567_v40 = vpop.xlane.xlu1 %6566 }
0x17ef   :  { %13287 = vrsqrt.f32 %v6587_v1  ;;  %v6581_v54 = vmul.f32 0.03125, %v6567_v40 }
0x17f0   :  { %v13286_v2 = vpop.eup %13285  ;;  %13289 = vrsqrt.f32 %v6590_v26 }
0x17f1   :  { %v6589_v57 = vadd.f32 1e-05, %v6581_v54  ;;  %v6604_v20 = vmul.f32 %v13286_v2, %v16443_v50 }
0x17f3   :  { %13291 = vrsqrt.f32 %v6589_v57  ;;  %6623 = vrot.lane.b32.xlu1 %v6604_v20, %s13464_s9 }
0x17f9   :  { %v13288_v8 = vpop.eup %13287 }
0x17fa   :  { %v6603_v44 = vmul.f32 %v13288_v8, %v16454_v13  ;;  %v13290_v48 = vpop.eup %13289  ;;  %v13435_v8 = vld [vmem:[%s17332_s2 + $0x3] ss:$0 sm:$0xff] }
0x17fb   :  { %v6606_v18 = vmul.f32 %v13290_v48, %v16448_v53 }
0x17fc   :  { %6621 = vrot.lane.b32.xlu0 %v6603_v44, %s13464_s9 }
0x17fd   :  { %v13292_v28 = vpop.eup %13291 }
0x17fe   :  { %v6605_v55 = vmul.f32 %v13292_v28, %v16460_v16 }
0x1800   :  { %6627 = vrot.lane.b32.xlu0 %v6606_v18, %s13464_s9  ;;  %6625 = vrot.lane.b32.xlu1 %v6605_v55, %s13464_s9 }
0x1802   :  { %v6620_v50 = vpop.permute.xlu1 %6619 }
0x180b   :  { %v6618_v37 = vpop.permute.xlu0 %6617 }
0x180c   :  { %11472 = vmatprep.mubr.msk.f32.mxu0 %vm151_vm0, %v6618_v37  ;;  %v17674_v37 = vld [vmem:[#allocation8_spill] sm:$0xff] }
0x180d   :  { %11473 = vmatmul.mubr.msk.f32.vlgmr.msra.gmra.mrb[108].mxu0 %vm151_vm0, %v6620_v50  ;;  %v17675_v50 = vld [vmem:[#allocation7_spill] sm:$0xff] }
0x180e   :  { %12451 = vmatpush3.bf16.msra.mxu0 %v15717_v5 }
0x180f   :  { %12453 = vmatprep.subr.bf16.mxu0 %v15730_v0 }
0x1812   :  { %12455 = vmatpush3.bf16.msra.mxu0 %v15730_v0 }
0x1813   :  { %12457 = vmatprep.subr.bf16.mxu0 %v15743_v23 }
0x1816   :  { %12459 = vmatpush3.bf16.msra.mxu0 %v15743_v23 }
0x1817   :  { %12461 = vmatprep.subr.bf16.mxu0 %v15750_v60 }
0x181a   :  { %12463 = vmatpush3.bf16.msra.mxu0 %v15750_v60 }
0x181b   :  { %12472 = vmatprep.subr.bf16.mxu0 %v17596_v27 }
0x1841   :  { %v6573_v53 = vpop.xlane.xlu1 %6572 }
0x1842   :  { %v6583_v13 = vmul.f32 0.03125, %v6573_v53  ;;  %v17676_v53 = vld [vmem:[#allocation10_spill] sm:$0xff] }
0x1844   :  { %v6591_v16 = vadd.f32 1e-05, %v6583_v13 }
0x1845   :  { %v6576_v11 = vpop.xlane.xlu0 %6575 }
0x1846   :  { %13293 = vrsqrt.f32 %v6591_v16  ;;  %v6584_v19 = vmul.f32 0.03125, %v6576_v11 }
0x1848   :  { %v6592_v25 = vadd.f32 1e-05, %v6584_v19 }
0x184a   :  { %13295 = vrsqrt.f32 %v6592_v25 }
0x1850   :  { %v13294_v24 = vpop.eup %13293 }
0x1851   :  { %v6607_v47 = vmul.f32 %v13294_v24, %v16469_v35 }
0x1853   :  { %6629 = vrot.lane.b32.xlu1 %v6607_v47, %s13464_s9 }
0x1854   :  { %v13296_v26 = vpop.eup %13295 }
0x1855   :  { %v6608_v1 = vmul.f32 %v13296_v26, %v16474_v22 }
0x1857   :  { %6631 = vrot.lane.b32.xlu0 %v6608_v1, %s13464_s9 }
0x1865   :  { %v6624_v40 = vpop.permute.xlu1 %6623 }
0x186e   :  { %v6622_v54 = vpop.permute.xlu0 %6621 }
0x186f   :  { %11475 = vmatprep.mubr.msk.f32.mxu0 %vm151_vm0, %v6622_v54 }
0x1870   :  { %11476 = vmatmul.mubr.msk.f32.gmra.mrb[110].mxu0 %vm151_vm0, %v6624_v40 }
0x1872   :  { %v6628_v2 = vpop.permute.xlu0 %6627  ;;  %v6626_v57 = vpop.permute.xlu1 %6625 }
0x1873   :  { %11478 = vmatprep.mubr.msk.f32.mxu0 %vm151_vm0, %v6626_v57 }
0x1874   :  { %11479 = vmatmul.mubr.msk.f32.gmra.mrb[112].mxu0 %vm151_vm0, %v6628_v2 }
0x18c5   :  { %v6630_v35 = vpop.permute.xlu1 %6629 }
0x18c6   :  { %11481 = vmatprep.mubr.msk.f32.mxu0 %vm151_vm0, %v6630_v35 }
0x18c9   :  { %v6632_v20 = vpop.permute.xlu0 %6631 }
0x18ca   :  { %11482 = vmatmul.mubr.msk.f32.gmra.mrb[114].mxu0 %vm151_vm0, %v6632_v20 }
0x18e0   :  { %v11474_v22 = vpop.f32.mrb[108].mxu0 }
0x18e1   :  { %v6721_v44 = vadd.f32 %v13435_v8, %v11474_v22  ;;  %v6715_v48 = vpop.f32.mrb[109].mxu0 }
0x18e2   :  { %v6716_v28 = vadd.f32 %v13435_v8, %v6715_v48 }
0x18e3   :  { %v6755_v55 = vmax.f32 %v6721_v44, 0.0 }
0x18e4   :  { %v6754_v18 = vmax.f32 %v6716_v28, 0.0 }
0x18e6   :  { %11500 = vmatprep.mubr.msk.f32.mxu0 %vm2575_vm3, %v6754_v18 }
0x18e7   :  { %11501 = vmatmul.mubr.msk.f32.vlgmr.msra.gmra.mrb[116].mxu0 %vm2575_vm3, %v6755_v55 }
0x18e8   :  { %12475 = vmatpush3.bf16.xpose.msk.msra.mxu0 %vm14662_vm1, %v14666_v6 }
0x18e9   :  { %12476 = vmatprep.subr.bf16.mxu0 %v17596_v27 }
0x18f0   :  { %12479 = vmatpush3.bf16.xpose.msk.msra.mxu0 %vm14662_vm1, %v17674_v37 }
0x18f1   :  { %12480 = vmatprep.subr.bf16.mxu0 %v17596_v27 }
0x18f8   :  { %12483 = vmatpush3.bf16.xpose.msk.msra.mxu0 %vm14662_vm1, %v17675_v50 }
0x18f9   :  { %12484 = vmatprep.subr.bf16.mxu0 %v17596_v27 }
0x1900   :  { %12487 = vmatpush3.bf16.xpose.msk.msra.mxu0 %vm14662_vm1, %v17676_v53 }
0x1901   :  { %12504 = vmatprep.subr.bf16.mxu0 %v17596_v27 }
0x1943   :  { %v11477_v6 = vpop.f32.mrb[110].mxu0 }
0x1944   :  { %v6731_v13 = vadd.f32 %v13435_v8, %v11477_v6  ;;  %v6725_v16 = vpop.f32.mrb[111].mxu0 }
0x1945   :  { %v6726_v11 = vadd.f32 %v13435_v8, %v6725_v16  ;;  %v17677_v16 = vld [vmem:[#allocation62_spill] sm:$0xff] }
0x1946   :  { %v6757_v24 = vmax.f32 %v6731_v13, 0.0 }
0x1947   :  { %v6756_v19 = vmax.f32 %v6726_v11, 0.0  ;;  %v11480_v25 = vpop.f32.mrb[112].mxu0 }
0x1948   :  { %v6741_v47 = vadd.f32 %v13435_v8, %v11480_v25  ;;  %v6735_v26 = vpop.f32.mrb[113].mxu0 }
0x1949   :  { %v6736_v1 = vadd.f32 %v13435_v8, %v6735_v26  ;;  %11503 = vmatprep.mubr.msk.f32.mxu0 %vm2575_vm3, %v6756_v19 }
0x194a   :  { %11504 = vmatmul.mubr.msk.f32.gmra.mrb[118].mxu0 %vm2575_vm3, %v6757_v24  ;;  %v6759_v54 = vmax.f32 %v6741_v47, 0.0 }
0x194b   :  { %v6758_v40 = vmax.f32 %v6736_v1, 0.0 }
0x194d   :  { %11506 = vmatprep.mubr.msk.f32.mxu0 %vm2575_vm3, %v6758_v40 }
0x194e   :  { %11507 = vmatmul.mubr.msk.f32.gmra.mrb[120].mxu0 %vm2575_vm3, %v6759_v54 }
0x199d   :  { %v11483_v2 = vpop.f32.mrb[114].mxu0 }
0x199e   :  { %v6751_v57 = vadd.f32 %v13435_v8, %v11483_v2  ;;  %v6745_v35 = vpop.f32.mrb[115].mxu0 }
0x199f   :  { %v6746_v20 = vadd.f32 %v13435_v8, %v6745_v35 }
0x19a0   :  { %v6761_v44 = vmax.f32 %v6751_v57, 0.0 }
0x19a1   :  { %v6760_v22 = vmax.f32 %v6746_v20, 0.0 }
0x19a3   :  { %11509 = vmatprep.mubr.msk.f32.mxu0 %vm2575_vm3, %v6760_v22 }
0x19a4   :  { %11510 = vmatmul.mubr.msk.f32.gmra.mrb[122].mxu0 %vm2575_vm3, %v6761_v44 }
0x19a5   :  { %11548 = vmatprep.mubr.msk.f32.mxu0 %vm13465_vm2, %v17598_v10 }
0x19ba   :  { %v11502_v48 = vpop.f32.mrb[116].mxu0 }
0x19bb   :  { %6901 = vrot.lane.b32.xlu0 %v11502_v48, %s13467_s14  ;;  %v6852_v28 = vpop.f32.mrb[117].mxu0 }
0x19bc   :  { %6899 = vrot.lane.b32.xlu1 %v6852_v28, %s13467_s14 }
0x1a1d   :  { %v11505_v18 = vpop.f32.mrb[118].mxu0 }
0x1a1e   :  { %6905 = vrot.lane.b32.xlu0 %v11505_v18, %s13467_s14  ;;  %v6862_v55 = vpop.f32.mrb[119].mxu0 }
0x1a1f   :  { %6903 = vrot.lane.b32.xlu1 %v6862_v55, %s13467_s14 }
0x1a21   :  { %v11508_v8 = vpop.f32.mrb[120].mxu0 }
0x1a22   :  { %v6872_v37 = vpop.f32.mrb[121].mxu0 }
0x1a2d   :  { %v6902_v50 = vpop.permute.xlu0 %6901 }
0x1a2e   :  { %v6924_v53 = vadd.f32 %v6902_v50, %v16366_v29  ;;  %v6900_v6 = vpop.permute.xlu1 %6899 }
0x1a2f   :  { %v6923_v13 = vadd.f32 %v6900_v6, %v16368_v15 }
0x1a30   :  { %v16554_v11 = vadd.f32 %v6924_v53, %v17677_v16 }
0x1a31   :  { %v16557_v19 = vadd.f32 %v6923_v13, %v17677_v16 }
0x1a32   :  { %6949 = vrot.lane.b32.xlu0 %v16554_v11, %s13464_s9 }
0x1a33   :  { %6947 = vrot.lane.b32.xlu1 %v16557_v19, %s13464_s9 }
0x1a36   :  { %6909 = vrot.lane.b32.xlu0 %v11508_v8, %s13467_s14 }
0x1a37   :  { %6907 = vrot.lane.b32.xlu1 %v6872_v37, %s13467_s14 }
0x1a77   :  { %v11511_v29 = vpop.f32.mrb[122].mxu0 }
0x1a78   :  { %v6882_v25 = vpop.f32.mrb[123].mxu0 }
0x1a79   :  { %6911 = vrot.lane.b32.xlu0 %v6882_v25, %s13467_s14 }
0x1a7d   :  { %6913 = vrot.lane.b32.xlu0 %v11511_v29, %s13467_s14 }
0x1a90   :  { %v6906_v15 = vpop.permute.xlu0 %6905 }
0x1a91   :  { %v6926_v24 = vadd.f32 %v6906_v15, %v16382_v38  ;;  %v6904_v47 = vpop.permute.xlu1 %6903 }
0x1a92   :  { %v6925_v1 = vadd.f32 %v6904_v47, %v16389_v46 }
0x1a93   :  { %v16569_v26 = vadd.f32 %v6926_v24, %v17677_v16 }
0x1a94   :  { %v16575_v40 = vadd.f32 %v6925_v1, %v17677_v16 }
0x1a95   :  { %6953 = vrot.lane.b32.xlu1 %v16569_v26, %s13464_s9 }
0x1a99   :  { %6951 = vrot.lane.b32.xlu1 %v16575_v40, %s13464_s9 }
0x1aa4   :  { %v6950_v54 = vpop.permute.xlu0 %6949 }
0x1aa5   :  { %v6948_v2 = vpop.permute.xlu1 %6947  ;;  %v6974_v55 = vsel %vm151_vm0, %v6950_v54, 0.0 }
0x1aa6   :  { %v6971_v37 = vsel %vm151_vm0, %v6948_v2, 0.0 }
0x1aa8   :  { %v6910_v57 = vpop.permute.xlu0 %6909 }
0x1aa9   :  { %v6928_v38 = vadd.f32 %v6910_v57, %v16400_v9  ;;  %v6908_v35 = vpop.permute.xlu1 %6907 }
0x1aaa   :  { %v6927_v20 = vadd.f32 %v6908_v35, %v16402_v56 }
0x1aab   :  { %v16582_v22 = vadd.f32 %v6928_v38, %v17677_v16 }
0x1aac   :  { %v16585_v46 = vadd.f32 %v6927_v20, %v17677_v16 }
0x1aad   :  { %6957 = vrot.lane.b32.xlu1 %v16582_v22, %s13464_s9 }
0x1aae   :  { %6955 = vrot.lane.b32.xlu0 %v16585_v46, %s13464_s9 }
0x1aeb   :  { %v6912_v44 = vpop.permute.xlu0 %6911 }
0x1aec   :  { %v6929_v48 = vadd.f32 %v6912_v44, %v16411_v32 }
0x1aee   :  { %v16593_v9 = vadd.f32 %v6929_v48, %v17677_v16 }
0x1aef   :  { %v6914_v28 = vpop.permute.xlu0 %6913 }
0x1af0   :  { %17678 = vst [vmem:[#allocation6_spill] sm:$0xff] %v16593_v9  ;;  %v6930_v56 = vadd.f32 %v6914_v28, %v16418_v61  ;;  %6959 = vrot.lane.b32.xlu0 %v16593_v9, %s13464_s9 }
0x1af2   :  { %v16599_v18 = vadd.f32 %v6930_v56, %v17677_v16 }
0x1af4   :  { %17679 = vst [vmem:[#allocation11_spill] sm:$0xff] %v16599_v18  ;;  %6961 = vrot.lane.b32.xlu1 %v16599_v18, %s13464_s9 }
0x1b07   :  { %v6954_v8 = vpop.permute.xlu1 %6953 }
0x1b08   :  { %v6980_v32 = vsel %vm151_vm0, %v6954_v8, 0.0 }
0x1b0b   :  { %v6952_v50 = vpop.permute.xlu1 %6951 }
0x1b0c   :  { %v6977_v61 = vsel %vm151_vm0, %v6952_v50, 0.0 }
0x1b0f   :  { %6975 = vadd.xlane.f32.xlu0 %v6974_v55 }
0x1b13   :  { %6981 = vadd.xlane.f32.xlu0 %v6980_v32 }
0x1b18   :  { %6972 = vadd.xlane.f32.xlu1 %v6971_v37 }
0x1b1c   :  { %6978 = vadd.xlane.f32.xlu1 %v6977_v61 }
0x1b1f   :  { %v6958_v53 = vpop.permute.xlu1 %6957 }
0x1b20   :  { %v6956_v6 = vpop.permute.xlu0 %6955  ;;  %v6986_v13 = vsel %vm151_vm0, %v6958_v53, 0.0 }
0x1b21   :  { %6987 = vadd.xlane.f32.xlu0 %v6986_v13  ;;  %v6983_v29 = vsel %vm151_vm0, %v6956_v6, 0.0 }
0x1b22   :  { %6984 = vadd.xlane.f32.xlu1 %v6983_v29 }
0x1b62   :  { %v6960_v25 = vpop.permute.xlu0 %6959 }
0x1b63   :  { %v6989_v20 = vsel %vm151_vm0, %v6960_v25, 0.0 }
0x1b66   :  { %v6962_v1 = vpop.permute.xlu1 %6961 }
0x1b67   :  { %v6992_v44 = vsel %vm151_vm0, %v6962_v1, 0.0 }
0x1b9c   :  { %v6976_v15 = vpop.xlane.xlu0 %6975 }
0x1b9d   :  { %v6996_v24 = vmul.f32 0.03125, %v6976_v15 }
0x1b9f   :  { %v16610_v47 = vsub.f32 %v16554_v11, %v6996_v24 }
0x1ba0   :  { %v6982_v48 = vpop.xlane.xlu0 %6981 }
0x1ba1   :  { %v7012_v54 = vmul.f32 %v16610_v47, %v16610_v47  ;;  %v6998_v28 = vmul.f32 0.03125, %v6982_v48 }
0x1ba3   :  { %7029 = vrot.lane.b32.xlu1 %v7012_v54, %s13464_s9  ;;  %v16624_v55 = vsub.f32 %v16569_v26, %v6998_v28 }
0x1ba5   :  { %v6973_v2 = vpop.xlane.xlu1 %6972  ;;  %v7014_v37 = vmul.f32 %v16624_v55, %v16624_v55 }
0x1ba6   :  { %v6995_v57 = vmul.f32 0.03125, %v6973_v2 }
0x1ba8   :  { %v16616_v38 = vsub.f32 %v16557_v19, %v6995_v57 }
0x1ba9   :  { %v6979_v32 = vpop.xlane.xlu1 %6978 }
0x1baa   :  { %v7011_v35 = vmul.f32 %v16616_v38, %v16616_v38  ;;  %v6997_v61 = vmul.f32 0.03125, %v6979_v32 }
0x1bac   :  { %7027 = vrot.lane.b32.xlu0 %v7011_v35, %s13464_s9  ;;  %v16635_v13 = vsub.f32 %v16575_v40, %v6997_v61 }
0x1bae   :  { %v6988_v56 = vpop.xlane.xlu0 %6987  ;;  %v7013_v25 = vmul.f32 %v16635_v13, %v16635_v13 }
0x1baf   :  { %v7000_v8 = vmul.f32 0.03125, %v6988_v56  ;;  %v6985_v53 = vpop.xlane.xlu1 %6984 }
0x1bb0   :  { %v6999_v29 = vmul.f32 0.03125, %v6985_v53 }
0x1bb1   :  { %v16629_v50 = vsub.f32 %v16582_v22, %v7000_v8 }
0x1bb2   :  { %v16641_v15 = vsub.f32 %v16585_v46, %v6999_v29 }
0x1bb3   :  { %v7016_v6 = vmul.f32 %v16629_v50, %v16629_v50 }
0x1bb4   :  { %v7015_v24 = vmul.f32 %v16641_v15, %v16641_v15 }
0x1bc7   :  { %6990 = vadd.xlane.f32.xlu1 %v6989_v20 }
0x1bcb   :  { %6993 = vadd.xlane.f32.xlu0 %v6992_v44 }
0x1bd8   :  { %7033 = vrot.lane.b32.xlu1 %v7014_v37, %s13464_s9 }
0x1bdc   :  { %7037 = vrot.lane.b32.xlu1 %v7016_v6, %s13464_s9 }
0x1be1   :  { %7031 = vrot.lane.b32.xlu0 %v7013_v25, %s13464_s9 }
0x1be5   :  { %7035 = vrot.lane.b32.xlu0 %v7015_v24, %s13464_s9 }
0x1c15   :  { %v7030_v1 = vpop.permute.xlu1 %7029 }
0x1c16   :  { %v7054_v54 = vsel %vm151_vm0, %v7030_v1, 0.0 }
0x1c17   :  { %7055 = vadd.xlane.f32.xlu0 %v7054_v54 }
0x1c1e   :  { %v7028_v2 = vpop.permute.xlu0 %7027 }
0x1c1f   :  { %v7051_v57 = vsel %vm151_vm0, %v7028_v2, 0.0 }
0x1c20   :  { %7052 = vadd.xlane.f32.xlu1 %v7051_v57 }
0x1c54   :  { %v6991_v35 = vpop.xlane.xlu1 %6990 }
0x1c55   :  { %v7001_v20 = vmul.f32 0.03125, %v6991_v35 }
0x1c57   :  { %v16650_v44 = vsub.f32 %v16593_v9, %v7001_v20 }
0x1c58   :  { %v6994_v48 = vpop.xlane.xlu0 %6993  ;;  %v7034_v37 = vpop.permute.xlu1 %7033 }
0x1c59   :  { %v7017_v28 = vmul.f32 %v16650_v44, %v16650_v44  ;;  %v7002_v56 = vmul.f32 0.03125, %v6994_v48  ;;  %v7060_v61 = vsel %vm151_vm0, %v7034_v37, 0.0 }
0x1c5b   :  { %v16655_v8 = vsub.f32 %v16599_v18, %v7002_v56  ;;  %7039 = vrot.lane.b32.xlu0 %v7017_v28, %s13464_s9 }
0x1c5c   :  { %v7038_v53 = vpop.permute.xlu1 %7037  ;;  %v7032_v6 = vpop.permute.xlu0 %7031 }
0x1c5d   :  { %v7018_v32 = vmul.f32 %v16655_v8, %v16655_v8  ;;  %v7066_v29 = vsel %vm151_vm0, %v7038_v53, 0.0  ;;  %v7057_v25 = vsel %vm151_vm0, %v7032_v6, 0.0 }
0x1c5f   :  { %7041 = vrot.lane.b32.xlu1 %v7018_v32, %s13464_s9 }
0x1c60   :  { %v7036_v24 = vpop.permute.xlu0 %7035 }
0x1c61   :  { %v7063_v1 = vsel %vm151_vm0, %v7036_v24, 0.0 }
0x1c7a   :  { %7061 = vadd.xlane.f32.xlu0 %v7060_v61 }
0x1c7e   :  { %7067 = vadd.xlane.f32.xlu0 %v7066_v29 }
0x1c83   :  { %7058 = vadd.xlane.f32.xlu1 %v7057_v25 }
0x1c87   :  { %7064 = vadd.xlane.f32.xlu1 %v7063_v1 }
0x1ca4   :  { %v7056_v54 = vpop.xlane.xlu0 %7055 }
0x1ca5   :  { %v7076_v2 = vmul.f32 0.03125, %v7056_v54 }
0x1ca7   :  { %v7084_v57 = vadd.f32 1e-05, %v7076_v2 }
0x1ca9   :  { %13297 = vrsqrt.f32 %v7084_v57 }
0x1cad   :  { %v7053_v35 = vpop.xlane.xlu1 %7052 }
0x1cae   :  { %v7075_v20 = vmul.f32 0.03125, %v7053_v35 }
0x1cb0   :  { %v7083_v48 = vadd.f32 1e-05, %v7075_v20 }
0x1cb2   :  { %13299 = vrsqrt.f32 %v7083_v48 }
0x1cb3   :  { %v13298_v28 = vpop.eup %13297 }
0x1cb4   :  { %v7100_v56 = vmul.f32 %v13298_v28, %v16610_v47 }
0x1cb6   :  { %7117 = vrot.lane.b32.xlu1 %v7100_v56, %s13464_s9 }
0x1cbc   :  { %v13300_v32 = vpop.eup %13299 }
0x1cbd   :  { %v7099_v37 = vmul.f32 %v13300_v32, %v16616_v38 }
0x1cbf   :  { %7115 = vrot.lane.b32.xlu0 %v7099_v37, %s13464_s9 }
0x1ccd   :  { %v7040_v61 = vpop.permute.xlu0 %7039 }
0x1cce   :  { %v7069_v53 = vsel %vm151_vm0, %v7040_v61, 0.0 }
0x1cd1   :  { %v7042_v6 = vpop.permute.xlu1 %7041 }
0x1cd2   :  { %v7072_v29 = vsel %vm151_vm0, %v7042_v6, 0.0 }
0x1cda   :  { %7070 = vadd.xlane.f32.xlu1 %v7069_v53 }
0x1cde   :  { %7073 = vadd.xlane.f32.xlu0 %v7072_v29 }
0x1d07   :  { %v7062_v25 = vpop.xlane.xlu0 %7061 }
0x1d08   :  { %v7078_v24 = vmul.f32 0.03125, %v7062_v25 }
0x1d0a   :  { %v7086_v1 = vadd.f32 1e-05, %v7078_v24 }
0x1d0b   :  { %v7068_v47 = vpop.xlane.xlu0 %7067 }
0x1d0c   :  { %13301 = vrsqrt.f32 %v7086_v1  ;;  %v7080_v54 = vmul.f32 0.03125, %v7068_v47 }
0x1d0e   :  { %v7088_v35 = vadd.f32 1e-05, %v7080_v54 }
0x1d10   :  { %v7059_v2 = vpop.xlane.xlu1 %7058 }
0x1d11   :  { %v7077_v57 = vmul.f32 0.03125, %v7059_v2 }
0x1d13   :  { %v7085_v38 = vadd.f32 1e-05, %v7077_v57 }
0x1d14   :  { %v7065_v20 = vpop.xlane.xlu1 %7064 }
0x1d15   :  { %13303 = vrsqrt.f32 %v7085_v38  ;;  %v7079_v48 = vmul.f32 0.03125, %v7065_v20 }
0x1d16   :  { %v13302_v28 = vpop.eup %13301  ;;  %13305 = vrsqrt.f32 %v7088_v35 }
0x1d17   :  { %v7087_v56 = vadd.f32 1e-05, %v7079_v48  ;;  %v7102_v32 = vmul.f32 %v13302_v28, %v16624_v55 }
0x1d19   :  { %13307 = vrsqrt.f32 %v7087_v56  ;;  %7121 = vrot.lane.b32.xlu1 %v7102_v32, %s13464_s9  ;;  %v16712_v56 = vld [vmem:[%s17332_s2 + $0x1] ss:$0 sm:$0xff] }
0x1d1f   :  { %v13304_v37 = vpop.eup %13303 }
0x1d20   :  { %v7101_v61 = vmul.f32 %v13304_v37, %v16635_v13  ;;  %v13306_v53 = vpop.eup %13305 }
0x1d21   :  { %v7104_v25 = vmul.f32 %v13306_v53, %v16629_v50  ;;  %v17680_v50 = vld [vmem:[#allocation12_spill] sm:$0xff]  ;;  %v17681_v53 = vld [vmem:[#allocation23_spill] sm:$0xff] }
0x1d22   :  { %7119 = vrot.lane.b32.xlu0 %v7101_v61, %s13464_s9 }
0x1d23   :  { %v13308_v6 = vpop.eup %13307 }
0x1d24   :  { %v7103_v29 = vmul.f32 %v13308_v6, %v16641_v15  ;;  %v17682_v6 = vld [vmem:[#allocation13_spill] sm:$0xff] }
0x1d26   :  { %7123 = vrot.lane.b32.xlu1 %v7103_v29, %s13464_s9  ;;  %7125 = vrot.lane.b32.xlu0 %v7104_v25, %s13464_s9  ;;  %v17683_v29 = vld [vmem:[#allocation17_spill] sm:$0xff]  ;;  %v17684_v25 = vld [vmem:[#allocation14_spill] sm:$0xff] }
0x1d28   :  { %v7118_v55 = vpop.permute.xlu1 %7117 }
0x1d31   :  { %v7116_v24 = vpop.permute.xlu0 %7115 }
0x1d32   :  { %11520 = vmatprep.mubr.msk.f32.mxu1 %vm151_vm0, %v7116_v24  ;;  %v17685_v24 = vld [vmem:[#allocation18_spill] sm:$0xff] }
0x1d33   :  { %11521 = vmatmul.mubr.msk.f32.vlgmr.msra.gmra.mrb[68].mxu1 %vm151_vm0, %v7118_v55  ;;  %v17686_v55 = vld [vmem:[#allocation15_spill] sm:$0xff] }
0x1d34   :  { %12491 = vmatpush3.bf16.xpose.msk.msra.mxu1 %vm14662_vm1, %v14700_v14 }
0x1d35   :  { %12492 = vmatprep.subr.bf16.mxu1 %v17596_v27 }
0x1d3c   :  { %12495 = vmatpush3.bf16.xpose.msk.msra.mxu1 %vm14662_vm1, %v14711_v59 }
0x1d3d   :  { %12496 = vmatprep.subr.bf16.mxu1 %v17596_v27 }
0x1d44   :  { %12499 = vmatpush3.bf16.xpose.msk.msra.mxu1 %vm14662_vm1, %v14720_v43 }
0x1d45   :  { %12500 = vmatprep.subr.bf16.mxu1 %v17596_v27 }
0x1d4c   :  { %12503 = vmatpush3.bf16.xpose.msk.msra.mxu1 %vm14662_vm1, %v17680_v50  ;;  %v17687_v50 = vld [vmem:[#allocation19_spill] sm:$0xff] }
0x1d4d   :  { %12520 = vmatprep.subr.bf16.mxu1 %v17596_v27 }
0x1d67   :  { %v7071_v14 = vpop.xlane.xlu1 %7070 }
0x1d68   :  { %v7081_v13 = vmul.f32 0.03125, %v7071_v14  ;;  %v17688_v14 = vld [vmem:[#allocation16_spill] sm:$0xff] }
0x1d6a   :  { %v7089_v15 = vadd.f32 1e-05, %v7081_v13 }
0x1d6b   :  { %v7074_v1 = vpop.xlane.xlu0 %7073 }
0x1d6c   :  { %13309 = vrsqrt.f32 %v7089_v15  ;;  %v7082_v59 = vmul.f32 0.03125, %v7074_v1 }
0x1d6e   :  { %v7090_v47 = vadd.f32 1e-05, %v7082_v59 }
0x1d70   :  { %13311 = vrsqrt.f32 %v7090_v47  ;;  %v17689_v47 = vld [vmem:[#allocation22_spill] sm:$0xff] }
0x1d76   :  { %v13310_v54 = vpop.eup %13309 }
0x1d77   :  { %v7105_v2 = vmul.f32 %v13310_v54, %v16650_v44 }
0x1d79   :  { %7127 = vrot.lane.b32.xlu1 %v7105_v2, %s13464_s9  ;;  %v17690_v2 = vld [vmem:[#allocation25_spill] sm:$0xff] }
0x1d7a   :  { %v13312_v43 = vpop.eup %13311 }
0x1d7b   :  { %v7106_v57 = vmul.f32 %v13312_v43, %v16655_v8 }
0x1d7d   :  { %7129 = vrot.lane.b32.xlu0 %v7106_v57, %s13464_s9  ;;  %v17691_v57 = vld [vmem:[#allocation24_spill] sm:$0xff] }
0x1d8b   :  { %v7122_v35 = vpop.permute.xlu1 %7121 }
0x1d94   :  { %v7120_v38 = vpop.permute.xlu0 %7119 }
0x1d95   :  { %11523 = vmatprep.mubr.msk.f32.mxu1 %vm151_vm0, %v7120_v38  ;;  %v17693_v38 = vld [vmem:[#allocation26_spill] sm:$0xff] }
0x1d96   :  { %11524 = vmatmul.mubr.msk.f32.gmra.mrb[70].mxu1 %vm151_vm0, %v7122_v35  ;;  %v17692_v35 = vld [vmem:[#allocation28_spill] sm:$0xff] }
0x1d98   :  { %v7124_v20 = vpop.permute.xlu1 %7123  ;;  %v7126_v48 = vpop.permute.xlu0 %7125 }
0x1d99   :  { %11526 = vmatprep.mubr.msk.f32.mxu1 %vm151_vm0, %v7124_v20  ;;  %v17694_v20 = vld [vmem:[#allocation29_spill] sm:$0xff] }
0x1d9a   :  { %11527 = vmatmul.mubr.msk.f32.gmra.mrb[72].mxu1 %vm151_vm0, %v7126_v48  ;;  %v17695_v48 = vld [vmem:[#allocation21_spill] sm:$0xff] }
0x1deb   :  { %v7128_v44 = vpop.permute.xlu1 %7127 }
0x1dec   :  { %11529 = vmatprep.mubr.msk.f32.mxu1 %vm151_vm0, %v7128_v44  ;;  %v17696_v44 = vld [vmem:[#allocation20_spill] sm:$0xff] }
0x1def   :  { %v7130_v28 = vpop.permute.xlu0 %7129 }
0x1df0   :  { %11530 = vmatmul.mubr.msk.f32.gmra.mrb[74].mxu1 %vm151_vm0, %v7130_v28 }
0x1df1   :  { %11567 = vmatprep.mubr.msk.f32.mxu1 %vm13465_vm2, %v17598_v10 }
0x1e06   :  { %v11522_v8 = vpop.f32.mrb[68].mxu1 }
0x1e07   :  { %v7219_v32 = vadd.f32 %v16712_v56, %v11522_v8  ;;  %v7213_v37 = vpop.f32.mrb[69].mxu1 }
0x1e08   :  { %v7214_v61 = vadd.f32 %v16712_v56, %v7213_v37  ;;  %v17698_v37 = vld [vmem:[#allocation32_spill] sm:$0xff] }
0x1e09   :  { %11568 = vmatmul.mubr.msk.f32.vlgmr.msra.gmra.mrb[76].mxu1 %vm151_vm0, %v7219_v32  ;;  %v17697_v32 = vld [vmem:[#allocation36_spill] sm:$0xff] }
0x1e0a   :  { %12523 = vmatpush3.bf16.xpose.msk.msra.mxu1 %vm14662_vm1, %v17681_v53  ;;  %11549 = vmatmul.mubr.msk.f32.vlgmr.msra.gmra.mrb[124].mxu0 %vm151_vm0, %v7214_v61  ;;  %v17699_v61 = vld [vmem:[#allocation33_spill] sm:$0xff]  ;;  %v17700_v53 = vld [vmem:[#allocation27_spill] sm:$0xff] }
0x1e0b   :  { %12507 = vmatpush3.bf16.xpose.msk.msra.mxu0 %vm14662_vm1, %v17682_v6  ;;  %12524 = vmatprep.subr.bf16.mxu1 %v17596_v27  ;;  %v17701_v6 = vld [vmem:[#allocation37_spill] sm:$0xff] }
0x1e0c   :  { %12508 = vmatprep.subr.bf16.mxu0 %v17596_v27  ;;  %11605 = vmatprep.mubr.msk.f32.mxu1 %vm13465_vm2, %v17598_v10 }
0x1e0d   :  { %11586 = vmatprep.mubr.msk.f32.mxu0 %vm13465_vm2, %v17598_v10 }
0x1e12   :  { %12527 = vmatpush3.bf16.xpose.msk.msra.mxu1 %vm14662_vm1, %v17683_v29  ;;  %v17702_v29 = vld [vmem:[#allocation34_spill] sm:$0xff] }
0x1e13   :  { %12511 = vmatpush3.bf16.xpose.msk.msra.mxu0 %vm14662_vm1, %v17684_v25  ;;  %12528 = vmatprep.subr.bf16.mxu1 %v17596_v27  ;;  %v17703_v25 = vld [vmem:[#allocation5_spill] sm:$0xff] }
0x1e14   :  { %12512 = vmatprep.subr.bf16.mxu0 %v17596_v27 }
0x1e1a   :  { %12531 = vmatpush3.bf16.xpose.msk.msra.mxu1 %vm14662_vm1, %v17685_v24  ;;  %v17704_v24 = vld [vmem:[#allocation35_spill] sm:$0xff] }
0x1e1b   :  { %12515 = vmatpush3.bf16.xpose.msk.msra.mxu0 %vm14662_vm1, %v17686_v55  ;;  %12532 = vmatprep.subr.bf16.mxu1 %v17596_v27 }
0x1e1c   :  { %12516 = vmatprep.subr.bf16.mxu0 %v17596_v27 }
0x1e22   :  { %12535 = vmatpush3.bf16.xpose.msk.msra.mxu1 %vm14662_vm1, %v17687_v50 }
0x1e23   :  { %12519 = vmatpush3.bf16.xpose.msk.msra.mxu0 %vm14662_vm1, %v17688_v14  ;;  %12552 = vmatprep.subr.bf16.mxu1 %v17596_v27 }
0x1e24   :  { %12536 = vmatprep.subr.bf16.mxu0 %v17596_v27 }
0x1e69   :  { %v11525_v13 = vpop.f32.mrb[70].mxu1 }
0x1e6a   :  { %v7229_v15 = vadd.f32 %v16712_v56, %v11525_v13  ;;  %v7223_v1 = vpop.f32.mrb[71].mxu1 }
0x1e6b   :  { %v7224_v59 = vadd.f32 %v16712_v56, %v7223_v1  ;;  %v17706_v1 = vld [vmem:[#allocation9_spill] sm:$0xff] }
0x1e6c   :  { %11606 = vmatmul.mubr.msk.f32.vlgmr.msra.gmra.mrb[78].mxu1 %vm151_vm0, %v7229_v15  ;;  %v17705_v15 = vld [vmem:[#allocation43_spill] sm:$0xff] }
0x1e6d   :  { %12555 = vmatpush3.bf16.xpose.msk.msra.mxu1 %vm14662_vm1, %v17689_v47  ;;  %v11528_v54 = vpop.f32.mrb[72].mxu1  ;;  %11587 = vmatmul.mubr.msk.f32.vlgmr.msra.gmra.mrb[126].mxu0 %vm151_vm0, %v7224_v59  ;;  %v17709_v59 = vld [vmem:[#allocation45_spill] sm:$0xff]  ;;  %v17710_v47 = vld [vmem:[#allocation40_spill] sm:$0xff] }
0x1e6e   :  { %12539 = vmatpush3.bf16.xpose.msk.msra.mxu0 %vm14662_vm1, %v17690_v2  ;;  %v7233_v43 = vpop.f32.mrb[73].mxu1  ;;  %12556 = vmatprep.subr.bf16.mxu1 %v17596_v27  ;;  %v7239_v28 = vadd.f32 %v16712_v56, %v11528_v54  ;;  %v17711_v54 = vld [vmem:[#allocation46_spill] sm:$0xff] }
0x1e6f   :  { %12540 = vmatprep.subr.bf16.mxu0 %v17596_v27  ;;  %11643 = vmatprep.mubr.msk.f32.mxu1 %vm13465_vm2, %v17598_v10  ;;  %v7234_v8 = vadd.f32 %v16712_v56, %v7233_v43  ;;  %v17712_v2 = vld [vmem:[#allocation42_spill] sm:$0xff] }
0x1e70   :  { %11624 = vmatprep.mubr.msk.f32.mxu0 %vm13465_vm2, %v17598_v10 }
0x1e75   :  { %12559 = vmatpush3.bf16.xpose.msk.msra.mxu1 %vm14662_vm1, %v17691_v57 }
0x1e76   :  { %12543 = vmatpush3.bf16.xpose.msk.msra.mxu0 %vm14662_vm1, %v17692_v35  ;;  %12560 = vmatprep.subr.bf16.mxu1 %v17596_v27 }
0x1e77   :  { %12544 = vmatprep.subr.bf16.mxu0 %v17596_v27 }
0x1e7d   :  { %12563 = vmatpush3.bf16.xpose.msk.msra.mxu1 %vm14662_vm1, %v17693_v38 }
0x1e7e   :  { %12547 = vmatpush3.bf16.xpose.msk.msra.mxu0 %vm14662_vm1, %v17694_v20  ;;  %12564 = vmatprep.subr.bf16.mxu1 %v17596_v27 }
0x1e7f   :  { %12548 = vmatprep.subr.bf16.mxu0 %v17596_v27 }
0x1e85   :  { %12567 = vmatpush3.bf16.xpose.msk.msra.mxu1 %vm14662_vm1, %v17695_v48 }
0x1e86   :  { %12551 = vmatpush3.bf16.xpose.msk.msra.mxu0 %vm14662_vm1, %v17696_v44  ;;  %12584 = vmatprep.subr.bf16.mxu1 %v17596_v27 }
0x1e87   :  { %12568 = vmatprep.subr.bf16.mxu0 %v17596_v27 }
0x1e8c   :  { %11644 = vmatmul.mubr.msk.f32.vlgmr.msra.gmra.mrb[80].mxu1 %vm151_vm0, %v7239_v28 }
0x1e8d   :  { %11625 = vmatmul.mubr.msk.f32.vlgmr.msra.gmra.mrb[128].mxu0 %vm151_vm0, %v7234_v8  ;;  %12587 = vmatpush3.bf16.xpose.msk.msra.mxu1 %vm14662_vm1, %v17697_v32 }
0x1e8e   :  { %12571 = vmatpush3.bf16.xpose.msk.msra.mxu0 %vm14662_vm1, %v17698_v37  ;;  %12588 = vmatprep.subr.bf16.mxu1 %v17596_v27 }
0x1e8f   :  { %12572 = vmatprep.subr.bf16.mxu0 %v17596_v27  ;;  %11681 = vmatprep.mubr.msk.f32.mxu1 %vm13465_vm2, %v17598_v10 }
0x1e90   :  { %11662 = vmatprep.mubr.msk.f32.mxu0 %vm13465_vm2, %v17598_v10 }
0x1e95   :  { %12591 = vmatpush3.bf16.xpose.msk.msra.mxu1 %vm14662_vm1, %v17699_v61 }
0x1e96   :  { %12575 = vmatpush3.bf16.xpose.msk.msra.mxu0 %vm14662_vm1, %v17700_v53  ;;  %12592 = vmatprep.subr.bf16.mxu1 %v17596_v27 }
0x1e97   :  { %12576 = vmatprep.subr.bf16.mxu0 %v17596_v27 }
0x1e9d   :  { %12595 = vmatpush3.bf16.xpose.msk.msra.mxu1 %vm14662_vm1, %v17701_v6 }
0x1e9e   :  { %12579 = vmatpush3.bf16.xpose.msk.msra.mxu0 %vm14662_vm1, %v17702_v29  ;;  %12596 = vmatprep.subr.bf16.mxu1 %v17596_v27 }
0x1e9f   :  { %12580 = vmatprep.subr.bf16.mxu0 %v17596_v27 }
0x1ea5   :  { %12599 = vmatpush3.bf16.xpose.msk.msra.mxu1 %vm14662_vm1, %v17703_v25 }
0x1ea6   :  { %12583 = vmatpush3.bf16.xpose.msk.msra.mxu0 %vm14662_vm1, %v17704_v24  ;;  %12612 = vmatprep.subr.bf16.mxu1 %v17596_v27 }
0x1ea7   :  { %12600 = vmatprep.subr.bf16.mxu0 %v17596_v27 }
0x1ec3   :  { %v11531_v55 = vpop.f32.mrb[74].mxu1 }
0x1ec4   :  { %v7249_v50 = vadd.f32 %v16712_v56, %v11531_v55  ;;  %v7243_v14 = vpop.f32.mrb[75].mxu1 }
0x1ec5   :  { %v7244_v13 = vadd.f32 %v16712_v56, %v7243_v14  ;;  %v17708_v56 = vld [vmem:[#allocation38_spill] sm:$0xff] }
0x1ec6   :  { %11682 = vmatmul.mubr.msk.f32.vlgmr.msra.gmra.mrb[82].mxu1 %vm151_vm0, %v7249_v50 }
0x1ec7   :  { %12614 = vmatpush3.bf16.msra.mxu1 %v17705_v15  ;;  %11663 = vmatmul.mubr.msk.f32.vlgmr.msra.gmra.mrb[130].mxu0 %vm151_vm0, %v7244_v13 }
0x1ec8   :  { %12602 = vmatpush3.bf16.msra.mxu0 %v17706_v1  ;;  %12615 = vmatprep.subr.bf16.mxu1 %v17596_v27 }
0x1ec9   :  { %12603 = vmatprep.subr.bf16.mxu0 %v17596_v27  ;;  %11719 = vmatprep.mubr.msk.f32.mxu1 %vm13465_vm2, %v17598_v10 }
0x1eca   :  { %11700 = vmatprep.mubr.msk.f32.mxu0 %vm13465_vm2, %v17598_v10 }
0x1ecb   :  { %12617 = vmatpush3.bf16.msra.mxu1 %v17707_v17 }
0x1ecc   :  { %12605 = vmatpush3.bf16.msra.mxu0 %v17708_v56  ;;  %12618 = vmatprep.subr.bf16.mxu1 %v17596_v27 }
0x1ecd   :  { %12606 = vmatprep.subr.bf16.mxu0 %v17596_v27 }
0x1ecf   :  { %12620 = vmatpush3.bf16.msra.mxu1 %v17709_v59 }
0x1ed0   :  { %12608 = vmatpush3.bf16.msra.mxu0 %v17710_v47  ;;  %12621 = vmatprep.subr.bf16.mxu1 %v17596_v27 }
0x1ed1   :  { %12609 = vmatprep.subr.bf16.mxu0 %v17596_v27 }
0x1ed3   :  { %12623 = vmatpush3.bf16.msra.mxu1 %v17711_v54 }
0x1ed4   :  { %12611 = vmatpush3.bf16.msra.mxu0 %v17712_v2  ;;  %12636 = vmatprep.subr.bf16.mxu1 %v17596_v27 }
0x1ed5   :  { %12624 = vmatprep.subr.bf16.mxu0 %v17596_v27 }
0x1edc   :  { %v7394_v43 = vpop.f32.mrb[76].mxu1 }
0x1edd   :  { %v7843_v57 = vsel %vm2575_vm3, %v7394_v43, -inf  ;;  %v7321_v35 = vpop.f32.mrb[124].mxu0  ;;  %v11569_v38 = vpop.f32.mrb[77].mxu1 }
0x1ede   :  { %v7844_v20 = vrot.slane %v7843_v57, 4  ;;  %v7836_v48 = vsel %vm2575_vm3, %v7321_v35, -inf  ;;  %v11550_v44 = vpop.f32.mrb[125].mxu0 }
0x1edf   :  { %v7837_v28 = vrot.slane %v7836_v48, 4 }
0x1ee0   :  { %v7845_v8 = vmax.f32 %v7843_v57, %v7844_v20 }
0x1ee1   :  { %v7838_v32 = vmax.f32 %v7836_v48, %v7837_v28 }
0x1ee2   :  { %v7846_v37 = vrot.slane %v7845_v8, 2 }
0x1ee3   :  { %v7839_v61 = vrot.slane %v7838_v32, 2 }
0x1ee4   :  { %v7847_v53 = vmax.f32 %v7845_v8, %v7846_v37 }
0x1ee5   :  { %v7840_v6 = vmax.f32 %v7838_v32, %v7839_v61 }
0x1ee6   :  { %v7848_v29 = vrot.slane %v7847_v53, 1 }
0x1ee7   :  { %v7841_v25 = vrot.slane %v7840_v6, 1 }
0x1ee8   :  { %v7849_v24 = vmax.f32 %v7847_v53, %v7848_v29 }
0x1ee9   :  { %v7842_v55 = vmax.f32 %v7840_v6, %v7841_v25 }
0x1eea   :  { %v7893_v50 = vsub.f32 %v7394_v43, %v7849_v24 }
0x1eeb   :  { %v7892_v14 = vsub.f32 %v7321_v35, %v7842_v55 }
0x1eec   :  { %v7902_v13 = vmul.f32 1.442695, %v7893_v50 }
0x1eed   :  { %v7900_v15 = vmul.f32 1.442695, %v7892_v14 }
0x1eee   :  { %13313 = vpow2.f32 %v7902_v13 }
0x1eef   :  { %13315 = vpow2.f32 %v7900_v15 }
0x1ef8   :  { %v13314_v1 = vpop.eup %13313 }
0x1ef9   :  { %v13316_v17 = vpop.eup %13315  ;;  %v7923_v56 = vsel %vm2575_vm3, %v13314_v1, 0.0 }
0x1efa   :  { %v7924_v59 = vrot.slane %v7923_v56, 4  ;;  %v7916_v47 = vsel %vm2575_vm3, %v13316_v17, 0.0 }
0x1efb   :  { %v7917_v54 = vrot.slane %v7916_v47, 4 }
0x1efc   :  { %v7925_v2 = vadd.f32 %v7924_v59, %v7923_v56 }
0x1efd   :  { %v7918_v57 = vadd.f32 %v7917_v54, %v7916_v47 }
0x1efe   :  { %v7926_v38 = vrot.slane %v7925_v2, 2 }
0x1eff   :  { %v7919_v20 = vrot.slane %v7918_v57, 2 }
0x1f00   :  { %v7927_v48 = vadd.f32 %v7926_v38, %v7925_v2 }
0x1f01   :  { %v7920_v44 = vadd.f32 %v7919_v20, %v7918_v57 }
0x1f02   :  { %v7928_v43 = vrot.slane %v7927_v48, 1 }
0x1f03   :  { %v7921_v35 = vrot.slane %v7920_v44, 1 }
0x1f04   :  { %v7929_v28 = vadd.f32 %v7928_v43, %v7927_v48 }
0x1f05   :  { %v7922_v8 = vadd.f32 %v7921_v35, %v7920_v44 }
0x1f06   :  { %13317 = vrcp.f32 %v7929_v28 }
0x1f07   :  { %13319 = vrcp.f32 %v7922_v8 }
0x1f10   :  { %v13318_v32 = vpop.eup %13317 }
0x1f11   :  { %v13320_v37 = vpop.eup %13319  ;;  %v7981_v61 = vmul.f32 %v13318_v32, %v13314_v1 }
0x1f12   :  { %v7980_v53 = vmul.f32 %v13320_v37, %v13316_v17 }
0x1f13   :  { %v16862_v6 = vadd.f32 1e-08, %v7981_v61 }
0x1f14   :  { %v16864_v29 = vadd.f32 1e-08, %v7980_v53 }
0x1f15   :  { %v7999_v25 = vsel %vm2575_vm3, %v16862_v6, 0.0 }
0x1f16   :  { %8000 = vadd.xlane.f32.xlu0 %v7999_v25  ;;  %v7996_v24 = vsel %vm2575_vm3, %v16864_v29, 0.0 }
0x1f17   :  { %7997 = vadd.xlane.f32.xlu1 %v7996_v24 }
0x1f3f   :  { %v7540_v55 = vpop.f32.mrb[78].mxu1 }
0x1f40   :  { %v7857_v50 = vsel %vm2575_vm3, %v7540_v55, -inf  ;;  %v7467_v14 = vpop.f32.mrb[126].mxu0  ;;  %v11607_v13 = vpop.f32.mrb[79].mxu1 }
0x1f41   :  { %v7858_v15 = vrot.slane %v7857_v50, 4  ;;  %v7850_v1 = vsel %vm2575_vm3, %v7467_v14, -inf  ;;  %v11588_v17 = vpop.f32.mrb[127].mxu0 }
0x1f42   :  { %v7851_v56 = vrot.slane %v7850_v1, 4 }
0x1f43   :  { %v7859_v59 = vmax.f32 %v7857_v50, %v7858_v15 }
0x1f44   :  { %v7852_v47 = vmax.f32 %v7850_v1, %v7851_v56 }
0x1f45   :  { %v7860_v54 = vrot.slane %v7859_v59, 2 }
0x1f46   :  { %v7853_v2 = vrot.slane %v7852_v47, 2 }
0x1f47   :  { %v7861_v57 = vmax.f32 %v7859_v59, %v7860_v54 }
0x1f48   :  { %v7854_v38 = vmax.f32 %v7852_v47, %v7853_v2 }
0x1f49   :  { %v7862_v20 = vrot.slane %v7861_v57, 1 }
0x1f4a   :  { %v7855_v48 = vrot.slane %v7854_v38, 1 }
0x1f4b   :  { %v7863_v44 = vmax.f32 %v7861_v57, %v7862_v20 }
0x1f4c   :  { %v7856_v43 = vmax.f32 %v7854_v38, %v7855_v48 }
0x1f4d   :  { %v7895_v35 = vsub.f32 %v7540_v55, %v7863_v44 }
0x1f4e   :  { %v7894_v28 = vsub.f32 %v7467_v14, %v7856_v43 }
0x1f4f   :  { %v7906_v8 = vmul.f32 1.442695, %v7895_v35 }
0x1f50   :  { %v7904_v32 = vmul.f32 1.442695, %v7894_v28 }
0x1f51   :  { %13321 = vpow2.f32 %v7906_v8 }
0x1f52   :  { %13323 = vpow2.f32 %v7904_v32 }
0x1f5b   :  { %v13322_v37 = vpop.eup %13321 }
0x1f5c   :  { %v13324_v61 = vpop.eup %13323  ;;  %v7937_v53 = vsel %vm2575_vm3, %v13322_v37, 0.0 }
0x1f5d   :  { %v7938_v25 = vrot.slane %v7937_v53, 4  ;;  %v7930_v24 = vsel %vm2575_vm3, %v13324_v61, 0.0 }
0x1f5e   :  { %v7931_v50 = vrot.slane %v7930_v24, 4 }
0x1f5f   :  { %v7939_v13 = vadd.f32 %v7938_v25, %v7937_v53  ;;  %v7686_v15 = vpop.f32.mrb[80].mxu1 }
0x1f60   :  { %v7932_v1 = vadd.f32 %v7931_v50, %v7930_v24  ;;  %v7871_v17 = vsel %vm2575_vm3, %v7686_v15, -inf  ;;  %v7613_v56 = vpop.f32.mrb[128].mxu0  ;;  %v11645_v55 = vpop.f32.mrb[81].mxu1 }
0x1f61   :  { %v7940_v14 = vrot.slane %v7939_v13, 2  ;;  %v7872_v59 = vrot.slane %v7871_v17, 4  ;;  %v7864_v47 = vsel %vm2575_vm3, %v7613_v56, -inf  ;;  %v11626_v54 = vpop.f32.mrb[129].mxu0 }
0x1f62   :  { %v7933_v2 = vrot.slane %v7932_v1, 2  ;;  %v7865_v57 = vrot.slane %v7864_v47, 4 }
0x1f63   :  { %v7941_v38 = vadd.f32 %v7940_v14, %v7939_v13  ;;  %v7873_v20 = vmax.f32 %v7871_v17, %v7872_v59 }
0x1f64   :  { %v7934_v48 = vadd.f32 %v7933_v2, %v7932_v1  ;;  %v7866_v44 = vmax.f32 %v7864_v47, %v7865_v57 }
0x1f65   :  { %v7874_v43 = vrot.slane %v7873_v20, 2  ;;  %v7942_v35 = vrot.slane %v7941_v38, 1 }
0x1f66   :  { %v7867_v28 = vrot.slane %v7866_v44, 2  ;;  %v7935_v8 = vrot.slane %v7934_v48, 1 }
0x1f67   :  { %v7875_v32 = vmax.f32 %v7873_v20, %v7874_v43  ;;  %v7943_v53 = vadd.f32 %v7942_v35, %v7941_v38 }
0x1f68   :  { %v7868_v25 = vmax.f32 %v7866_v44, %v7867_v28  ;;  %v7936_v24 = vadd.f32 %v7935_v8, %v7934_v48 }
0x1f69   :  { %v7876_v50 = vrot.slane %v7875_v32, 1  ;;  %13325 = vrcp.f32 %v7943_v53 }
0x1f6a   :  { %v7869_v55 = vrot.slane %v7868_v25, 1  ;;  %13327 = vrcp.f32 %v7936_v24 }
0x1f6b   :  { %v7877_v16 = vmax.f32 %v7875_v32, %v7876_v50 }
0x1f6c   :  { %v7870_v54 = vmax.f32 %v7868_v25, %v7869_v55 }
0x1f6d   :  { %v7897_v18 = vsub.f32 %v7686_v15, %v7877_v16 }
0x1f6e   :  { %v7896_v9 = vsub.f32 %v7613_v56, %v7870_v54 }
0x1f6f   :  { %v7910_v13 = vmul.f32 1.442695, %v7897_v18 }
0x1f70   :  { %v7908_v17 = vmul.f32 1.442695, %v7896_v9 }
0x1f71   :  { %13329 = vpow2.f32 %v7910_v13 }
0x1f72   :  { %13331 = vpow2.f32 %v7908_v17 }
0x1f73   :  { %v13326_v1 = vpop.eup %13325 }
0x1f74   :  { %v13328_v14 = vpop.eup %13327  ;;  %v7983_v47 = vmul.f32 %v13326_v1, %v13322_v37 }
0x1f75   :  { %v7982_v59 = vmul.f32 %v13328_v14, %v13324_v61 }
0x1f76   :  { %v16880_v38 = vadd.f32 1e-08, %v7983_v47 }
0x1f77   :  { %v16876_v2 = vadd.f32 1e-08, %v7982_v59 }
0x1f78   :  { %v8005_v15 = vsel %vm2575_vm3, %v16880_v38, 0.0 }
0x1f79   :  { %v8002_v57 = vsel %vm2575_vm3, %v16876_v2, 0.0 }
0x1f7a   :  { %8003 = vadd.xlane.f32.xlu0 %v8002_v57 }
0x1f7b   :  { %v13330_v20 = vpop.eup %13329 }
0x1f7c   :  { %v13332_v48 = vpop.eup %13331  ;;  %v7951_v16 = vsel %vm2575_vm3, %v13330_v20, 0.0 }
0x1f7d   :  { %v7952_v18 = vrot.slane %v7951_v16, 4  ;;  %v7944_v9 = vsel %vm2575_vm3, %v13332_v48, 0.0 }
0x1f7e   :  { %v7945_v61 = vrot.slane %v7944_v9, 4  ;;  %8006 = vadd.xlane.f32.xlu0 %v8005_v15 }
0x1f7f   :  { %v7953_v37 = vadd.f32 %v7952_v18, %v7951_v16 }
0x1f80   :  { %v7946_v56 = vadd.f32 %v7945_v61, %v7944_v9 }
0x1f81   :  { %v7954_v44 = vrot.slane %v7953_v37, 2 }
0x1f82   :  { %v7947_v43 = vrot.slane %v7946_v56, 2 }
0x1f83   :  { %v7955_v35 = vadd.f32 %v7954_v44, %v7953_v37 }
0x1f84   :  { %v7948_v28 = vadd.f32 %v7947_v43, %v7946_v56 }
0x1f85   :  { %v7956_v8 = vrot.slane %v7955_v35, 1 }
0x1f86   :  { %v7949_v32 = vrot.slane %v7948_v28, 1 }
0x1f87   :  { %v7957_v53 = vadd.f32 %v7956_v8, %v7955_v35 }
0x1f88   :  { %v7950_v25 = vadd.f32 %v7949_v32, %v7948_v28 }
0x1f89   :  { %13333 = vrcp.f32 %v7957_v53 }
0x1f8a   :  { %13335 = vrcp.f32 %v7950_v25 }
0x1f93   :  { %v13334_v24 = vpop.eup %13333 }
0x1f94   :  { %v13336_v50 = vpop.eup %13335  ;;  %v7985_v55 = vmul.f32 %v13334_v24, %v13330_v20 }
0x1f95   :  { %v7984_v54 = vmul.f32 %v13336_v50, %v13332_v48 }
0x1f96   :  { %v16886_v13 = vadd.f32 1e-08, %v7985_v55 }
0x1f97   :  { %v16888_v17 = vadd.f32 1e-08, %v7984_v54 }
0x1f98   :  { %v8011_v1 = vsel %vm2575_vm3, %v16886_v13, 0.0 }
0x1f99   :  { %8012 = vadd.xlane.f32.xlu0 %v8011_v1  ;;  %v8008_v14 = vsel %vm2575_vm3, %v16888_v17, 0.0  ;;  %v7832_v59 = vpop.f32.mrb[82].mxu1 }
0x1f9a   :  { %8009 = vadd.xlane.f32.xlu1 %v8008_v14  ;;  %v7885_v47 = vsel %vm2575_vm3, %v7832_v59, -inf  ;;  %v7759_v57 = vpop.f32.mrb[130].mxu0  ;;  %v11683_v16 = vpop.f32.mrb[83].mxu1 }
0x1f9b   :  { %v7886_v18 = vrot.slane %v7885_v47, 4  ;;  %v7878_v20 = vsel %vm2575_vm3, %v7759_v57, -inf  ;;  %v11664_v48 = vpop.f32.mrb[131].mxu0 }
0x1f9c   :  { %v7879_v9 = vrot.slane %v7878_v20, 4 }
0x1f9d   :  { %v7887_v15 = vmax.f32 %v7885_v47, %v7886_v18 }
0x1f9e   :  { %v7880_v61 = vmax.f32 %v7878_v20, %v7879_v9 }
0x1f9f   :  { %v7888_v37 = vrot.slane %v7887_v15, 2 }
0x1fa0   :  { %v7881_v56 = vrot.slane %v7880_v61, 2 }
0x1fa1   :  { %v7889_v44 = vmax.f32 %v7887_v15, %v7888_v37 }
0x1fa2   :  { %v7882_v43 = vmax.f32 %v7880_v61, %v7881_v56 }
0x1fa3   :  { %v7890_v35 = vrot.slane %v7889_v44, 1  ;;  %v8001_v28 = vpop.xlane.xlu0 %8000 }
0x1fa4   :  { %v7883_v8 = vrot.slane %v7882_v43, 1  ;;  %13337 = vrcp.f32 %v8001_v28  ;;  %v7998_v32 = vpop.xlane.xlu1 %7997 }
0x1fa5   :  { %v7891_v53 = vmax.f32 %v7889_v44, %v7890_v35  ;;  %13339 = vrcp.f32 %v7998_v32 }
0x1fa6   :  { %v7884_v25 = vmax.f32 %v7882_v43, %v7883_v8 }
0x1fa7   :  { %v7899_v24 = vsub.f32 %v7832_v59, %v7891_v53 }
0x1fa8   :  { %v7898_v50 = vsub.f32 %v7759_v57, %v7884_v25 }
0x1fa9   :  { %v7914_v55 = vmul.f32 1.442695, %v7899_v24 }
0x1faa   :  { %v7912_v54 = vmul.f32 1.442695, %v7898_v50 }
0x1fab   :  { %13341 = vpow2.f32 %v7914_v55 }
0x1fac   :  { %13343 = vpow2.f32 %v7912_v54  ;;  %v17720_v54 = vld [vmem:[#allocation57_spill] sm:$0xff] }
0x1fae   :  { %v13338_v1 = vpop.eup %13337 }
0x1faf   :  { %v13340_v14 = vpop.eup %13339  ;;  %v8029_v47 = vmul.f32 %v13338_v1, %v16862_v6  ;;  %v17721_v1 = vld [vmem:[#allocation58_spill] sm:$0xff] }
0x1fb0   :  { %v8028_v16 = vmul.f32 %v13340_v14, %v16864_v29  ;;  %v17722_v14 = vld [vmem:[#allocation59_spill] sm:$0xff] }
0x1fb1   :  { %11720 = vmatmul.mubr.msk.f32.vlgmr.msra.gmra.mrb[84].mxu1 %vm2575_vm3, %v8029_v47 }
0x1fb2   :  { %12638 = vmatpush3.bf16.msra.mxu1 %v15201_v41  ;;  %11701 = vmatmul.mubr.msk.f32.vlgmr.msra.gmra.mrb[132].mxu0 %vm2575_vm3, %v8028_v16 }
0x1fb3   :  { %12626 = vmatpush3.bf16.msra.mxu0 %v17655_v39  ;;  %12639 = vmatprep.subr.bf16.mxu1 %v17596_v27 }
0x1fb4   :  { %12627 = vmatprep.subr.bf16.mxu0 %v17596_v27  ;;  %11738 = vmatprep.mubr.msk.f32.mxu0 %vm13465_vm2, %v17598_v10 }
0x1fb5   :  { %v13342_v59 = vpop.eup %13341  ;;  %11757 = vmatprep.mubr.msk.f32.mxu1 %vm13465_vm2, %v17598_v10 }
0x1fb6   :  { %v13344_v6 = vpop.eup %13343  ;;  %v7965_v29 = vsel %vm2575_vm3, %v13342_v59, 0.0  ;;  %12641 = vmatpush3.bf16.msra.mxu1 %v15210_v12 }
0x1fb7   :  { %v7966_v41 = vrot.slane %v7965_v29, 4  ;;  %v7958_v57 = vsel %vm2575_vm3, %v13344_v6, 0.0  ;;  %12629 = vmatpush3.bf16.msra.mxu0 %v17656_v51  ;;  %12642 = vmatprep.subr.bf16.mxu1 %v17596_v27 }
0x1fb8   :  { %v7959_v39 = vrot.slane %v7958_v57, 4  ;;  %12630 = vmatprep.subr.bf16.mxu0 %v17596_v27 }
0x1fb9   :  { %v7967_v18 = vadd.f32 %v7966_v41, %v7965_v29 }
0x1fba   :  { %v7960_v20 = vadd.f32 %v7959_v39, %v7958_v57  ;;  %12644 = vmatpush3.bf16.msra.mxu1 %v15216_v21 }
0x1fbb   :  { %v7968_v48 = vrot.slane %v7967_v18, 2  ;;  %12632 = vmatpush3.bf16.msra.mxu0 %v17657_v49  ;;  %12645 = vmatprep.subr.bf16.mxu1 %v17596_v27 }
0x1fbc   :  { %v7961_v12 = vrot.slane %v7960_v20, 2  ;;  %12633 = vmatprep.subr.bf16.mxu0 %v17596_v27 }
0x1fbd   :  { %v7969_v9 = vadd.f32 %v7968_v48, %v7967_v18 }
0x1fbe   :  { %v7962_v15 = vadd.f32 %v7961_v12, %v7960_v20  ;;  %12647 = vmatpush3.bf16.msra.mxu1 %v15222_v63 }
0x1fbf   :  { %12635 = vmatpush3.bf16.msra.mxu0 %v17658_v45  ;;  %v7970_v51 = vrot.slane %v7969_v9, 1  ;;  %12660 = vmatprep.subr.bf16.mxu1 %v17596_v27 }
0x1fc0   :  { %v7963_v61 = vrot.slane %v7962_v15, 1  ;;  %12648 = vmatprep.subr.bf16.mxu0 %v17596_v27 }
0x1fc1   :  { %v7971_v21 = vadd.f32 %v7970_v51, %v7969_v9 }
0x1fc2   :  { %v7964_v37 = vadd.f32 %v7963_v61, %v7962_v15 }
0x1fc3   :  { %13345 = vrcp.f32 %v7971_v21 }
0x1fc4   :  { %13347 = vrcp.f32 %v7964_v37 }
0x1fcd   :  { %v13346_v49 = vpop.eup %13345 }
0x1fce   :  { %v13348_v56 = vpop.eup %13347  ;;  %v7987_v44 = vmul.f32 %v13346_v49, %v13342_v59 }
0x1fcf   :  { %v7986_v43 = vmul.f32 %v13348_v56, %v13344_v6 }
0x1fd0   :  { %v16922_v35 = vadd.f32 1e-08, %v7987_v44 }
0x1fd1   :  { %v16924_v28 = vadd.f32 1e-08, %v7986_v43  ;;  %v17723_v43 = vld [vmem:[#allocation6_spill] sm:$0xff] }
0x1fd2   :  { %v8017_v63 = vsel %vm2575_vm3, %v16922_v35, 0.0 }
0x1fd3   :  { %8018 = vadd.xlane.f32.xlu0 %v8017_v63  ;;  %v8014_v45 = vsel %vm2575_vm3, %v16924_v28, 0.0  ;;  %v17724_v63 = vld [vmem:[#allocation11_spill] sm:$0xff] }
0x1fd4   :  { %8015 = vadd.xlane.f32.xlu1 %v8014_v45 }
0x2007   :  { %v8004_v8 = vpop.xlane.xlu0 %8003 }
0x2008   :  { %13349 = vrcp.f32 %v8004_v8 }
0x200b   :  { %v8007_v32 = vpop.xlane.xlu0 %8006 }
0x200c   :  { %13351 = vrcp.f32 %v8007_v32  ;;  %v13437_v32 = vld [vmem:[%s17332_s2 + $0x2] ss:$0 sm:$0xff] }
0x2012   :  { %v13350_v53 = vpop.eup %13349 }
0x2013   :  { %v8030_v25 = vmul.f32 %v13350_v53, %v16876_v2 }
0x2015   :  { %11739 = vmatmul.mubr.msk.f32.vlgmr.msra.gmra.mrb[134].mxu0 %vm2575_vm3, %v8030_v25 }
0x2016   :  { %v13352_v24 = vpop.eup %13351  ;;  %12650 = vmatpush3.bf16.msra.mxu0 %v15247_v58  ;;  %11776 = vmatprep.mubr.msk.f32.mxu0 %vm13465_vm2, %v17598_v10 }
0x2017   :  { %v8031_v50 = vmul.f32 %v13352_v24, %v16880_v38  ;;  %12651 = vmatprep.subr.bf16.mxu0 %v17596_v27 }
0x2019   :  { %11758 = vmatmul.mubr.msk.f32.vlgmr.msra.gmra.mrb[86].mxu1 %vm2575_vm3, %v8031_v50 }
0x201a   :  { %12653 = vmatpush3.bf16.msra.mxu0 %v15268_v7  ;;  %12662 = vmatpush3.bf16.msra.mxu1 %v15257_v30 }
0x201b   :  { %12654 = vmatprep.subr.bf16.mxu0 %v17596_v27  ;;  %12663 = vmatprep.subr.bf16.mxu1 %v17596_v27 }
0x201c   :  { %11795 = vmatprep.mubr.msk.f32.mxu1 %vm13465_vm2, %v17598_v10 }
0x201e   :  { %12656 = vmatpush3.bf16.msra.mxu0 %v15292_v4  ;;  %12665 = vmatpush3.bf16.msra.mxu1 %v15280_v33 }
0x201f   :  { %12657 = vmatprep.subr.bf16.mxu0 %v17596_v27  ;;  %12666 = vmatprep.subr.bf16.mxu1 %v17596_v27 }
0x2022   :  { %12659 = vmatpush3.bf16.msra.mxu0 %v15312_v3  ;;  %12668 = vmatpush3.bf16.msra.mxu1 %v15302_v52  ;;  %v17713_v52 = vld [vmem:[#allocation52_spill] sm:$0xff] }
0x2023   :  { %12669 = vmatprep.subr.bf16.mxu1 %v17596_v27  ;;  %12672 = vmatprep.subr.bf16.mxu0 %v17596_v27 }
0x2026   :  { %12671 = vmatpush3.bf16.msra.mxu1 %v17659_v31  ;;  %v8013_v58 = vpop.xlane.xlu0 %8012  ;;  %v17714_v31 = vld [vmem:[#allocation53_spill] sm:$0xff] }
0x2027   :  { %13353 = vrcp.f32 %v8013_v58  ;;  %v8010_v30 = vpop.xlane.xlu1 %8009  ;;  %12684 = vmatprep.subr.bf16.mxu1 %v17596_v27 }
0x2028   :  { %13355 = vrcp.f32 %v8010_v30 }
0x2031   :  { %v13354_v7 = vpop.eup %13353 }
0x2032   :  { %v13356_v33 = vpop.eup %13355  ;;  %v8033_v4 = vmul.f32 %v13354_v7, %v16886_v13 }
0x2033   :  { %v8032_v3 = vmul.f32 %v13356_v33, %v16888_v17 }
0x2034   :  { %11796 = vmatmul.mubr.msk.f32.vlgmr.msra.gmra.mrb[88].mxu1 %vm2575_vm3, %v8033_v4 }
0x2035   :  { %12686 = vmatpush3.bf16.msra.mxu1 %v17660_v36  ;;  %11777 = vmatmul.mubr.msk.f32.vlgmr.msra.gmra.mrb[136].mxu0 %vm2575_vm3, %v8032_v3  ;;  %v17715_v36 = vld [vmem:[#allocation56_spill] sm:$0xff] }
0x2036   :  { %12674 = vmatpush3.bf16.msra.mxu0 %v17661_v34  ;;  %12687 = vmatprep.subr.bf16.mxu1 %v17596_v27  ;;  %v17716_v34 = vld [vmem:[#allocation55_spill] sm:$0xff] }
0x2037   :  { %12675 = vmatprep.subr.bf16.mxu0 %v17596_v27  ;;  %11833 = vmatprep.mubr.msk.f32.mxu1 %vm13465_vm2, %v17598_v10 }
0x2038   :  { %11814 = vmatprep.mubr.msk.f32.mxu0 %vm13465_vm2, %v17598_v10  ;;  %v17717_v10 = vld [vmem:[#allocation60_spill] sm:$0xff] }
0x2039   :  { %12689 = vmatpush3.bf16.msra.mxu1 %v17662_v62  ;;  %v17718_v62 = vld [vmem:[#allocation54_spill] sm:$0xff] }
0x203a   :  { %12677 = vmatpush3.bf16.msra.mxu0 %v17663_v42  ;;  %12690 = vmatprep.subr.bf16.mxu1 %v17596_v27 }
0x203b   :  { %12678 = vmatprep.subr.bf16.mxu0 %v17596_v27 }
0x203d   :  { %12692 = vmatpush3.bf16.msra.mxu1 %v17713_v52 }
0x203e   :  { %12680 = vmatpush3.bf16.msra.mxu0 %v17714_v31  ;;  %12693 = vmatprep.subr.bf16.mxu1 %v17596_v27 }
0x203f   :  { %12681 = vmatprep.subr.bf16.mxu0 %v17596_v27  ;;  %v17719_v27 = vld [vmem:[#allocation61_spill] sm:$0xff] }
0x2041   :  { %12695 = vmatpush3.bf16.msra.mxu1 %v17715_v36 }
0x2042   :  { %12683 = vmatpush3.bf16.msra.mxu0 %v17716_v34  ;;  %12713 = vmatprep.subr.bf16.mxu1 %v17717_v10 }
0x2043   :  { %12697 = vmatprep.subr.bf16.mxu0 %v17718_v62 }
0x2060   :  { %v8019_v42 = vpop.xlane.xlu0 %8018 }
0x2061   :  { %13357 = vrcp.f32 %v8019_v42  ;;  %v8016_v2 = vpop.xlane.xlu1 %8015 }
0x2062   :  { %13359 = vrcp.f32 %v8016_v2 }
0x206b   :  { %v13358_v38 = vpop.eup %13357 }
0x206c   :  { %v13360_v13 = vpop.eup %13359  ;;  %v8035_v17 = vmul.f32 %v13358_v38, %v16922_v35 }
0x206d   :  { %v8034_v55 = vmul.f32 %v13360_v13, %v16924_v28 }
0x206e   :  { %11834 = vmatmul.mubr.msk.f32.vlgmr.msra.gmra.mrb[90].mxu1 %vm2575_vm3, %v8035_v17 }
0x206f   :  { %11815 = vmatmul.mubr.msk.f32.vlgmr.msra.gmra.mrb[138].mxu0 %vm2575_vm3, %v8034_v55  ;;  %12715 = vmatpush3.bf16.msra.mxu1 %v17717_v10 }
0x2070   :  { %12699 = vmatpush3.bf16.msra.mxu0 %v17718_v62  ;;  %12717 = vmatprep.subr.bf16.mxu1 %v17719_v27 }
0x2071   :  { %12701 = vmatprep.subr.bf16.mxu0 %v17720_v54 }
0x2073   :  { %12719 = vmatpush3.bf16.msra.mxu1 %v17719_v27 }
0x2074   :  { %12703 = vmatpush3.bf16.msra.mxu0 %v17720_v54  ;;  %12736 = vmatprep.subr.bf16.mxu1 %v15717_v5 }
0x2075   :  { %12705 = vmatprep.subr.bf16.mxu0 %v17721_v1 }
0x2078   :  { %12707 = vmatpush3.bf16.msra.mxu0 %v17721_v1 }
0x2079   :  { %12709 = vmatprep.subr.bf16.mxu0 %v17722_v14 }
0x207c   :  { %12711 = vmatpush3.bf16.msra.mxu0 %v17722_v14 }
0x207d   :  { %12721 = vmatprep.subr.bf16.mxu0 %v15717_v5 }
0x2084   :  { %v8178_v47 = vpop.f32.mrb[84].mxu1 }
0x2085   :  { %v8105_v16 = vpop.f32.mrb[132].mxu0  ;;  %v11721_v59 = vpop.f32.mrb[85].mxu1  ;;  %v8621_v41 = vsel %vm151_vm0, %v8178_v47, %v16554_v11 }
0x2086   :  { %v8620_v6 = vsel %vm151_vm0, %v8105_v16, %v16557_v19  ;;  %v11702_v29 = vpop.f32.mrb[133].mxu0 }
0x2087   :  { %11852 = vmatprep.mubr.msk.f32.mxu0 %vm2575_vm3, %v8620_v6 }
0x2088   :  { %11853 = vmatmul.mubr.msk.f32.vlgmr.msra.gmra.mrb[140].mxu0 %vm2575_vm3, %v8621_v41 }
0x2089   :  { %12723 = vmatpush3.bf16.msra.mxu0 %v15717_v5 }
0x208a   :  { %12725 = vmatprep.subr.bf16.mxu0 %v15730_v0 }
0x208d   :  { %12727 = vmatpush3.bf16.msra.mxu0 %v15730_v0 }
0x208e   :  { %12729 = vmatprep.subr.bf16.mxu0 %v15743_v23 }
0x2091   :  { %12731 = vmatpush3.bf16.msra.mxu0 %v15743_v23 }
0x2092   :  { %12733 = vmatprep.subr.bf16.mxu0 %v15750_v60 }
0x2095   :  { %12735 = vmatpush3.bf16.msra.mxu0 %v15750_v60 }
0x20e8   :  { %v8251_v57 = vpop.f32.mrb[134].mxu0 }
0x20e9   :  { %v8622_v39 = vsel %vm151_vm0, %v8251_v57, %v16575_v40  ;;  %v11740_v18 = vpop.f32.mrb[135].mxu0 }
0x20ea   :  { %11855 = vmatprep.mubr.msk.f32.mxu0 %vm2575_vm3, %v8622_v39 }
0x20ec   :  { %v8324_v20 = vpop.f32.mrb[86].mxu1 }
0x20ed   :  { %v8623_v48 = vsel %vm151_vm0, %v8324_v20, %v16569_v26  ;;  %v11759_v12 = vpop.f32.mrb[87].mxu1 }
0x20ee   :  { %11856 = vmatmul.mubr.msk.f32.gmra.mrb[142].mxu0 %vm2575_vm3, %v8623_v48 }
0x2107   :  { %v8470_v9 = vpop.f32.mrb[88].mxu1 }
0x2108   :  { %v8397_v15 = vpop.f32.mrb[136].mxu0  ;;  %v11797_v51 = vpop.f32.mrb[89].mxu1  ;;  %v8625_v37 = vsel %vm151_vm0, %v8470_v9, %v16582_v22 }
0x2109   :  { %v8624_v61 = vsel %vm151_vm0, %v8397_v15, %v16585_v46  ;;  %v11778_v21 = vpop.f32.mrb[137].mxu0 }
0x210a   :  { %11858 = vmatprep.mubr.msk.f32.mxu0 %vm2575_vm3, %v8624_v61 }
0x210b   :  { %11859 = vmatmul.mubr.msk.f32.gmra.mrb[144].mxu0 %vm2575_vm3, %v8625_v37 }
0x2141   :  { %v8616_v49 = vpop.f32.mrb[90].mxu1 }
0x2142   :  { %v8543_v56 = vpop.f32.mrb[138].mxu0  ;;  %v11835_v44 = vpop.f32.mrb[91].mxu1  ;;  %v8627_v45 = vsel %vm151_vm0, %v8616_v49, %v17724_v63 }
0x2143   :  { %v8626_v35 = vsel %vm151_vm0, %v8543_v56, %v17723_v43  ;;  %v11816_v28 = vpop.f32.mrb[139].mxu0 }
0x2144   :  { %11861 = vmatprep.mubr.msk.f32.mxu0 %vm2575_vm3, %v8626_v35 }
0x2145   :  { %11862 = vmatmul.mubr.msk.f32.gmra.mrb[146].mxu0 %vm2575_vm3, %v8627_v45 }
0x215b   :  { %v11854_v8 = vpop.f32.mrb[140].mxu0 }
0x215c   :  { %v17028_v53 = vadd.f32 %v13437_v32, %v11854_v8  ;;  %v8718_v25 = vpop.f32.mrb[141].mxu0 }
0x215d   :  { %v17030_v24 = vadd.f32 %v13437_v32, %v8718_v25 }
0x215e   :  { %8815 = vrot.lane.b32.xlu0 %v17028_v53, %s13467_s14  ;;  %v9917_v31 = vmul.f32 -1.442695, %v17028_v53 }
0x215f   :  { %8813 = vrot.lane.b32.xlu1 %v17030_v24, %s13467_s14  ;;  %v9916_v36 = vmul.f32 -1.442695, %v17030_v24 }
0x2160   :  { %13361 = vpow2.f32 %v9917_v31 }
0x2161   :  { %13363 = vpow2.f32 %v9916_v36 }
0x216a   :  { %v13362_v34 = vpop.eup %13361 }
0x216b   :  { %v13364_v10 = vpop.eup %13363  ;;  %v8782_v62 = vadd.f32 1.0, %v13362_v34 }
0x216c   :  { %v8781_v42 = vadd.f32 1.0, %v13364_v10 }
0x216d   :  { %13365 = vrcp.f32 %v8782_v62 }
0x216e   :  { %13367 = vrcp.f32 %v8781_v42 }
0x2177   :  { %v17062_v14 = vpop.eup %13365 }
0x2178   :  { %v17066_v47 = vpop.eup %13367 }
0x21c1   :  { %v11857_v50 = vpop.f32.mrb[142].mxu0 }
0x21c2   :  { %v17036_v58 = vadd.f32 %v13437_v32, %v11857_v50  ;;  %v8728_v30 = vpop.f32.mrb[143].mxu0 }
0x21c3   :  { %v17040_v7 = vadd.f32 %v13437_v32, %v8728_v30 }
0x21c4   :  { %8819 = vrot.lane.b32.xlu1 %v17036_v58, %s13467_s14  ;;  %v9919_v2 = vmul.f32 -1.442695, %v17036_v58 }
0x21c5   :  { %v9918_v54 = vmul.f32 -1.442695, %v17040_v7 }
0x21c6   :  { %13369 = vpow2.f32 %v9919_v2 }
0x21c7   :  { %13371 = vpow2.f32 %v9918_v54 }
0x21c8   :  { %8817 = vrot.lane.b32.xlu1 %v17040_v7, %s13467_s14 }
0x21d0   :  { %v8816_v55 = vpop.permute.xlu0 %8815  ;;  %v13370_v6 = vpop.eup %13369 }
0x21d1   :  { %v8814_v1 = vpop.permute.xlu1 %8813  ;;  %v8838_v16 = vmul.f32 %v17062_v14, %v8816_v55  ;;  %v8784_v29 = vadd.f32 1.0, %v13370_v6  ;;  %v13372_v41 = vpop.eup %13371 }
0x21d2   :  { %v8837_v59 = vmul.f32 %v17066_v47, %v8814_v1  ;;  %v8783_v57 = vadd.f32 1.0, %v13372_v41 }
0x21d3   :  { %13373 = vrcp.f32 %v8784_v29 }
0x21d4   :  { %13375 = vrcp.f32 %v8783_v57 }
0x21dd   :  { %v17074_v20 = vpop.eup %13373 }
0x21de   :  { %v11860_v33 = vpop.f32.mrb[144].mxu0  ;;  %v17078_v9 = vpop.eup %13375 }
0x21df   :  { %v17044_v4 = vadd.f32 %v13437_v32, %v11860_v33  ;;  %v8738_v3 = vpop.f32.mrb[145].mxu0 }
0x21e0   :  { %v17046_v52 = vadd.f32 %v13437_v32, %v8738_v3 }
0x21e1   :  { %8823 = vrot.lane.b32.xlu0 %v17044_v4, %s13467_s14  ;;  %v9921_v39 = vmul.f32 -1.442695, %v17044_v4 }
0x21e2   :  { %8821 = vrot.lane.b32.xlu1 %v17046_v52, %s13467_s14  ;;  %v9920_v18 = vmul.f32 -1.442695, %v17046_v52 }
0x21e3   :  { %13377 = vpow2.f32 %v9921_v39 }
0x21e4   :  { %13379 = vpow2.f32 %v9920_v18 }
0x21ed   :  { %v13378_v61 = vpop.eup %13377 }
0x21ee   :  { %v13380_v21 = vpop.eup %13379  ;;  %v8786_v37 = vadd.f32 1.0, %v13378_v61 }
0x21ef   :  { %v8785_v49 = vadd.f32 1.0, %v13380_v21 }
0x21f0   :  { %13381 = vrcp.f32 %v8786_v37  ;;  %v8893_v37 = vsub.f32 1.0, %v17066_v47 }
0x21f1   :  { %13383 = vrcp.f32 %v8785_v49  ;;  %v8942_v49 = vmul.f32 %v17062_v14, %v16554_v11  ;;  %v8944_v11 = vmul.f32 %v17074_v20, %v16569_v26 }
0x21fa   :  { %v17082_v56 = vpop.eup %13381 }
0x21fb   :  { %v17084_v35 = vpop.eup %13383  ;;  %v8898_v26 = vsub.f32 1.0, %v17082_v56 }
0x2218   :  { %v11863_v38 = vpop.f32.mrb[146].mxu0 }
0x2219   :  { %v17055_v13 = vadd.f32 %v13437_v32, %v11863_v38  ;;  %v8748_v17 = vpop.f32.mrb[147].mxu0 }
0x221a   :  { %v17057_v27 = vadd.f32 %v13437_v32, %v8748_v17 }
0x221b   :  { %8827 = vrot.lane.b32.xlu0 %v17055_v13, %s13467_s14  ;;  %v9923_v32 = vmul.f32 -1.442695, %v17055_v13 }
0x221c   :  { %8825 = vrot.lane.b32.xlu1 %v17057_v27, %s13467_s14  ;;  %v9922_v25 = vmul.f32 -1.442695, %v17057_v27 }
0x221d   :  { %13385 = vpow2.f32 %v9923_v32  ;;  %v8896_v32 = vsub.f32 1.0, %v17074_v20 }
0x221e   :  { %13387 = vpow2.f32 %v9922_v25 }
0x221f   :  { %8855 = vrot.lane.b32.xlu0 %v8838_v16, %s13468_s21 }
0x2220   :  { %8853 = vrot.lane.b32.xlu1 %v8837_v59, %s13468_s21 }
0x2227   :  { %v13386_v50 = vpop.eup %13385 }
0x2228   :  { %v13388_v30 = vpop.eup %13387  ;;  %v8788_v33 = vadd.f32 1.0, %v13386_v50 }
0x2229   :  { %v8787_v3 = vadd.f32 1.0, %v13388_v30  ;;  %v8943_v30 = vmul.f32 %v17078_v9, %v16575_v40  ;;  %v8945_v40 = vmul.f32 %v17084_v35, %v16585_v46 }
0x222a   :  { %13389 = vrcp.f32 %v8788_v33 }
0x222b   :  { %13391 = vrcp.f32 %v8787_v3 }
0x2234   :  { %v17092_v31 = vpop.eup %13389 }
0x2235   :  { %v17094_v34 = vpop.eup %13391 }
0x2236   :  { %v8820_v48 = vpop.permute.xlu1 %8819 }
0x2237   :  { %v8840_v12 = vmul.f32 %v17074_v20, %v8820_v48 }
0x2239   :  { %8859 = vrot.lane.b32.xlu0 %v8840_v12, %s13468_s21 }
0x223a   :  { %v8818_v15 = vpop.permute.xlu1 %8817 }
0x223b   :  { %v8839_v51 = vmul.f32 %v17078_v9, %v8818_v15 }
0x223d   :  { %8857 = vrot.lane.b32.xlu1 %v8839_v51, %s13468_s21 }
0x2253   :  { %v8824_v44 = vpop.permute.xlu0 %8823 }
0x2254   :  { %v8842_v28 = vmul.f32 %v17082_v56, %v8824_v44  ;;  %v8822_v45 = vpop.permute.xlu1 %8821 }
0x2255   :  { %v8841_v8 = vmul.f32 %v17084_v35, %v8822_v45 }
0x2256   :  { %8863 = vrot.lane.b32.xlu0 %v8842_v28, %s13468_s21 }
0x2257   :  { %8861 = vrot.lane.b32.xlu1 %v8841_v8, %s13468_s21 }
0x228d   :  { %v8828_v36 = vpop.permute.xlu0 %8827 }
0x228e   :  { %v8844_v10 = vmul.f32 %v17092_v31, %v8828_v36  ;;  %v8826_v62 = vpop.permute.xlu1 %8825  ;;  %v8897_v36 = vsub.f32 1.0, %v17084_v35 }
0x228f   :  { %v8843_v42 = vmul.f32 %v17094_v34, %v8826_v62 }
0x2290   :  { %8867 = vrot.lane.b32.xlu0 %v8844_v10, %s13468_s21  ;;  %v8946_v10 = vmul.f32 %v17082_v56, %v16582_v22  ;;  %v8899_v22 = vsub.f32 1.0, %v17094_v34  ;;  %v8948_v56 = vmul.f32 %v17092_v31, %v17724_v63 }
0x2291   :  { %v8856_v2 = vpop.permute.xlu0 %8855  ;;  %8865 = vrot.lane.b32.xlu1 %v8843_v42, %s13468_s21 }
0x2292   :  { %v8878_v38 = vadd.f32 %v8856_v2, %v17028_v53  ;;  %v8854_v17 = vpop.permute.xlu1 %8853 }
0x2293   :  { %v8877_v55 = vadd.f32 %v8854_v17, %v17030_v24  ;;  %v8900_v17 = vsub.f32 1.0, %v17092_v31 }
0x2294   :  { %13393 = vtanh.f32 %v8878_v38 }
0x2295   :  { %13395 = vtanh.f32 %v8877_v55 }
0x229e   :  { %v13394_v54 = vpop.eup %13393 }
0x229f   :  { %v13396_v1 = vpop.eup %13395  ;;  %8911 = vrot.lane.b32.xlu0 %v13394_v54, %s13464_s9  ;;  %v8947_v54 = vmul.f32 %v17094_v34, %v17723_v43 }
0x22a0   :  { %8909 = vrot.lane.b32.xlu1 %v13396_v1, %s13464_s9 }
0x22ab   :  { %v8860_v16 = vpop.permute.xlu0 %8859 }
0x22ac   :  { %v8880_v59 = vadd.f32 %v8860_v16, %v17036_v58 }
0x22ae   :  { %13397 = vtanh.f32 %v8880_v59 }
0x22af   :  { %v8858_v6 = vpop.permute.xlu1 %8857 }
0x22b0   :  { %v8879_v29 = vadd.f32 %v8858_v6, %v17040_v7 }
0x22b2   :  { %13399 = vtanh.f32 %v8879_v29 }
0x22b8   :  { %v13398_v53 = vpop.eup %13397 }
0x22b9   :  { %8915 = vrot.lane.b32.xlu0 %v13398_v53, %s13464_s9 }
0x22bc   :  { %v13400_v24 = vpop.eup %13399 }
0x22bd   :  { %8913 = vrot.lane.b32.xlu1 %v13400_v24, %s13464_s9 }
0x22c8   :  { %v8864_v41 = vpop.permute.xlu0 %8863 }
0x22c9   :  { %v8882_v57 = vadd.f32 %v8864_v41, %v17044_v4  ;;  %v8862_v39 = vpop.permute.xlu1 %8861 }
0x22ca   :  { %v8881_v18 = vadd.f32 %v8862_v39, %v17046_v52  ;;  %v8894_v52 = vsub.f32 1.0, %v17062_v14 }
0x22cb   :  { %13401 = vtanh.f32 %v8882_v57 }
0x22cc   :  { %13403 = vtanh.f32 %v8881_v18 }
0x22d5   :  { %v13402_v58 = vpop.eup %13401 }
0x22d6   :  { %v13404_v48 = vpop.eup %13403  ;;  %8919 = vrot.lane.b32.xlu0 %v13402_v58, %s13464_s9 }
0x22d7   :  { %8917 = vrot.lane.b32.xlu1 %v13404_v48, %s13464_s9 }
0x2302   :  { %v8868_v7 = vpop.permute.xlu0 %8867 }
0x2303   :  { %v8884_v12 = vadd.f32 %v8868_v7, %v17055_v13  ;;  %v8866_v15 = vpop.permute.xlu1 %8865 }
0x2304   :  { %v8883_v51 = vadd.f32 %v8866_v15, %v17057_v27  ;;  %v8941_v27 = vmul.f32 %v17066_v47, %v16557_v19  ;;  %v8895_v19 = vsub.f32 1.0, %v17078_v9 }
0x2305   :  { %13405 = vtanh.f32 %v8884_v12 }
0x2306   :  { %13407 = vtanh.f32 %v8883_v51 }
0x230f   :  { %v13406_v4 = vpop.eup %13405 }
0x2310   :  { %v13408_v61 = vpop.eup %13407  ;;  %8923 = vrot.lane.b32.xlu0 %v13406_v4, %s13464_s9 }
0x2311   :  { %v8912_v21 = vpop.permute.xlu0 %8911  ;;  %8921 = vrot.lane.b32.xlu1 %v13408_v61, %s13464_s9 }
0x2312   :  { %v8934_v13 = vmul.f32 %v8912_v21, %v8894_v52  ;;  %v8910_v44 = vpop.permute.xlu1 %8909 }
0x2313   :  { %v8933_v28 = vmul.f32 %v8910_v44, %v8893_v37 }
0x2314   :  { %v17122_v45 = vadd.f32 %v8942_v49, %v8934_v13 }
0x2315   :  { %v17124_v8 = vadd.f32 %v8941_v27, %v8933_v28 }
0x2316   :  { %8967 = vrot.lane.b32.xlu0 %v17122_v45, %s13464_s9 }
0x2317   :  { %8965 = vrot.lane.b32.xlu1 %v17124_v8, %s13464_s9 }
0x232b   :  { %v8916_v25 = vpop.permute.xlu0 %8915 }
0x232c   :  { %v8936_v14 = vmul.f32 %v8916_v25, %v8896_v32 }
0x232e   :  { %v17133_v50 = vadd.f32 %v8944_v11, %v8936_v14 }
0x232f   :  { %v8914_v47 = vpop.permute.xlu1 %8913 }
0x2330   :  { %v8935_v33 = vmul.f32 %v8914_v47, %v8895_v19  ;;  %8971 = vrot.lane.b32.xlu0 %v17133_v50, %s13464_s9 }
0x2332   :  { %v17140_v3 = vadd.f32 %v8943_v30, %v8935_v33 }
0x2334   :  { %8969 = vrot.lane.b32.xlu1 %v17140_v3, %s13464_s9 }
0x2348   :  { %v8920_v20 = vpop.permute.xlu0 %8919 }
0x2349   :  { %v8938_v62 = vmul.f32 %v8920_v20, %v8898_v26  ;;  %v8918_v42 = vpop.permute.xlu1 %8917 }
0x234a   :  { %v8937_v9 = vmul.f32 %v8918_v42, %v8897_v36 }
0x234b   :  { %v17150_v2 = vadd.f32 %v8946_v10, %v8938_v62 }
0x234c   :  { %v17152_v38 = vadd.f32 %v8945_v40, %v8937_v9 }
0x234d   :  { %8975 = vrot.lane.b32.xlu0 %v17150_v2, %s13464_s9 }
0x234e   :  { %8973 = vrot.lane.b32.xlu1 %v17152_v38, %s13464_s9 }
0x2382   :  { %v8924_v55 = vpop.permute.xlu0 %8923 }
0x2383   :  { %v8940_v46 = vmul.f32 %v8924_v55, %v8900_v17  ;;  %v8922_v35 = vpop.permute.xlu1 %8921 }
0x2384   :  { %v8939_v1 = vmul.f32 %v8922_v35, %v8899_v22 }
0x2385   :  { %v17164_v16 = vadd.f32 %v8948_v56, %v8940_v46 }
0x2386   :  { %v17166_v59 = vadd.f32 %v8947_v54, %v8939_v1 }
0x2387   :  { %8979 = vrot.lane.b32.xlu0 %v17164_v16, %s13464_s9 }
0x2388   :  { %8977 = vrot.lane.b32.xlu1 %v17166_v59, %s13464_s9  ;;  %v8968_v6 = vpop.permute.xlu0 %8967 }
0x2389   :  { %v8966_v29 = vpop.permute.xlu1 %8965  ;;  %v8992_v63 = vsel %vm151_vm0, %v8968_v6, 0.0 }
0x238a   :  { %v8989_v34 = vsel %vm151_vm0, %v8966_v29, 0.0 }
0x23a2   :  { %v8972_v43 = vpop.permute.xlu0 %8971 }
0x23a3   :  { %v8998_v24 = vsel %vm151_vm0, %v8972_v43, 0.0 }
0x23a6   :  { %8993 = vadd.xlane.f32.xlu0 %v8992_v63  ;;  %v8970_v31 = vpop.permute.xlu1 %8969 }
0x23a7   :  { %v8995_v53 = vsel %vm151_vm0, %v8970_v31, 0.0 }
0x23aa   :  { %8996 = vadd.xlane.f32.xlu0 %v8995_v53 }
0x23ac   :  { %8990 = vadd.xlane.f32.xlu1 %v8989_v34 }
0x23ae   :  { %8999 = vadd.xlane.f32.xlu0 %v8998_v24 }
0x23bf   :  { %v8976_v41 = vpop.permute.xlu0 %8975 }
0x23c0   :  { %v9004_v57 = vsel %vm151_vm0, %v8976_v41, 0.0  ;;  %v8974_v39 = vpop.permute.xlu1 %8973 }
0x23c1   :  { %v9001_v18 = vsel %vm151_vm0, %v8974_v39, 0.0  ;;  %9005 = vadd.xlane.f32.xlu0 %v9004_v57 }
0x23c2   :  { %9002 = vadd.xlane.f32.xlu1 %v9001_v18 }
0x23f9   :  { %v8980_v58 = vpop.permute.xlu0 %8979 }
0x23fa   :  { %v9010_v48 = vsel %vm151_vm0, %v8980_v58, 0.0  ;;  %v8978_v7 = vpop.permute.xlu1 %8977 }
0x23fb   :  { %v9007_v12 = vsel %vm151_vm0, %v8978_v7, 0.0  ;;  %9011 = vadd.xlane.f32.xlu0 %v9010_v48 }
0x23fc   :  { %9008 = vadd.xlane.f32.xlu1 %v9007_v12 }
0x2433   :  { %v8994_v15 = vpop.xlane.xlu0 %8993 }
0x2434   :  { %v9014_v51 = vmul.f32 0.03125, %v8994_v15 }
0x2436   :  { %v17181_v4 = vsub.f32 %v17122_v45, %v9014_v51 }
0x2437   :  { %v8997_v61 = vpop.xlane.xlu0 %8996 }
0x2438   :  { %v9030_v52 = vmul.f32 %v17181_v4, %v17181_v4  ;;  %v9015_v27 = vmul.f32 0.03125, %v8997_v61 }
0x2439   :  { %v8991_v21 = vpop.xlane.xlu1 %8990 }
0x243a   :  { %v9013_v37 = vmul.f32 0.03125, %v8991_v21  ;;  %9047 = vrot.lane.b32.xlu0 %v9030_v52, %s13464_s9  ;;  %v17196_v25 = vsub.f32 %v17140_v3, %v9015_v27 }
0x243b   :  { %v9000_v49 = vpop.xlane.xlu0 %8999 }
0x243c   :  { %v17187_v13 = vsub.f32 %v17124_v8, %v9013_v37  ;;  %v9016_v44 = vmul.f32 0.03125, %v9000_v49  ;;  %v9031_v14 = vmul.f32 %v17196_v25, %v17196_v25 }
0x243e   :  { %v9029_v28 = vmul.f32 %v17187_v13, %v17187_v13  ;;  %v17192_v32 = vsub.f32 %v17133_v50, %v9016_v44 }
0x2440   :  { %9045 = vrot.lane.b32.xlu1 %v9029_v28, %s13464_s9  ;;  %v9032_v11 = vmul.f32 %v17192_v32, %v17192_v32 }
0x2444   :  { %9051 = vrot.lane.b32.xlu1 %v9032_v11, %s13464_s9 }
0x2448   :  { %9049 = vrot.lane.b32.xlu1 %v9031_v14, %s13464_s9 }
0x244e   :  { %v9006_v19 = vpop.xlane.xlu0 %9005 }
0x244f   :  { %v9018_v47 = vmul.f32 0.03125, %v9006_v19  ;;  %v9003_v30 = vpop.xlane.xlu1 %9002 }
0x2450   :  { %v9017_v33 = vmul.f32 0.03125, %v9003_v30 }
0x2451   :  { %v17205_v26 = vsub.f32 %v17150_v2, %v9018_v47 }
0x2452   :  { %v17208_v20 = vsub.f32 %v17152_v38, %v9017_v33 }
0x2453   :  { %v9034_v36 = vmul.f32 %v17205_v26, %v17205_v26 }
0x2454   :  { %v9033_v10 = vmul.f32 %v17208_v20, %v17208_v20 }
0x2455   :  { %9055 = vrot.lane.b32.xlu0 %v9034_v36, %s13464_s9 }
0x2456   :  { %9053 = vrot.lane.b32.xlu1 %v9033_v10, %s13464_s9 }
0x2488   :  { %v9012_v62 = vpop.xlane.xlu0 %9011 }
0x2489   :  { %v9020_v42 = vmul.f32 0.03125, %v9012_v62  ;;  %v9009_v40 = vpop.xlane.xlu1 %9008 }
0x248a   :  { %v9019_v9 = vmul.f32 0.03125, %v9009_v40 }
0x248b   :  { %v17217_v17 = vsub.f32 %v17164_v16, %v9020_v42 }
0x248c   :  { %v17220_v55 = vsub.f32 %v17166_v59, %v9019_v9 }
0x248d   :  { %v9036_v22 = vmul.f32 %v17217_v17, %v17217_v17 }
0x248e   :  { %v9035_v56 = vmul.f32 %v17220_v55, %v17220_v55 }
0x248f   :  { %9059 = vrot.lane.b32.xlu0 %v9036_v22, %s13464_s9 }
0x2490   :  { %9057 = vrot.lane.b32.xlu1 %v9035_v56, %s13464_s9 }
0x24ac   :  { %v9048_v46 = vpop.permute.xlu0 %9047 }
0x24ad   :  { %v9072_v35 = vsel %vm151_vm0, %v9048_v46, 0.0 }
0x24ae   :  { %9073 = vadd.xlane.f32.xlu0 %v9072_v35 }
0x24b2   :  { %v9046_v54 = vpop.permute.xlu1 %9045 }
0x24b3   :  { %v9069_v1 = vsel %vm151_vm0, %v9046_v54, 0.0 }
0x24b4   :  { %9070 = vadd.xlane.f32.xlu1 %v9069_v1 }
0x24b6   :  { %v9052_v6 = vpop.permute.xlu1 %9051 }
0x24b7   :  { %v9078_v31 = vsel %vm151_vm0, %v9052_v6, 0.0 }
0x24ba   :  { %v9050_v29 = vpop.permute.xlu1 %9049 }
0x24bb   :  { %v9075_v63 = vsel %vm151_vm0, %v9050_v29, 0.0 }
0x24bc   :  { %9076 = vadd.xlane.f32.xlu0 %v9075_v63 }
0x24c0   :  { %9079 = vadd.xlane.f32.xlu0 %v9078_v31 }
0x24c7   :  { %v9056_v53 = vpop.permute.xlu0 %9055 }
0x24c8   :  { %v9084_v43 = vsel %vm151_vm0, %v9056_v53, 0.0  ;;  %v9054_v34 = vpop.permute.xlu1 %9053 }
0x24c9   :  { %v9081_v24 = vsel %vm151_vm0, %v9054_v34, 0.0  ;;  %9085 = vadd.xlane.f32.xlu0 %v9084_v43 }
0x24ca   :  { %9082 = vadd.xlane.f32.xlu1 %v9081_v24 }
0x2501   :  { %v9060_v41 = vpop.permute.xlu0 %9059 }
0x2502   :  { %v9090_v57 = vsel %vm151_vm0, %v9060_v41, 0.0  ;;  %v9058_v39 = vpop.permute.xlu1 %9057 }
0x2503   :  { %v9087_v18 = vsel %vm151_vm0, %v9058_v39, 0.0  ;;  %9091 = vadd.xlane.f32.xlu0 %v9090_v57 }
0x2504   :  { %9088 = vadd.xlane.f32.xlu1 %v9087_v18 }
0x253b   :  { %v9074_v58 = vpop.xlane.xlu0 %9073 }
0x253c   :  { %v9094_v48 = vmul.f32 0.03125, %v9074_v58 }
0x253e   :  { %v9102_v7 = vadd.f32 1e-05, %v9094_v48 }
0x2540   :  { %13409 = vrsqrt.f32 %v9102_v7 }
0x2541   :  { %v9071_v12 = vpop.xlane.xlu1 %9070 }
0x2542   :  { %v9093_v15 = vmul.f32 0.03125, %v9071_v12 }
0x2544   :  { %v9101_v51 = vadd.f32 1e-05, %v9093_v15 }
0x2546   :  { %13411 = vrsqrt.f32 %v9101_v51 }
0x2549   :  { %v9077_v61 = vpop.xlane.xlu0 %9076 }
0x254a   :  { %v13410_v52 = vpop.eup %13409  ;;  %v9095_v37 = vmul.f32 0.03125, %v9077_v61 }
0x254b   :  { %v9118_v21 = vmul.f32 %v13410_v52, %v17181_v4 }
0x254c   :  { %v9103_v28 = vadd.f32 1e-05, %v9095_v37 }
0x254d   :  { %9135 = vrot.lane.b32.xlu0 %v9118_v21, %s13464_s9  ;;  %v9080_v49 = vpop.xlane.xlu0 %9079 }
0x254e   :  { %v9096_v44 = vmul.f32 0.03125, %v9080_v49 }
0x2550   :  { %v13412_v27 = vpop.eup %13411  ;;  %v9104_v11 = vadd.f32 1e-05, %v9096_v44 }
0x2551   :  { %v9117_v14 = vmul.f32 %v13412_v27, %v17187_v13 }
0x2552   :  { %13413 = vrsqrt.f32 %v9104_v11 }
0x2553   :  { %9133 = vrot.lane.b32.xlu1 %v9117_v14, %s13464_s9  ;;  %13415 = vrsqrt.f32 %v9103_v28 }
0x2556   :  { %v9086_v19 = vpop.xlane.xlu0 %9085 }
0x2557   :  { %v9098_v47 = vmul.f32 0.03125, %v9086_v19  ;;  %v9083_v30 = vpop.xlane.xlu1 %9082 }
0x2558   :  { %v9097_v33 = vmul.f32 0.03125, %v9083_v30 }
0x2559   :  { %v9106_v36 = vadd.f32 1e-05, %v9098_v47 }
0x255a   :  { %v9105_v4 = vadd.f32 1e-05, %v9097_v33 }
0x255b   :  { %13417 = vrsqrt.f32 %v9106_v36 }
0x255c   :  { %v13414_v10 = vpop.eup %13413  ;;  %13419 = vrsqrt.f32 %v9105_v4 }
0x255d   :  { %v9120_v62 = vmul.f32 %v13414_v10, %v17192_v32  ;;  %v13416_v42 = vpop.eup %13415 }
0x255e   :  { %v9119_v13 = vmul.f32 %v13416_v42, %v17196_v25 }
0x255f   :  { %9139 = vrot.lane.b32.xlu1 %v9120_v62, %s13464_s9 }
0x2563   :  { %9137 = vrot.lane.b32.xlu1 %v9119_v13, %s13464_s9 }
0x2565   :  { %v13418_v40 = vpop.eup %13417 }
0x2566   :  { %v13420_v9 = vpop.eup %13419  ;;  %v9122_v22 = vmul.f32 %v13418_v40, %v17205_v26 }
0x2567   :  { %v9121_v56 = vmul.f32 %v13420_v9, %v17208_v20 }
0x2568   :  { %9143 = vrot.lane.b32.xlu0 %v9122_v22, %s13464_s9 }
0x2569   :  { %9141 = vrot.lane.b32.xlu1 %v9121_v56, %s13464_s9  ;;  %v17725_v56 = vld [vmem:[#allocation62_spill] sm:$0xff] }
0x2590   :  { %v9092_v46 = vpop.xlane.xlu0 %9091 }
0x2591   :  { %v9100_v35 = vmul.f32 0.03125, %v9092_v46  ;;  %v9089_v32 = vpop.xlane.xlu1 %9088 }
0x2592   :  { %v9099_v54 = vmul.f32 0.03125, %v9089_v32 }
0x2593   :  { %v9108_v1 = vadd.f32 1e-05, %v9100_v35 }
0x2594   :  { %v9107_v6 = vadd.f32 1e-05, %v9099_v54 }
0x2595   :  { %13421 = vrsqrt.f32 %v9108_v1 }
0x2596   :  { %13423 = vrsqrt.f32 %v9107_v6 }
0x259f   :  { %v13422_v25 = vpop.eup %13421 }
0x25a0   :  { %v13424_v29 = vpop.eup %13423  ;;  %v9124_v63 = vmul.f32 %v13422_v25, %v17217_v17 }
0x25a1   :  { %v9123_v26 = vmul.f32 %v13424_v29, %v17220_v55 }
0x25a2   :  { %9147 = vrot.lane.b32.xlu0 %v9124_v63, %s13464_s9 }
0x25a3   :  { %9145 = vrot.lane.b32.xlu1 %v9123_v26, %s13464_s9 }
0x25bf   :  { %v9136_v31 = vpop.permute.xlu0 %9135 }
0x25c5   :  { %v9134_v20 = vpop.permute.xlu1 %9133 }
0x25c6   :  { %11872 = vmatprep.mubr.msk.f32.mxu1 %vm151_vm0, %v9134_v20 }
0x25c7   :  { %11873 = vmatmul.mubr.msk.f32.vlgmr.msra.gmra.mrb[92].mxu1 %vm151_vm0, %v9136_v31 }
0x25c8   :  { %12740 = vmatpush3.bf16.msra.mxu1 %v15717_v5 }
0x25c9   :  { %12737 = vmatprep.subr.bf16.mxu1 %v15730_v0 }
0x25cc   :  { %12741 = vmatpush3.bf16.msra.mxu1 %v15730_v0 }
0x25cd   :  { %12738 = vmatprep.subr.bf16.mxu1 %v15743_v23 }
0x25d0   :  { %12742 = vmatpush3.bf16.msra.mxu1 %v15743_v23 }
0x25d1   :  { %v9140_v17 = vpop.permute.xlu1 %9139  ;;  %12739 = vmatprep.subr.bf16.mxu1 %v15750_v60 }
0x25d4   :  { %12743 = vmatpush3.bf16.msra.mxu1 %v15750_v60  ;;  %v13438_v60 = vld [vmem:[%s17332_s2 + $0x3] ss:$0 sm:$0xff]  ;;  %s13469_s2 = smov [#allocation2]  }
0x25d5   :  { %v9138_v55 = vpop.permute.xlu1 %9137 }
0x25d6   :  { %11875 = vmatprep.mubr.msk.f32.mxu1 %vm151_vm0, %v9138_v55 }
0x25d7   :  { %11876 = vmatmul.mubr.msk.f32.gmra.mrb[94].mxu1 %vm151_vm0, %v9140_v17 }
0x25da   :  { %v9144_v5 = vpop.permute.xlu0 %9143 }
0x25db   :  { %v9142_v53 = vpop.permute.xlu1 %9141 }
0x25dc   :  { %11878 = vmatprep.mubr.msk.f32.mxu1 %vm151_vm0, %v9142_v53 }
0x25dd   :  { %11879 = vmatmul.mubr.msk.f32.gmra.mrb[96].mxu1 %vm151_vm0, %v9144_v5 }
0x2614   :  { %v9148_v43 = vpop.permute.xlu0 %9147 }
0x2615   :  { %v9146_v0 = vpop.permute.xlu1 %9145 }
0x2616   :  { %11881 = vmatprep.mubr.msk.f32.mxu1 %vm151_vm0, %v9146_v0 }
0x2617   :  { %11882 = vmatmul.mubr.msk.f32.gmra.mrb[98].mxu1 %vm151_vm0, %v9148_v43 }
0x269a   :  { %v11874_v23 = vpop.f32.mrb[92].mxu1 }
0x269b   :  { %v9237_v34 = vadd.f32 %v13438_v60, %v11874_v23  ;;  %v9231_v24 = vpop.f32.mrb[93].mxu1 }
0x269c   :  { %v9232_v41 = vadd.f32 %v13438_v60, %v9231_v24 }
0x269d   :  { %v9271_v39 = vmax.f32 %v9237_v34, 0.0 }
0x269e   :  { %v9270_v57 = vmax.f32 %v9232_v41, 0.0 }
0x26a0   :  { %11900 = vmatprep.mubr.msk.f32.mxu0 %vm2575_vm3, %v9270_v57 }
0x26a1   :  { %11901 = vmatmul.mubr.msk.f32.vlgmr.msra.gmra.mrb[148].mxu0 %vm2575_vm3, %v9271_v39 }
0x26aa   :  { %v11877_v18 = vpop.f32.mrb[94].mxu1 }
0x26ab   :  { %v9247_v58 = vadd.f32 %v13438_v60, %v11877_v18  ;;  %v9241_v48 = vpop.f32.mrb[95].mxu1 }
0x26ac   :  { %v9242_v7 = vadd.f32 %v13438_v60, %v9241_v48 }
0x26ad   :  { %v9273_v15 = vmax.f32 %v9247_v58, 0.0 }
0x26ae   :  { %v9272_v12 = vmax.f32 %v9242_v7, 0.0 }
0x26b0   :  { %v11880_v51 = vpop.f32.mrb[96].mxu1  ;;  %11903 = vmatprep.mubr.msk.f32.mxu1 %vm2575_vm3, %v9272_v12 }
0x26b1   :  { %v9257_v61 = vadd.f32 %v13438_v60, %v11880_v51  ;;  %v9251_v52 = vpop.f32.mrb[97].mxu1  ;;  %11904 = vmatmul.mubr.msk.f32.vlgmr.msra.gmra.mrb[100].mxu1 %vm2575_vm3, %v9273_v15 }
0x26b2   :  { %v9252_v21 = vadd.f32 %v13438_v60, %v9251_v52 }
0x26b3   :  { %v9275_v49 = vmax.f32 %v9257_v61, 0.0 }
0x26b4   :  { %v9274_v37 = vmax.f32 %v9252_v21, 0.0 }
0x26b6   :  { %11906 = vmatprep.mubr.msk.f32.mxu1 %vm2575_vm3, %v9274_v37 }
0x26b7   :  { %11907 = vmatmul.mubr.msk.f32.gmra.mrb[102].mxu1 %vm2575_vm3, %v9275_v49 }
0x26ea   :  { %v11883_v44 = vpop.f32.mrb[98].mxu1 }
0x26eb   :  { %v9267_v27 = vadd.f32 %v13438_v60, %v11883_v44  ;;  %v9261_v28 = vpop.f32.mrb[99].mxu1 }
0x26ec   :  { %v9262_v11 = vadd.f32 %v13438_v60, %v9261_v28 }
0x26ed   :  { %v9277_v19 = vmax.f32 %v9267_v27, 0.0 }
0x26ee   :  { %v9276_v14 = vmax.f32 %v9262_v11, 0.0 }
0x26f0   :  { %11909 = vmatprep.mubr.msk.f32.mxu1 %vm2575_vm3, %v9276_v14 }
0x26f1   :  { %11910 = vmatmul.mubr.msk.f32.gmra.mrb[104].mxu1 %vm2575_vm3, %v9277_v19 }
0x2774   :  { %v11902_v47 = vpop.f32.mrb[148].mxu0 }
0x2775   :  { %9417 = vrot.lane.b32.xlu0 %v11902_v47, %s13467_s14  ;;  %v9368_v30 = vpop.f32.mrb[149].mxu0 }
0x2776   :  { %9415 = vrot.lane.b32.xlu1 %v9368_v30, %s13467_s14 }
0x2784   :  { %v11905_v33 = vpop.f32.mrb[100].mxu1 }
0x2785   :  { %9421 = vrot.lane.b32.xlu0 %v11905_v33, %s13467_s14  ;;  %v9378_v36 = vpop.f32.mrb[101].mxu1 }
0x2786   :  { %9419 = vrot.lane.b32.xlu1 %v9378_v36, %s13467_s14 }
0x278a   :  { %v11908_v4 = vpop.f32.mrb[102].mxu1 }
0x278b   :  { %9425 = vrot.lane.b32.xlu0 %v11908_v4, %s13467_s14  ;;  %v9388_v10 = vpop.f32.mrb[103].mxu1 }
0x278c   :  { %9423 = vrot.lane.b32.xlu1 %v9388_v10, %s13467_s14 }
0x27c4   :  { %v11911_v62 = vpop.f32.mrb[104].mxu1 }
0x27c5   :  { %9429 = vrot.lane.b32.xlu0 %v11911_v62, %s13467_s14  ;;  %v9398_v42 = vpop.f32.mrb[105].mxu1 }
0x27c6   :  { %9427 = vrot.lane.b32.xlu1 %v9398_v42, %s13467_s14 }
0x27e7   :  { %v9418_v13 = vpop.permute.xlu0 %9417 }
0x27e8   :  { %v9440_v40 = vadd.f32 %v9418_v13, %v17122_v45  ;;  %v9416_v9 = vpop.permute.xlu1 %9415 }
0x27e9   :  { %v9439_v22 = vadd.f32 %v9416_v9, %v17124_v8 }
0x27ea   :  { %v9448_v46 = vadd.f32 %v9440_v40, %v17725_v56 }
0x27eb   :  { %v9447_v35 = vadd.f32 %v9439_v22, %v17725_v56 }
0x27ec   :  { %9465 = vrot.lane.b32.xlu0 %v9448_v46, %s13464_s9 }
0x27ed   :  { %9463 = vrot.lane.b32.xlu1 %v9447_v35, %s13464_s9 }
0x27f7   :  { %v9422_v32 = vpop.permute.xlu0 %9421 }
0x27f8   :  { %v9442_v54 = vadd.f32 %v9422_v32, %v17133_v50  ;;  %v9420_v1 = vpop.permute.xlu1 %9419 }
0x27f9   :  { %v9441_v6 = vadd.f32 %v9420_v1, %v17140_v3 }
0x27fa   :  { %v9450_v25 = vadd.f32 %v9442_v54, %v17725_v56 }
0x27fb   :  { %v9449_v45 = vadd.f32 %v9441_v6, %v17725_v56 }
0x27fc   :  { %9469 = vrot.lane.b32.xlu0 %v9450_v25, %s13464_s9 }
0x27fd   :  { %v9426_v8 = vpop.permute.xlu0 %9425  ;;  %9467 = vrot.lane.b32.xlu1 %v9449_v45, %s13464_s9 }
0x27fe   :  { %v9444_v29 = vadd.f32 %v9426_v8, %v17150_v2  ;;  %v9424_v63 = vpop.permute.xlu1 %9423 }
0x27ff   :  { %v9443_v26 = vadd.f32 %v9424_v63, %v17152_v38 }
0x2800   :  { %v9452_v20 = vadd.f32 %v9444_v29, %v17725_v56 }
0x2801   :  { %v9451_v50 = vadd.f32 %v9443_v26, %v17725_v56 }
0x2802   :  { %9473 = vrot.lane.b32.xlu0 %v9452_v20, %s13464_s9 }
0x2803   :  { %9471 = vrot.lane.b32.xlu1 %v9451_v50, %s13464_s9 }
0x2837   :  { %v9430_v3 = vpop.permute.xlu0 %9429 }
0x2838   :  { %v9446_v31 = vadd.f32 %v9430_v3, %v17164_v16  ;;  %v9428_v17 = vpop.permute.xlu1 %9427 }
0x2839   :  { %v9445_v55 = vadd.f32 %v9428_v17, %v17166_v59 }
0x283a   :  { %v9454_v53 = vadd.f32 %v9446_v31, %v17725_v56 }
0x283b   :  { %v9453_v2 = vadd.f32 %v9445_v55, %v17725_v56 }
0x283c   :  { %9477 = vrot.lane.b32.xlu0 %v9454_v53, %s13464_s9 }
0x283d   :  { %9475 = vrot.lane.b32.xlu1 %v9453_v2, %s13464_s9  ;;  %s9500_s9 = sshll.u32 %s13469_s2, 4  ;;  %s9501_s9 = int_to_ptr.vmem [resolvable:$true] %s9500_s9 }
0x283e   :  { %s13439_s14 = scalar_lea.vmem %s9501_s9, 1024  ;;  %p13444_p1 = scmp.lt.s32.totalorder %s9501_s9, %s9501_s9 }
0x283f   :  { %p13440_p0 = scmp.ne.s32.totalorder %s9501_s9, %s13439_s14  ;;  %p13445_p2 = scmp.lt.s32.totalorder %s13439_s14, %s13439_s14 }
0x2841   :  { %p13446_p3 = por %p13445_p2, %p13444_p1 }
0x2843   :  { %p13447_p4 = pnand %p13446_p3, %p13440_p0 }
0x285e   :  { %v9466_v38 = vpop.permute.xlu0 %9465 }
0x285f   :  { %9488 = vst.msk [vmem:[#allocation2 + $0x8] sm:$0xff] %vm151_vm0, %v9466_v38  ;;  %v9464_v5 = vpop.permute.xlu1 %9463 }
0x2860   :  { %9487 = vst.msk [vmem:[#allocation2] sm:$0xff] %vm151_vm0, %v9464_v5 }
0x286e   :  { %v9470_v0 = vpop.permute.xlu0 %9469 }
0x286f   :  { %9490 = vst.msk [vmem:[#allocation2 + $0x18] sm:$0xff] %vm151_vm0, %v9470_v0  ;;  %v9468_v16 = vpop.permute.xlu1 %9467 }
0x2870   :  { %9489 = vst.msk [vmem:[#allocation2 + $0x10] sm:$0xff] %vm151_vm0, %v9468_v16 }
0x2874   :  { %v9474_v59 = vpop.permute.xlu0 %9473 }
0x2875   :  { %9492 = vst.msk [vmem:[#allocation2 + $0x28] sm:$0xff] %vm151_vm0, %v9474_v59  ;;  %v9472_v43 = vpop.permute.xlu1 %9471 }
0x2876   :  { %9491 = vst.msk [vmem:[#allocation2 + $0x20] sm:$0xff] %vm151_vm0, %v9472_v43 }
0x28ae   :  { %v9478_v23 = vpop.permute.xlu0 %9477 }
0x28af   :  { %9494 = vst.msk [vmem:[#allocation2 + $0x38] sm:$0xff] %vm151_vm0, %v9478_v23  ;;  %v9476_v60 = vpop.permute.xlu1 %9475 }
0x28b0   :  { %9493 = vst.msk [vmem:[#allocation2 + $0x30] sm:$0xff] %vm151_vm0, %v9476_v60 }
0x28b1   :  { %13450 = shalt.err (!%p13447_p4)
}
0x28b2   :  { %s13451_s12 = scalar_lea.hbm %s17338_s8, 1024 }
0x28b3   :  { %p13452_p5 = scmp.ne.s32.totalorder %s17338_s8, %s13451_s12  ;;  %p13455_p6 = scmp.lt.u32.totalorder %s13451_s12, %s17338_s8 }
0x28b5   :  { %p13457_p7 = pnand %p13455_p6, %p13452_p5 }
0x28b7   :  { %13460 = shalt.err (!%p13457_p7)
}
0x28b8   :  { %s13470_s18 = smov 128   ;;  %s13471_s19 = smov 8  }
0x28b9   :  { %9506 = dma.vmem_to_hbm [thread:$0]  %s9501_s9, 1024, %s17338_s8, [#allocation3], %s13470_s18, %s13470_s18, %s13471_s19  }
0x28ba   :  { %13461 = dma.done.wait [#allocation3], 1024  }
0x28bb   :  { %13462 = vsyncadd [#allocation3], 4294966272 }
0x28bc   :  { %9510 = vsyncpa [#allocation3], 1 }

</bundles_post_ra>
